<compile_context>
chip_gen: v6e
topology: v6e:2x2x1
jax: 0.10.0
libtpu: 0.0.40
codegen_flags: <defaults>
</compile_context>

<pallas_src>
import numpy as np
import jax
import jax.numpy as jnp
from jax import lax
from jax.experimental import pallas as pl


# -----------------------------------------------------------------------------
# Model dimensions (synthetic Encoder / LRB, see TODO above).
# -----------------------------------------------------------------------------
C_IN = 2                 # concat(source, target), 1 channel each
C1, C2 = 8, 16           # conv output channels
H1 = 32                  # hidden width of the regression head
N_OUT = 6                # 6 DoF
S0, S1, S2 = 8, 4, 2     # spatial size: input -> conv1 out -> conv2 out
KVOL = 27                # 3*3*3 taps
LANE = 128               # TPU lane width; every GEMM operand is padded to this
BPAD = 8                 # rows reserved per conv2 spatial position (>= batch)


# -----------------------------------------------------------------------------
# Pallas kernel: the entire network in one invocation, everything VMEM-resident.
# -----------------------------------------------------------------------------
def _register3d_kernel(cols_ref, gsel_ref, w1_ref, b1_ref, w2_ref, b2_ref,
                       w3_ref, b3_ref, w4_ref, b4_ref, out_ref):
    f32 = jnp.float32
    n_taps = w2_ref.shape[0]              # 27
    ns2 = w3_ref.shape[0]                 # 8 spatial positions of conv2 output
    rpt = gsel_ref.shape[0] // n_taps     # rows per tap = ns2 * BPAD = 64
    bpad = rpt // ns2                     # padded batch rows = 8

    # ---- conv1: one aligned GEMM + bias + ReLU (padded channels stay exactly 0)
    y1 = jnp.dot(cols_ref[...], w1_ref[...], preferred_element_type=f32)
    y1 = jnp.maximum(y1 + b1_ref[...], 0.0)                      # (B*64, 128)

    # ---- conv2: for each tap, a 0/1 row-gather matmul (in-kernel im2col) selects the
    # shifted conv1 activations, then the per-tap weight block accumulates the GEMM.
    acc2 = jnp.zeros((rpt, y1.shape[1]), f32)
    for k in range(n_taps):
        sel = gsel_ref[pl.ds(k * rpt, rpt), :]                   # (64, B*64) 0/1 constant
        gk = jnp.dot(sel, y1, preferred_element_type=f32)        # (64, 128) gathered taps
        acc2 = acc2 + jnp.dot(gk, w2_ref[k], preferred_element_type=f32)
    y2 = jnp.maximum(acc2 + b2_ref[...], 0.0)                    # rows = (spatial, padded batch)

    # ---- flatten + fc1: each spatial row-block multiplies its own slice of w3
    acc3 = jnp.zeros((bpad, y2.shape[1]), f32)
    for s in range(ns2):
        acc3 = acc3 + jnp.dot(y2[s * bpad:(s + 1) * bpad, :], w3_ref[s],
                              preferred_element_type=f32)
    h = jnp.maximum(acc3 + b3_ref[...], 0.0)                     # (8, 128)

    # ---- fc2 + tanh -> 6-DoF head (lane-dense padded store; wrapper slices [:B, :6])
    theta = jnp.tanh(jnp.dot(h, w4_ref[...], preferred_element_type=f32) + b4_ref[...])
    out_ref[...] = theta.astype(out_ref.dtype)


def _fused_pallas_call(cols1p, packed):
    operands = (cols1p, packed["gsel"], packed["w1"], packed["b1"], packed["w2"],
                packed["b2"], packed["w3"], packed["b3"], packed["w4"], packed["b4"])

    def full_spec(a):
        return pl.BlockSpec(a.shape, lambda n=a.ndim: (0,) * n)

    # Advisory cost estimate so XLA schedules surrounding ops around the custom call.
    m1 = cols1p.shape[0]
    n_taps = packed["w2"].shape[0]
    rpt = packed["gsel"].shape[0] // n_taps
    ns2 = packed["w3"].shape[0]
    bpad = rpt // ns2
    flops = 2 * m1 * LANE * LANE                                   # conv1
    flops += n_taps * 2 * (rpt * m1 * LANE + rpt * LANE * LANE)    # conv2 gathers + GEMMs
    flops += (ns2 + 1) * 2 * bpad * LANE * LANE                    # fc1 + fc2
    bytes_accessed = sum(int(np.prod(o.shape)) * o.dtype.itemsize for o in operands)
    bytes_accessed += bpad * LANE * 4

    return pl.pallas_call(
        _register3d_kernel,
        out_shape=jax.ShapeDtypeStruct((bpad, LANE), jnp.float32),
        in_specs=[full_spec(o) for o in operands],
        out_specs=pl.BlockSpec((bpad, LANE), lambda: (0, 0)),
        cost_estimate=pl.CostEstimate(flops=int(flops),
                                      transcendentals=int(bpad * LANE),
                                      bytes_accessed=int(bytes_accessed)),
    )(*operands)


# -----------------------------------------------------------------------------
# Parameter init (logical shapes) and one-time packing into padded kernel layout.
# -----------------------------------------------------------------------------
def init_params(key):
    ks = jax.random.split(key, 8)
    fc_in = C2 * S2 ** 3     # 128

    def dense(kk, fan_in, shape):
        return (jax.random.normal(kk, shape, jnp.float32) / np.sqrt(fan_in)).astype(jnp.float32)

    return {
        "w1": dense(ks[0], KVOL * C_IN, (KVOL * C_IN, C1)),
        "b1": 0.01 * jax.random.normal(ks[1], (C1,), jnp.float32),
        "w2": dense(ks[2], KVOL * C1, (KVOL * C1, C2)),
        "b2": 0.01 * jax.random.normal(ks[3], (C2,), jnp.float32),
        "w3": dense(ks[4], fc_in, (fc_in, H1)),
        "b3": 0.01 * jax.random.normal(ks[5], (H1,), jnp.float32),
        "w4": dense(ks[6], H1, (H1, N_OUT)),
        "b4": 0.01 * jax.random.normal(ks[7], (N_OUT,), jnp.float32),
    }


def build_gather_matrix(batch):
    """0/1 matrix implementing conv2's im2col as a row gather of conv1 activations.

    Row (k*8 + s)*BPAD + b selects y1 row ((b*4+di)*4+hi)*4+wi for tap k at conv2
    output spatial position s of batch b (all-zero row for zero-padding / padded batch).
    """
    assert batch <= BPAD
    n_rows_in = batch * S1 ** 3
    assert n_rows_in % LANE == 0, "batch*64 must be a multiple of 128 (use even batch)"
    ns2 = S2 ** 3
    g = np.zeros((KVOL * ns2 * BPAD, n_rows_in), np.float32)
    for kd in range(3):
        for kh in range(3):
            for kw in range(3):
                k = (kd * 3 + kh) * 3 + kw
                for do in range(S2):
                    for ho in range(S2):
                        for wo in range(S2):
                            s = (do * S2 + ho) * S2 + wo
                            di, hi, wi = 2 * do - 1 + kd, 2 * ho - 1 + kh, 2 * wo - 1 + kw
                            if 0 <= di < S1 and 0 <= hi < S1 and 0 <= wi < S1:
                                for b in range(batch):
                                    r = ((b * S1 + di) * S1 + hi) * S1 + wi
                                    g[(k * ns2 + s) * BPAD + b, r] = 1.0
    return g


def pack_params(params, batch):
    """One-time padding of weights/constants to (8,128)-aligned kernel layout."""
    def pad2(a, rows, cols):
        a = np.asarray(a, np.float32)
        out = np.zeros((rows, cols), np.float32)
        out[: a.shape[0], : a.shape[1]] = a
        return out

    w2 = np.asarray(params["w2"], np.float32)                       # (216, 16)
    w2p = np.zeros((KVOL, LANE, LANE), np.float32)
    for k in range(KVOL):
        w2p[k, :C1, :C2] = w2[k * C1:(k + 1) * C1, :]

    w3 = np.asarray(params["w3"], np.float32)                       # (128, 32)
    ns2 = S2 ** 3
    w3p = np.zeros((ns2, LANE, LANE), np.float32)
    for s in range(ns2):
        w3p[s, :C2, :H1] = w3[s * C2:(s + 1) * C2, :]

    packed = {
        "gsel": build_gather_matrix(batch),
        "w1": pad2(params["w1"], LANE, LANE),
        "b1": pad2(np.asarray(params["b1"])[None, :], 1, LANE),
        "w2": w2p,
        "b2": pad2(np.asarray(params["b2"])[None, :], 1, LANE),
        "w3": w3p,
        "b3": pad2(np.asarray(params["b3"])[None, :], 1, LANE),
        "w4": pad2(params["w4"], LANE, LANE),
        "b4": pad2(np.asarray(params["b4"])[None, :], 1, LANE),
    }
    return jax.tree_util.tree_map(jnp.asarray, packed)


# -----------------------------------------------------------------------------
# Forward passes: Pallas (fused kernel) and pure-JAX reference.
# -----------------------------------------------------------------------------
def _conv1_patches(x, batch):
    """Single-op patch extraction (im2col) for conv1; features ordered (c, kd, kh, kw)."""
    patches = lax.conv_general_dilated_patches(
        x, filter_shape=(3, 3, 3), window_strides=(2, 2, 2),
        padding=((1, 1), (1, 1), (1, 1)),
        dimension_numbers=("NCDHW", "OIDHW", "NCDHW"),
        precision=lax.Precision.HIGHEST)
    assert patches.shape == (batch, C_IN * KVOL, S1, S1, S1)
    return jnp.moveaxis(patches, 1, -1).reshape(batch * S1 ** 3, C_IN * KVOL)


def register3d_forward(packed, source, target):
    """source, target: (B, 1, 8, 8, 8) float32 (NCDHW).  Returns theta: (B, 6) in [-1, 1]."""
    batch = source.shape[0]
    x = jnp.concatenate([source, target], axis=1)                    # (B, 2, 8, 8, 8)
    cols1 = _conv1_patches(x, batch)                                 # (B*64, 54)
    cols1p = jnp.pad(cols1, ((0, 0), (0, LANE - cols1.shape[1])))    # (B*64, 128)
    theta_pad = _fused_pallas_call(cols1p, packed)                   # (8, 128)
    return theta_pad[:batch, :N_OUT]


def _im2col_ndhwc(vol, ksize=3, stride=2, pad=1):
    b, d, h, w, c = vol.shape
    xp = jnp.pad(vol, ((0, 0), (pad, pad), (pad, pad), (pad, pad), (0, 0)))
    do = (d + 2 * pad - ksize) // stride + 1
    ho = (h + 2 * pad - ksize) // stride + 1
    wo = (w + 2 * pad - ksize) // stride + 1
    cols = []
    for kd in range(ksize):
        for kh in range(ksize):
            for kw in range(ksize):
                cols.append(xp[:, kd:kd + do * stride:stride,
                               kh:kh + ho * stride:stride,
                               kw:kw + wo * stride:stride, :])
    return jnp.concatenate(cols, axis=-1).reshape(b * do * ho * wo, ksize ** 3 * c)


def register3d_forward_ref(params, source, target):
    """Pure-JAX reference with the same layout conventions (validates the fused kernel)."""
    batch = source.shape[0]
    x = jnp.concatenate([source, target], axis=1)
    cols1 = _conv1_patches(x, batch)
    y1 = jax.nn.relu(cols1 @ params["w1"] + params["b1"])            # (B*64, 8)
    cols2 = _im2col_ndhwc(y1.reshape(batch, S1, S1, S1, C1))         # (B*8, 216)
    y2 = jax.nn.relu(cols2 @ params["w2"] + params["b2"])            # (B*8, 16)
    flat = y2.reshape(batch, S2 ** 3 * C2)                           # (B, 128)
    h = jax.nn.relu(flat @ params["w3"] + params["b3"])              # (B, 32)
    return jnp.tanh(h @ params["w4"] + params["b4"])                 # (B, 6)


if __name__ == "__main__":
    key = jax.random.PRNGKey(0)
    kp, ks, kt = jax.random.split(key, 3)

    B = 2
    source = jax.random.normal(ks, (B, 1, S0, S0, S0), jnp.float32)
    target = jax.random.normal(kt, (B, 1, S0, S0, S0), jnp.float32)

    params = init_params(kp)
    packed = pack_params(params, B)          # one-time padding; zero per-call cost

    fwd = jax.jit(register3d_forward)
    theta = jax.block_until_ready(fwd(packed, source, target))
    theta_ref = jax.block_until_ready(register3d_forward_ref(params, source, target))

    assert theta.shape == (B, N_OUT)
    assert bool(jnp.all(jnp.isfinite(theta)))
    max_err = float(jnp.max(jnp.abs(theta - theta_ref)))
    assert bool(jnp.allclose(theta, theta_ref, atol=1e-4, rtol=1e-3)), max_err
    print("KERNEL_OK")
</pallas_src>

<mosaic_0001>
module attributes {stable_mosaic.version = 11 : i64} {
  func.func @_register3d_kernel(%arg0: memref<128x128xf32, #tpu.memory_space<vmem>>, %arg1: memref<1728x128xf32, #tpu.memory_space<vmem>>, %arg2: memref<128x128xf32, #tpu.memory_space<vmem>>, %arg3: memref<1x128xf32, #tpu.memory_space<vmem>>, %arg4: memref<27x128x128xf32, #tpu.memory_space<vmem>>, %arg5: memref<1x128xf32, #tpu.memory_space<vmem>>, %arg6: memref<8x128x128xf32, #tpu.memory_space<vmem>>, %arg7: memref<1x128xf32, #tpu.memory_space<vmem>>, %arg8: memref<128x128xf32, #tpu.memory_space<vmem>>, %arg9: memref<1x128xf32, #tpu.memory_space<vmem>>, %arg10: memref<8x128xf32, #tpu.memory_space<vmem>>) attributes {dimension_semantics = [], scalar_prefetch = 0 : i64, scratch_operands = 0 : i64, tpu.core_type = #tpu.core_type<tc>} {
    %c0 = arith.constant 0 : index
    %c0_0 = arith.constant 0 : index
    %0 = vector.load %arg0[%c0, %c0_0] : memref<128x128xf32, #tpu.memory_space<vmem>>, vector<128x128xf32>
    %c0_1 = arith.constant 0 : index
    %c0_2 = arith.constant 0 : index
    %1 = vector.load %arg2[%c0_1, %c0_2] : memref<128x128xf32, #tpu.memory_space<vmem>>, vector<128x128xf32>
    %cst = arith.constant dense<0.000000e+00> : vector<128x128xf32>
    %2 = tpu.matmul %0, %1, %cst {dimension_numbers = #tpu.dot_dimension_numbers<[1], [0], [0], [1], [0, 0, 1, 1], [], []>} : vector<128x128xf32>, vector<128x128xf32>, vector<128x128xf32> -> vector<128x128xf32>
    %c0_3 = arith.constant 0 : index
    %c0_4 = arith.constant 0 : index
    %3 = vector.load %arg3[%c0_3, %c0_4] : memref<1x128xf32, #tpu.memory_space<vmem>>, vector<1x128xf32>
    %4 = vector.broadcast %3 : vector<1x128xf32> to vector<128x128xf32>
    %5 = arith.addf %2, %4 : vector<128x128xf32>
    %cst_5 = arith.constant 0.000000e+00 : f32
    %6 = vector.broadcast %cst_5 : f32 to vector<128x128xf32>
    %7 = arith.maximumf %5, %6 : vector<128x128xf32>
    %cst_6 = arith.constant 0.000000e+00 : f32
    %8 = vector.broadcast %cst_6 : f32 to vector<64x128xf32>
    %c0_7 = arith.constant 0 : index
    %c0_8 = arith.constant 0 : index
    %9 = vector.load %arg1[%c0_7, %c0_8] : memref<1728x128xf32, #tpu.memory_space<vmem>>, vector<64x128xf32>
    %cst_9 = arith.constant dense<0.000000e+00> : vector<64x128xf32>
    %10 = tpu.matmul %9, %7, %cst_9 {dimension_numbers = #tpu.dot_dimension_numbers<[1], [0], [0], [1], [0, 0, 1, 1], [], []>} : vector<64x128xf32>, vector<128x128xf32>, vector<64x128xf32> -> vector<64x128xf32>
    %c0_10 = arith.constant 0 : index
    %c0_11 = arith.constant 0 : index
    %c0_12 = arith.constant 0 : index
    %11 = vector.load %arg4[%c0_10, %c0_11, %c0_12] : memref<27x128x128xf32, #tpu.memory_space<vmem>>, vector<1x128x128xf32>
    %12 = vector.shape_cast %11 : vector<1x128x128xf32> to vector<128x128xf32>
    %cst_13 = arith.constant dense<0.000000e+00> : vector<64x128xf32>
    %13 = tpu.matmul %10, %12, %cst_13 {dimension_numbers = #tpu.dot_dimension_numbers<[1], [0], [0], [1], [0, 0, 1, 1], [], []>} : vector<64x128xf32>, vector<128x128xf32>, vector<64x128xf32> -> vector<64x128xf32>
    %14 = arith.addf %8, %13 : vector<64x128xf32>
    %c64 = arith.constant 64 : index
    %c0_14 = arith.constant 0 : index
    %15 = vector.load %arg1[%c64, %c0_14] : memref<1728x128xf32, #tpu.memory_space<vmem>>, vector<64x128xf32>
    %cst_15 = arith.constant dense<0.000000e+00> : vector<64x128xf32>
    %16 = tpu.matmul %15, %7, %cst_15 {dimension_numbers = #tpu.dot_dimension_numbers<[1], [0], [0], [1], [0, 0, 1, 1], [], []>} : vector<64x128xf32>, vector<128x128xf32>, vector<64x128xf32> -> vector<64x128xf32>
    %c1 = arith.constant 1 : index
    %c0_16 = arith.constant 0 : index
    %c0_17 = arith.constant 0 : index
    %17 = vector.load %arg4[%c1, %c0_16, %c0_17] : memref<27x128x128xf32, #tpu.memory_space<vmem>>, vector<1x128x128xf32>
    %18 = vector.shape_cast %17 : vector<1x128x128xf32> to vector<128x128xf32>
    %cst_18 = arith.constant dense<0.000000e+00> : vector<64x128xf32>
    %19 = tpu.matmul %16, %18, %cst_18 {dimension_numbers = #tpu.dot_dimension_numbers<[1], [0], [0], [1], [0, 0, 1, 1], [], []>} : vector<64x128xf32>, vector<128x128xf32>, vector<64x128xf32> -> vector<64x128xf32>
    %20 = arith.addf %14, %19 : vector<64x128xf32>
    %c128 = arith.constant 128 : index
    %c0_19 = arith.constant 0 : index
    %21 = vector.load %arg1[%c128, %c0_19] : memref<1728x128xf32, #tpu.memory_space<vmem>>, vector<64x128xf32>
    %cst_20 = arith.constant dense<0.000000e+00> : vector<64x128xf32>
    %22 = tpu.matmul %21, %7, %cst_20 {dimension_numbers = #tpu.dot_dimension_numbers<[1], [0], [0], [1], [0, 0, 1, 1], [], []>} : vector<64x128xf32>, vector<128x128xf32>, vector<64x128xf32> -> vector<64x128xf32>
    %c2 = arith.constant 2 : index
    %c0_21 = arith.constant 0 : index
    %c0_22 = arith.constant 0 : index
    %23 = vector.load %arg4[%c2, %c0_21, %c0_22] : memref<27x128x128xf32, #tpu.memory_space<vmem>>, vector<1x128x128xf32>
    %24 = vector.shape_cast %23 : vector<1x128x128xf32> to vector<128x128xf32>
    %cst_23 = arith.constant dense<0.000000e+00> : vector<64x128xf32>
    %25 = tpu.matmul %22, %24, %cst_23 {dimension_numbers = #tpu.dot_dimension_numbers<[1], [0], [0], [1], [0, 0, 1, 1], [], []>} : vector<64x128xf32>, vector<128x128xf32>, vector<64x128xf32> -> vector<64x128xf32>
    %26 = arith.addf %20, %25 : vector<64x128xf32>
    %c192 = arith.constant 192 : index
    %c0_24 = arith.constant 0 : index
    %27 = vector.load %arg1[%c192, %c0_24] : memref<1728x128xf32, #tpu.memory_space<vmem>>, vector<64x128xf32>
    %cst_25 = arith.constant dense<0.000000e+00> : vector<64x128xf32>
    %28 = tpu.matmul %27, %7, %cst_25 {dimension_numbers = #tpu.dot_dimension_numbers<[1], [0], [0], [1], [0, 0, 1, 1], [], []>} : vector<64x128xf32>, vector<128x128xf32>, vector<64x128xf32> -> vector<64x128xf32>
    %c3 = arith.constant 3 : index
    %c0_26 = arith.constant 0 : index
    %c0_27 = arith.constant 0 : index
    %29 = vector.load %arg4[%c3, %c0_26, %c0_27] : memref<27x128x128xf32, #tpu.memory_space<vmem>>, vector<1x128x128xf32>
    %30 = vector.shape_cast %29 : vector<1x128x128xf32> to vector<128x128xf32>
    %cst_28 = arith.constant dense<0.000000e+00> : vector<64x128xf32>
    %31 = tpu.matmul %28, %30, %cst_28 {dimension_numbers = #tpu.dot_dimension_numbers<[1], [0], [0], [1], [0, 0, 1, 1], [], []>} : vector<64x128xf32>, vector<128x128xf32>, vector<64x128xf32> -> vector<64x128xf32>
    %32 = arith.addf %26, %31 : vector<64x128xf32>
    %c256 = arith.constant 256 : index
    %c0_29 = arith.constant 0 : index
    %33 = vector.load %arg1[%c256, %c0_29] : memref<1728x128xf32, #tpu.memory_space<vmem>>, vector<64x128xf32>
    %cst_30 = arith.constant dense<0.000000e+00> : vector<64x128xf32>
    %34 = tpu.matmul %33, %7, %cst_30 {dimension_numbers = #tpu.dot_dimension_numbers<[1], [0], [0], [1], [0, 0, 1, 1], [], []>} : vector<64x128xf32>, vector<128x128xf32>, vector<64x128xf32> -> vector<64x128xf32>
    %c4 = arith.constant 4 : index
    %c0_31 = arith.constant 0 : index
    %c0_32 = arith.constant 0 : index
    %35 = vector.load %arg4[%c4, %c0_31, %c0_32] : memref<27x128x128xf32, #tpu.memory_space<vmem>>, vector<1x128x128xf32>
    %36 = vector.shape_cast %35 : vector<1x128x128xf32> to vector<128x128xf32>
    %cst_33 = arith.constant dense<0.000000e+00> : vector<64x128xf32>
    %37 = tpu.matmul %34, %36, %cst_33 {dimension_numbers = #tpu.dot_dimension_numbers<[1], [0], [0], [1], [0, 0, 1, 1], [], []>} : vector<64x128xf32>, vector<128x128xf32>, vector<64x128xf32> -> vector<64x128xf32>
    %38 = arith.addf %32, %37 : vector<64x128xf32>
    %c320 = arith.constant 320 : index
    %c0_34 = arith.constant 0 : index
    %39 = vector.load %arg1[%c320, %c0_34] : memref<1728x128xf32, #tpu.memory_space<vmem>>, vector<64x128xf32>
    %cst_35 = arith.constant dense<0.000000e+00> : vector<64x128xf32>
    %40 = tpu.matmul %39, %7, %cst_35 {dimension_numbers = #tpu.dot_dimension_numbers<[1], [0], [0], [1], [0, 0, 1, 1], [], []>} : vector<64x128xf32>, vector<128x128xf32>, vector<64x128xf32> -> vector<64x128xf32>
    %c5 = arith.constant 5 : index
    %c0_36 = arith.constant 0 : index
    %c0_37 = arith.constant 0 : index
    %41 = vector.load %arg4[%c5, %c0_36, %c0_37] : memref<27x128x128xf32, #tpu.memory_space<vmem>>, vector<1x128x128xf32>
    %42 = vector.shape_cast %41 : vector<1x128x128xf32> to vector<128x128xf32>
    %cst_38 = arith.constant dense<0.000000e+00> : vector<64x128xf32>
    %43 = tpu.matmul %40, %42, %cst_38 {dimension_numbers = #tpu.dot_dimension_numbers<[1], [0], [0], [1], [0, 0, 1, 1], [], []>} : vector<64x128xf32>, vector<128x128xf32>, vector<64x128xf32> -> vector<64x128xf32>
    %44 = arith.addf %38, %43 : vector<64x128xf32>
    %c384 = arith.constant 384 : index
    %c0_39 = arith.constant 0 : index
    %45 = vector.load %arg1[%c384, %c0_39] : memref<1728x128xf32, #tpu.memory_space<vmem>>, vector<64x128xf32>
    %cst_40 = arith.constant dense<0.000000e+00> : vector<64x128xf32>
    %46 = tpu.matmul %45, %7, %cst_40 {dimension_numbers = #tpu.dot_dimension_numbers<[1], [0], [0], [1], [0, 0, 1, 1], [], []>} : vector<64x128xf32>, vector<128x128xf32>, vector<64x128xf32> -> vector<64x128xf32>
    %c6 = arith.constant 6 : index
    %c0_41 = arith.constant 0 : index
    %c0_42 = arith.constant 0 : index
    %47 = vector.load %arg4[%c6, %c0_41, %c0_42] : memref<27x128x128xf32, #tpu.memory_space<vmem>>, vector<1x128x128xf32>
    %48 = vector.shape_cast %47 : vector<1x128x128xf32> to vector<128x128xf32>
    %cst_43 = arith.constant dense<0.000000e+00> : vector<64x128xf32>
    %49 = tpu.matmul %46, %48, %cst_43 {dimension_numbers = #tpu.dot_dimension_numbers<[1], [0], [0], [1], [0, 0, 1, 1], [], []>} : vector<64x128xf32>, vector<128x128xf32>, vector<64x128xf32> -> vector<64x128xf32>
    %50 = arith.addf %44, %49 : vector<64x128xf32>
    %c448 = arith.constant 448 : index
    %c0_44 = arith.constant 0 : index
    %51 = vector.load %arg1[%c448, %c0_44] : memref<1728x128xf32, #tpu.memory_space<vmem>>, vector<64x128xf32>
    %cst_45 = arith.constant dense<0.000000e+00> : vector<64x128xf32>
    %52 = tpu.matmul %51, %7, %cst_45 {dimension_numbers = #tpu.dot_dimension_numbers<[1], [0], [0], [1], [0, 0, 1, 1], [], []>} : vector<64x128xf32>, vector<128x128xf32>, vector<64x128xf32> -> vector<64x128xf32>
    %c7 = arith.constant 7 : index
    %c0_46 = arith.constant 0 : index
    %c0_47 = arith.constant 0 : index
    %53 = vector.load %arg4[%c7, %c0_46, %c0_47] : memref<27x128x128xf32, #tpu.memory_space<vmem>>, vector<1x128x128xf32>
    %54 = vector.shape_cast %53 : vector<1x128x128xf32> to vector<128x128xf32>
    %cst_48 = arith.constant dense<0.000000e+00> : vector<64x128xf32>
    %55 = tpu.matmul %52, %54, %cst_48 {dimension_numbers = #tpu.dot_dimension_numbers<[1], [0], [0], [1], [0, 0, 1, 1], [], []>} : vector<64x128xf32>, vector<128x128xf32>, vector<64x128xf32> -> vector<64x128xf32>
    %56 = arith.addf %50, %55 : vector<64x128xf32>
    %c512 = arith.constant 512 : index
    %c0_49 = arith.constant 0 : index
    %57 = vector.load %arg1[%c512, %c0_49] : memref<1728x128xf32, #tpu.memory_space<vmem>>, vector<64x128xf32>
    %cst_50 = arith.constant dense<0.000000e+00> : vector<64x128xf32>
    %58 = tpu.matmul %57, %7, %cst_50 {dimension_numbers = #tpu.dot_dimension_numbers<[1], [0], [0], [1], [0, 0, 1, 1], [], []>} : vector<64x128xf32>, vector<128x128xf32>, vector<64x128xf32> -> vector<64x128xf32>
    %c8 = arith.constant 8 : index
    %c0_51 = arith.constant 0 : index
    %c0_52 = arith.constant 0 : index
    %59 = vector.load %arg4[%c8, %c0_51, %c0_52] : memref<27x128x128xf32, #tpu.memory_space<vmem>>, vector<1x128x128xf32>
    %60 = vector.shape_cast %59 : vector<1x128x128xf32> to vector<128x128xf32>
    %cst_53 = arith.constant dense<0.000000e+00> : vector<64x128xf32>
    %61 = tpu.matmul %58, %60, %cst_53 {dimension_numbers = #tpu.dot_dimension_numbers<[1], [0], [0], [1], [0, 0, 1, 1], [], []>} : vector<64x128xf32>, vector<128x128xf32>, vector<64x128xf32> -> vector<64x128xf32>
    %62 = arith.addf %56, %61 : vector<64x128xf32>
    %c576 = arith.constant 576 : index
    %c0_54 = arith.constant 0 : index
    %63 = vector.load %arg1[%c576, %c0_54] : memref<1728x128xf32, #tpu.memory_space<vmem>>, vector<64x128xf32>
    %cst_55 = arith.constant dense<0.000000e+00> : vector<64x128xf32>
    %64 = tpu.matmul %63, %7, %cst_55 {dimension_numbers = #tpu.dot_dimension_numbers<[1], [0], [0], [1], [0, 0, 1, 1], [], []>} : vector<64x128xf32>, vector<128x128xf32>, vector<64x128xf32> -> vector<64x128xf32>
    %c9 = arith.constant 9 : index
    %c0_56 = arith.constant 0 : index
    %c0_57 = arith.constant 0 : index
    %65 = vector.load %arg4[%c9, %c0_56, %c0_57] : memref<27x128x128xf32, #tpu.memory_space<vmem>>, vector<1x128x128xf32>
    %66 = vector.shape_cast %65 : vector<1x128x128xf32> to vector<128x128xf32>
    %cst_58 = arith.constant dense<0.000000e+00> : vector<64x128xf32>
    %67 = tpu.matmul %64, %66, %cst_58 {dimension_numbers = #tpu.dot_dimension_numbers<[1], [0], [0], [1], [0, 0, 1, 1], [], []>} : vector<64x128xf32>, vector<128x128xf32>, vector<64x128xf32> -> vector<64x128xf32>
    %68 = arith.addf %62, %67 : vector<64x128xf32>
    %c640 = arith.constant 640 : index
    %c0_59 = arith.constant 0 : index
    %69 = vector.load %arg1[%c640, %c0_59] : memref<1728x128xf32, #tpu.memory_space<vmem>>, vector<64x128xf32>
    %cst_60 = arith.constant dense<0.000000e+00> : vector<64x128xf32>
    %70 = tpu.matmul %69, %7, %cst_60 {dimension_numbers = #tpu.dot_dimension_numbers<[1], [0], [0], [1], [0, 0, 1, 1], [], []>} : vector<64x128xf32>, vector<128x128xf32>, vector<64x128xf32> -> vector<64x128xf32>
    %c10 = arith.constant 10 : index
    %c0_61 = arith.constant 0 : index
    %c0_62 = arith.constant 0 : index
    %71 = vector.load %arg4[%c10, %c0_61, %c0_62] : memref<27x128x128xf32, #tpu.memory_space<vmem>>, vector<1x128x128xf32>
    %72 = vector.shape_cast %71 : vector<1x128x128xf32> to vector<128x128xf32>
    %cst_63 = arith.constant dense<0.000000e+00> : vector<64x128xf32>
    %73 = tpu.matmul %70, %72, %cst_63 {dimension_numbers = #tpu.dot_dimension_numbers<[1], [0], [0], [1], [0, 0, 1, 1], [], []>} : vector<64x128xf32>, vector<128x128xf32>, vector<64x128xf32> -> vector<64x128xf32>
    %74 = arith.addf %68, %73 : vector<64x128xf32>
    %c704 = arith.constant 704 : index
    %c0_64 = arith.constant 0 : index
    %75 = vector.load %arg1[%c704, %c0_64] : memref<1728x128xf32, #tpu.memory_space<vmem>>, vector<64x128xf32>
    %cst_65 = arith.constant dense<0.000000e+00> : vector<64x128xf32>
    %76 = tpu.matmul %75, %7, %cst_65 {dimension_numbers = #tpu.dot_dimension_numbers<[1], [0], [0], [1], [0, 0, 1, 1], [], []>} : vector<64x128xf32>, vector<128x128xf32>, vector<64x128xf32> -> vector<64x128xf32>
    %c11 = arith.constant 11 : index
    %c0_66 = arith.constant 0 : index
    %c0_67 = arith.constant 0 : index
    %77 = vector.load %arg4[%c11, %c0_66, %c0_67] : memref<27x128x128xf32, #tpu.memory_space<vmem>>, vector<1x128x128xf32>
    %78 = vector.shape_cast %77 : vector<1x128x128xf32> to vector<128x128xf32>
    %cst_68 = arith.constant dense<0.000000e+00> : vector<64x128xf32>
    %79 = tpu.matmul %76, %78, %cst_68 {dimension_numbers = #tpu.dot_dimension_numbers<[1], [0], [0], [1], [0, 0, 1, 1], [], []>} : vector<64x128xf32>, vector<128x128xf32>, vector<64x128xf32> -> vector<64x128xf32>
    %80 = arith.addf %74, %79 : vector<64x128xf32>
    %c768 = arith.constant 768 : index
    %c0_69 = arith.constant 0 : index
    %81 = vector.load %arg1[%c768, %c0_69] : memref<1728x128xf32, #tpu.memory_space<vmem>>, vector<64x128xf32>
    %cst_70 = arith.constant dense<0.000000e+00> : vector<64x128xf32>
    %82 = tpu.matmul %81, %7, %cst_70 {dimension_numbers = #tpu.dot_dimension_numbers<[1], [0], [0], [1], [0, 0, 1, 1], [], []>} : vector<64x128xf32>, vector<128x128xf32>, vector<64x128xf32> -> vector<64x128xf32>
    %c12 = arith.constant 12 : index
    %c0_71 = arith.constant 0 : index
    %c0_72 = arith.constant 0 : index
    %83 = vector.load %arg4[%c12, %c0_71, %c0_72] : memref<27x128x128xf32, #tpu.memory_space<vmem>>, vector<1x128x128xf32>
    %84 = vector.shape_cast %83 : vector<1x128x128xf32> to vector<128x128xf32>
    %cst_73 = arith.constant dense<0.000000e+00> : vector<64x128xf32>
    %85 = tpu.matmul %82, %84, %cst_73 {dimension_numbers = #tpu.dot_dimension_numbers<[1], [0], [0], [1], [0, 0, 1, 1], [], []>} : vector<64x128xf32>, vector<128x128xf32>, vector<64x128xf32> -> vector<64x128xf32>
    %86 = arith.addf %80, %85 : vector<64x128xf32>
    %c832 = arith.constant 832 : index
    %c0_74 = arith.constant 0 : index
    %87 = vector.load %arg1[%c832, %c0_74] : memref<1728x128xf32, #tpu.memory_space<vmem>>, vector<64x128xf32>
    %cst_75 = arith.constant dense<0.000000e+00> : vector<64x128xf32>
    %88 = tpu.matmul %87, %7, %cst_75 {dimension_numbers = #tpu.dot_dimension_numbers<[1], [0], [0], [1], [0, 0, 1, 1], [], []>} : vector<64x128xf32>, vector<128x128xf32>, vector<64x128xf32> -> vector<64x128xf32>
    %c13 = arith.constant 13 : index
    %c0_76 = arith.constant 0 : index
    %c0_77 = arith.constant 0 : index
    %89 = vector.load %arg4[%c13, %c0_76, %c0_77] : memref<27x128x128xf32, #tpu.memory_space<vmem>>, vector<1x128x128xf32>
    %90 = vector.shape_cast %89 : vector<1x128x128xf32> to vector<128x128xf32>
    %cst_78 = arith.constant dense<0.000000e+00> : vector<64x128xf32>
    %91 = tpu.matmul %88, %90, %cst_78 {dimension_numbers = #tpu.dot_dimension_numbers<[1], [0], [0], [1], [0, 0, 1, 1], [], []>} : vector<64x128xf32>, vector<128x128xf32>, vector<64x128xf32> -> vector<64x128xf32>
    %92 = arith.addf %86, %91 : vector<64x128xf32>
    %c896 = arith.constant 896 : index
    %c0_79 = arith.constant 0 : index
    %93 = vector.load %arg1[%c896, %c0_79] : memref<1728x128xf32, #tpu.memory_space<vmem>>, vector<64x128xf32>
    %cst_80 = arith.constant dense<0.000000e+00> : vector<64x128xf32>
    %94 = tpu.matmul %93, %7, %cst_80 {dimension_numbers = #tpu.dot_dimension_numbers<[1], [0], [0], [1], [0, 0, 1, 1], [], []>} : vector<64x128xf32>, vector<128x128xf32>, vector<64x128xf32> -> vector<64x128xf32>
    %c14 = arith.constant 14 : index
    %c0_81 = arith.constant 0 : index
    %c0_82 = arith.constant 0 : index
    %95 = vector.load %arg4[%c14, %c0_81, %c0_82] : memref<27x128x128xf32, #tpu.memory_space<vmem>>, vector<1x128x128xf32>
    %96 = vector.shape_cast %95 : vector<1x128x128xf32> to vector<128x128xf32>
    %cst_83 = arith.constant dense<0.000000e+00> : vector<64x128xf32>
    %97 = tpu.matmul %94, %96, %cst_83 {dimension_numbers = #tpu.dot_dimension_numbers<[1], [0], [0], [1], [0, 0, 1, 1], [], []>} : vector<64x128xf32>, vector<128x128xf32>, vector<64x128xf32> -> vector<64x128xf32>
    %98 = arith.addf %92, %97 : vector<64x128xf32>
    %c960 = arith.constant 960 : index
    %c0_84 = arith.constant 0 : index
    %99 = vector.load %arg1[%c960, %c0_84] : memref<1728x128xf32, #tpu.memory_space<vmem>>, vector<64x128xf32>
    %cst_85 = arith.constant dense<0.000000e+00> : vector<64x128xf32>
    %100 = tpu.matmul %99, %7, %cst_85 {dimension_numbers = #tpu.dot_dimension_numbers<[1], [0], [0], [1], [0, 0, 1, 1], [], []>} : vector<64x128xf32>, vector<128x128xf32>, vector<64x128xf32> -> vector<64x128xf32>
    %c15 = arith.constant 15 : index
    %c0_86 = arith.constant 0 : index
    %c0_87 = arith.constant 0 : index
    %101 = vector.load %arg4[%c15, %c0_86, %c0_87] : memref<27x128x128xf32, #tpu.memory_space<vmem>>, vector<1x128x128xf32>
    %102 = vector.shape_cast %101 : vector<1x128x128xf32> to vector<128x128xf32>
    %cst_88 = arith.constant dense<0.000000e+00> : vector<64x128xf32>
    %103 = tpu.matmul %100, %102, %cst_88 {dimension_numbers = #tpu.dot_dimension_numbers<[1], [0], [0], [1], [0, 0, 1, 1], [], []>} : vector<64x128xf32>, vector<128x128xf32>, vector<64x128xf32> -> vector<64x128xf32>
    %104 = arith.addf %98, %103 : vector<64x128xf32>
    %c1024 = arith.constant 1024 : index
    %c0_89 = arith.constant 0 : index
    %105 = vector.load %arg1[%c1024, %c0_89] : memref<1728x128xf32, #tpu.memory_space<vmem>>, vector<64x128xf32>
    %cst_90 = arith.constant dense<0.000000e+00> : vector<64x128xf32>
    %106 = tpu.matmul %105, %7, %cst_90 {dimension_numbers = #tpu.dot_dimension_numbers<[1], [0], [0], [1], [0, 0, 1, 1], [], []>} : vector<64x128xf32>, vector<128x128xf32>, vector<64x128xf32> -> vector<64x128xf32>
    %c16 = arith.constant 16 : index
    %c0_91 = arith.constant 0 : index
    %c0_92 = arith.constant 0 : index
    %107 = vector.load %arg4[%c16, %c0_91, %c0_92] : memref<27x128x128xf32, #tpu.memory_space<vmem>>, vector<1x128x128xf32>
    %108 = vector.shape_cast %107 : vector<1x128x128xf32> to vector<128x128xf32>
    %cst_93 = arith.constant dense<0.000000e+00> : vector<64x128xf32>
    %109 = tpu.matmul %106, %108, %cst_93 {dimension_numbers = #tpu.dot_dimension_numbers<[1], [0], [0], [1], [0, 0, 1, 1], [], []>} : vector<64x128xf32>, vector<128x128xf32>, vector<64x128xf32> -> vector<64x128xf32>
    %110 = arith.addf %104, %109 : vector<64x128xf32>
    %c1088 = arith.constant 1088 : index
    %c0_94 = arith.constant 0 : index
    %111 = vector.load %arg1[%c1088, %c0_94] : memref<1728x128xf32, #tpu.memory_space<vmem>>, vector<64x128xf32>
    %cst_95 = arith.constant dense<0.000000e+00> : vector<64x128xf32>
    %112 = tpu.matmul %111, %7, %cst_95 {dimension_numbers = #tpu.dot_dimension_numbers<[1], [0], [0], [1], [0, 0, 1, 1], [], []>} : vector<64x128xf32>, vector<128x128xf32>, vector<64x128xf32> -> vector<64x128xf32>
    %c17 = arith.constant 17 : index
    %c0_96 = arith.constant 0 : index
    %c0_97 = arith.constant 0 : index
    %113 = vector.load %arg4[%c17, %c0_96, %c0_97] : memref<27x128x128xf32, #tpu.memory_space<vmem>>, vector<1x128x128xf32>
    %114 = vector.shape_cast %113 : vector<1x128x128xf32> to vector<128x128xf32>
    %cst_98 = arith.constant dense<0.000000e+00> : vector<64x128xf32>
    %115 = tpu.matmul %112, %114, %cst_98 {dimension_numbers = #tpu.dot_dimension_numbers<[1], [0], [0], [1], [0, 0, 1, 1], [], []>} : vector<64x128xf32>, vector<128x128xf32>, vector<64x128xf32> -> vector<64x128xf32>
    %116 = arith.addf %110, %115 : vector<64x128xf32>
    %c1152 = arith.constant 1152 : index
    %c0_99 = arith.constant 0 : index
    %117 = vector.load %arg1[%c1152, %c0_99] : memref<1728x128xf32, #tpu.memory_space<vmem>>, vector<64x128xf32>
    %cst_100 = arith.constant dense<0.000000e+00> : vector<64x128xf32>
    %118 = tpu.matmul %117, %7, %cst_100 {dimension_numbers = #tpu.dot_dimension_numbers<[1], [0], [0], [1], [0, 0, 1, 1], [], []>} : vector<64x128xf32>, vector<128x128xf32>, vector<64x128xf32> -> vector<64x128xf32>
    %c18 = arith.constant 18 : index
    %c0_101 = arith.constant 0 : index
    %c0_102 = arith.constant 0 : index
    %119 = vector.load %arg4[%c18, %c0_101, %c0_102] : memref<27x128x128xf32, #tpu.memory_space<vmem>>, vector<1x128x128xf32>
    %120 = vector.shape_cast %119 : vector<1x128x128xf32> to vector<128x128xf32>
    %cst_103 = arith.constant dense<0.000000e+00> : vector<64x128xf32>
    %121 = tpu.matmul %118, %120, %cst_103 {dimension_numbers = #tpu.dot_dimension_numbers<[1], [0], [0], [1], [0, 0, 1, 1], [], []>} : vector<64x128xf32>, vector<128x128xf32>, vector<64x128xf32> -> vector<64x128xf32>
    %122 = arith.addf %116, %121 : vector<64x128xf32>
    %c1216 = arith.constant 1216 : index
    %c0_104 = arith.constant 0 : index
    %123 = vector.load %arg1[%c1216, %c0_104] : memref<1728x128xf32, #tpu.memory_space<vmem>>, vector<64x128xf32>
    %cst_105 = arith.constant dense<0.000000e+00> : vector<64x128xf32>
    %124 = tpu.matmul %123, %7, %cst_105 {dimension_numbers = #tpu.dot_dimension_numbers<[1], [0], [0], [1], [0, 0, 1, 1], [], []>} : vector<64x128xf32>, vector<128x128xf32>, vector<64x128xf32> -> vector<64x128xf32>
    %c19 = arith.constant 19 : index
    %c0_106 = arith.constant 0 : index
    %c0_107 = arith.constant 0 : index
    %125 = vector.load %arg4[%c19, %c0_106, %c0_107] : memref<27x128x128xf32, #tpu.memory_space<vmem>>, vector<1x128x128xf32>
    %126 = vector.shape_cast %125 : vector<1x128x128xf32> to vector<128x128xf32>
    %cst_108 = arith.constant dense<0.000000e+00> : vector<64x128xf32>
    %127 = tpu.matmul %124, %126, %cst_108 {dimension_numbers = #tpu.dot_dimension_numbers<[1], [0], [0], [1], [0, 0, 1, 1], [], []>} : vector<64x128xf32>, vector<128x128xf32>, vector<64x128xf32> -> vector<64x128xf32>
    %128 = arith.addf %122, %127 : vector<64x128xf32>
    %c1280 = arith.constant 1280 : index
    %c0_109 = arith.constant 0 : index
    %129 = vector.load %arg1[%c1280, %c0_109] : memref<1728x128xf32, #tpu.memory_space<vmem>>, vector<64x128xf32>
    %cst_110 = arith.constant dense<0.000000e+00> : vector<64x128xf32>
    %130 = tpu.matmul %129, %7, %cst_110 {dimension_numbers = #tpu.dot_dimension_numbers<[1], [0], [0], [1], [0, 0, 1, 1], [], []>} : vector<64x128xf32>, vector<128x128xf32>, vector<64x128xf32> -> vector<64x128xf32>
    %c20 = arith.constant 20 : index
    %c0_111 = arith.constant 0 : index
    %c0_112 = arith.constant 0 : index
    %131 = vector.load %arg4[%c20, %c0_111, %c0_112] : memref<27x128x128xf32, #tpu.memory_space<vmem>>, vector<1x128x128xf32>
    %132 = vector.shape_cast %131 : vector<1x128x128xf32> to vector<128x128xf32>
    %cst_113 = arith.constant dense<0.000000e+00> : vector<64x128xf32>
    %133 = tpu.matmul %130, %132, %cst_113 {dimension_numbers = #tpu.dot_dimension_numbers<[1], [0], [0], [1], [0, 0, 1, 1], [], []>} : vector<64x128xf32>, vector<128x128xf32>, vector<64x128xf32> -> vector<64x128xf32>
    %134 = arith.addf %128, %133 : vector<64x128xf32>
    %c1344 = arith.constant 1344 : index
    %c0_114 = arith.constant 0 : index
    %135 = vector.load %arg1[%c1344, %c0_114] : memref<1728x128xf32, #tpu.memory_space<vmem>>, vector<64x128xf32>
    %cst_115 = arith.constant dense<0.000000e+00> : vector<64x128xf32>
    %136 = tpu.matmul %135, %7, %cst_115 {dimension_numbers = #tpu.dot_dimension_numbers<[1], [0], [0], [1], [0, 0, 1, 1], [], []>} : vector<64x128xf32>, vector<128x128xf32>, vector<64x128xf32> -> vector<64x128xf32>
    %c21 = arith.constant 21 : index
    %c0_116 = arith.constant 0 : index
    %c0_117 = arith.constant 0 : index
    %137 = vector.load %arg4[%c21, %c0_116, %c0_117] : memref<27x128x128xf32, #tpu.memory_space<vmem>>, vector<1x128x128xf32>
    %138 = vector.shape_cast %137 : vector<1x128x128xf32> to vector<128x128xf32>
    %cst_118 = arith.constant dense<0.000000e+00> : vector<64x128xf32>
    %139 = tpu.matmul %136, %138, %cst_118 {dimension_numbers = #tpu.dot_dimension_numbers<[1], [0], [0], [1], [0, 0, 1, 1], [], []>} : vector<64x128xf32>, vector<128x128xf32>, vector<64x128xf32> -> vector<64x128xf32>
    %140 = arith.addf %134, %139 : vector<64x128xf32>
    %c1408 = arith.constant 1408 : index
    %c0_119 = arith.constant 0 : index
    %141 = vector.load %arg1[%c1408, %c0_119] : memref<1728x128xf32, #tpu.memory_space<vmem>>, vector<64x128xf32>
    %cst_120 = arith.constant dense<0.000000e+00> : vector<64x128xf32>
    %142 = tpu.matmul %141, %7, %cst_120 {dimension_numbers = #tpu.dot_dimension_numbers<[1], [0], [0], [1], [0, 0, 1, 1], [], []>} : vector<64x128xf32>, vector<128x128xf32>, vector<64x128xf32> -> vector<64x128xf32>
    %c22 = arith.constant 22 : index
    %c0_121 = arith.constant 0 : index
    %c0_122 = arith.constant 0 : index
    %143 = vector.load %arg4[%c22, %c0_121, %c0_122] : memref<27x128x128xf32, #tpu.memory_space<vmem>>, vector<1x128x128xf32>
    %144 = vector.shape_cast %143 : vector<1x128x128xf32> to vector<128x128xf32>
    %cst_123 = arith.constant dense<0.000000e+00> : vector<64x128xf32>
    %145 = tpu.matmul %142, %144, %cst_123 {dimension_numbers = #tpu.dot_dimension_numbers<[1], [0], [0], [1], [0, 0, 1, 1], [], []>} : vector<64x128xf32>, vector<128x128xf32>, vector<64x128xf32> -> vector<64x128xf32>
    %146 = arith.addf %140, %145 : vector<64x128xf32>
    %c1472 = arith.constant 1472 : index
    %c0_124 = arith.constant 0 : index
    %147 = vector.load %arg1[%c1472, %c0_124] : memref<1728x128xf32, #tpu.memory_space<vmem>>, vector<64x128xf32>
    %cst_125 = arith.constant dense<0.000000e+00> : vector<64x128xf32>
    %148 = tpu.matmul %147, %7, %cst_125 {dimension_numbers = #tpu.dot_dimension_numbers<[1], [0], [0], [1], [0, 0, 1, 1], [], []>} : vector<64x128xf32>, vector<128x128xf32>, vector<64x128xf32> -> vector<64x128xf32>
    %c23 = arith.constant 23 : index
    %c0_126 = arith.constant 0 : index
    %c0_127 = arith.constant 0 : index
    %149 = vector.load %arg4[%c23, %c0_126, %c0_127] : memref<27x128x128xf32, #tpu.memory_space<vmem>>, vector<1x128x128xf32>
    %150 = vector.shape_cast %149 : vector<1x128x128xf32> to vector<128x128xf32>
    %cst_128 = arith.constant dense<0.000000e+00> : vector<64x128xf32>
    %151 = tpu.matmul %148, %150, %cst_128 {dimension_numbers = #tpu.dot_dimension_numbers<[1], [0], [0], [1], [0, 0, 1, 1], [], []>} : vector<64x128xf32>, vector<128x128xf32>, vector<64x128xf32> -> vector<64x128xf32>
    %152 = arith.addf %146, %151 : vector<64x128xf32>
    %c1536 = arith.constant 1536 : index
    %c0_129 = arith.constant 0 : index
    %153 = vector.load %arg1[%c1536, %c0_129] : memref<1728x128xf32, #tpu.memory_space<vmem>>, vector<64x128xf32>
    %cst_130 = arith.constant dense<0.000000e+00> : vector<64x128xf32>
    %154 = tpu.matmul %153, %7, %cst_130 {dimension_numbers = #tpu.dot_dimension_numbers<[1], [0], [0], [1], [0, 0, 1, 1], [], []>} : vector<64x128xf32>, vector<128x128xf32>, vector<64x128xf32> -> vector<64x128xf32>
    %c24 = arith.constant 24 : index
    %c0_131 = arith.constant 0 : index
    %c0_132 = arith.constant 0 : index
    %155 = vector.load %arg4[%c24, %c0_131, %c0_132] : memref<27x128x128xf32, #tpu.memory_space<vmem>>, vector<1x128x128xf32>
    %156 = vector.shape_cast %155 : vector<1x128x128xf32> to vector<128x128xf32>
    %cst_133 = arith.constant dense<0.000000e+00> : vector<64x128xf32>
    %157 = tpu.matmul %154, %156, %cst_133 {dimension_numbers = #tpu.dot_dimension_numbers<[1], [0], [0], [1], [0, 0, 1, 1], [], []>} : vector<64x128xf32>, vector<128x128xf32>, vector<64x128xf32> -> vector<64x128xf32>
    %158 = arith.addf %152, %157 : vector<64x128xf32>
    %c1600 = arith.constant 1600 : index
    %c0_134 = arith.constant 0 : index
    %159 = vector.load %arg1[%c1600, %c0_134] : memref<1728x128xf32, #tpu.memory_space<vmem>>, vector<64x128xf32>
    %cst_135 = arith.constant dense<0.000000e+00> : vector<64x128xf32>
    %160 = tpu.matmul %159, %7, %cst_135 {dimension_numbers = #tpu.dot_dimension_numbers<[1], [0], [0], [1], [0, 0, 1, 1], [], []>} : vector<64x128xf32>, vector<128x128xf32>, vector<64x128xf32> -> vector<64x128xf32>
    %c25 = arith.constant 25 : index
    %c0_136 = arith.constant 0 : index
    %c0_137 = arith.constant 0 : index
    %161 = vector.load %arg4[%c25, %c0_136, %c0_137] : memref<27x128x128xf32, #tpu.memory_space<vmem>>, vector<1x128x128xf32>
    %162 = vector.shape_cast %161 : vector<1x128x128xf32> to vector<128x128xf32>
    %cst_138 = arith.constant dense<0.000000e+00> : vector<64x128xf32>
    %163 = tpu.matmul %160, %162, %cst_138 {dimension_numbers = #tpu.dot_dimension_numbers<[1], [0], [0], [1], [0, 0, 1, 1], [], []>} : vector<64x128xf32>, vector<128x128xf32>, vector<64x128xf32> -> vector<64x128xf32>
    %164 = arith.addf %158, %163 : vector<64x128xf32>
    %c1664 = arith.constant 1664 : index
    %c0_139 = arith.constant 0 : index
    %165 = vector.load %arg1[%c1664, %c0_139] : memref<1728x128xf32, #tpu.memory_space<vmem>>, vector<64x128xf32>
    %cst_140 = arith.constant dense<0.000000e+00> : vector<64x128xf32>
    %166 = tpu.matmul %165, %7, %cst_140 {dimension_numbers = #tpu.dot_dimension_numbers<[1], [0], [0], [1], [0, 0, 1, 1], [], []>} : vector<64x128xf32>, vector<128x128xf32>, vector<64x128xf32> -> vector<64x128xf32>
    %c26 = arith.constant 26 : index
    %c0_141 = arith.constant 0 : index
    %c0_142 = arith.constant 0 : index
    %167 = vector.load %arg4[%c26, %c0_141, %c0_142] : memref<27x128x128xf32, #tpu.memory_space<vmem>>, vector<1x128x128xf32>
    %168 = vector.shape_cast %167 : vector<1x128x128xf32> to vector<128x128xf32>
    %cst_143 = arith.constant dense<0.000000e+00> : vector<64x128xf32>
    %169 = tpu.matmul %166, %168, %cst_143 {dimension_numbers = #tpu.dot_dimension_numbers<[1], [0], [0], [1], [0, 0, 1, 1], [], []>} : vector<64x128xf32>, vector<128x128xf32>, vector<64x128xf32> -> vector<64x128xf32>
    %170 = arith.addf %164, %169 : vector<64x128xf32>
    %c0_144 = arith.constant 0 : index
    %c0_145 = arith.constant 0 : index
    %171 = vector.load %arg5[%c0_144, %c0_145] : memref<1x128xf32, #tpu.memory_space<vmem>>, vector<1x128xf32>
    %172 = vector.broadcast %171 : vector<1x128xf32> to vector<64x128xf32>
    %173 = arith.addf %170, %172 : vector<64x128xf32>
    %cst_146 = arith.constant 0.000000e+00 : f32
    %174 = vector.broadcast %cst_146 : f32 to vector<64x128xf32>
    %175 = arith.maximumf %173, %174 : vector<64x128xf32>
    %cst_147 = arith.constant 0.000000e+00 : f32
    %176 = vector.broadcast %cst_147 : f32 to vector<8x128xf32>
    %177 = vector.extract_strided_slice %175 {offsets = [0, 0], sizes = [8, 128], strides = [1, 1]} : vector<64x128xf32> to vector<8x128xf32>
    %c0_148 = arith.constant 0 : index
    %c0_149 = arith.constant 0 : index
    %c0_150 = arith.constant 0 : index
    %178 = vector.load %arg6[%c0_148, %c0_149, %c0_150] : memref<8x128x128xf32, #tpu.memory_space<vmem>>, vector<1x128x128xf32>
    %179 = vector.shape_cast %178 : vector<1x128x128xf32> to vector<128x128xf32>
    %cst_151 = arith.constant dense<0.000000e+00> : vector<8x128xf32>
    %180 = tpu.matmul %177, %179, %cst_151 {dimension_numbers = #tpu.dot_dimension_numbers<[1], [0], [0], [1], [0, 0, 1, 1], [], []>} : vector<8x128xf32>, vector<128x128xf32>, vector<8x128xf32> -> vector<8x128xf32>
    %181 = arith.addf %176, %180 : vector<8x128xf32>
    %182 = vector.extract_strided_slice %175 {offsets = [8, 0], sizes = [8, 128], strides = [1, 1]} : vector<64x128xf32> to vector<8x128xf32>
    %c1_152 = arith.constant 1 : index
    %c0_153 = arith.constant 0 : index
    %c0_154 = arith.constant 0 : index
    %183 = vector.load %arg6[%c1_152, %c0_153, %c0_154] : memref<8x128x128xf32, #tpu.memory_space<vmem>>, vector<1x128x128xf32>
    %184 = vector.shape_cast %183 : vector<1x128x128xf32> to vector<128x128xf32>
    %cst_155 = arith.constant dense<0.000000e+00> : vector<8x128xf32>
    %185 = tpu.matmul %182, %184, %cst_155 {dimension_numbers = #tpu.dot_dimension_numbers<[1], [0], [0], [1], [0, 0, 1, 1], [], []>} : vector<8x128xf32>, vector<128x128xf32>, vector<8x128xf32> -> vector<8x128xf32>
    %186 = arith.addf %181, %185 : vector<8x128xf32>
    %187 = vector.extract_strided_slice %175 {offsets = [16, 0], sizes = [8, 128], strides = [1, 1]} : vector<64x128xf32> to vector<8x128xf32>
    %c2_156 = arith.constant 2 : index
    %c0_157 = arith.constant 0 : index
    %c0_158 = arith.constant 0 : index
    %188 = vector.load %arg6[%c2_156, %c0_157, %c0_158] : memref<8x128x128xf32, #tpu.memory_space<vmem>>, vector<1x128x128xf32>
    %189 = vector.shape_cast %188 : vector<1x128x128xf32> to vector<128x128xf32>
    %cst_159 = arith.constant dense<0.000000e+00> : vector<8x128xf32>
    %190 = tpu.matmul %187, %189, %cst_159 {dimension_numbers = #tpu.dot_dimension_numbers<[1], [0], [0], [1], [0, 0, 1, 1], [], []>} : vector<8x128xf32>, vector<128x128xf32>, vector<8x128xf32> -> vector<8x128xf32>
    %191 = arith.addf %186, %190 : vector<8x128xf32>
    %192 = vector.extract_strided_slice %175 {offsets = [24, 0], sizes = [8, 128], strides = [1, 1]} : vector<64x128xf32> to vector<8x128xf32>
    %c3_160 = arith.constant 3 : index
    %c0_161 = arith.constant 0 : index
    %c0_162 = arith.constant 0 : index
    %193 = vector.load %arg6[%c3_160, %c0_161, %c0_162] : memref<8x128x128xf32, #tpu.memory_space<vmem>>, vector<1x128x128xf32>
    %194 = vector.shape_cast %193 : vector<1x128x128xf32> to vector<128x128xf32>
    %cst_163 = arith.constant dense<0.000000e+00> : vector<8x128xf32>
    %195 = tpu.matmul %192, %194, %cst_163 {dimension_numbers = #tpu.dot_dimension_numbers<[1], [0], [0], [1], [0, 0, 1, 1], [], []>} : vector<8x128xf32>, vector<128x128xf32>, vector<8x128xf32> -> vector<8x128xf32>
    %196 = arith.addf %191, %195 : vector<8x128xf32>
    %197 = vector.extract_strided_slice %175 {offsets = [32, 0], sizes = [8, 128], strides = [1, 1]} : vector<64x128xf32> to vector<8x128xf32>
    %c4_164 = arith.constant 4 : index
    %c0_165 = arith.constant 0 : index
    %c0_166 = arith.constant 0 : index
    %198 = vector.load %arg6[%c4_164, %c0_165, %c0_166] : memref<8x128x128xf32, #tpu.memory_space<vmem>>, vector<1x128x128xf32>
    %199 = vector.shape_cast %198 : vector<1x128x128xf32> to vector<128x128xf32>
    %cst_167 = arith.constant dense<0.000000e+00> : vector<8x128xf32>
    %200 = tpu.matmul %197, %199, %cst_167 {dimension_numbers = #tpu.dot_dimension_numbers<[1], [0], [0], [1], [0, 0, 1, 1], [], []>} : vector<8x128xf32>, vector<128x128xf32>, vector<8x128xf32> -> vector<8x128xf32>
    %201 = arith.addf %196, %200 : vector<8x128xf32>
    %202 = vector.extract_strided_slice %175 {offsets = [40, 0], sizes = [8, 128], strides = [1, 1]} : vector<64x128xf32> to vector<8x128xf32>
    %c5_168 = arith.constant 5 : index
    %c0_169 = arith.constant 0 : index
    %c0_170 = arith.constant 0 : index
    %203 = vector.load %arg6[%c5_168, %c0_169, %c0_170] : memref<8x128x128xf32, #tpu.memory_space<vmem>>, vector<1x128x128xf32>
    %204 = vector.shape_cast %203 : vector<1x128x128xf32> to vector<128x128xf32>
    %cst_171 = arith.constant dense<0.000000e+00> : vector<8x128xf32>
    %205 = tpu.matmul %202, %204, %cst_171 {dimension_numbers = #tpu.dot_dimension_numbers<[1], [0], [0], [1], [0, 0, 1, 1], [], []>} : vector<8x128xf32>, vector<128x128xf32>, vector<8x128xf32> -> vector<8x128xf32>
    %206 = arith.addf %201, %205 : vector<8x128xf32>
    %207 = vector.extract_strided_slice %175 {offsets = [48, 0], sizes = [8, 128], strides = [1, 1]} : vector<64x128xf32> to vector<8x128xf32>
    %c6_172 = arith.constant 6 : index
    %c0_173 = arith.constant 0 : index
    %c0_174 = arith.constant 0 : index
    %208 = vector.load %arg6[%c6_172, %c0_173, %c0_174] : memref<8x128x128xf32, #tpu.memory_space<vmem>>, vector<1x128x128xf32>
    %209 = vector.shape_cast %208 : vector<1x128x128xf32> to vector<128x128xf32>
    %cst_175 = arith.constant dense<0.000000e+00> : vector<8x128xf32>
    %210 = tpu.matmul %207, %209, %cst_175 {dimension_numbers = #tpu.dot_dimension_numbers<[1], [0], [0], [1], [0, 0, 1, 1], [], []>} : vector<8x128xf32>, vector<128x128xf32>, vector<8x128xf32> -> vector<8x128xf32>
    %211 = arith.addf %206, %210 : vector<8x128xf32>
    %212 = vector.extract_strided_slice %175 {offsets = [56, 0], sizes = [8, 128], strides = [1, 1]} : vector<64x128xf32> to vector<8x128xf32>
    %c7_176 = arith.constant 7 : index
    %c0_177 = arith.constant 0 : index
    %c0_178 = arith.constant 0 : index
    %213 = vector.load %arg6[%c7_176, %c0_177, %c0_178] : memref<8x128x128xf32, #tpu.memory_space<vmem>>, vector<1x128x128xf32>
    %214 = vector.shape_cast %213 : vector<1x128x128xf32> to vector<128x128xf32>
    %cst_179 = arith.constant dense<0.000000e+00> : vector<8x128xf32>
    %215 = tpu.matmul %212, %214, %cst_179 {dimension_numbers = #tpu.dot_dimension_numbers<[1], [0], [0], [1], [0, 0, 1, 1], [], []>} : vector<8x128xf32>, vector<128x128xf32>, vector<8x128xf32> -> vector<8x128xf32>
    %216 = arith.addf %211, %215 : vector<8x128xf32>
    %c0_180 = arith.constant 0 : index
    %c0_181 = arith.constant 0 : index
    %217 = vector.load %arg7[%c0_180, %c0_181] : memref<1x128xf32, #tpu.memory_space<vmem>>, vector<1x128xf32>
    %218 = vector.broadcast %217 : vector<1x128xf32> to vector<8x128xf32>
    %219 = arith.addf %216, %218 : vector<8x128xf32>
    %cst_182 = arith.constant 0.000000e+00 : f32
    %220 = vector.broadcast %cst_182 : f32 to vector<8x128xf32>
    %221 = arith.maximumf %219, %220 : vector<8x128xf32>
    %c0_183 = arith.constant 0 : index
    %c0_184 = arith.constant 0 : index
    %222 = vector.load %arg8[%c0_183, %c0_184] : memref<128x128xf32, #tpu.memory_space<vmem>>, vector<128x128xf32>
    %cst_185 = arith.constant dense<0.000000e+00> : vector<8x128xf32>
    %223 = tpu.matmul %221, %222, %cst_185 {dimension_numbers = #tpu.dot_dimension_numbers<[1], [0], [0], [1], [0, 0, 1, 1], [], []>} : vector<8x128xf32>, vector<128x128xf32>, vector<8x128xf32> -> vector<8x128xf32>
    %c0_186 = arith.constant 0 : index
    %c0_187 = arith.constant 0 : index
    %224 = vector.load %arg9[%c0_186, %c0_187] : memref<1x128xf32, #tpu.memory_space<vmem>>, vector<1x128xf32>
    %225 = vector.broadcast %224 : vector<1x128xf32> to vector<8x128xf32>
    %226 = arith.addf %223, %225 : vector<8x128xf32>
    %227 = math.tanh %226 : vector<8x128xf32>
    %c0_188 = arith.constant 0 : index
    %c0_189 = arith.constant 0 : index
    %228 = vector.load %arg10[%c0_188, %c0_189] : memref<8x128xf32, #tpu.memory_space<vmem>>, vector<8x128xf32>
    tpu.vector_store %arg10[%c0_188, %c0_189], %227 {strides = array<i32>} : memref<8x128xf32, #tpu.memory_space<vmem>>, vector<8x128xf32>,
    return
  }
}

</mosaic_0001>

<bundles_post_ra>
// kernel: register3d_forward.1
= control target key start
LH: loop header
LB: loop body
LE: loop exit
PB: predicated region body
PF: predicated region fallthrough
CT: control target
= control target key end

     0   :  { %15 = vsyncpa [#allocation3], 0  ;;  %s15504_s0 = inlined_call_operand.vmem [shape: f32[128,128], index: 0, kind: input, shape index: {}]   ;;  %s15505_s1 = inlined_call_operand.hbm [shape: f32[1728,128], index: 1, kind: input, shape index: {}]   ;;  %s15506_s2 = inlined_call_operand.vmem [shape: f32[128,128], index: 2, kind: input, shape index: {}]   ;;  %s15507_s3 = inlined_call_operand.vmem [shape: f32[1,128], index: 3, kind: input, shape index: {}]   ;;  %s15508_s4 = inlined_call_operand.vmem [shape: f32[27,128,128], index: 4, kind: input, shape index: {}]   ;;  %s15509_s5 = inlined_call_operand.vmem [shape: f32[1,128], index: 5, kind: input, shape index: {}]   ;;  %s15510_s6 = inlined_call_operand.hbm [shape: f32[8,128,128], index: 6, kind: input, shape index: {}]   ;;  %s15511_s7 = inlined_call_operand.vmem [shape: f32[1,128], index: 7, kind: input, shape index: {}]   ;;  %s15512_s8 = inlined_call_operand.hbm [shape: f32[128,128], index: 8, kind: input, shape index: {}]   ;;  %s15513_s9 = inlined_call_operand.vmem [shape: f32[1,128], index: 9, kind: input, shape index: {}]   ;;  %s15514_s10 = inlined_call_operand.vmem [shape: f32[8,128], index: 10, kind: output, shape index: {}]  }
   0x1   :  { %16 = vsyncpa [#allocation5], 0  ;;  %s12375_s13 = smov [#allocation4]   ;;  %s12376_s15 = smov [#allocation2]  }
   0x2   :  { %s44_s14 = sshll.u32 %s12375_s13, 4  ;;  %s24_s16 = sshll.u32 %s12376_s15, 4  ;;  %s45_s14 = int_to_ptr.vmem [resolvable:$true] %s44_s14  ;;  %s25_s16 = int_to_ptr.vmem [resolvable:$true] %s24_s16 }
   0x3   :  { %s12319_s17 = scalar_lea.vmem %s45_s14, 16384  ;;  %p12324_p1 = scmp.lt.s32.totalorder %s45_s14, %s45_s14 }
   0x4   :  { %p12320_p0 = scmp.ne.s32.totalorder %s45_s14, %s12319_s17  ;;  %p12325_p2 = scmp.lt.s32.totalorder %s12319_s17, %s12319_s17 }
   0x6   :  { %p12326_p3 = por %p12325_p2, %p12324_p1 }
   0x8   :  { %p12327_p4 = pnand %p12326_p3, %p12320_p0 }
   0xa   :  { %12330 = shalt.err (!%p12327_p4)
}
   0xb   :  { %s12377_s18 = smov 128   ;;  %s12378_s19 = smov 8  }
   0xc   :  { %50 = dma.hbm_to_vmem [thread:$0]  %s15510_s6, 16384, %s45_s14, [#allocation5], %s12377_s18, %s12377_s18, %s12378_s19  }
   0xd   :  { %s12339_s22 = scalar_lea.vmem %s25_s16, 27648  ;;  %p12344_p6 = scmp.lt.s32.totalorder %s25_s16, %s25_s16 }
   0xe   :  { %p12340_p5 = scmp.ne.s32.totalorder %s25_s16, %s12339_s22  ;;  %p12345_p7 = scmp.lt.s32.totalorder %s12339_s22, %s12339_s22 }
  0x10   :  { %p12346_p8 = por %p12345_p7, %p12344_p6 }
  0x12   :  { %p12347_p9 = pnand %p12346_p8, %p12340_p5 }
  0x14   :  { %12350 = shalt.err (!%p12347_p9)
}
  0x15   :  { %30 = dma.hbm_to_vmem [thread:$0]  %s15505_s1, 27648, %s25_s16, [#allocation3], %s12377_s18, %s12377_s18, %s12378_s19  }
  0x16   :  { %s12379_s25 = smov [#allocation6]  }
  0x17   :  { %s58_s26 = sshll.u32 %s12379_s25, 4  ;;  %s59_s26 = int_to_ptr.vmem [resolvable:$true] %s58_s26 }
  0x18   :  { %s12359_s27 = scalar_lea.vmem %s59_s26, 2048  ;;  %p12364_p11 = scmp.lt.s32.totalorder %s59_s26, %s59_s26 }
  0x19   :  { %p12360_p10 = scmp.ne.s32.totalorder %s59_s26, %s12359_s27  ;;  %p12365_p12 = scmp.lt.s32.totalorder %s12359_s27, %s12359_s27 }
  0x1b   :  { %p12366_p13 = por %p12365_p12, %p12364_p11 }
  0x1d   :  { %p12367_p0 = pnand %p12366_p13, %p12360_p10 }
  0x1f   :  { %12370 = shalt.err (!%p12367_p0)
}
  0x20   :  { %64 = dma.hbm_to_vmem [thread:$0]  %s15512_s8, 2048, %s59_s26, [#allocation5], %s12377_s18, %s12377_s18, %s12378_s19  }
  0x21   :  { %12371 = dma.done.wait [#allocation3], 27648  }
  0x22   :  { %12372 = vsyncadd [#allocation3], 4294939648 }
  0x23   :  { %12373 = dma.done.wait [#allocation5], 18432  }
  0x24   :  { %12374 = vsyncadd [#allocation5], 4294948864  ;;  %v107_v0 = vld [vmem:[%s15506_s2 + $0x78] sm:$0xff]  ;;  %v106_v1 = vld [vmem:[%s15506_s2 + $0x70] sm:$0xff]  ;;  %vm12381_vm0 = vmmov 0  }
  0x25   :  { %9555 = vmatprep.subr.mxu0 %v107_v0  ;;  %v105_v2 = vld [vmem:[%s15506_s2 + $0x68] sm:$0xff]  ;;  %v104_v3 = vld [vmem:[%s15506_s2 + $0x60] sm:$0xff]  ;;  %v103_v5 = vld [vmem:[%s15506_s2 + $0x58] sm:$0xff] }
  0x26   :  { %9556 = vmatpush3.msra.mxu0 %v107_v0  ;;  %v76_v4 = vld [vmem:[%s15504_s0] sm:$0xff]  ;;  %v102_v6 = vld [vmem:[%s15506_s2 + $0x50] sm:$0xff]  ;;  %v101_v7 = vld [vmem:[%s15506_s2 + $0x48] sm:$0xff] }
  0x27   :  { %9557 = vmatprep.subr.mxu0 %v106_v1  ;;  %9587 = vmatprep.mubr.f32.mxu0 %v76_v4  ;;  %v100_v8 = vld [vmem:[%s15506_s2 + $0x40] sm:$0xff]  ;;  %v99_v9 = vld [vmem:[%s15506_s2 + $0x38] sm:$0xff]  ;;  %v98_v10 = vld [vmem:[%s15506_s2 + $0x30] sm:$0xff] }
  0x28   :  { %9558 = vmatpush3.msra.mxu0 %v106_v1  ;;  %v97_v11 = vld [vmem:[%s15506_s2 + $0x28] sm:$0xff]  ;;  %v96_v12 = vld [vmem:[%s15506_s2 + $0x20] sm:$0xff]  ;;  %v95_v13 = vld [vmem:[%s15506_s2 + $0x18] sm:$0xff] }
  0x29   :  { %9559 = vmatprep.subr.mxu0 %v105_v2  ;;  %v94_v14 = vld [vmem:[%s15506_s2 + $0x10] sm:$0xff]  ;;  %v93_v15 = vld [vmem:[%s15506_s2 + $0x8] sm:$0xff]  ;;  %v92_v16 = vld [vmem:[%s15506_s2] sm:$0xff] }
  0x2a   :  { %9560 = vmatpush3.msra.mxu0 %v105_v2  ;;  %v77_v17 = vld [vmem:[%s15504_s0 + $0x8] sm:$0xff]  ;;  %v78_v18 = vld [vmem:[%s15504_s0 + $0x10] sm:$0xff]  ;;  %v79_v19 = vld [vmem:[%s15504_s0 + $0x18] sm:$0xff] }
  0x2b   :  { %9561 = vmatprep.subr.mxu0 %v104_v3  ;;  %v80_v20 = vld [vmem:[%s15504_s0 + $0x20] sm:$0xff]  ;;  %v81_v21 = vld [vmem:[%s15504_s0 + $0x28] sm:$0xff]  ;;  %v82_v22 = vld [vmem:[%s15504_s0 + $0x30] sm:$0xff] }
  0x2c   :  { %9562 = vmatpush3.msra.mxu0 %v104_v3  ;;  %v83_v23 = vld [vmem:[%s15504_s0 + $0x38] sm:$0xff]  ;;  %v84_v24 = vld [vmem:[%s15504_s0 + $0x40] sm:$0xff]  ;;  %v85_v25 = vld [vmem:[%s15504_s0 + $0x48] sm:$0xff] }
  0x2d   :  { %9563 = vmatprep.subr.mxu0 %v103_v5  ;;  %v86_v26 = vld [vmem:[%s15504_s0 + $0x50] sm:$0xff]  ;;  %v87_v27 = vld [vmem:[%s15504_s0 + $0x58] sm:$0xff]  ;;  %v88_v28 = vld [vmem:[%s15504_s0 + $0x60] sm:$0xff] }
  0x2e   :  { %9564 = vmatpush3.msra.mxu0 %v103_v5  ;;  %v89_v29 = vld [vmem:[%s15504_s0 + $0x68] sm:$0xff]  ;;  %v90_v30 = vld [vmem:[%s15504_s0 + $0x70] sm:$0xff]  ;;  %v91_v31 = vld [vmem:[%s15504_s0 + $0x78] sm:$0xff] }
  0x2f   :  { %9565 = vmatprep.subr.mxu0 %v102_v6  ;;  %v276_v32 = vld [vmem:[#allocation2] sm:$0xff] }
  0x30   :  { %9566 = vmatpush3.msra.mxu0 %v102_v6  ;;  %v405_v33 = vld [vmem:[#allocation2 + $0x40] sm:$0xff]  ;;  %9643 = vmatprep.mubr.f32.mxu1 %v276_v32  ;;  %v410_v32 = vld [vmem:[#allocation2 + $0x68] sm:$0xff] }
  0x31   :  { %9567 = vmatprep.subr.mxu0 %v101_v7  ;;  %v12555_v48 = vld [vmem:[%s15507_s3] ss:$0 sm:$0xff] }
  0x32   :  { %9568 = vmatpush3.msra.mxu0 %v101_v7 }
  0x33   :  { %9569 = vmatprep.subr.mxu0 %v100_v8 }
  0x34   :  { %9570 = vmatpush3.msra.mxu0 %v100_v8 }
  0x35   :  { %9571 = vmatprep.subr.mxu0 %v99_v9 }
  0x36   :  { %9572 = vmatpush3.msra.mxu0 %v99_v9 }
  0x37   :  { %9573 = vmatprep.subr.mxu0 %v98_v10 }
  0x38   :  { %9574 = vmatpush3.msra.mxu0 %v98_v10 }
  0x39   :  { %9575 = vmatprep.subr.mxu0 %v97_v11 }
  0x3a   :  { %9576 = vmatpush3.msra.mxu0 %v97_v11 }
  0x3b   :  { %9577 = vmatprep.subr.mxu0 %v96_v12 }
  0x3c   :  { %9578 = vmatpush3.msra.mxu0 %v96_v12 }
  0x3d   :  { %9579 = vmatprep.subr.mxu0 %v95_v13 }
  0x3e   :  { %9580 = vmatpush3.msra.mxu0 %v95_v13 }
  0x3f   :  { %9581 = vmatprep.subr.mxu0 %v94_v14 }
  0x40   :  { %9582 = vmatpush3.msra.mxu0 %v94_v14 }
  0x41   :  { %9583 = vmatprep.subr.mxu0 %v93_v15 }
  0x42   :  { %9584 = vmatpush3.msra.mxu0 %v93_v15 }
  0x43   :  { %9585 = vmatprep.subr.mxu0 %v92_v16 }
  0x44   :  { %9586 = vmatpush3.msra.mxu0 %v92_v16 }
  0x45   :  { %9588 = vmatmul.mubr.f32.vlgmr.msra.gmra.mxu0 %v77_v17 }
  0x46   :  { %9590 = vmatprep.mubr.f32.mxu0 %v78_v18 }
  0x49   :  { %9591 = vmatmul.mubr.f32.gmra.mxu0 %v79_v19  ;;  %v277_v19 = vld [vmem:[#allocation2 + $0x8] sm:$0xff] }
  0x4a   :  { %9593 = vmatprep.mubr.f32.mxu0 %v80_v20  ;;  %v406_v20 = vld [vmem:[#allocation2 + $0x48] sm:$0xff] }
  0x4d   :  { %9594 = vmatmul.mubr.f32.gmra.mxu0 %v81_v21  ;;  %v7670_v21 = vld [vmem:[%s15508_s4 + $0xf8] sm:$0xff] }
  0x4e   :  { %9596 = vmatprep.mubr.f32.mxu0 %v82_v22  ;;  %v278_v22 = vld [vmem:[#allocation2 + $0x10] sm:$0xff] }
  0x51   :  { %9597 = vmatmul.mubr.f32.gmra.mxu0 %v83_v23  ;;  %v407_v23 = vld [vmem:[#allocation2 + $0x50] sm:$0xff] }
  0x52   :  { %9599 = vmatprep.mubr.f32.mxu0 %v84_v24  ;;  %v7669_v24 = vld [vmem:[%s15508_s4 + $0xf0] sm:$0xff] }
  0x55   :  { %9600 = vmatmul.mubr.f32.gmra.mxu0 %v85_v25  ;;  %v404_v25 = vld [vmem:[%s15508_s4 + $0x78] sm:$0xff] }
  0x56   :  { %9602 = vmatprep.mubr.f32.mxu0 %v86_v26  ;;  %v408_v26 = vld [vmem:[#allocation2 + $0x58] sm:$0xff] }
  0x59   :  { %9603 = vmatmul.mubr.f32.gmra.mxu0 %v87_v27  ;;  %v7668_v27 = vld [vmem:[%s15508_s4 + $0xe8] sm:$0xff] }
  0x5a   :  { %9605 = vmatprep.mubr.f32.mxu0 %v88_v28  ;;  %v279_v28 = vld [vmem:[#allocation2 + $0x18] sm:$0xff] }
  0x5d   :  { %9606 = vmatmul.mubr.f32.gmra.mxu0 %v89_v29  ;;  %v280_v29 = vld [vmem:[#allocation2 + $0x20] sm:$0xff] }
  0x5e   :  { %9608 = vmatprep.mubr.f32.mxu0 %v90_v30  ;;  %v7667_v30 = vld [vmem:[%s15508_s4 + $0xe0] sm:$0xff] }
  0x61   :  { %9609 = vmatmul.mubr.f32.gmra.mxu0 %v91_v31  ;;  %v409_v31 = vld [vmem:[#allocation2 + $0x60] sm:$0xff] }
  0x62   :  { %9687 = vmatprep.mubr.f32.mxu0 %v405_v33  ;;  %v7666_v33 = vld [vmem:[%s15508_s4 + $0xd8] sm:$0xff] }
 0x105   :  { %v12542_v34 = vpop.f32.mrf.mxu0 }
 0x106   :  { %v187_v13 = vadd.f32 %v12542_v34, %v12555_v48  ;;  %v281_v34 = vld [vmem:[#allocation2 + $0x28] sm:$0xff] }
 0x107   :  { %v12544_v35 = vpop.f32.mrf.mxu0 }
 0x108   :  { %v182_v15 = vadd.f32 %v12555_v48, %v12544_v35  ;;  %v12658_v17 = vmax.f32 %v187_v13, 0.0  ;;  %v282_v35 = vld [vmem:[#allocation2 + $0x30] sm:$0xff] }
 0x109   :  { %v12546_v36 = vpop.f32.mrf.mxu0 }
 0x10a   :  { %v197_v9 = vadd.f32 %v12546_v36, %v12555_v48  ;;  %v12664_v18 = vmax.f32 %v182_v15, 0.0  ;;  %v7665_v36 = vld [vmem:[%s15508_s4 + $0xd0] sm:$0xff] }
 0x10b   :  { %v12548_v37 = vpop.f32.mrf.mxu0 }
 0x10c   :  { %v192_v11 = vadd.f32 %v12555_v48, %v12548_v37  ;;  %v12644_v14 = vmax.f32 %v197_v9, 0.0  ;;  %v411_v37 = vld [vmem:[#allocation2 + $0x70] sm:$0xff]  ;;  %v390_v9 = vld [vmem:[%s15508_s4 + $0x8] sm:$0xff] }
 0x10d   :  { %v9595_v38 = vpop.f32.mrf.mxu0 }
 0x10e   :  { %v207_v5 = vadd.f32 %v9595_v38, %v12555_v48  ;;  %v12652_v16 = vmax.f32 %v192_v11, 0.0  ;;  %v412_v38 = vld [vmem:[#allocation2 + $0x78] sm:$0xff]  ;;  %v389_v11 = vld [vmem:[%s15508_s4] sm:$0xff] }
 0x10f   :  { %v12550_v39 = vpop.f32.mrf.mxu0 }
 0x110   :  { %v202_v7 = vadd.f32 %v12555_v48, %v12550_v39  ;;  %v12628_v10 = vmax.f32 %v207_v5, 0.0  ;;  %v7664_v39 = vld [vmem:[%s15508_s4 + $0xc8] sm:$0xff]  ;;  %v392_v5 = vld [vmem:[%s15508_s4 + $0x18] sm:$0xff] }
 0x111   :  { %v9598_v40 = vpop.f32.mrf.mxu0 }
 0x112   :  { %v217_v1 = vadd.f32 %v9598_v40, %v12555_v48  ;;  %v12636_v12 = vmax.f32 %v202_v7, 0.0  ;;  %v283_v40 = vld [vmem:[#allocation2 + $0x38] sm:$0xff]  ;;  %v391_v7 = vld [vmem:[%s15508_s4 + $0x10] sm:$0xff] }
 0x113   :  { %v211_v41 = vpop.f32.mrf.mxu0 }
 0x114   :  { %v212_v3 = vadd.f32 %v12555_v48, %v211_v41  ;;  %v12612_v6 = vmax.f32 %v217_v1, 0.0  ;;  %v7663_v41 = vld [vmem:[%s15508_s4 + $0xc0] sm:$0xff]  ;;  %v394_v1 = vld [vmem:[%s15508_s4 + $0x28] sm:$0xff] }
 0x115   :  { %v9601_v42 = vpop.f32.mrf.mxu0 }
 0x116   :  { %v227_v61 = vadd.f32 %v9601_v42, %v12555_v48  ;;  %v12620_v8 = vmax.f32 %v212_v3, 0.0  ;;  %v403_v42 = vld [vmem:[%s15508_s4 + $0x70] sm:$0xff]  ;;  %v393_v3 = vld [vmem:[%s15508_s4 + $0x20] sm:$0xff] }
 0x117   :  { %v221_v43 = vpop.f32.mrf.mxu0 }
 0x118   :  { %v222_v63 = vadd.f32 %v12555_v48, %v221_v43  ;;  %v12598_v2 = vmax.f32 %v227_v61, 0.0  ;;  %v7662_v43 = vld [vmem:[%s15508_s4 + $0xb8] sm:$0xff]  ;;  %v7655_v61 = vld [vmem:[%s15508_s4 + $0x80] sm:$0xff] }
 0x119   :  { %v9604_v44 = vpop.f32.mrf.mxu0 }
 0x11a   :  { %v237_v57 = vadd.f32 %v9604_v44, %v12555_v48  ;;  %v12605_v4 = vmax.f32 %v222_v63, 0.0  ;;  %v402_v44 = vld [vmem:[%s15508_s4 + $0x68] sm:$0xff]  ;;  %v395_v63 = vld [vmem:[%s15508_s4 + $0x30] sm:$0xff] }
 0x11b   :  { %v231_v45 = vpop.f32.mrf.mxu0 }
 0x11c   :  { %v232_v59 = vadd.f32 %v12555_v48, %v231_v45  ;;  %v12584_v62 = vmax.f32 %v237_v57, 0.0  ;;  %v7661_v45 = vld [vmem:[%s15508_s4 + $0xb0] sm:$0xff]  ;;  %v7656_v57 = vld [vmem:[%s15508_s4 + $0x88] sm:$0xff] }
 0x11d   :  { %v9607_v46 = vpop.f32.mrf.mxu0 }
 0x11e   :  { %v247_v52 = vadd.f32 %v9607_v46, %v12555_v48  ;;  %v12591_v0 = vmax.f32 %v232_v59, 0.0  ;;  %v401_v46 = vld [vmem:[%s15508_s4 + $0x60] sm:$0xff]  ;;  %v396_v59 = vld [vmem:[%s15508_s4 + $0x38] sm:$0xff] }
 0x11f   :  { %v241_v47 = vpop.f32.mrf.mxu0 }
 0x120   :  { %v242_v55 = vadd.f32 %v12555_v48, %v241_v47  ;;  %v12570_v58 = vmax.f32 %v247_v52, 0.0  ;;  %v7660_v47 = vld [vmem:[%s15508_s4 + $0xa8] sm:$0xff] }
 0x121   :  { %v9610_v49 = vpop.f32.mrf.mxu0  ;;  %v398_v52 = vld [vmem:[%s15508_s4 + $0x48] sm:$0xff] }
 0x122   :  { %v257_v50 = vadd.f32 %v9610_v49, %v12555_v48  ;;  %v12577_v60 = vmax.f32 %v242_v55, 0.0  ;;  %v7659_v49 = vld [vmem:[%s15508_s4 + $0xa0] sm:$0xff] }
 0x123   :  { %v251_v51 = vpop.f32.mrf.mxu0  ;;  %v397_v55 = vld [vmem:[%s15508_s4 + $0x40] sm:$0xff] }
 0x124   :  { %v12559_v53 = vmax.f32 %v257_v50, 0.0  ;;  %v252_v54 = vadd.f32 %v12555_v48, %v251_v51  ;;  %v400_v48 = vld [vmem:[%s15508_s4 + $0x58] sm:$0xff]  ;;  %v399_v50 = vld [vmem:[%s15508_s4 + $0x50] sm:$0xff] }
 0x125   :  { %v7658_v51 = vld [vmem:[%s15508_s4 + $0x98] sm:$0xff] }
 0x126   :  { %v12563_v56 = vmax.f32 %v252_v54, 0.0  ;;  %9611 = vmatprep.subr.mxu1 %v12559_v53  ;;  %9655 = vmatprep.subr.mxu0 %v12559_v53  ;;  %v7657_v54 = vld [vmem:[%s15508_s4 + $0x90] sm:$0xff] }
 0x127   :  { %9612 = vmatpush3.msra.mxu1 %v12559_v53  ;;  %9656 = vmatpush3.msra.mxu0 %v12559_v53 }
 0x128   :  { %9613 = vmatprep.subr.mxu1 %v12563_v56  ;;  %9657 = vmatprep.subr.mxu0 %v12563_v56 }
 0x129   :  { %9614 = vmatpush3.msra.mxu1 %v12563_v56  ;;  %9658 = vmatpush3.msra.mxu0 %v12563_v56 }
 0x12a   :  { %9615 = vmatprep.subr.mxu1 %v12570_v58  ;;  %9659 = vmatprep.subr.mxu0 %v12570_v58 }
 0x12b   :  { %9616 = vmatpush3.msra.mxu1 %v12570_v58  ;;  %9660 = vmatpush3.msra.mxu0 %v12570_v58 }
 0x12c   :  { %9617 = vmatprep.subr.mxu1 %v12577_v60  ;;  %9661 = vmatprep.subr.mxu0 %v12577_v60 }
 0x12d   :  { %9618 = vmatpush3.msra.mxu1 %v12577_v60  ;;  %9662 = vmatpush3.msra.mxu0 %v12577_v60 }
 0x12e   :  { %9619 = vmatprep.subr.mxu1 %v12584_v62  ;;  %9663 = vmatprep.subr.mxu0 %v12584_v62 }
 0x12f   :  { %9620 = vmatpush3.msra.mxu1 %v12584_v62  ;;  %9664 = vmatpush3.msra.mxu0 %v12584_v62 }
 0x130   :  { %9621 = vmatprep.subr.mxu1 %v12591_v0  ;;  %9665 = vmatprep.subr.mxu0 %v12591_v0 }
 0x131   :  { %9622 = vmatpush3.msra.mxu1 %v12591_v0  ;;  %9666 = vmatpush3.msra.mxu0 %v12591_v0 }
 0x132   :  { %9623 = vmatprep.subr.mxu1 %v12598_v2  ;;  %9667 = vmatprep.subr.mxu0 %v12598_v2 }
 0x133   :  { %9624 = vmatpush3.msra.mxu1 %v12598_v2  ;;  %9668 = vmatpush3.msra.mxu0 %v12598_v2 }
 0x134   :  { %9625 = vmatprep.subr.mxu1 %v12605_v4  ;;  %9669 = vmatprep.subr.mxu0 %v12605_v4 }
 0x135   :  { %9626 = vmatpush3.msra.mxu1 %v12605_v4  ;;  %9670 = vmatpush3.msra.mxu0 %v12605_v4 }
 0x136   :  { %9627 = vmatprep.subr.mxu1 %v12612_v6  ;;  %9671 = vmatprep.subr.mxu0 %v12612_v6 }
 0x137   :  { %9628 = vmatpush3.msra.mxu1 %v12612_v6  ;;  %9672 = vmatpush3.msra.mxu0 %v12612_v6 }
 0x138   :  { %9629 = vmatprep.subr.mxu1 %v12620_v8  ;;  %9673 = vmatprep.subr.mxu0 %v12620_v8 }
 0x139   :  { %9630 = vmatpush3.msra.mxu1 %v12620_v8  ;;  %9674 = vmatpush3.msra.mxu0 %v12620_v8 }
 0x13a   :  { %9631 = vmatprep.subr.mxu1 %v12628_v10  ;;  %9675 = vmatprep.subr.mxu0 %v12628_v10 }
 0x13b   :  { %9632 = vmatpush3.msra.mxu1 %v12628_v10  ;;  %9676 = vmatpush3.msra.mxu0 %v12628_v10 }
 0x13c   :  { %9633 = vmatprep.subr.mxu1 %v12636_v12  ;;  %9677 = vmatprep.subr.mxu0 %v12636_v12 }
 0x13d   :  { %9634 = vmatpush3.msra.mxu1 %v12636_v12  ;;  %9678 = vmatpush3.msra.mxu0 %v12636_v12 }
 0x13e   :  { %9635 = vmatprep.subr.mxu1 %v12644_v14  ;;  %9679 = vmatprep.subr.mxu0 %v12644_v14 }
 0x13f   :  { %9636 = vmatpush3.msra.mxu1 %v12644_v14  ;;  %9680 = vmatpush3.msra.mxu0 %v12644_v14 }
 0x140   :  { %9637 = vmatprep.subr.mxu1 %v12652_v16  ;;  %9681 = vmatprep.subr.mxu0 %v12652_v16 }
 0x141   :  { %9638 = vmatpush3.msra.mxu1 %v12652_v16  ;;  %9682 = vmatpush3.msra.mxu0 %v12652_v16 }
 0x142   :  { %9639 = vmatprep.subr.mxu1 %v12658_v17  ;;  %9683 = vmatprep.subr.mxu0 %v12658_v17 }
 0x143   :  { %9640 = vmatpush3.msra.mxu1 %v12658_v17  ;;  %9684 = vmatpush3.msra.mxu0 %v12658_v17 }
 0x144   :  { %9641 = vmatprep.subr.mxu1 %v12664_v18  ;;  %9685 = vmatprep.subr.mxu0 %v12664_v18 }
 0x145   :  { %9642 = vmatpush3.msra.mxu1 %v12664_v18  ;;  %9686 = vmatpush3.msra.mxu0 %v12664_v18 }
 0x146   :  { %9644 = vmatmul.mubr.f32.vlgmr.msra.gmra.mxu1 %v277_v19  ;;  %9688 = vmatmul.mubr.f32.vlgmr.msra.gmra.mxu0 %v406_v20 }
 0x147   :  { %9699 = vmatprep.subr.mxu1 %v7670_v21  ;;  %9646 = vmatprep.mubr.f32.mxu1 %v278_v22 }
 0x148   :  { %9700 = vmatpush3.msra.mxu1 %v7670_v21  ;;  %9690 = vmatprep.mubr.f32.mxu0 %v407_v23 }
 0x149   :  { %9701 = vmatprep.subr.mxu1 %v7669_v24  ;;  %9743 = vmatprep.subr.mxu0 %v404_v25 }
 0x14a   :  { %9702 = vmatpush3.msra.mxu1 %v7669_v24  ;;  %9691 = vmatmul.mubr.f32.gmra.mxu0 %v408_v26 }
 0x14b   :  { %9703 = vmatprep.subr.mxu1 %v7668_v27  ;;  %9647 = vmatmul.mubr.f32.gmra.mxu1 %v279_v28 }
 0x14c   :  { %9704 = vmatpush3.msra.mxu1 %v7668_v27  ;;  %9649 = vmatprep.mubr.f32.mxu1 %v280_v29 }
 0x14d   :  { %9705 = vmatprep.subr.mxu1 %v7667_v30  ;;  %9693 = vmatprep.mubr.f32.mxu0 %v409_v31 }
 0x14e   :  { %9706 = vmatpush3.msra.mxu1 %v7667_v30  ;;  %9694 = vmatmul.mubr.f32.gmra.mxu0 %v410_v32 }
 0x14f   :  { %9707 = vmatprep.subr.mxu1 %v7666_v33  ;;  %9650 = vmatmul.mubr.f32.gmra.mxu1 %v281_v34  ;;  %v746_v34 = vld [vmem:[#allocation2 + $0x88] sm:$0xff] }
 0x150   :  { %9708 = vmatpush3.msra.mxu1 %v7666_v33  ;;  %9652 = vmatprep.mubr.f32.mxu1 %v282_v35  ;;  %v745_v33 = vld [vmem:[#allocation2 + $0x80] sm:$0xff]  ;;  %v747_v35 = vld [vmem:[#allocation2 + $0x90] sm:$0xff] }
 0x151   :  { %9709 = vmatprep.subr.mxu1 %v7665_v36  ;;  %9696 = vmatprep.mubr.f32.mxu0 %v411_v37  ;;  %v749_v37 = vld [vmem:[#allocation2 + $0xa0] sm:$0xff] }
 0x152   :  { %9710 = vmatpush3.msra.mxu1 %v7665_v36  ;;  %9697 = vmatmul.mubr.f32.gmra.mxu0 %v412_v38  ;;  %v748_v36 = vld [vmem:[#allocation2 + $0x98] sm:$0xff]  ;;  %v750_v38 = vld [vmem:[#allocation2 + $0xa8] sm:$0xff] }
 0x153   :  { %9711 = vmatprep.subr.mxu1 %v7664_v39  ;;  %9653 = vmatmul.mubr.f32.gmra.mxu1 %v283_v40  ;;  %v752_v40 = vld [vmem:[#allocation2 + $0xb8] sm:$0xff] }
 0x154   :  { %9712 = vmatpush3.msra.mxu1 %v7664_v39  ;;  %9744 = vmatpush3.msra.mxu0 %v404_v25  ;;  %v751_v39 = vld [vmem:[#allocation2 + $0xb0] sm:$0xff] }
 0x155   :  { %9713 = vmatprep.subr.mxu1 %v7663_v41  ;;  %9745 = vmatprep.subr.mxu0 %v403_v42 }
 0x156   :  { %9714 = vmatpush3.msra.mxu1 %v7663_v41  ;;  %9746 = vmatpush3.msra.mxu0 %v403_v42  ;;  %v988_v41 = vld [vmem:[#allocation2 + $0xc0] sm:$0xff]  ;;  %v989_v42 = vld [vmem:[#allocation2 + $0xc8] sm:$0xff] }
 0x157   :  { %9715 = vmatprep.subr.mxu1 %v7662_v43  ;;  %9747 = vmatprep.subr.mxu0 %v402_v44 }
 0x158   :  { %9716 = vmatpush3.msra.mxu1 %v7662_v43  ;;  %9748 = vmatpush3.msra.mxu0 %v402_v44  ;;  %v990_v43 = vld [vmem:[#allocation2 + $0xd0] sm:$0xff]  ;;  %v991_v44 = vld [vmem:[#allocation2 + $0xd8] sm:$0xff] }
 0x159   :  { %9717 = vmatprep.subr.mxu1 %v7661_v45  ;;  %9749 = vmatprep.subr.mxu0 %v401_v46 }
 0x15a   :  { %9718 = vmatpush3.msra.mxu1 %v7661_v45  ;;  %9750 = vmatpush3.msra.mxu0 %v401_v46  ;;  %v992_v45 = vld [vmem:[#allocation2 + $0xe0] sm:$0xff]  ;;  %v7686_v46 = vld [vmem:[%s15508_s4 + $0x178] sm:$0xff] }
 0x15b   :  { %9719 = vmatprep.subr.mxu1 %v7660_v47  ;;  %9751 = vmatprep.subr.mxu0 %v400_v48 }
 0x15c   :  { %9720 = vmatpush3.msra.mxu1 %v7660_v47  ;;  %9752 = vmatpush3.msra.mxu0 %v400_v48  ;;  %v993_v47 = vld [vmem:[#allocation2 + $0xe8] sm:$0xff]  ;;  %v994_v48 = vld [vmem:[#allocation2 + $0xf0] sm:$0xff] }
 0x15d   :  { %9721 = vmatprep.subr.mxu1 %v7659_v49  ;;  %9753 = vmatprep.subr.mxu0 %v399_v50 }
 0x15e   :  { %9722 = vmatpush3.msra.mxu1 %v7659_v49  ;;  %9754 = vmatpush3.msra.mxu0 %v399_v50  ;;  %v7685_v49 = vld [vmem:[%s15508_s4 + $0x170] sm:$0xff]  ;;  %v995_v50 = vld [vmem:[#allocation2 + $0xf8] sm:$0xff] }
 0x15f   :  { %9723 = vmatprep.subr.mxu1 %v7658_v51  ;;  %9755 = vmatprep.subr.mxu0 %v398_v52 }
 0x160   :  { %9724 = vmatpush3.msra.mxu1 %v7658_v51  ;;  %9756 = vmatpush3.msra.mxu0 %v398_v52  ;;  %v1231_v51 = vld [vmem:[#allocation2 + $0x100] sm:$0xff]  ;;  %v7684_v52 = vld [vmem:[%s15508_s4 + $0x168] sm:$0xff] }
 0x161   :  { %9725 = vmatprep.subr.mxu1 %v7657_v54  ;;  %9757 = vmatprep.subr.mxu0 %v397_v55 }
 0x162   :  { %9726 = vmatpush3.msra.mxu1 %v7657_v54  ;;  %9758 = vmatpush3.msra.mxu0 %v397_v55  ;;  %v7683_v54 = vld [vmem:[%s15508_s4 + $0x160] sm:$0xff]  ;;  %v7682_v55 = vld [vmem:[%s15508_s4 + $0x158] sm:$0xff] }
 0x163   :  { %9727 = vmatprep.subr.mxu1 %v7656_v57  ;;  %9759 = vmatprep.subr.mxu0 %v396_v59 }
 0x164   :  { %9728 = vmatpush3.msra.mxu1 %v7656_v57  ;;  %9760 = vmatpush3.msra.mxu0 %v396_v59  ;;  %v7681_v57 = vld [vmem:[%s15508_s4 + $0x150] sm:$0xff]  ;;  %v7680_v59 = vld [vmem:[%s15508_s4 + $0x148] sm:$0xff] }
 0x165   :  { %9729 = vmatprep.subr.mxu1 %v7655_v61  ;;  %9761 = vmatprep.subr.mxu0 %v395_v63 }
 0x166   :  { %9730 = vmatpush3.msra.mxu1 %v7655_v61  ;;  %9762 = vmatpush3.msra.mxu0 %v395_v63  ;;  %v7679_v61 = vld [vmem:[%s15508_s4 + $0x140] sm:$0xff]  ;;  %v7678_v63 = vld [vmem:[%s15508_s4 + $0x138] sm:$0xff] }
 0x167   :  { %9787 = vmatprep.subr.mxu1 %v12559_v53  ;;  %9763 = vmatprep.subr.mxu0 %v394_v1 }
 0x168   :  { %9764 = vmatpush3.msra.mxu0 %v394_v1  ;;  %v7677_v1 = vld [vmem:[%s15508_s4 + $0x130] sm:$0xff] }
 0x169   :  { %9765 = vmatprep.subr.mxu0 %v393_v3 }
 0x16a   :  { %9766 = vmatpush3.msra.mxu0 %v393_v3  ;;  %v7676_v3 = vld [vmem:[%s15508_s4 + $0x128] sm:$0xff] }
 0x16b   :  { %9767 = vmatprep.subr.mxu0 %v392_v5 }
 0x16c   :  { %9768 = vmatpush3.msra.mxu0 %v392_v5  ;;  %v1232_v5 = vld [vmem:[#allocation2 + $0x108] sm:$0xff] }
 0x16d   :  { %9769 = vmatprep.subr.mxu0 %v391_v7 }
 0x16e   :  { %9770 = vmatpush3.msra.mxu0 %v391_v7  ;;  %v1233_v7 = vld [vmem:[#allocation2 + $0x110] sm:$0xff] }
 0x16f   :  { %9771 = vmatprep.subr.mxu0 %v390_v9 }
 0x170   :  { %9772 = vmatpush3.msra.mxu0 %v390_v9  ;;  %v7675_v9 = vld [vmem:[%s15508_s4 + $0x120] sm:$0xff] }
 0x171   :  { %9773 = vmatprep.subr.mxu0 %v389_v11 }
 0x172   :  { %9774 = vmatpush3.msra.mxu0 %v389_v11  ;;  %v1234_v11 = vld [vmem:[#allocation2 + $0x118] sm:$0xff] }
 0x173   :  { %9831 = vmatprep.subr.mxu0 %v7686_v46 }
 0x206   :  { %v9645_v13 = vpop.f32.mrf.mxu1  ;;  %v9689_v15 = vpop.f32.mrf.mxu0 }
 0x208   :  { %v350_v19 = vpop.f32.mrf.mxu1  ;;  %v479_v20 = vpop.f32.mrf.mxu0 }
 0x209   :  { %9731 = vmatprep.mubr.f32.mxu1 %v479_v20  ;;  %9775 = vmatprep.mubr.f32.mxu0 %v350_v19  ;;  %v1236_v19 = vld [vmem:[#allocation2 + $0x128] sm:$0xff]  ;;  %v1237_v20 = vld [vmem:[#allocation2 + $0x130] sm:$0xff] }
 0x20a   :  { %9732 = vmatmul.mubr.f32.vlgmr.msra.gmra.mxu1 %v9689_v15  ;;  %9776 = vmatmul.mubr.f32.vlgmr.msra.gmra.mxu0 %v9645_v13  ;;  %v9692_v21 = vpop.f32.mrf.mxu0  ;;  %v1235_v13 = vld [vmem:[#allocation2 + $0x120] sm:$0xff]  ;;  %v7674_v15 = vld [vmem:[%s15508_s4 + $0x118] sm:$0xff] }
 0x20b   :  { %9788 = vmatpush3.msra.mxu1 %v12559_v53  ;;  %v9648_v22 = vpop.f32.mrf.mxu1  ;;  %9832 = vmatpush3.msra.mxu0 %v7686_v46 }
 0x20c   :  { %9789 = vmatprep.subr.mxu1 %v12563_v56  ;;  %v489_v23 = vpop.f32.mrf.mxu0  ;;  %9833 = vmatprep.subr.mxu0 %v7685_v49 }
 0x20d   :  { %9790 = vmatpush3.msra.mxu1 %v12563_v56  ;;  %v360_v24 = vpop.f32.mrf.mxu1  ;;  %9734 = vmatprep.mubr.f32.mxu1 %v489_v23  ;;  %v1474_v23 = vld [vmem:[#allocation2 + $0x140] sm:$0xff] }
 0x20e   :  { %9791 = vmatprep.subr.mxu1 %v12570_v58  ;;  %9778 = vmatprep.mubr.f32.mxu0 %v360_v24  ;;  %v9695_v25 = vpop.f32.mrf.mxu0  ;;  %v7672_v24 = vld [vmem:[%s15508_s4 + $0x108] sm:$0xff] }
 0x20f   :  { %9792 = vmatpush3.msra.mxu1 %v12570_v58  ;;  %v9651_v26 = vpop.f32.mrf.mxu1  ;;  %9779 = vmatmul.mubr.f32.gmra.mxu0 %v9648_v22  ;;  %v1238_v22 = vld [vmem:[#allocation2 + $0x138] sm:$0xff] }
 0x210   :  { %9793 = vmatprep.subr.mxu1 %v12577_v60  ;;  %9735 = vmatmul.mubr.f32.gmra.mxu1 %v9692_v21  ;;  %v499_v27 = vpop.f32.mrf.mxu0  ;;  %v7673_v21 = vld [vmem:[%s15508_s4 + $0x110] sm:$0xff] }
 0x211   :  { %9794 = vmatpush3.msra.mxu1 %v12577_v60  ;;  %v370_v28 = vpop.f32.mrf.mxu1  ;;  %9737 = vmatprep.mubr.f32.mxu1 %v499_v27  ;;  %v1475_v27 = vld [vmem:[#allocation2 + $0x148] sm:$0xff] }
 0x212   :  { %9795 = vmatprep.subr.mxu1 %v12584_v62  ;;  %9781 = vmatprep.mubr.f32.mxu0 %v370_v28  ;;  %v9698_v29 = vpop.f32.mrf.mxu0  ;;  %v1476_v28 = vld [vmem:[#allocation2 + $0x150] sm:$0xff] }
 0x213   :  { %9796 = vmatpush3.msra.mxu1 %v12584_v62  ;;  %v9654_v30 = vpop.f32.mrf.mxu1  ;;  %9782 = vmatmul.mubr.f32.gmra.mxu0 %v9651_v26  ;;  %v12933_v26 = vld [vmem:[%s15508_s4 + $0x1f8] sm:$0xff] }
 0x214   :  { %9797 = vmatprep.subr.mxu1 %v12591_v0  ;;  %9738 = vmatmul.mubr.f32.gmra.mxu1 %v9695_v25  ;;  %v509_v31 = vpop.f32.mrf.mxu0  ;;  %v7671_v25 = vld [vmem:[%s15508_s4 + $0x100] sm:$0xff] }
 0x215   :  { %9798 = vmatpush3.msra.mxu1 %v12591_v0  ;;  %v380_v32 = vpop.f32.mrf.mxu1  ;;  %9740 = vmatprep.mubr.f32.mxu1 %v509_v31  ;;  %v1479_v31 = vld [vmem:[#allocation2 + $0x168] sm:$0xff] }
 0x216   :  { %9799 = vmatprep.subr.mxu1 %v12598_v2  ;;  %9784 = vmatprep.mubr.f32.mxu0 %v380_v32  ;;  %v1480_v32 = vld [vmem:[#allocation2 + $0x170] sm:$0xff] }
 0x217   :  { %9800 = vmatpush3.msra.mxu1 %v12598_v2  ;;  %9785 = vmatmul.mubr.f32.gmra.mxu0 %v9654_v30  ;;  %v1478_v30 = vld [vmem:[#allocation2 + $0x160] sm:$0xff] }
 0x218   :  { %9801 = vmatprep.subr.mxu1 %v12605_v4  ;;  %9741 = vmatmul.mubr.f32.gmra.mxu1 %v9698_v29  ;;  %v1477_v29 = vld [vmem:[#allocation2 + $0x158] sm:$0xff] }
 0x219   :  { %9802 = vmatpush3.msra.mxu1 %v12605_v4  ;;  %9819 = vmatprep.mubr.f32.mxu1 %v745_v33  ;;  %v1481_v33 = vld [vmem:[#allocation2 + $0x178] sm:$0xff] }
 0x21a   :  { %9803 = vmatprep.subr.mxu1 %v12612_v6  ;;  %9834 = vmatpush3.msra.mxu0 %v7685_v49  ;;  %v1964_v49 = vld [vmem:[#allocation2 + $0x1e0] sm:$0xff] }
 0x21b   :  { %9804 = vmatpush3.msra.mxu1 %v12612_v6  ;;  %9835 = vmatprep.subr.mxu0 %v7684_v52 }
 0x21c   :  { %9805 = vmatprep.subr.mxu1 %v12620_v8  ;;  %9836 = vmatpush3.msra.mxu0 %v7684_v52  ;;  %v1965_v52 = vld [vmem:[#allocation2 + $0x1e8] sm:$0xff] }
 0x21d   :  { %9806 = vmatpush3.msra.mxu1 %v12620_v8  ;;  %9837 = vmatprep.subr.mxu0 %v7683_v54 }
 0x21e   :  { %9807 = vmatprep.subr.mxu1 %v12628_v10  ;;  %9838 = vmatpush3.msra.mxu0 %v7683_v54 }
 0x21f   :  { %9808 = vmatpush3.msra.mxu1 %v12628_v10  ;;  %9839 = vmatprep.subr.mxu0 %v7682_v55 }
 0x220   :  { %9809 = vmatprep.subr.mxu1 %v12636_v12  ;;  %9840 = vmatpush3.msra.mxu0 %v7682_v55  ;;  %v1966_v55 = vld [vmem:[#allocation2 + $0x1f0] sm:$0xff] }
 0x221   :  { %9810 = vmatpush3.msra.mxu1 %v12636_v12  ;;  %9841 = vmatprep.subr.mxu0 %v7681_v57 }
 0x222   :  { %9811 = vmatprep.subr.mxu1 %v12644_v14  ;;  %9842 = vmatpush3.msra.mxu0 %v7681_v57 }
 0x223   :  { %9812 = vmatpush3.msra.mxu1 %v12644_v14  ;;  %9843 = vmatprep.subr.mxu0 %v7680_v59 }
 0x224   :  { %9813 = vmatprep.subr.mxu1 %v12652_v16  ;;  %9844 = vmatpush3.msra.mxu0 %v7680_v59 }
 0x225   :  { %9814 = vmatpush3.msra.mxu1 %v12652_v16  ;;  %9845 = vmatprep.subr.mxu0 %v7679_v61 }
 0x226   :  { %9815 = vmatprep.subr.mxu1 %v12658_v17  ;;  %9846 = vmatpush3.msra.mxu0 %v7679_v61 }
 0x227   :  { %9816 = vmatpush3.msra.mxu1 %v12658_v17  ;;  %9847 = vmatprep.subr.mxu0 %v7678_v63 }
 0x228   :  { %9817 = vmatprep.subr.mxu1 %v12664_v18  ;;  %9848 = vmatpush3.msra.mxu0 %v7678_v63 }
 0x229   :  { %9818 = vmatpush3.msra.mxu1 %v12664_v18  ;;  %9849 = vmatprep.subr.mxu0 %v7677_v1 }
 0x22a   :  { %9820 = vmatmul.mubr.f32.vlgmr.msra.gmra.mxu1 %v746_v34  ;;  %9875 = vmatprep.subr.mxu1 %v12559_v53  ;;  %v1717_v34 = vld [vmem:[#allocation2 + $0x180] sm:$0xff] }
 0x22b   :  { %9876 = vmatpush3.msra.mxu1 %v12559_v53  ;;  %9822 = vmatprep.mubr.f32.mxu1 %v747_v35  ;;  %v1718_v35 = vld [vmem:[#allocation2 + $0x188] sm:$0xff] }
 0x22c   :  { %9877 = vmatprep.subr.mxu1 %v12563_v56  ;;  %9850 = vmatpush3.msra.mxu0 %v7677_v1  ;;  %v1967_v1 = vld [vmem:[#allocation2 + $0x1f8] sm:$0xff] }
 0x22d   :  { %9878 = vmatpush3.msra.mxu1 %v12563_v56  ;;  %9851 = vmatprep.subr.mxu0 %v7676_v3 }
 0x22e   :  { %9823 = vmatmul.mubr.f32.gmra.mxu1 %v748_v36  ;;  %9879 = vmatprep.subr.mxu1 %v12570_v58  ;;  %v1719_v36 = vld [vmem:[#allocation2 + $0x190] sm:$0xff] }
 0x22f   :  { %9880 = vmatpush3.msra.mxu1 %v12570_v58  ;;  %9825 = vmatprep.mubr.f32.mxu1 %v749_v37  ;;  %v1720_v37 = vld [vmem:[#allocation2 + $0x198] sm:$0xff] }
 0x230   :  { %9881 = vmatprep.subr.mxu1 %v12577_v60  ;;  %9852 = vmatpush3.msra.mxu0 %v7676_v3 }
 0x231   :  { %9882 = vmatpush3.msra.mxu1 %v12577_v60  ;;  %9853 = vmatprep.subr.mxu0 %v7675_v9 }
 0x232   :  { %9826 = vmatmul.mubr.f32.gmra.mxu1 %v750_v38  ;;  %9883 = vmatprep.subr.mxu1 %v12584_v62  ;;  %v1721_v38 = vld [vmem:[#allocation2 + $0x1a0] sm:$0xff] }
 0x233   :  { %9884 = vmatpush3.msra.mxu1 %v12584_v62  ;;  %9828 = vmatprep.mubr.f32.mxu1 %v751_v39  ;;  %v1722_v39 = vld [vmem:[#allocation2 + $0x1a8] sm:$0xff] }
 0x234   :  { %9885 = vmatprep.subr.mxu1 %v12591_v0  ;;  %9854 = vmatpush3.msra.mxu0 %v7675_v9 }
 0x235   :  { %9886 = vmatpush3.msra.mxu1 %v12591_v0  ;;  %9855 = vmatprep.subr.mxu0 %v7674_v15 }
 0x236   :  { %9829 = vmatmul.mubr.f32.gmra.mxu1 %v752_v40  ;;  %9887 = vmatprep.subr.mxu1 %v12598_v2  ;;  %v1723_v40 = vld [vmem:[#allocation2 + $0x1b0] sm:$0xff] }
 0x237   :  { %9888 = vmatpush3.msra.mxu1 %v12598_v2  ;;  %9907 = vmatprep.mubr.f32.mxu1 %v988_v41  ;;  %v1724_v41 = vld [vmem:[#allocation2 + $0x1b8] sm:$0xff] }
 0x238   :  { %9889 = vmatprep.subr.mxu1 %v12605_v4  ;;  %9856 = vmatpush3.msra.mxu0 %v7674_v15 }
 0x239   :  { %9890 = vmatpush3.msra.mxu1 %v12605_v4  ;;  %9857 = vmatprep.subr.mxu0 %v7673_v21 }
 0x23a   :  { %9891 = vmatprep.subr.mxu1 %v12612_v6  ;;  %9858 = vmatpush3.msra.mxu0 %v7673_v21  ;;  %v2204_v21 = vld [vmem:[#allocation2 + $0x208] sm:$0xff] }
 0x23b   :  { %9892 = vmatpush3.msra.mxu1 %v12612_v6  ;;  %9859 = vmatprep.subr.mxu0 %v7672_v24 }
 0x23c   :  { %9893 = vmatprep.subr.mxu1 %v12620_v8  ;;  %9860 = vmatpush3.msra.mxu0 %v7672_v24 }
 0x23d   :  { %9894 = vmatpush3.msra.mxu1 %v12620_v8  ;;  %9861 = vmatprep.subr.mxu0 %v7671_v25 }
 0x23e   :  { %9895 = vmatprep.subr.mxu1 %v12628_v10  ;;  %9862 = vmatpush3.msra.mxu0 %v7671_v25  ;;  %v2206_v25 = vld [vmem:[#allocation2 + $0x218] sm:$0xff] }
 0x23f   :  { %9896 = vmatpush3.msra.mxu1 %v12628_v10  ;;  %9919 = vmatprep.subr.mxu0 %v12933_v26 }
 0x240   :  { %9897 = vmatprep.subr.mxu1 %v12636_v12 }
 0x241   :  { %9898 = vmatpush3.msra.mxu1 %v12636_v12 }
 0x242   :  { %9899 = vmatprep.subr.mxu1 %v12644_v14 }
 0x243   :  { %9900 = vmatpush3.msra.mxu1 %v12644_v14 }
 0x244   :  { %9901 = vmatprep.subr.mxu1 %v12652_v16 }
 0x245   :  { %9902 = vmatpush3.msra.mxu1 %v12652_v16 }
 0x246   :  { %9903 = vmatprep.subr.mxu1 %v12658_v17 }
 0x247   :  { %9904 = vmatpush3.msra.mxu1 %v12658_v17 }
 0x248   :  { %9905 = vmatprep.subr.mxu1 %v12664_v18 }
 0x249   :  { %9906 = vmatpush3.msra.mxu1 %v12664_v18 }
 0x24a   :  { %9908 = vmatmul.mubr.f32.vlgmr.msra.gmra.mxu1 %v989_v42  ;;  %9963 = vmatprep.subr.mxu1 %v12559_v53  ;;  %v1960_v42 = vld [vmem:[#allocation2 + $0x1c0] sm:$0xff] }
 0x24b   :  { %9964 = vmatpush3.msra.mxu1 %v12559_v53  ;;  %9910 = vmatprep.mubr.f32.mxu1 %v990_v43  ;;  %v1961_v43 = vld [vmem:[#allocation2 + $0x1c8] sm:$0xff] }
 0x24c   :  { %9965 = vmatprep.subr.mxu1 %v12563_v56 }
 0x24d   :  { %9966 = vmatpush3.msra.mxu1 %v12563_v56 }
 0x24e   :  { %9911 = vmatmul.mubr.f32.gmra.mxu1 %v991_v44  ;;  %9967 = vmatprep.subr.mxu1 %v12570_v58  ;;  %v1962_v44 = vld [vmem:[#allocation2 + $0x1d0] sm:$0xff] }
 0x24f   :  { %9968 = vmatpush3.msra.mxu1 %v12570_v58  ;;  %9913 = vmatprep.mubr.f32.mxu1 %v992_v45 }
 0x250   :  { %9969 = vmatprep.subr.mxu1 %v12577_v60 }
 0x251   :  { %9970 = vmatpush3.msra.mxu1 %v12577_v60 }
 0x252   :  { %9914 = vmatmul.mubr.f32.gmra.mxu1 %v993_v47  ;;  %9971 = vmatprep.subr.mxu1 %v12584_v62 }
 0x253   :  { %9972 = vmatpush3.msra.mxu1 %v12584_v62  ;;  %9916 = vmatprep.mubr.f32.mxu1 %v994_v48  ;;  %v1963_v48 = vld [vmem:[#allocation2 + $0x1d8] sm:$0xff] }
 0x254   :  { %9973 = vmatprep.subr.mxu1 %v12591_v0 }
 0x255   :  { %9974 = vmatpush3.msra.mxu1 %v12591_v0 }
 0x256   :  { %9917 = vmatmul.mubr.f32.gmra.mxu1 %v995_v50  ;;  %9975 = vmatprep.subr.mxu1 %v12598_v2 }
 0x257   :  { %9976 = vmatpush3.msra.mxu1 %v12598_v2  ;;  %9995 = vmatprep.mubr.f32.mxu1 %v1231_v51 }
 0x258   :  { %9977 = vmatprep.subr.mxu1 %v12605_v4 }
 0x259   :  { %9978 = vmatpush3.msra.mxu1 %v12605_v4 }
 0x25a   :  { %9979 = vmatprep.subr.mxu1 %v12612_v6 }
 0x25b   :  { %9980 = vmatpush3.msra.mxu1 %v12612_v6 }
 0x25c   :  { %9981 = vmatprep.subr.mxu1 %v12620_v8 }
 0x25d   :  { %9982 = vmatpush3.msra.mxu1 %v12620_v8 }
 0x25e   :  { %9983 = vmatprep.subr.mxu1 %v12628_v10 }
 0x25f   :  { %9984 = vmatpush3.msra.mxu1 %v12628_v10 }
 0x260   :  { %9985 = vmatprep.subr.mxu1 %v12636_v12 }
 0x261   :  { %9986 = vmatpush3.msra.mxu1 %v12636_v12 }
 0x262   :  { %9987 = vmatprep.subr.mxu1 %v12644_v14 }
 0x263   :  { %9988 = vmatpush3.msra.mxu1 %v12644_v14 }
 0x264   :  { %9989 = vmatprep.subr.mxu1 %v12652_v16 }
 0x265   :  { %9990 = vmatpush3.msra.mxu1 %v12652_v16 }
 0x266   :  { %9991 = vmatprep.subr.mxu1 %v12658_v17 }
 0x267   :  { %9992 = vmatpush3.msra.mxu1 %v12658_v17 }
 0x268   :  { %9993 = vmatprep.subr.mxu1 %v12664_v18 }
 0x269   :  { %9994 = vmatpush3.msra.mxu1 %v12664_v18 }
 0x26a   :  { %9996 = vmatmul.mubr.f32.vlgmr.msra.gmra.mxu1 %v1232_v5  ;;  %10051 = vmatprep.subr.mxu1 %v12559_v53 }
 0x26b   :  { %10052 = vmatpush3.msra.mxu1 %v12559_v53  ;;  %9998 = vmatprep.mubr.f32.mxu1 %v1233_v7  ;;  %v2203_v7 = vld [vmem:[#allocation2 + $0x200] sm:$0xff] }
 0x26c   :  { %10053 = vmatprep.subr.mxu1 %v12563_v56 }
 0x26d   :  { %10054 = vmatpush3.msra.mxu1 %v12563_v56 }
 0x26e   :  { %9999 = vmatmul.mubr.f32.gmra.mxu1 %v1234_v11  ;;  %10055 = vmatprep.subr.mxu1 %v12570_v58 }
 0x26f   :  { %10056 = vmatpush3.msra.mxu1 %v12570_v58  ;;  %10001 = vmatprep.mubr.f32.mxu1 %v1235_v13 }
 0x270   :  { %10057 = vmatprep.subr.mxu1 %v12577_v60 }
 0x271   :  { %10058 = vmatpush3.msra.mxu1 %v12577_v60 }
 0x272   :  { %10002 = vmatmul.mubr.f32.gmra.mxu1 %v1236_v19  ;;  %10059 = vmatprep.subr.mxu1 %v12584_v62 }
 0x273   :  { %10060 = vmatpush3.msra.mxu1 %v12584_v62  ;;  %10004 = vmatprep.mubr.f32.mxu1 %v1237_v20 }
 0x274   :  { %10061 = vmatprep.subr.mxu1 %v12591_v0 }
 0x275   :  { %10062 = vmatpush3.msra.mxu1 %v12591_v0 }
 0x276   :  { %10005 = vmatmul.mubr.f32.gmra.mxu1 %v1238_v22  ;;  %10063 = vmatprep.subr.mxu1 %v12598_v2 }
 0x277   :  { %10064 = vmatpush3.msra.mxu1 %v12598_v2  ;;  %10083 = vmatprep.mubr.f32.mxu1 %v1474_v23  ;;  %v2205_v23 = vld [vmem:[#allocation2 + $0x210] sm:$0xff] }
 0x278   :  { %10065 = vmatprep.subr.mxu1 %v12605_v4 }
 0x279   :  { %10066 = vmatpush3.msra.mxu1 %v12605_v4 }
 0x27a   :  { %10067 = vmatprep.subr.mxu1 %v12612_v6 }
 0x27b   :  { %10068 = vmatpush3.msra.mxu1 %v12612_v6 }
 0x27c   :  { %10069 = vmatprep.subr.mxu1 %v12620_v8 }
 0x27d   :  { %10070 = vmatpush3.msra.mxu1 %v12620_v8 }
 0x27e   :  { %10071 = vmatprep.subr.mxu1 %v12628_v10 }
 0x27f   :  { %10072 = vmatpush3.msra.mxu1 %v12628_v10 }
 0x280   :  { %10073 = vmatprep.subr.mxu1 %v12636_v12 }
 0x281   :  { %10074 = vmatpush3.msra.mxu1 %v12636_v12 }
 0x282   :  { %10075 = vmatprep.subr.mxu1 %v12644_v14 }
 0x283   :  { %10076 = vmatpush3.msra.mxu1 %v12644_v14 }
 0x284   :  { %10077 = vmatprep.subr.mxu1 %v12652_v16 }
 0x285   :  { %10078 = vmatpush3.msra.mxu1 %v12652_v16 }
 0x286   :  { %10079 = vmatprep.subr.mxu1 %v12658_v17 }
 0x287   :  { %10080 = vmatpush3.msra.mxu1 %v12658_v17 }
 0x288   :  { %10081 = vmatprep.subr.mxu1 %v12664_v18 }
 0x289   :  { %10082 = vmatpush3.msra.mxu1 %v12664_v18 }
 0x28a   :  { %10084 = vmatmul.mubr.f32.vlgmr.msra.gmra.mxu1 %v1475_v27  ;;  %10139 = vmatprep.subr.mxu1 %v12559_v53 }
 0x28b   :  { %10140 = vmatpush3.msra.mxu1 %v12559_v53  ;;  %10086 = vmatprep.mubr.f32.mxu1 %v1476_v28  ;;  %v7701_v28 = vld [vmem:[%s15508_s4 + $0x1f0] sm:$0xff] }
 0x28c   :  { %10141 = vmatprep.subr.mxu1 %v12563_v56 }
 0x28d   :  { %10142 = vmatpush3.msra.mxu1 %v12563_v56 }
 0x28e   :  { %10087 = vmatmul.mubr.f32.gmra.mxu1 %v1477_v29  ;;  %10143 = vmatprep.subr.mxu1 %v12570_v58 }
 0x28f   :  { %10144 = vmatpush3.msra.mxu1 %v12570_v58  ;;  %10089 = vmatprep.mubr.f32.mxu1 %v1478_v30  ;;  %v2207_v30 = vld [vmem:[#allocation2 + $0x220] sm:$0xff] }
 0x290   :  { %10145 = vmatprep.subr.mxu1 %v12577_v60 }
 0x291   :  { %10146 = vmatpush3.msra.mxu1 %v12577_v60 }
 0x292   :  { %10090 = vmatmul.mubr.f32.gmra.mxu1 %v1479_v31  ;;  %10147 = vmatprep.subr.mxu1 %v12584_v62 }
 0x293   :  { %10148 = vmatpush3.msra.mxu1 %v12584_v62  ;;  %10092 = vmatprep.mubr.f32.mxu1 %v1480_v32  ;;  %v7700_v32 = vld [vmem:[%s15508_s4 + $0x1e8] sm:$0xff] }
 0x294   :  { %10149 = vmatprep.subr.mxu1 %v12591_v0 }
 0x295   :  { %10150 = vmatpush3.msra.mxu1 %v12591_v0 }
 0x296   :  { %10093 = vmatmul.mubr.f32.gmra.mxu1 %v1481_v33  ;;  %10151 = vmatprep.subr.mxu1 %v12598_v2  ;;  %v2208_v33 = vld [vmem:[#allocation2 + $0x228] sm:$0xff] }
 0x297   :  { %10152 = vmatpush3.msra.mxu1 %v12598_v2  ;;  %10171 = vmatprep.mubr.f32.mxu1 %v1717_v34 }
 0x298   :  { %10153 = vmatprep.subr.mxu1 %v12605_v4 }
 0x299   :  { %10154 = vmatpush3.msra.mxu1 %v12605_v4 }
 0x29a   :  { %10155 = vmatprep.subr.mxu1 %v12612_v6 }
 0x29b   :  { %10156 = vmatpush3.msra.mxu1 %v12612_v6 }
 0x29c   :  { %10157 = vmatprep.subr.mxu1 %v12620_v8 }
 0x29d   :  { %10158 = vmatpush3.msra.mxu1 %v12620_v8 }
 0x29e   :  { %10159 = vmatprep.subr.mxu1 %v12628_v10 }
 0x29f   :  { %10160 = vmatpush3.msra.mxu1 %v12628_v10 }
 0x2a0   :  { %10161 = vmatprep.subr.mxu1 %v12636_v12 }
 0x2a1   :  { %10162 = vmatpush3.msra.mxu1 %v12636_v12 }
 0x2a2   :  { %10163 = vmatprep.subr.mxu1 %v12644_v14 }
 0x2a3   :  { %10164 = vmatpush3.msra.mxu1 %v12644_v14 }
 0x2a4   :  { %10165 = vmatprep.subr.mxu1 %v12652_v16 }
 0x2a5   :  { %10166 = vmatpush3.msra.mxu1 %v12652_v16 }
 0x2a6   :  { %10167 = vmatprep.subr.mxu1 %v12658_v17 }
 0x2a7   :  { %10168 = vmatpush3.msra.mxu1 %v12658_v17 }
 0x2a8   :  { %10169 = vmatprep.subr.mxu1 %v12664_v18 }
 0x2a9   :  { %10170 = vmatpush3.msra.mxu1 %v12664_v18 }
 0x2aa   :  { %10172 = vmatmul.mubr.f32.vlgmr.msra.gmra.mxu1 %v1718_v35  ;;  %10227 = vmatprep.subr.mxu1 %v12559_v53 }
 0x2ab   :  { %10228 = vmatpush3.msra.mxu1 %v12559_v53  ;;  %10174 = vmatprep.mubr.f32.mxu1 %v1719_v36  ;;  %v2209_v36 = vld [vmem:[#allocation2 + $0x230] sm:$0xff] }
 0x2ac   :  { %10229 = vmatprep.subr.mxu1 %v12563_v56 }
 0x2ad   :  { %10230 = vmatpush3.msra.mxu1 %v12563_v56 }
 0x2ae   :  { %10175 = vmatmul.mubr.f32.gmra.mxu1 %v1720_v37  ;;  %10231 = vmatprep.subr.mxu1 %v12570_v58 }
 0x2af   :  { %10232 = vmatpush3.msra.mxu1 %v12570_v58  ;;  %10177 = vmatprep.mubr.f32.mxu1 %v1721_v38  ;;  %v7698_v38 = vld [vmem:[%s15508_s4 + $0x1d8] sm:$0xff] }
 0x2b0   :  { %10233 = vmatprep.subr.mxu1 %v12577_v60 }
 0x2b1   :  { %10234 = vmatpush3.msra.mxu1 %v12577_v60 }
 0x2b2   :  { %10178 = vmatmul.mubr.f32.gmra.mxu1 %v1722_v39  ;;  %10235 = vmatprep.subr.mxu1 %v12584_v62  ;;  %v2210_v39 = vld [vmem:[#allocation2 + $0x238] sm:$0xff] }
 0x2b3   :  { %10236 = vmatpush3.msra.mxu1 %v12584_v62  ;;  %10180 = vmatprep.mubr.f32.mxu1 %v1723_v40  ;;  %v7697_v40 = vld [vmem:[%s15508_s4 + $0x1d0] sm:$0xff] }
 0x2b4   :  { %10237 = vmatprep.subr.mxu1 %v12591_v0 }
 0x2b5   :  { %10238 = vmatpush3.msra.mxu1 %v12591_v0 }
 0x2b6   :  { %10181 = vmatmul.mubr.f32.gmra.mxu1 %v1724_v41  ;;  %10239 = vmatprep.subr.mxu1 %v12598_v2 }
 0x2b7   :  { %10240 = vmatpush3.msra.mxu1 %v12598_v2  ;;  %10259 = vmatprep.mubr.f32.mxu1 %v1960_v42  ;;  %v7696_v42 = vld [vmem:[%s15508_s4 + $0x1c8] sm:$0xff] }
 0x2b8   :  { %10241 = vmatprep.subr.mxu1 %v12605_v4 }
 0x2b9   :  { %10242 = vmatpush3.msra.mxu1 %v12605_v4 }
 0x2ba   :  { %10243 = vmatprep.subr.mxu1 %v12612_v6 }
 0x2bb   :  { %10244 = vmatpush3.msra.mxu1 %v12612_v6 }
 0x2bc   :  { %10245 = vmatprep.subr.mxu1 %v12620_v8 }
 0x2bd   :  { %10246 = vmatpush3.msra.mxu1 %v12620_v8 }
 0x2be   :  { %10247 = vmatprep.subr.mxu1 %v12628_v10 }
 0x2bf   :  { %10248 = vmatpush3.msra.mxu1 %v12628_v10 }
 0x2c0   :  { %10249 = vmatprep.subr.mxu1 %v12636_v12 }
 0x2c1   :  { %10250 = vmatpush3.msra.mxu1 %v12636_v12 }
 0x2c2   :  { %10251 = vmatprep.subr.mxu1 %v12644_v14 }
 0x2c3   :  { %10252 = vmatpush3.msra.mxu1 %v12644_v14 }
 0x2c4   :  { %10253 = vmatprep.subr.mxu1 %v12652_v16 }
 0x2c5   :  { %10254 = vmatpush3.msra.mxu1 %v12652_v16 }
 0x2c6   :  { %10255 = vmatprep.subr.mxu1 %v12658_v17 }
 0x2c7   :  { %10256 = vmatpush3.msra.mxu1 %v12658_v17 }
 0x2c8   :  { %10257 = vmatprep.subr.mxu1 %v12664_v18 }
 0x2c9   :  { %10258 = vmatpush3.msra.mxu1 %v12664_v18 }
 0x2ca   :  { %10260 = vmatmul.mubr.f32.vlgmr.msra.gmra.mxu1 %v1961_v43  ;;  %10315 = vmatprep.subr.mxu1 %v12559_v53  ;;  %v9733_v45 = vpop.f32.mrf.mxu1  ;;  %v9777_v46 = vpop.f32.mrf.mxu0  ;;  %v7695_v43 = vld [vmem:[%s15508_s4 + $0x1c0] sm:$0xff] }
 0x2cb   :  { %v13017_v47 = vadd.f32 %v9777_v46, %v9733_v45  ;;  %10316 = vmatpush3.msra.mxu1 %v12559_v53  ;;  %10262 = vmatprep.mubr.f32.mxu1 %v1962_v44  ;;  %v7694_v44 = vld [vmem:[%s15508_s4 + $0x1b8] sm:$0xff]  ;;  %v7693_v45 = vld [vmem:[%s15508_s4 + $0x1b0] sm:$0xff]  ;;  %v7692_v46 = vld [vmem:[%s15508_s4 + $0x1a8] sm:$0xff] }
 0x2cc   :  { %10317 = vmatprep.subr.mxu1 %v12563_v56  ;;  %v13021_v50 = vpop.f32.mrf.mxu0  ;;  %v13024_v51 = vpop.f32.mrf.mxu1 }
 0x2cd   :  { %10318 = vmatpush3.msra.mxu1 %v12563_v56 }
 0x2ce   :  { %10263 = vmatmul.mubr.f32.gmra.mxu1 %v1963_v48  ;;  %10319 = vmatprep.subr.mxu1 %v12570_v58  ;;  %v7691_v48 = vld [vmem:[%s15508_s4 + $0x1a0] sm:$0xff] }
 0x2cf   :  { %10320 = vmatpush3.msra.mxu1 %v12570_v58  ;;  %10265 = vmatprep.mubr.f32.mxu1 %v1964_v49  ;;  %v9780_v54 = vpop.f32.mrf.mxu0  ;;  %v7690_v49 = vld [vmem:[%s15508_s4 + $0x198] sm:$0xff] }
 0x2d0   :  { %10321 = vmatprep.subr.mxu1 %v12577_v60  ;;  %v9736_v57 = vpop.f32.mrf.mxu1 }
 0x2d1   :  { %10322 = vmatpush3.msra.mxu1 %v12577_v60  ;;  %v13030_v59 = vadd.f32 %v9780_v54, %v9736_v57  ;;  %v13032_v61 = vpop.f32.mrf.mxu0 }
 0x2d2   :  { %10266 = vmatmul.mubr.f32.gmra.mxu1 %v1965_v52  ;;  %10323 = vmatprep.subr.mxu1 %v12584_v62  ;;  %v13035_v63 = vpop.f32.mrf.mxu1  ;;  %v7689_v52 = vld [vmem:[%s15508_s4 + $0x190] sm:$0xff] }
 0x2d3   :  { %10324 = vmatpush3.msra.mxu1 %v12584_v62  ;;  %10268 = vmatprep.mubr.f32.mxu1 %v1966_v55  ;;  %v9783_v3 = vpop.f32.mrf.mxu0  ;;  %v2446_v55 = vld [vmem:[#allocation2 + $0x240] sm:$0xff] }
 0x2d4   :  { %10325 = vmatprep.subr.mxu1 %v12591_v0  ;;  %v9739_v5 = vpop.f32.mrf.mxu1 }
 0x2d5   :  { %10326 = vmatpush3.msra.mxu1 %v12591_v0  ;;  %v13040_v9 = vadd.f32 %v9783_v3, %v9739_v5  ;;  %v13042_v11 = vpop.f32.mrf.mxu0  ;;  %v2447_v3 = vld [vmem:[#allocation2 + $0x248] sm:$0xff] }
 0x2d6   :  { %10269 = vmatmul.mubr.f32.gmra.mxu1 %v1967_v1  ;;  %10327 = vmatprep.subr.mxu1 %v12598_v2  ;;  %v13045_v13 = vpop.f32.mrf.mxu1  ;;  %v7688_v1 = vld [vmem:[%s15508_s4 + $0x188] sm:$0xff] }
 0x2d7   :  { %10328 = vmatpush3.msra.mxu1 %v12598_v2  ;;  %10347 = vmatprep.mubr.f32.mxu1 %v2203_v7  ;;  %v9786_v19 = vpop.f32.mrf.mxu0  ;;  %v7687_v7 = vld [vmem:[%s15508_s4 + $0x180] sm:$0xff] }
 0x2d8   :  { %10329 = vmatprep.subr.mxu1 %v12605_v4  ;;  %v9742_v15 = vpop.f32.mrf.mxu1 }
 0x2d9   :  { %10330 = vmatpush3.msra.mxu1 %v12605_v4  ;;  %v13050_v20 = vadd.f32 %v9786_v19, %v9742_v15  ;;  %v2448_v15 = vld [vmem:[#allocation2 + $0x250] sm:$0xff] }
 0x2da   :  { %10331 = vmatprep.subr.mxu1 %v12612_v6  ;;  %v13066_v22 = vpop.f32.mrf.mxu1 }
 0x2db   :  { %10332 = vmatpush3.msra.mxu1 %v12612_v6 }
 0x2dc   :  { %10333 = vmatprep.subr.mxu1 %v12620_v8 }
 0x2dd   :  { %10334 = vmatpush3.msra.mxu1 %v12620_v8 }
 0x2de   :  { %10335 = vmatprep.subr.mxu1 %v12628_v10 }
 0x2df   :  { %10336 = vmatpush3.msra.mxu1 %v12628_v10 }
 0x2e0   :  { %10337 = vmatprep.subr.mxu1 %v12636_v12 }
 0x2e1   :  { %10338 = vmatpush3.msra.mxu1 %v12636_v12 }
 0x2e2   :  { %10339 = vmatprep.subr.mxu1 %v12644_v14 }
 0x2e3   :  { %10340 = vmatpush3.msra.mxu1 %v12644_v14 }
 0x2e4   :  { %10341 = vmatprep.subr.mxu1 %v12652_v16 }
 0x2e5   :  { %10342 = vmatpush3.msra.mxu1 %v12652_v16 }
 0x2e6   :  { %10343 = vmatprep.subr.mxu1 %v12658_v17 }
 0x2e7   :  { %10344 = vmatpush3.msra.mxu1 %v12658_v17 }
 0x2e8   :  { %10345 = vmatprep.subr.mxu1 %v12664_v18 }
 0x2e9   :  { %10346 = vmatpush3.msra.mxu1 %v12664_v18 }
 0x2ea   :  { %v9821_v24 = vpop.f32.mrf.mxu1  ;;  %10348 = vmatmul.mubr.f32.vlgmr.msra.gmra.mxu1 %v2204_v21  ;;  %10403 = vmatprep.subr.mxu1 %v12559_v53  ;;  %v7718_v21 = vld [vmem:[%s15508_s4 + $0x278] sm:$0xff] }
 0x2eb   :  { %10404 = vmatpush3.msra.mxu1 %v12559_v53  ;;  %10350 = vmatprep.mubr.f32.mxu1 %v2205_v23  ;;  %v2449_v23 = vld [vmem:[#allocation2 + $0x258] sm:$0xff] }
 0x2ec   :  { %v819_v27 = vpop.f32.mrf.mxu1  ;;  %10405 = vmatprep.subr.mxu1 %v12563_v56 }
 0x2ed   :  { %9863 = vmatprep.mubr.f32.mxu0 %v819_v27  ;;  %10406 = vmatpush3.msra.mxu1 %v12563_v56  ;;  %v2450_v27 = vld [vmem:[#allocation2 + $0x260] sm:$0xff] }
 0x2ee   :  { %v9824_v29 = vpop.f32.mrf.mxu1  ;;  %9864 = vmatmul.mubr.f32.vlgmr.msra.gmra.mxu0 %v9821_v24  ;;  %10351 = vmatmul.mubr.f32.gmra.mxu1 %v2206_v25  ;;  %v7717_v24 = vld [vmem:[%s15508_s4 + $0x270] sm:$0xff] }
 0x2ef   :  { %10407 = vmatprep.subr.mxu1 %v12570_v58  ;;  %9920 = vmatpush3.msra.mxu0 %v12933_v26  ;;  %v7699_v26 = vld [vmem:[%s15508_s4 + $0x1e0] sm:$0xff] }
 0x2f0   :  { %10408 = vmatpush3.msra.mxu1 %v12570_v58  ;;  %v829_v31 = vpop.f32.mrf.mxu1  ;;  %9921 = vmatprep.subr.mxu0 %v7701_v28 }
 0x2f1   :  { %10409 = vmatprep.subr.mxu1 %v12577_v60  ;;  %9866 = vmatprep.mubr.f32.mxu0 %v829_v31  ;;  %v7715_v31 = vld [vmem:[%s15508_s4 + $0x260] sm:$0xff] }
 0x2f2   :  { %9922 = vmatpush3.msra.mxu0 %v7701_v28  ;;  %10353 = vmatprep.mubr.f32.mxu1 %v2207_v30  ;;  %v9827_v34 = vpop.f32.mrf.mxu1  ;;  %v7716_v28 = vld [vmem:[%s15508_s4 + $0x268] sm:$0xff] }
 0x2f3   :  { %10410 = vmatpush3.msra.mxu1 %v12577_v60  ;;  %9867 = vmatmul.mubr.f32.gmra.mxu0 %v9824_v29  ;;  %v2451_v29 = vld [vmem:[#allocation2 + $0x268] sm:$0xff] }
 0x2f4   :  { %9923 = vmatprep.subr.mxu0 %v7700_v32  ;;  %10354 = vmatmul.mubr.f32.gmra.mxu1 %v2208_v33  ;;  %v839_v35 = vpop.f32.mrf.mxu1 }
 0x2f5   :  { %10411 = vmatprep.subr.mxu1 %v12584_v62  ;;  %9924 = vmatpush3.msra.mxu0 %v7700_v32  ;;  %v2452_v32 = vld [vmem:[#allocation2 + $0x270] sm:$0xff] }
 0x2f6   :  { %10412 = vmatpush3.msra.mxu1 %v12584_v62  ;;  %9925 = vmatprep.subr.mxu0 %v7699_v26  ;;  %v9830_v37 = vpop.f32.mrf.mxu1 }
 0x2f7   :  { %10413 = vmatprep.subr.mxu1 %v12591_v0  ;;  %9869 = vmatprep.mubr.f32.mxu0 %v839_v35  ;;  %v7713_v35 = vld [vmem:[%s15508_s4 + $0x250] sm:$0xff] }
 0x2f8   :  { %9926 = vmatpush3.msra.mxu0 %v7699_v26  ;;  %10356 = vmatprep.mubr.f32.mxu1 %v2209_v36  ;;  %v849_v41 = vpop.f32.mrf.mxu1  ;;  %v2453_v26 = vld [vmem:[#allocation2 + $0x278] sm:$0xff] }
 0x2f9   :  { %10414 = vmatpush3.msra.mxu1 %v12591_v0  ;;  %9870 = vmatmul.mubr.f32.gmra.mxu0 %v9827_v34  ;;  %v7714_v34 = vld [vmem:[%s15508_s4 + $0x258] sm:$0xff] }
 0x2fa   :  { %9927 = vmatprep.subr.mxu0 %v7698_v38  ;;  %10357 = vmatmul.mubr.f32.gmra.mxu1 %v2210_v39  ;;  %v7710_v39 = vld [vmem:[%s15508_s4 + $0x238] sm:$0xff] }
 0x2fb   :  { %10415 = vmatprep.subr.mxu1 %v12598_v2  ;;  %9928 = vmatpush3.msra.mxu0 %v7698_v38  ;;  %v7711_v38 = vld [vmem:[%s15508_s4 + $0x240] sm:$0xff] }
 0x2fc   :  { %10416 = vmatpush3.msra.mxu1 %v12598_v2  ;;  %9929 = vmatprep.subr.mxu0 %v7697_v40 }
 0x2fd   :  { %10417 = vmatprep.subr.mxu1 %v12605_v4  ;;  %9872 = vmatprep.mubr.f32.mxu0 %v849_v41  ;;  %v7708_v41 = vld [vmem:[%s15508_s4 + $0x228] sm:$0xff] }
 0x2fe   :  { %9930 = vmatpush3.msra.mxu0 %v7697_v40  ;;  %10418 = vmatpush3.msra.mxu1 %v12605_v4  ;;  %v7709_v40 = vld [vmem:[%s15508_s4 + $0x230] sm:$0xff] }
 0x2ff   :  { %9873 = vmatmul.mubr.f32.gmra.mxu0 %v9830_v37  ;;  %9931 = vmatprep.subr.mxu0 %v7696_v42  ;;  %v7712_v37 = vld [vmem:[%s15508_s4 + $0x248] sm:$0xff] }
 0x300   :  { %10419 = vmatprep.subr.mxu1 %v12612_v6  ;;  %9932 = vmatpush3.msra.mxu0 %v7696_v42  ;;  %v7707_v42 = vld [vmem:[%s15508_s4 + $0x220] sm:$0xff] }
 0x301   :  { %10420 = vmatpush3.msra.mxu1 %v12612_v6  ;;  %9933 = vmatprep.subr.mxu0 %v7695_v43 }
 0x302   :  { %10421 = vmatprep.subr.mxu1 %v12620_v8  ;;  %9934 = vmatpush3.msra.mxu0 %v7695_v43 }
 0x303   :  { %10422 = vmatpush3.msra.mxu1 %v12620_v8  ;;  %9935 = vmatprep.subr.mxu0 %v7694_v44 }
 0x304   :  { %10423 = vmatprep.subr.mxu1 %v12628_v10  ;;  %9936 = vmatpush3.msra.mxu0 %v7694_v44  ;;  %v7706_v44 = vld [vmem:[%s15508_s4 + $0x218] sm:$0xff] }
 0x305   :  { %10424 = vmatpush3.msra.mxu1 %v12628_v10  ;;  %9937 = vmatprep.subr.mxu0 %v7693_v45 }
 0x306   :  { %10425 = vmatprep.subr.mxu1 %v12636_v12  ;;  %9938 = vmatpush3.msra.mxu0 %v7693_v45  ;;  %v7705_v45 = vld [vmem:[%s15508_s4 + $0x210] sm:$0xff] }
 0x307   :  { %10426 = vmatpush3.msra.mxu1 %v12636_v12  ;;  %9939 = vmatprep.subr.mxu0 %v7692_v46 }
 0x308   :  { %10427 = vmatprep.subr.mxu1 %v12644_v14  ;;  %9940 = vmatpush3.msra.mxu0 %v7692_v46 }
 0x309   :  { %10428 = vmatpush3.msra.mxu1 %v12644_v14  ;;  %9941 = vmatprep.subr.mxu0 %v7691_v48 }
 0x30a   :  { %10429 = vmatprep.subr.mxu1 %v12652_v16  ;;  %9942 = vmatpush3.msra.mxu0 %v7691_v48  ;;  %v9909_v54 = vpop.f32.mrf.mxu1  ;;  %v2689_v48 = vld [vmem:[#allocation2 + $0x280] sm:$0xff] }
 0x30b   :  { %10430 = vmatpush3.msra.mxu1 %v12652_v16  ;;  %9943 = vmatprep.subr.mxu0 %v7690_v49 }
 0x30c   :  { %10431 = vmatprep.subr.mxu1 %v12658_v17  ;;  %9944 = vmatpush3.msra.mxu0 %v7690_v49  ;;  %v1062_v57 = vpop.f32.mrf.mxu1  ;;  %v7704_v49 = vld [vmem:[%s15508_s4 + $0x208] sm:$0xff] }
 0x30d   :  { %10432 = vmatpush3.msra.mxu1 %v12658_v17  ;;  %9945 = vmatprep.subr.mxu0 %v7689_v52 }
 0x30e   :  { %10433 = vmatprep.subr.mxu1 %v12664_v18  ;;  %9946 = vmatpush3.msra.mxu0 %v7689_v52  ;;  %v9912_v5 = vpop.f32.mrf.mxu1  ;;  %v2690_v52 = vld [vmem:[#allocation2 + $0x288] sm:$0xff] }
 0x30f   :  { %10434 = vmatpush3.msra.mxu1 %v12664_v18  ;;  %10435 = vmatprep.mubr.f32.mxu1 %v2446_v55  ;;  %v7703_v55 = vld [vmem:[%s15508_s4 + $0x200] sm:$0xff] }
 0x310   :  { %9947 = vmatprep.subr.mxu0 %v7688_v1  ;;  %10436 = vmatmul.mubr.f32.vlgmr.msra.gmra.mxu1 %v2447_v3  ;;  %v1072_v19 = vpop.f32.mrf.mxu1  ;;  %v7734_v3 = vld [vmem:[%s15508_s4 + $0x2f8] sm:$0xff] }
 0x311   :  { %10491 = vmatprep.subr.mxu1 %v12559_v53  ;;  %9948 = vmatpush3.msra.mxu0 %v7688_v1 }
 0x312   :  { %10492 = vmatpush3.msra.mxu1 %v12559_v53  ;;  %9949 = vmatprep.subr.mxu0 %v7687_v7  ;;  %v9915_v25 = vpop.f32.mrf.mxu1 }
 0x313   :  { %10493 = vmatprep.subr.mxu1 %v12563_v56  ;;  %9950 = vmatpush3.msra.mxu0 %v7687_v7  ;;  %v7733_v7 = vld [vmem:[%s15508_s4 + $0x2f0] sm:$0xff] }
 0x314   :  { %9951 = vmatprep.mubr.f32.mxu0 %v1062_v57  ;;  %10438 = vmatprep.mubr.f32.mxu1 %v2448_v15  ;;  %v1082_v30 = vpop.f32.mrf.mxu1  ;;  %v2691_v57 = vld [vmem:[#allocation2 + $0x290] sm:$0xff] }
 0x315   :  { %10494 = vmatpush3.msra.mxu1 %v12563_v56  ;;  %9952 = vmatmul.mubr.f32.vlgmr.msra.gmra.mxu0 %v9909_v54 }
 0x316   :  { %10007 = vmatprep.subr.mxu0 %v7718_v21  ;;  %10439 = vmatmul.mubr.f32.gmra.mxu1 %v2449_v23  ;;  %v9918_v33 = vpop.f32.mrf.mxu1  ;;  %v2694_v23 = vld [vmem:[#allocation2 + $0x2a8] sm:$0xff] }
 0x317   :  { %10495 = vmatprep.subr.mxu1 %v12570_v58  ;;  %10008 = vmatpush3.msra.mxu0 %v7718_v21  ;;  %v7732_v21 = vld [vmem:[%s15508_s4 + $0x2e8] sm:$0xff] }
 0x318   :  { %10496 = vmatpush3.msra.mxu1 %v12570_v58  ;;  %10009 = vmatprep.subr.mxu0 %v7717_v24  ;;  %v1092_v36 = vpop.f32.mrf.mxu1 }
 0x319   :  { %10497 = vmatprep.subr.mxu1 %v12577_v60  ;;  %9954 = vmatprep.mubr.f32.mxu0 %v1072_v19  ;;  %v2693_v19 = vld [vmem:[#allocation2 + $0x2a0] sm:$0xff] }
 0x31a   :  { %10010 = vmatpush3.msra.mxu0 %v7717_v24  ;;  %10441 = vmatprep.mubr.f32.mxu1 %v2450_v27  ;;  %v2695_v27 = vld [vmem:[#allocation2 + $0x2b0] sm:$0xff] }
 0x31b   :  { %10498 = vmatpush3.msra.mxu1 %v12577_v60  ;;  %9955 = vmatmul.mubr.f32.gmra.mxu0 %v9912_v5  ;;  %v2692_v5 = vld [vmem:[#allocation2 + $0x298] sm:$0xff] }
 0x31c   :  { %10011 = vmatprep.subr.mxu0 %v7716_v28  ;;  %10442 = vmatmul.mubr.f32.gmra.mxu1 %v2451_v29  ;;  %v7730_v29 = vld [vmem:[%s15508_s4 + $0x2d8] sm:$0xff] }
 0x31d   :  { %10499 = vmatprep.subr.mxu1 %v12584_v62  ;;  %10012 = vmatpush3.msra.mxu0 %v7716_v28 }
 0x31e   :  { %10500 = vmatpush3.msra.mxu1 %v12584_v62  ;;  %10013 = vmatprep.subr.mxu0 %v7715_v31 }
 0x31f   :  { %10501 = vmatprep.subr.mxu1 %v12591_v0  ;;  %9957 = vmatprep.mubr.f32.mxu0 %v1082_v30  ;;  %v2696_v30 = vld [vmem:[#allocation2 + $0x2b8] sm:$0xff] }
 0x320   :  { %10014 = vmatpush3.msra.mxu0 %v7715_v31  ;;  %10444 = vmatprep.mubr.f32.mxu1 %v2452_v32  ;;  %v7729_v31 = vld [vmem:[%s15508_s4 + $0x2d0] sm:$0xff] }
 0x321   :  { %10502 = vmatpush3.msra.mxu1 %v12591_v0  ;;  %9958 = vmatmul.mubr.f32.gmra.mxu0 %v9915_v25  ;;  %v7731_v25 = vld [vmem:[%s15508_s4 + $0x2e0] sm:$0xff] }
 0x322   :  { %10015 = vmatprep.subr.mxu0 %v7714_v34  ;;  %10445 = vmatmul.mubr.f32.gmra.mxu1 %v2453_v26  ;;  %v7726_v26 = vld [vmem:[%s15508_s4 + $0x2b8] sm:$0xff] }
 0x323   :  { %10503 = vmatprep.subr.mxu1 %v12598_v2  ;;  %10016 = vmatpush3.msra.mxu0 %v7714_v34  ;;  %v7727_v34 = vld [vmem:[%s15508_s4 + $0x2c0] sm:$0xff] }
 0x324   :  { %10504 = vmatpush3.msra.mxu1 %v12598_v2  ;;  %10017 = vmatprep.subr.mxu0 %v7713_v35 }
 0x325   :  { %10505 = vmatprep.subr.mxu1 %v12605_v4  ;;  %9960 = vmatprep.mubr.f32.mxu0 %v1092_v36  ;;  %v7724_v36 = vld [vmem:[%s15508_s4 + $0x2a8] sm:$0xff] }
 0x326   :  { %10018 = vmatpush3.msra.mxu0 %v7713_v35  ;;  %10506 = vmatpush3.msra.mxu1 %v12605_v4  ;;  %v7725_v35 = vld [vmem:[%s15508_s4 + $0x2b0] sm:$0xff] }
 0x327   :  { %9961 = vmatmul.mubr.f32.gmra.mxu0 %v9918_v33  ;;  %10019 = vmatprep.subr.mxu0 %v7712_v37  ;;  %v7728_v33 = vld [vmem:[%s15508_s4 + $0x2c8] sm:$0xff] }
 0x328   :  { %10507 = vmatprep.subr.mxu1 %v12612_v6  ;;  %10020 = vmatpush3.msra.mxu0 %v7712_v37  ;;  %v7723_v37 = vld [vmem:[%s15508_s4 + $0x2a0] sm:$0xff] }
 0x329   :  { %10508 = vmatpush3.msra.mxu1 %v12612_v6  ;;  %10021 = vmatprep.subr.mxu0 %v7711_v38 }
 0x32a   :  { %10509 = vmatprep.subr.mxu1 %v12620_v8  ;;  %10022 = vmatpush3.msra.mxu0 %v7711_v38  ;;  %v9997_v43 = vpop.f32.mrf.mxu1 }
 0x32b   :  { %10510 = vmatpush3.msra.mxu1 %v12620_v8  ;;  %10023 = vmatprep.subr.mxu0 %v7710_v39 }
 0x32c   :  { %10511 = vmatprep.subr.mxu1 %v12628_v10  ;;  %10024 = vmatpush3.msra.mxu0 %v7710_v39  ;;  %v1305_v46 = vpop.f32.mrf.mxu1  ;;  %v7722_v39 = vld [vmem:[%s15508_s4 + $0x298] sm:$0xff] }
 0x32d   :  { %10512 = vmatpush3.msra.mxu1 %v12628_v10  ;;  %10025 = vmatprep.subr.mxu0 %v7709_v40 }
 0x32e   :  { %10513 = vmatprep.subr.mxu1 %v12636_v12  ;;  %10026 = vmatpush3.msra.mxu0 %v7709_v40  ;;  %v10000_v54 = vpop.f32.mrf.mxu1  ;;  %v7721_v40 = vld [vmem:[%s15508_s4 + $0x290] sm:$0xff] }
 0x32f   :  { %10514 = vmatpush3.msra.mxu1 %v12636_v12  ;;  %10027 = vmatprep.subr.mxu0 %v7708_v41 }
 0x330   :  { %10515 = vmatprep.subr.mxu1 %v12644_v14  ;;  %10028 = vmatpush3.msra.mxu0 %v7708_v41  ;;  %v1315_v1 = vpop.f32.mrf.mxu1 }
 0x331   :  { %10516 = vmatpush3.msra.mxu1 %v12644_v14  ;;  %10029 = vmatprep.subr.mxu0 %v7707_v42 }
 0x332   :  { %10517 = vmatprep.subr.mxu1 %v12652_v16  ;;  %10030 = vmatpush3.msra.mxu0 %v7707_v42  ;;  %v10003_v15 = vpop.f32.mrf.mxu1  ;;  %v2932_v42 = vld [vmem:[#allocation2 + $0x2c0] sm:$0xff] }
 0x333   :  { %10518 = vmatpush3.msra.mxu1 %v12652_v16  ;;  %10031 = vmatprep.subr.mxu0 %v7706_v44 }
 0x334   :  { %10519 = vmatprep.subr.mxu1 %v12658_v17  ;;  %10032 = vmatpush3.msra.mxu0 %v7706_v44  ;;  %v1325_v24 = vpop.f32.mrf.mxu1  ;;  %v2933_v44 = vld [vmem:[#allocation2 + $0x2c8] sm:$0xff] }
 0x335   :  { %10520 = vmatpush3.msra.mxu1 %v12658_v17  ;;  %10033 = vmatprep.subr.mxu0 %v7705_v45 }
 0x336   :  { %10521 = vmatprep.subr.mxu1 %v12664_v18  ;;  %10034 = vmatpush3.msra.mxu0 %v7705_v45  ;;  %v10006_v28 = vpop.f32.mrf.mxu1 }
 0x337   :  { %10522 = vmatpush3.msra.mxu1 %v12664_v18  ;;  %10523 = vmatprep.mubr.f32.mxu1 %v2689_v48  ;;  %v2934_v48 = vld [vmem:[#allocation2 + $0x2d0] sm:$0xff] }
 0x338   :  { %10035 = vmatprep.subr.mxu0 %v7704_v49  ;;  %10524 = vmatmul.mubr.f32.vlgmr.msra.gmra.mxu1 %v2690_v52  ;;  %v1335_v32 = vpop.f32.mrf.mxu1  ;;  %v7750_v52 = vld [vmem:[%s15508_s4 + $0x378] sm:$0xff] }
 0x339   :  { %10579 = vmatprep.subr.mxu1 %v12559_v53  ;;  %10036 = vmatpush3.msra.mxu0 %v7704_v49 }
 0x33a   :  { %10580 = vmatpush3.msra.mxu1 %v12559_v53  ;;  %10037 = vmatprep.subr.mxu0 %v7703_v55 }
 0x33b   :  { %10581 = vmatprep.subr.mxu1 %v12563_v56  ;;  %10038 = vmatpush3.msra.mxu0 %v7703_v55  ;;  %v7749_v55 = vld [vmem:[%s15508_s4 + $0x370] sm:$0xff] }
 0x33c   :  { %10039 = vmatprep.mubr.f32.mxu0 %v1305_v46  ;;  %10526 = vmatprep.mubr.f32.mxu1 %v2691_v57  ;;  %v7719_v46 = vld [vmem:[%s15508_s4 + $0x280] sm:$0xff] }
 0x33d   :  { %10582 = vmatpush3.msra.mxu1 %v12563_v56  ;;  %10040 = vmatmul.mubr.f32.vlgmr.msra.gmra.mxu0 %v9997_v43  ;;  %v7720_v43 = vld [vmem:[%s15508_s4 + $0x288] sm:$0xff] }
 0x33e   :  { %10095 = vmatprep.subr.mxu0 %v7734_v3  ;;  %10527 = vmatmul.mubr.f32.gmra.mxu1 %v2692_v5  ;;  %v2937_v5 = vld [vmem:[#allocation2 + $0x2e8] sm:$0xff] }
 0x33f   :  { %10583 = vmatprep.subr.mxu1 %v12570_v58  ;;  %10096 = vmatpush3.msra.mxu0 %v7734_v3  ;;  %v7748_v3 = vld [vmem:[%s15508_s4 + $0x368] sm:$0xff] }
 0x340   :  { %10584 = vmatpush3.msra.mxu1 %v12570_v58  ;;  %10097 = vmatprep.subr.mxu0 %v7733_v7 }
 0x341   :  { %10585 = vmatprep.subr.mxu1 %v12577_v60  ;;  %10042 = vmatprep.mubr.f32.mxu0 %v1315_v1  ;;  %v2936_v1 = vld [vmem:[#allocation2 + $0x2e0] sm:$0xff] }
 0x342   :  { %10098 = vmatpush3.msra.mxu0 %v7733_v7  ;;  %10529 = vmatprep.mubr.f32.mxu1 %v2693_v19  ;;  %v2938_v19 = vld [vmem:[#allocation2 + $0x2f0] sm:$0xff] }
 0x343   :  { %10586 = vmatpush3.msra.mxu1 %v12577_v60  ;;  %10043 = vmatmul.mubr.f32.gmra.mxu0 %v10000_v54  ;;  %v2935_v54 = vld [vmem:[#allocation2 + $0x2d8] sm:$0xff] }
 0x344   :  { %10099 = vmatprep.subr.mxu0 %v7732_v21  ;;  %10530 = vmatmul.mubr.f32.gmra.mxu1 %v2694_v23  ;;  %v7746_v23 = vld [vmem:[%s15508_s4 + $0x358] sm:$0xff] }
 0x345   :  { %10587 = vmatprep.subr.mxu1 %v12584_v62  ;;  %10100 = vmatpush3.msra.mxu0 %v7732_v21 }
 0x346   :  { %10588 = vmatpush3.msra.mxu1 %v12584_v62  ;;  %10101 = vmatprep.subr.mxu0 %v7731_v25 }
 0x347   :  { %10589 = vmatprep.subr.mxu1 %v12591_v0  ;;  %10045 = vmatprep.mubr.f32.mxu0 %v1325_v24  ;;  %v2939_v24 = vld [vmem:[#allocation2 + $0x2f8] sm:$0xff] }
 0x348   :  { %10102 = vmatpush3.msra.mxu0 %v7731_v25  ;;  %10532 = vmatprep.mubr.f32.mxu1 %v2695_v27  ;;  %v7745_v25 = vld [vmem:[%s15508_s4 + $0x350] sm:$0xff] }
 0x349   :  { %10590 = vmatpush3.msra.mxu1 %v12591_v0  ;;  %10046 = vmatmul.mubr.f32.gmra.mxu0 %v10003_v15  ;;  %v7747_v15 = vld [vmem:[%s15508_s4 + $0x360] sm:$0xff] }
 0x34a   :  { %10103 = vmatprep.subr.mxu0 %v7730_v29  ;;  %10533 = vmatmul.mubr.f32.gmra.mxu1 %v2696_v30  ;;  %v10085_v38 = vpop.f32.mrf.mxu1  ;;  %v7742_v30 = vld [vmem:[%s15508_s4 + $0x338] sm:$0xff] }
 0x34b   :  { %10591 = vmatprep.subr.mxu1 %v12598_v2  ;;  %10104 = vmatpush3.msra.mxu0 %v7730_v29  ;;  %v7743_v29 = vld [vmem:[%s15508_s4 + $0x340] sm:$0xff] }
 0x34c   :  { %10592 = vmatpush3.msra.mxu1 %v12598_v2  ;;  %10105 = vmatprep.subr.mxu0 %v7729_v31  ;;  %v1548_v41 = vpop.f32.mrf.mxu1 }
 0x34d   :  { %10593 = vmatprep.subr.mxu1 %v12605_v4  ;;  %10048 = vmatprep.mubr.f32.mxu0 %v1335_v32  ;;  %v7740_v32 = vld [vmem:[%s15508_s4 + $0x328] sm:$0xff] }
 0x34e   :  { %10106 = vmatpush3.msra.mxu0 %v7729_v31  ;;  %10594 = vmatpush3.msra.mxu1 %v12605_v4  ;;  %v10088_v45 = vpop.f32.mrf.mxu1  ;;  %v7741_v31 = vld [vmem:[%s15508_s4 + $0x330] sm:$0xff] }
 0x34f   :  { %10049 = vmatmul.mubr.f32.gmra.mxu0 %v10006_v28  ;;  %10107 = vmatprep.subr.mxu0 %v7728_v33  ;;  %v7744_v28 = vld [vmem:[%s15508_s4 + $0x348] sm:$0xff] }
 0x350   :  { %10595 = vmatprep.subr.mxu1 %v12612_v6  ;;  %10108 = vmatpush3.msra.mxu0 %v7728_v33  ;;  %v1558_v49 = vpop.f32.mrf.mxu1  ;;  %v7739_v33 = vld [vmem:[%s15508_s4 + $0x320] sm:$0xff] }
 0x351   :  { %10596 = vmatpush3.msra.mxu1 %v12612_v6  ;;  %10109 = vmatprep.subr.mxu0 %v7727_v34 }
 0x352   :  { %10597 = vmatprep.subr.mxu1 %v12620_v8  ;;  %10110 = vmatpush3.msra.mxu0 %v7727_v34  ;;  %v10091_v57 = vpop.f32.mrf.mxu1 }
 0x353   :  { %10598 = vmatpush3.msra.mxu1 %v12620_v8  ;;  %10111 = vmatprep.subr.mxu0 %v7726_v26 }
 0x354   :  { %10599 = vmatprep.subr.mxu1 %v12628_v10  ;;  %10112 = vmatpush3.msra.mxu0 %v7726_v26  ;;  %v1568_v7 = vpop.f32.mrf.mxu1  ;;  %v7738_v26 = vld [vmem:[%s15508_s4 + $0x318] sm:$0xff] }
 0x355   :  { %10600 = vmatpush3.msra.mxu1 %v12628_v10  ;;  %10113 = vmatprep.subr.mxu0 %v7725_v35 }
 0x356   :  { %10601 = vmatprep.subr.mxu1 %v12636_v12  ;;  %10114 = vmatpush3.msra.mxu0 %v7725_v35  ;;  %v10094_v21 = vpop.f32.mrf.mxu1  ;;  %v7737_v35 = vld [vmem:[%s15508_s4 + $0x310] sm:$0xff] }
 0x357   :  { %10602 = vmatpush3.msra.mxu1 %v12636_v12  ;;  %10115 = vmatprep.subr.mxu0 %v7724_v36 }
 0x358   :  { %10603 = vmatprep.subr.mxu1 %v12644_v14  ;;  %10116 = vmatpush3.msra.mxu0 %v7724_v36  ;;  %v1578_v27 = vpop.f32.mrf.mxu1 }
 0x359   :  { %10604 = vmatpush3.msra.mxu1 %v12644_v14  ;;  %10117 = vmatprep.subr.mxu0 %v7723_v37 }
 0x35a   :  { %10605 = vmatprep.subr.mxu1 %v12652_v16  ;;  %10118 = vmatpush3.msra.mxu0 %v7723_v37  ;;  %v3175_v37 = vld [vmem:[#allocation2 + $0x300] sm:$0xff] }
 0x35b   :  { %10606 = vmatpush3.msra.mxu1 %v12652_v16  ;;  %10119 = vmatprep.subr.mxu0 %v7722_v39 }
 0x35c   :  { %10607 = vmatprep.subr.mxu1 %v12658_v17  ;;  %10120 = vmatpush3.msra.mxu0 %v7722_v39  ;;  %v3176_v39 = vld [vmem:[#allocation2 + $0x308] sm:$0xff] }
 0x35d   :  { %10608 = vmatpush3.msra.mxu1 %v12658_v17  ;;  %10121 = vmatprep.subr.mxu0 %v7721_v40 }
 0x35e   :  { %10609 = vmatprep.subr.mxu1 %v12664_v18  ;;  %10122 = vmatpush3.msra.mxu0 %v7721_v40 }
 0x35f   :  { %10610 = vmatpush3.msra.mxu1 %v12664_v18  ;;  %10611 = vmatprep.mubr.f32.mxu1 %v2932_v42  ;;  %v3177_v42 = vld [vmem:[#allocation2 + $0x310] sm:$0xff] }
 0x360   :  { %10123 = vmatprep.subr.mxu0 %v7720_v43  ;;  %10612 = vmatmul.mubr.f32.vlgmr.msra.gmra.mxu1 %v2933_v44  ;;  %v7766_v44 = vld [vmem:[%s15508_s4 + $0x3f8] sm:$0xff] }
 0x361   :  { %10667 = vmatprep.subr.mxu1 %v12559_v53  ;;  %10124 = vmatpush3.msra.mxu0 %v7720_v43 }
 0x362   :  { %10668 = vmatpush3.msra.mxu1 %v12559_v53  ;;  %10125 = vmatprep.subr.mxu0 %v7719_v46 }
 0x363   :  { %10669 = vmatprep.subr.mxu1 %v12563_v56  ;;  %10126 = vmatpush3.msra.mxu0 %v7719_v46  ;;  %v7765_v46 = vld [vmem:[%s15508_s4 + $0x3f0] sm:$0xff] }
 0x364   :  { %10127 = vmatprep.mubr.f32.mxu0 %v1548_v41  ;;  %10614 = vmatprep.mubr.f32.mxu1 %v2934_v48  ;;  %v7735_v41 = vld [vmem:[%s15508_s4 + $0x300] sm:$0xff] }
 0x365   :  { %10670 = vmatpush3.msra.mxu1 %v12563_v56  ;;  %10128 = vmatmul.mubr.f32.vlgmr.msra.gmra.mxu0 %v10085_v38  ;;  %v7736_v38 = vld [vmem:[%s15508_s4 + $0x308] sm:$0xff] }
 0x366   :  { %10183 = vmatprep.subr.mxu0 %v7750_v52  ;;  %10615 = vmatmul.mubr.f32.gmra.mxu1 %v2935_v54  ;;  %v3180_v54 = vld [vmem:[#allocation2 + $0x328] sm:$0xff] }
 0x367   :  { %10671 = vmatprep.subr.mxu1 %v12570_v58  ;;  %10184 = vmatpush3.msra.mxu0 %v7750_v52  ;;  %v7764_v52 = vld [vmem:[%s15508_s4 + $0x3e8] sm:$0xff] }
 0x368   :  { %10672 = vmatpush3.msra.mxu1 %v12570_v58  ;;  %10185 = vmatprep.subr.mxu0 %v7749_v55 }
 0x369   :  { %10673 = vmatprep.subr.mxu1 %v12577_v60  ;;  %10130 = vmatprep.mubr.f32.mxu0 %v1558_v49  ;;  %v3179_v49 = vld [vmem:[#allocation2 + $0x320] sm:$0xff] }
 0x36a   :  { %10186 = vmatpush3.msra.mxu0 %v7749_v55  ;;  %10617 = vmatprep.mubr.f32.mxu1 %v2936_v1  ;;  %v10173_v34 = vpop.f32.mrf.mxu1  ;;  %v3181_v1 = vld [vmem:[#allocation2 + $0x330] sm:$0xff] }
 0x36b   :  { %10674 = vmatpush3.msra.mxu1 %v12577_v60  ;;  %10131 = vmatmul.mubr.f32.gmra.mxu0 %v10088_v45  ;;  %v3178_v45 = vld [vmem:[#allocation2 + $0x318] sm:$0xff] }
 0x36c   :  { %10187 = vmatprep.subr.mxu0 %v7748_v3  ;;  %10618 = vmatmul.mubr.f32.gmra.mxu1 %v2937_v5  ;;  %v1791_v36 = vpop.f32.mrf.mxu1  ;;  %v7762_v5 = vld [vmem:[%s15508_s4 + $0x3d8] sm:$0xff] }
 0x36d   :  { %10675 = vmatprep.subr.mxu1 %v12584_v62  ;;  %10188 = vmatpush3.msra.mxu0 %v7748_v3 }
 0x36e   :  { %10676 = vmatpush3.msra.mxu1 %v12584_v62  ;;  %10189 = vmatprep.subr.mxu0 %v7747_v15  ;;  %v10176_v40 = vpop.f32.mrf.mxu1 }
 0x36f   :  { %10677 = vmatprep.subr.mxu1 %v12591_v0  ;;  %10133 = vmatprep.mubr.f32.mxu0 %v1568_v7  ;;  %v3182_v7 = vld [vmem:[#allocation2 + $0x338] sm:$0xff] }
 0x370   :  { %10190 = vmatpush3.msra.mxu0 %v7747_v15  ;;  %10620 = vmatprep.mubr.f32.mxu1 %v2938_v19  ;;  %v1801_v43 = vpop.f32.mrf.mxu1  ;;  %v7761_v15 = vld [vmem:[%s15508_s4 + $0x3d0] sm:$0xff] }
 0x371   :  { %10678 = vmatpush3.msra.mxu1 %v12591_v0  ;;  %10134 = vmatmul.mubr.f32.gmra.mxu0 %v10091_v57  ;;  %v7763_v57 = vld [vmem:[%s15508_s4 + $0x3e0] sm:$0xff] }
 0x372   :  { %10191 = vmatprep.subr.mxu0 %v7746_v23  ;;  %10621 = vmatmul.mubr.f32.gmra.mxu1 %v2939_v24  ;;  %v10179_v48 = vpop.f32.mrf.mxu1  ;;  %v7758_v24 = vld [vmem:[%s15508_s4 + $0x3b8] sm:$0xff] }
 0x373   :  { %10679 = vmatprep.subr.mxu1 %v12598_v2  ;;  %10192 = vmatpush3.msra.mxu0 %v7746_v23  ;;  %v7759_v23 = vld [vmem:[%s15508_s4 + $0x3c0] sm:$0xff] }
 0x374   :  { %10680 = vmatpush3.msra.mxu1 %v12598_v2  ;;  %10193 = vmatprep.subr.mxu0 %v7745_v25  ;;  %v1811_v55 = vpop.f32.mrf.mxu1 }
 0x375   :  { %10681 = vmatprep.subr.mxu1 %v12605_v4  ;;  %10136 = vmatprep.mubr.f32.mxu0 %v1578_v27  ;;  %v7756_v27 = vld [vmem:[%s15508_s4 + $0x3a8] sm:$0xff] }
 0x376   :  { %10194 = vmatpush3.msra.mxu0 %v7745_v25  ;;  %10682 = vmatpush3.msra.mxu1 %v12605_v4  ;;  %v10182_v3 = vpop.f32.mrf.mxu1  ;;  %v7757_v25 = vld [vmem:[%s15508_s4 + $0x3b0] sm:$0xff] }
 0x377   :  { %10137 = vmatmul.mubr.f32.gmra.mxu0 %v10094_v21  ;;  %10195 = vmatprep.subr.mxu0 %v7744_v28  ;;  %v7760_v21 = vld [vmem:[%s15508_s4 + $0x3c8] sm:$0xff] }
 0x378   :  { %10683 = vmatprep.subr.mxu1 %v12612_v6  ;;  %10196 = vmatpush3.msra.mxu0 %v7744_v28  ;;  %v1821_v19 = vpop.f32.mrf.mxu1  ;;  %v7755_v28 = vld [vmem:[%s15508_s4 + $0x3a0] sm:$0xff] }
 0x379   :  { %10684 = vmatpush3.msra.mxu1 %v12612_v6  ;;  %10197 = vmatprep.subr.mxu0 %v7743_v29 }
 0x37a   :  { %10685 = vmatprep.subr.mxu1 %v12620_v8  ;;  %10198 = vmatpush3.msra.mxu0 %v7743_v29 }
 0x37b   :  { %10686 = vmatpush3.msra.mxu1 %v12620_v8  ;;  %10199 = vmatprep.subr.mxu0 %v7742_v30 }
 0x37c   :  { %10687 = vmatprep.subr.mxu1 %v12628_v10  ;;  %10200 = vmatpush3.msra.mxu0 %v7742_v30  ;;  %v7754_v30 = vld [vmem:[%s15508_s4 + $0x398] sm:$0xff] }
 0x37d   :  { %10688 = vmatpush3.msra.mxu1 %v12628_v10  ;;  %10201 = vmatprep.subr.mxu0 %v7741_v31 }
 0x37e   :  { %10689 = vmatprep.subr.mxu1 %v12636_v12  ;;  %10202 = vmatpush3.msra.mxu0 %v7741_v31  ;;  %v7753_v31 = vld [vmem:[%s15508_s4 + $0x390] sm:$0xff] }
 0x37f   :  { %10690 = vmatpush3.msra.mxu1 %v12636_v12  ;;  %10203 = vmatprep.subr.mxu0 %v7740_v32 }
 0x380   :  { %10691 = vmatprep.subr.mxu1 %v12644_v14  ;;  %10204 = vmatpush3.msra.mxu0 %v7740_v32 }
 0x381   :  { %10692 = vmatpush3.msra.mxu1 %v12644_v14  ;;  %10205 = vmatprep.subr.mxu0 %v7739_v33 }
 0x382   :  { %10693 = vmatprep.subr.mxu1 %v12652_v16  ;;  %10206 = vmatpush3.msra.mxu0 %v7739_v33  ;;  %v13458_v33 = vpop.f32.mrf.mxu0 }
 0x383   :  { %10694 = vmatpush3.msra.mxu1 %v12652_v16  ;;  %10207 = vmatprep.subr.mxu0 %v7738_v26 }
 0x384   :  { %10695 = vmatprep.subr.mxu1 %v12658_v17  ;;  %10208 = vmatpush3.msra.mxu0 %v7738_v26  ;;  %v7752_v26 = vld [vmem:[%s15508_s4 + $0x388] sm:$0xff] }
 0x385   :  { %10696 = vmatpush3.msra.mxu1 %v12658_v17  ;;  %10209 = vmatprep.subr.mxu0 %v7737_v35 }
 0x386   :  { %10697 = vmatprep.subr.mxu1 %v12664_v18  ;;  %10210 = vmatpush3.msra.mxu0 %v7737_v35  ;;  %v3419_v35 = vld [vmem:[#allocation2 + $0x348] sm:$0xff] }
 0x387   :  { %10698 = vmatpush3.msra.mxu1 %v12664_v18  ;;  %10699 = vmatprep.mubr.f32.mxu1 %v3175_v37 }
 0x388   :  { %10211 = vmatprep.subr.mxu0 %v7736_v38  ;;  %10700 = vmatmul.mubr.f32.vlgmr.msra.gmra.mxu1 %v3176_v39 }
 0x389   :  { %10755 = vmatprep.subr.mxu1 %v12559_v53  ;;  %10212 = vmatpush3.msra.mxu0 %v7736_v38  ;;  %v7751_v38 = vld [vmem:[%s15508_s4 + $0x380] sm:$0xff] }
 0x38a   :  { %10756 = vmatpush3.msra.mxu1 %v12559_v53  ;;  %10213 = vmatprep.subr.mxu0 %v7735_v41  ;;  %v10261_v29 = vpop.f32.mrf.mxu1 }
 0x38b   :  { %10757 = vmatprep.subr.mxu1 %v12563_v56  ;;  %10214 = vmatpush3.msra.mxu0 %v7735_v41  ;;  %v3420_v41 = vld [vmem:[#allocation2 + $0x350] sm:$0xff] }
 0x38c   :  { %10215 = vmatprep.mubr.f32.mxu0 %v1791_v36  ;;  %10702 = vmatprep.mubr.f32.mxu1 %v3177_v42  ;;  %v2034_v32 = vpop.f32.mrf.mxu1 }
 0x38d   :  { %10758 = vmatpush3.msra.mxu1 %v12563_v56  ;;  %10216 = vmatmul.mubr.f32.vlgmr.msra.gmra.mxu0 %v10173_v34  ;;  %v3418_v34 = vld [vmem:[#allocation2 + $0x340] sm:$0xff] }
 0x38e   :  { %10271 = vmatprep.subr.mxu0 %v7766_v44  ;;  %10703 = vmatmul.mubr.f32.gmra.mxu1 %v3178_v45  ;;  %v10264_v36 = vpop.f32.mrf.mxu1 }
 0x38f   :  { %10759 = vmatprep.subr.mxu1 %v12570_v58  ;;  %10272 = vmatpush3.msra.mxu0 %v7766_v44 }
 0x390   :  { %10760 = vmatpush3.msra.mxu1 %v12570_v58  ;;  %10273 = vmatprep.subr.mxu0 %v7765_v46  ;;  %v2044_v42 = vpop.f32.mrf.mxu1 }
 0x391   :  { %10761 = vmatprep.subr.mxu1 %v12577_v60  ;;  %10218 = vmatprep.mubr.f32.mxu0 %v1801_v43  ;;  %v3421_v43 = vld [vmem:[#allocation2 + $0x358] sm:$0xff] }
 0x392   :  { %10274 = vmatpush3.msra.mxu0 %v7765_v46  ;;  %10705 = vmatprep.mubr.f32.mxu1 %v3179_v49  ;;  %v7781_v46 = vld [vmem:[%s15508_s4 + $0x470] sm:$0xff]  ;;  %v10267_v49 = vpop.f32.mrf.mxu1 }
 0x393   :  { %10762 = vmatpush3.msra.mxu1 %v12577_v60  ;;  %10219 = vmatmul.mubr.f32.gmra.mxu0 %v10176_v40 }
 0x394   :  { %10275 = vmatprep.subr.mxu0 %v7764_v52  ;;  %10706 = vmatmul.mubr.f32.gmra.mxu1 %v3180_v54  ;;  %v3423_v54 = vld [vmem:[#allocation2 + $0x368] sm:$0xff] }
 0x395   :  { %10763 = vmatprep.subr.mxu1 %v12584_v62  ;;  %10276 = vmatpush3.msra.mxu0 %v7764_v52  ;;  %v3422_v52 = vld [vmem:[#allocation2 + $0x360] sm:$0xff] }
 0x396   :  { %10764 = vmatpush3.msra.mxu1 %v12584_v62  ;;  %10277 = vmatprep.subr.mxu0 %v7763_v57 }
 0x397   :  { %10765 = vmatprep.subr.mxu1 %v12591_v0  ;;  %10221 = vmatprep.mubr.f32.mxu0 %v1811_v55 }
 0x398   :  { %10278 = vmatpush3.msra.mxu0 %v7763_v57  ;;  %10708 = vmatprep.mubr.f32.mxu1 %v3181_v1  ;;  %v2054_v57 = vpop.f32.mrf.mxu1 }
 0x399   :  { %10766 = vmatpush3.msra.mxu1 %v12591_v0  ;;  %10222 = vmatmul.mubr.f32.gmra.mxu0 %v10179_v48 }
 0x39a   :  { %10279 = vmatprep.subr.mxu0 %v7762_v5  ;;  %10709 = vmatmul.mubr.f32.gmra.mxu1 %v3182_v7  ;;  %v3424_v7 = vld [vmem:[#allocation2 + $0x370] sm:$0xff] }
 0x39b   :  { %10767 = vmatprep.subr.mxu1 %v12598_v2  ;;  %10280 = vmatpush3.msra.mxu0 %v7762_v5 }
 0x39c   :  { %10768 = vmatpush3.msra.mxu1 %v12598_v2  ;;  %10281 = vmatprep.subr.mxu0 %v7761_v15 }
 0x39d   :  { %10769 = vmatprep.subr.mxu1 %v12605_v4  ;;  %10224 = vmatprep.mubr.f32.mxu0 %v1821_v19  ;;  %v3425_v19 = vld [vmem:[#allocation2 + $0x378] sm:$0xff] }
 0x39e   :  { %10282 = vmatpush3.msra.mxu0 %v7761_v15  ;;  %10770 = vmatpush3.msra.mxu1 %v12605_v4  ;;  %v7778_v15 = vld [vmem:[%s15508_s4 + $0x458] sm:$0xff] }
 0x39f   :  { %10225 = vmatmul.mubr.f32.gmra.mxu0 %v10182_v3  ;;  %10283 = vmatprep.subr.mxu0 %v7760_v21  ;;  %v7779_v3 = vld [vmem:[%s15508_s4 + $0x460] sm:$0xff] }
 0x3a0   :  { %10771 = vmatprep.subr.mxu1 %v12612_v6  ;;  %10284 = vmatpush3.msra.mxu0 %v7760_v21 }
 0x3a1   :  { %10772 = vmatpush3.msra.mxu1 %v12612_v6  ;;  %10285 = vmatprep.subr.mxu0 %v7759_v23 }
 0x3a2   :  { %10773 = vmatprep.subr.mxu1 %v12620_v8  ;;  %10286 = vmatpush3.msra.mxu0 %v7759_v23 }
 0x3a3   :  { %10774 = vmatpush3.msra.mxu1 %v12620_v8  ;;  %10287 = vmatprep.subr.mxu0 %v7758_v24 }
 0x3a4   :  { %10775 = vmatprep.subr.mxu1 %v12628_v10  ;;  %10288 = vmatpush3.msra.mxu0 %v7758_v24  ;;  %v7777_v24 = vld [vmem:[%s15508_s4 + $0x450] sm:$0xff] }
 0x3a5   :  { %10776 = vmatpush3.msra.mxu1 %v12628_v10  ;;  %10289 = vmatprep.subr.mxu0 %v7757_v25 }
 0x3a6   :  { %10777 = vmatprep.subr.mxu1 %v12636_v12  ;;  %10290 = vmatpush3.msra.mxu0 %v7757_v25 }
 0x3a7   :  { %10778 = vmatpush3.msra.mxu1 %v12636_v12  ;;  %10291 = vmatprep.subr.mxu0 %v7756_v27 }
 0x3a8   :  { %10779 = vmatprep.subr.mxu1 %v12644_v14  ;;  %10292 = vmatpush3.msra.mxu0 %v7756_v27  ;;  %v7775_v27 = vld [vmem:[%s15508_s4 + $0x440] sm:$0xff] }
 0x3a9   :  { %10780 = vmatpush3.msra.mxu1 %v12644_v14  ;;  %10293 = vmatprep.subr.mxu0 %v7755_v28 }
 0x3aa   :  { %10781 = vmatprep.subr.mxu1 %v12652_v16  ;;  %10294 = vmatpush3.msra.mxu0 %v7755_v28  ;;  %v7774_v28 = vld [vmem:[%s15508_s4 + $0x438] sm:$0xff] }
 0x3ab   :  { %10782 = vmatpush3.msra.mxu1 %v12652_v16  ;;  %10295 = vmatprep.subr.mxu0 %v7754_v30 }
 0x3ac   :  { %10783 = vmatprep.subr.mxu1 %v12658_v17  ;;  %10296 = vmatpush3.msra.mxu0 %v7754_v30  ;;  %v7772_v30 = vld [vmem:[%s15508_s4 + $0x428] sm:$0xff] }
 0x3ad   :  { %10784 = vmatpush3.msra.mxu1 %v12658_v17  ;;  %10297 = vmatprep.subr.mxu0 %v7753_v31 }
 0x3ae   :  { %10785 = vmatprep.subr.mxu1 %v12664_v18  ;;  %10298 = vmatpush3.msra.mxu0 %v7753_v31  ;;  %v9865_v37 = vpop.f32.mrf.mxu0  ;;  %v7771_v31 = vld [vmem:[%s15508_s4 + $0x420] sm:$0xff] }
 0x3af   :  { %10786 = vmatpush3.msra.mxu1 %v12664_v18  ;;  %10787 = vmatprep.mubr.f32.mxu1 %v3418_v34  ;;  %v13471_v39 = vadd.f32 %v9865_v37, %v13017_v47  ;;  %v7782_v47 = vld [vmem:[%s15508_s4 + $0x478] sm:$0xff]  ;;  %v3661_v37 = vld [vmem:[#allocation2 + $0x380] sm:$0xff] }
 0x3b0   :  { %10299 = vmatprep.subr.mxu0 %v7752_v26  ;;  %10788 = vmatmul.mubr.f32.vlgmr.msra.gmra.mxu1 %v3419_v35  ;;  %v13473_v40 = vpop.f32.mrf.mxu0  ;;  %v7770_v34 = vld [vmem:[%s15508_s4 + $0x418] sm:$0xff] }
 0x3b1   :  { %10843 = vmatprep.subr.mxu1 %v12559_v53  ;;  %10300 = vmatpush3.msra.mxu0 %v7752_v26  ;;  %v7769_v26 = vld [vmem:[%s15508_s4 + $0x410] sm:$0xff] }
 0x3b2   :  { %10844 = vmatpush3.msra.mxu1 %v12559_v53  ;;  %10301 = vmatprep.subr.mxu0 %v7751_v38 }
 0x3b3   :  { %10845 = vmatprep.subr.mxu1 %v12563_v56  ;;  %10302 = vmatpush3.msra.mxu0 %v7751_v38  ;;  %v9868_v44 = vpop.f32.mrf.mxu0  ;;  %v7768_v38 = vld [vmem:[%s15508_s4 + $0x408] sm:$0xff] }
 0x3b4   :  { %10303 = vmatprep.mubr.f32.mxu0 %v2034_v32  ;;  %10790 = vmatprep.mubr.f32.mxu1 %v3420_v41  ;;  %v13482_v45 = vadd.f32 %v9868_v44, %v13030_v59  ;;  %v7780_v59 = vld [vmem:[%s15508_s4 + $0x468] sm:$0xff]  ;;  %v7767_v44 = vld [vmem:[%s15508_s4 + $0x400] sm:$0xff] }
 0x3b5   :  { %10846 = vmatpush3.msra.mxu1 %v12563_v56  ;;  %10304 = vmatmul.mubr.f32.vlgmr.msra.gmra.mxu0 %v10261_v29  ;;  %v13488_v48 = vpop.f32.mrf.mxu0  ;;  %v7773_v29 = vld [vmem:[%s15508_s4 + $0x430] sm:$0xff]  ;;  %v3662_v41 = vld [vmem:[#allocation2 + $0x388] sm:$0xff] }
 0x3b6   :  { %10359 = vmatprep.subr.mxu0 %v7782_v47  ;;  %10791 = vmatmul.mubr.f32.gmra.mxu1 %v3421_v43 }
 0x3b7   :  { %10847 = vmatprep.subr.mxu1 %v12570_v58  ;;  %10360 = vmatpush3.msra.mxu0 %v7782_v47 }
 0x3b8   :  { %10848 = vmatpush3.msra.mxu1 %v12570_v58  ;;  %10361 = vmatprep.subr.mxu0 %v7781_v46 }
 0x3b9   :  { %10849 = vmatprep.subr.mxu1 %v12577_v60  ;;  %10306 = vmatprep.mubr.f32.mxu0 %v2044_v42  ;;  %v9871_v55 = vpop.f32.mrf.mxu0 }
 0x3ba   :  { %10362 = vmatpush3.msra.mxu0 %v7781_v46  ;;  %10793 = vmatprep.mubr.f32.mxu1 %v3422_v52  ;;  %v13497_v1 = vadd.f32 %v9871_v55, %v13040_v9  ;;  %v10270_v9 = vpop.f32.mrf.mxu1  ;;  %v7798_v52 = vld [vmem:[%s15508_s4 + $0x4f8] sm:$0xff] }
 0x3bb   :  { %10850 = vmatpush3.msra.mxu1 %v12577_v60  ;;  %10307 = vmatmul.mubr.f32.gmra.mxu0 %v10264_v36  ;;  %v13503_v5 = vpop.f32.mrf.mxu0 }
 0x3bc   :  { %10363 = vmatprep.subr.mxu0 %v7780_v59  ;;  %10794 = vmatmul.mubr.f32.gmra.mxu1 %v3423_v54  ;;  %v2064_v25 = vpop.f32.mrf.mxu1 }
 0x3bd   :  { %10851 = vmatprep.subr.mxu1 %v12584_v62  ;;  %10364 = vmatpush3.msra.mxu0 %v7780_v59  ;;  %v3664_v59 = vld [vmem:[#allocation2 + $0x398] sm:$0xff] }
 0x3be   :  { %10852 = vmatpush3.msra.mxu1 %v12584_v62  ;;  %10365 = vmatprep.subr.mxu0 %v7779_v3  ;;  %v10349_v32 = vpop.f32.mrf.mxu1 }
 0x3bf   :  { %10853 = vmatprep.subr.mxu1 %v12591_v0  ;;  %10309 = vmatprep.mubr.f32.mxu0 %v2054_v57  ;;  %v9874_v21 = vpop.f32.mrf.mxu0  ;;  %v7797_v57 = vld [vmem:[%s15508_s4 + $0x4f0] sm:$0xff] }
 0x3c0   :  { %10366 = vmatpush3.msra.mxu0 %v7779_v3  ;;  %10796 = vmatprep.mubr.f32.mxu1 %v3424_v7  ;;  %v13512_v23 = vadd.f32 %v9874_v21, %v13050_v20  ;;  %v7776_v20 = vld [vmem:[%s15508_s4 + $0x448] sm:$0xff]  ;;  %v2277_v35 = vpop.f32.mrf.mxu1 }
 0x3c1   :  { %10854 = vmatpush3.msra.mxu1 %v12591_v0  ;;  %10310 = vmatmul.mubr.f32.gmra.mxu0 %v10267_v49  ;;  %v13558_v36 = vpop.f32.mrf.mxu0  ;;  %v3663_v49 = vld [vmem:[#allocation2 + $0x390] sm:$0xff] }
 0x3c2   :  { %10367 = vmatprep.subr.mxu0 %v7778_v15  ;;  %10797 = vmatmul.mubr.f32.gmra.mxu1 %v3425_v19  ;;  %v10352_v47 = vpop.f32.mrf.mxu1 }
 0x3c3   :  { %10855 = vmatprep.subr.mxu1 %v12598_v2  ;;  %10368 = vmatpush3.msra.mxu0 %v7778_v15  ;;  %v3666_v15 = vld [vmem:[#allocation2 + $0x3a8] sm:$0xff] }
 0x3c4   :  { %10856 = vmatpush3.msra.mxu1 %v12598_v2  ;;  %10369 = vmatprep.subr.mxu0 %v7777_v24 }
 0x3c5   :  { %10857 = vmatprep.subr.mxu1 %v12605_v4  ;;  %10312 = vmatprep.mubr.f32.mxu0 %v2064_v25  ;;  %v7795_v25 = vld [vmem:[%s15508_s4 + $0x4e0] sm:$0xff] }
 0x3c6   :  { %10370 = vmatpush3.msra.mxu0 %v7777_v24  ;;  %10858 = vmatpush3.msra.mxu1 %v12605_v4 }
 0x3c7   :  { %10313 = vmatmul.mubr.f32.gmra.mxu0 %v10270_v9  ;;  %10371 = vmatprep.subr.mxu0 %v7776_v20  ;;  %v3665_v9 = vld [vmem:[#allocation2 + $0x3a0] sm:$0xff] }
 0x3c8   :  { %10859 = vmatprep.subr.mxu1 %v12612_v6  ;;  %10372 = vmatpush3.msra.mxu0 %v7776_v20 }
 0x3c9   :  { %10860 = vmatpush3.msra.mxu1 %v12612_v6  ;;  %10373 = vmatprep.subr.mxu0 %v7775_v27 }
 0x3ca   :  { %10861 = vmatprep.subr.mxu1 %v12620_v8  ;;  %10374 = vmatpush3.msra.mxu0 %v7775_v27  ;;  %v3667_v27 = vld [vmem:[#allocation2 + $0x3b0] sm:$0xff] }
 0x3cb   :  { %10862 = vmatpush3.msra.mxu1 %v12620_v8  ;;  %10375 = vmatprep.subr.mxu0 %v7774_v28 }
 0x3cc   :  { %10863 = vmatprep.subr.mxu1 %v12628_v10  ;;  %10376 = vmatpush3.msra.mxu0 %v7774_v28  ;;  %v7794_v28 = vld [vmem:[%s15508_s4 + $0x4d8] sm:$0xff] }
 0x3cd   :  { %10864 = vmatpush3.msra.mxu1 %v12628_v10  ;;  %10377 = vmatprep.subr.mxu0 %v7773_v29 }
 0x3ce   :  { %10865 = vmatprep.subr.mxu1 %v12636_v12  ;;  %10378 = vmatpush3.msra.mxu0 %v7773_v29  ;;  %v3668_v29 = vld [vmem:[#allocation2 + $0x3b8] sm:$0xff] }
 0x3cf   :  { %10866 = vmatpush3.msra.mxu1 %v12636_v12  ;;  %10379 = vmatprep.subr.mxu0 %v7772_v30 }
 0x3d0   :  { %10867 = vmatprep.subr.mxu1 %v12644_v14  ;;  %10380 = vmatpush3.msra.mxu0 %v7772_v30 }
 0x3d1   :  { %10868 = vmatpush3.msra.mxu1 %v12644_v14  ;;  %10381 = vmatprep.subr.mxu0 %v7771_v31 }
 0x3d2   :  { %10869 = vmatprep.subr.mxu1 %v12652_v16  ;;  %10382 = vmatpush3.msra.mxu0 %v7771_v31 }
 0x3d3   :  { %10870 = vmatpush3.msra.mxu1 %v12652_v16  ;;  %10383 = vmatprep.subr.mxu0 %v7770_v34 }
 0x3d4   :  { %10871 = vmatprep.subr.mxu1 %v12658_v17  ;;  %10384 = vmatpush3.msra.mxu0 %v7770_v34 }
 0x3d5   :  { %10872 = vmatpush3.msra.mxu1 %v12658_v17  ;;  %10385 = vmatprep.subr.mxu0 %v7769_v26  ;;  %v9953_v42 = vpop.f32.mrf.mxu0 }
 0x3d6   :  { %10873 = vmatprep.subr.mxu1 %v12664_v18  ;;  %10386 = vmatpush3.msra.mxu0 %v7769_v26  ;;  %v13567_v43 = vadd.f32 %v9953_v42, %v13471_v39  ;;  %v2287_v39 = vpop.f32.mrf.mxu1  ;;  %v7791_v26 = vld [vmem:[%s15508_s4 + $0x4c0] sm:$0xff] }
 0x3d7   :  { %10874 = vmatpush3.msra.mxu1 %v12664_v18  ;;  %10875 = vmatprep.mubr.f32.mxu1 %v3661_v37  ;;  %v13573_v46 = vpop.f32.mrf.mxu0  ;;  %v7789_v37 = vld [vmem:[%s15508_s4 + $0x4b0] sm:$0xff] }
 0x3d8   :  { %10387 = vmatprep.subr.mxu0 %v7768_v38  ;;  %10876 = vmatmul.mubr.f32.vlgmr.msra.gmra.mxu1 %v3662_v41  ;;  %v10355_v7 = vpop.f32.mrf.mxu1  ;;  %v7787_v41 = vld [vmem:[%s15508_s4 + $0x4a0] sm:$0xff] }
 0x3d9   :  { %10931 = vmatprep.subr.mxu1 %v12559_v53  ;;  %10388 = vmatpush3.msra.mxu0 %v7768_v38  ;;  %v7788_v38 = vld [vmem:[%s15508_s4 + $0x4a8] sm:$0xff] }
 0x3da   :  { %10932 = vmatpush3.msra.mxu1 %v12559_v53  ;;  %10389 = vmatprep.subr.mxu0 %v7767_v44  ;;  %v2297_v21 = vpop.f32.mrf.mxu1 }
 0x3db   :  { %10933 = vmatprep.subr.mxu1 %v12563_v56  ;;  %10390 = vmatpush3.msra.mxu0 %v7767_v44  ;;  %v9956_v54 = vpop.f32.mrf.mxu0  ;;  %v7785_v44 = vld [vmem:[%s15508_s4 + $0x490] sm:$0xff] }
 0x3dc   :  { %10391 = vmatprep.mubr.f32.mxu0 %v2277_v35  ;;  %10878 = vmatprep.mubr.f32.mxu1 %v3663_v49  ;;  %v13582_v55 = vadd.f32 %v9956_v54, %v13482_v45  ;;  %v7796_v45 = vld [vmem:[%s15508_s4 + $0x4e8] sm:$0xff]  ;;  %v7790_v35 = vld [vmem:[%s15508_s4 + $0x4b8] sm:$0xff] }
 0x3dd   :  { %10934 = vmatpush3.msra.mxu1 %v12563_v56  ;;  %10392 = vmatmul.mubr.f32.vlgmr.msra.gmra.mxu0 %v10349_v32  ;;  %v13588_v3 = vpop.f32.mrf.mxu0  ;;  %v7793_v32 = vld [vmem:[%s15508_s4 + $0x4d0] sm:$0xff]  ;;  %v3905_v54 = vld [vmem:[#allocation2 + $0x3c8] sm:$0xff] }
 0x3de   :  { %10447 = vmatprep.subr.mxu0 %v7798_v52  ;;  %10879 = vmatmul.mubr.f32.gmra.mxu1 %v3664_v59  ;;  %v7784_v59 = vld [vmem:[%s15508_s4 + $0x488] sm:$0xff] }
 0x3df   :  { %10935 = vmatprep.subr.mxu1 %v12570_v58  ;;  %10448 = vmatpush3.msra.mxu0 %v7798_v52  ;;  %v3904_v52 = vld [vmem:[#allocation2 + $0x3c0] sm:$0xff] }
 0x3e0   :  { %10936 = vmatpush3.msra.mxu1 %v12570_v58  ;;  %10449 = vmatprep.subr.mxu0 %v7797_v57 }
 0x3e1   :  { %10937 = vmatprep.subr.mxu1 %v12577_v60  ;;  %10394 = vmatprep.mubr.f32.mxu0 %v2287_v39  ;;  %v9959_v19 = vpop.f32.mrf.mxu0 }
 0x3e2   :  { %10450 = vmatpush3.msra.mxu0 %v7797_v57  ;;  %10881 = vmatprep.mubr.f32.mxu1 %v3665_v9  ;;  %v13597_v24 = vadd.f32 %v9959_v19, %v13497_v1  ;;  %v10358_v1 = vpop.f32.mrf.mxu1  ;;  %v3906_v19 = vld [vmem:[#allocation2 + $0x3d0] sm:$0xff] }
 0x3e3   :  { %10938 = vmatpush3.msra.mxu1 %v12577_v60  ;;  %10395 = vmatmul.mubr.f32.gmra.mxu0 %v10352_v47  ;;  %v13603_v20 = vpop.f32.mrf.mxu0  ;;  %v7786_v47 = vld [vmem:[%s15508_s4 + $0x498] sm:$0xff] }
 0x3e4   :  { %10451 = vmatprep.subr.mxu0 %v7796_v45  ;;  %10882 = vmatmul.mubr.f32.gmra.mxu1 %v3666_v15  ;;  %v2307_v34 = vpop.f32.mrf.mxu1 }
 0x3e5   :  { %10939 = vmatprep.subr.mxu1 %v12584_v62  ;;  %10452 = vmatpush3.msra.mxu0 %v7796_v45  ;;  %v7783_v45 = vld [vmem:[%s15508_s4 + $0x480] sm:$0xff] }
 0x3e6   :  { %10940 = vmatpush3.msra.mxu1 %v12584_v62  ;;  %10453 = vmatprep.subr.mxu0 %v7795_v25  ;;  %v10437_v42 = vpop.f32.mrf.mxu1 }
 0x3e7   :  { %10941 = vmatprep.subr.mxu1 %v12591_v0  ;;  %10397 = vmatprep.mubr.f32.mxu0 %v2297_v21  ;;  %v9962_v30 = vpop.f32.mrf.mxu0  ;;  %v7814_v21 = vld [vmem:[%s15508_s4 + $0x578] sm:$0xff] }
 0x3e8   :  { %10454 = vmatpush3.msra.mxu0 %v7795_v25  ;;  %10884 = vmatprep.mubr.f32.mxu1 %v3667_v27  ;;  %v13612_v31 = vadd.f32 %v9962_v30, %v13512_v23  ;;  %v7792_v23 = vld [vmem:[%s15508_s4 + $0x4c8] sm:$0xff]  ;;  %v2520_v49 = vpop.f32.mrf.mxu1  ;;  %v3907_v25 = vld [vmem:[#allocation2 + $0x3d8] sm:$0xff] }
 0x3e9   :  { %10942 = vmatpush3.msra.mxu1 %v12591_v0  ;;  %10398 = vmatmul.mubr.f32.gmra.mxu0 %v10355_v7  ;;  %v13658_v39 = vpop.f32.mrf.mxu0 }
 0x3ea   :  { %10455 = vmatprep.subr.mxu0 %v7794_v28  ;;  %10885 = vmatmul.mubr.f32.gmra.mxu1 %v3668_v29  ;;  %v10440_v7 = vpop.f32.mrf.mxu1 }
 0x3eb   :  { %10943 = vmatprep.subr.mxu1 %v12598_v2  ;;  %10456 = vmatpush3.msra.mxu0 %v7794_v28  ;;  %v7813_v28 = vld [vmem:[%s15508_s4 + $0x570] sm:$0xff] }
 0x3ec   :  { %10944 = vmatpush3.msra.mxu1 %v12598_v2  ;;  %10457 = vmatprep.subr.mxu0 %v7793_v32 }
 0x3ed   :  { %10945 = vmatprep.subr.mxu1 %v12605_v4  ;;  %10400 = vmatprep.mubr.f32.mxu0 %v2307_v34  ;;  %v3909_v34 = vld [vmem:[#allocation2 + $0x3e8] sm:$0xff] }
 0x3ee   :  { %10458 = vmatpush3.msra.mxu0 %v7793_v32  ;;  %10946 = vmatpush3.msra.mxu1 %v12605_v4  ;;  %v3908_v32 = vld [vmem:[#allocation2 + $0x3e0] sm:$0xff] }
 0x3ef   :  { %10401 = vmatmul.mubr.f32.gmra.mxu0 %v10358_v1  ;;  %10459 = vmatprep.subr.mxu0 %v7792_v23 }
 0x3f0   :  { %10947 = vmatprep.subr.mxu1 %v12612_v6  ;;  %10460 = vmatpush3.msra.mxu0 %v7792_v23 }
 0x3f1   :  { %10948 = vmatpush3.msra.mxu1 %v12612_v6  ;;  %10461 = vmatprep.subr.mxu0 %v7791_v26 }
 0x3f2   :  { %10949 = vmatprep.subr.mxu1 %v12620_v8  ;;  %10462 = vmatpush3.msra.mxu0 %v7791_v26 }
 0x3f3   :  { %10950 = vmatpush3.msra.mxu1 %v12620_v8  ;;  %10463 = vmatprep.subr.mxu0 %v7790_v35 }
 0x3f4   :  { %10951 = vmatprep.subr.mxu1 %v12628_v10  ;;  %10464 = vmatpush3.msra.mxu0 %v7790_v35 }
 0x3f5   :  { %10952 = vmatpush3.msra.mxu1 %v12628_v10  ;;  %10465 = vmatprep.subr.mxu0 %v7789_v37 }
 0x3f6   :  { %10953 = vmatprep.subr.mxu1 %v12636_v12  ;;  %10466 = vmatpush3.msra.mxu0 %v7789_v37  ;;  %v7811_v37 = vld [vmem:[%s15508_s4 + $0x560] sm:$0xff] }
 0x3f7   :  { %10954 = vmatpush3.msra.mxu1 %v12636_v12  ;;  %10467 = vmatprep.subr.mxu0 %v7788_v38 }
 0x3f8   :  { %10955 = vmatprep.subr.mxu1 %v12644_v14  ;;  %10468 = vmatpush3.msra.mxu0 %v7788_v38 }
 0x3f9   :  { %10956 = vmatpush3.msra.mxu1 %v12644_v14  ;;  %10469 = vmatprep.subr.mxu0 %v7787_v41 }
 0x3fa   :  { %10957 = vmatprep.subr.mxu1 %v12652_v16  ;;  %10470 = vmatpush3.msra.mxu0 %v7787_v41  ;;  %v3910_v41 = vld [vmem:[#allocation2 + $0x3f0] sm:$0xff] }
 0x3fb   :  { %10958 = vmatpush3.msra.mxu1 %v12652_v16  ;;  %10471 = vmatprep.subr.mxu0 %v7786_v47 }
 0x3fc   :  { %10959 = vmatprep.subr.mxu1 %v12658_v17  ;;  %10472 = vmatpush3.msra.mxu0 %v7786_v47  ;;  %v3911_v47 = vld [vmem:[#allocation2 + $0x3f8] sm:$0xff] }
 0x3fd   :  { %10960 = vmatpush3.msra.mxu1 %v12658_v17  ;;  %10473 = vmatprep.subr.mxu0 %v7785_v44  ;;  %v10041_v57 = vpop.f32.mrf.mxu0 }
 0x3fe   :  { %10961 = vmatprep.subr.mxu1 %v12664_v18  ;;  %10474 = vmatpush3.msra.mxu0 %v7785_v44  ;;  %v13667_v9 = vadd.f32 %v10041_v57, %v13567_v43  ;;  %v2530_v43 = vpop.f32.mrf.mxu1  ;;  %v7806_v57 = vld [vmem:[%s15508_s4 + $0x538] sm:$0xff] }
 0x3ff   :  { %10962 = vmatpush3.msra.mxu1 %v12664_v18  ;;  %10963 = vmatprep.mubr.f32.mxu1 %v3904_v52  ;;  %v13673_v15 = vpop.f32.mrf.mxu0  ;;  %v7809_v52 = vld [vmem:[%s15508_s4 + $0x550] sm:$0xff] }
 0x400   :  { %10475 = vmatprep.subr.mxu0 %v7784_v59  ;;  %10964 = vmatmul.mubr.f32.vlgmr.msra.gmra.mxu1 %v3905_v54  ;;  %v10443_v30 = vpop.f32.mrf.mxu1  ;;  %v7807_v54 = vld [vmem:[%s15508_s4 + $0x540] sm:$0xff] }
 0x401   :  { %11019 = vmatprep.subr.mxu1 %v12559_v53  ;;  %10476 = vmatpush3.msra.mxu0 %v7784_v59 }
 0x402   :  { %11020 = vmatpush3.msra.mxu1 %v12559_v53  ;;  %10477 = vmatprep.subr.mxu0 %v7783_v45  ;;  %v2540_v26 = vpop.f32.mrf.mxu1 }
 0x403   :  { %11021 = vmatprep.subr.mxu1 %v12563_v56  ;;  %10478 = vmatpush3.msra.mxu0 %v7783_v45  ;;  %v10044_v27 = vpop.f32.mrf.mxu0  ;;  %v7804_v45 = vld [vmem:[%s15508_s4 + $0x528] sm:$0xff] }
 0x404   :  { %10479 = vmatprep.mubr.f32.mxu0 %v2520_v49  ;;  %10966 = vmatprep.mubr.f32.mxu1 %v3906_v19  ;;  %v13682_v1 = vadd.f32 %v10044_v27, %v13582_v55  ;;  %v7812_v55 = vld [vmem:[%s15508_s4 + $0x568] sm:$0xff]  ;;  %v7803_v19 = vld [vmem:[%s15508_s4 + $0x520] sm:$0xff] }
 0x405   :  { %11022 = vmatpush3.msra.mxu1 %v12563_v56  ;;  %10480 = vmatmul.mubr.f32.vlgmr.msra.gmra.mxu0 %v10437_v42  ;;  %v13688_v29 = vpop.f32.mrf.mxu0  ;;  %v7810_v42 = vld [vmem:[%s15508_s4 + $0x558] sm:$0xff] }
 0x406   :  { %10535 = vmatprep.subr.mxu0 %v7814_v21  ;;  %10967 = vmatmul.mubr.f32.gmra.mxu1 %v3907_v25  ;;  %v7801_v25 = vld [vmem:[%s15508_s4 + $0x510] sm:$0xff] }
 0x407   :  { %11023 = vmatprep.subr.mxu1 %v12570_v58  ;;  %10536 = vmatpush3.msra.mxu0 %v7814_v21  ;;  %v7802_v21 = vld [vmem:[%s15508_s4 + $0x518] sm:$0xff] }
 0x408   :  { %11024 = vmatpush3.msra.mxu1 %v12570_v58  ;;  %10537 = vmatprep.subr.mxu0 %v7813_v28 }
 0x409   :  { %11025 = vmatprep.subr.mxu1 %v12577_v60  ;;  %10482 = vmatprep.mubr.f32.mxu0 %v2530_v43  ;;  %v10047_v23 = vpop.f32.mrf.mxu0 }
 0x40a   :  { %10538 = vmatpush3.msra.mxu0 %v7813_v28  ;;  %10969 = vmatprep.mubr.f32.mxu1 %v3908_v32  ;;  %v13697_v35 = vadd.f32 %v10047_v23, %v13597_v24  ;;  %v10446_v24 = vpop.f32.mrf.mxu1  ;;  %v7800_v32 = vld [vmem:[%s15508_s4 + $0x508] sm:$0xff] }
 0x40b   :  { %11026 = vmatpush3.msra.mxu1 %v12577_v60  ;;  %10483 = vmatmul.mubr.f32.gmra.mxu0 %v10440_v7  ;;  %v13703_v38 = vpop.f32.mrf.mxu0  ;;  %v7805_v7 = vld [vmem:[%s15508_s4 + $0x530] sm:$0xff] }
 0x40c   :  { %10539 = vmatprep.subr.mxu0 %v7812_v55  ;;  %10970 = vmatmul.mubr.f32.gmra.mxu1 %v3909_v34  ;;  %v2550_v59 = vpop.f32.mrf.mxu1 }
 0x40d   :  { %11027 = vmatprep.subr.mxu1 %v12584_v62  ;;  %10540 = vmatpush3.msra.mxu0 %v7812_v55  ;;  %v4148_v55 = vld [vmem:[#allocation2 + $0x408] sm:$0xff] }
 0x40e   :  { %11028 = vmatpush3.msra.mxu1 %v12584_v62  ;;  %10541 = vmatprep.subr.mxu0 %v7811_v37  ;;  %v10525_v43 = vpop.f32.mrf.mxu1 }
 0x40f   :  { %11029 = vmatprep.subr.mxu1 %v12591_v0  ;;  %10485 = vmatprep.mubr.f32.mxu0 %v2540_v26  ;;  %v10050_v44 = vpop.f32.mrf.mxu0 }
 0x410   :  { %10542 = vmatpush3.msra.mxu0 %v7811_v37  ;;  %10972 = vmatprep.mubr.f32.mxu1 %v3910_v41  ;;  %v13712_v49 = vadd.f32 %v10050_v44, %v13612_v31  ;;  %v7808_v31 = vld [vmem:[%s15508_s4 + $0x548] sm:$0xff]  ;;  %v2763_v27 = vpop.f32.mrf.mxu1  ;;  %v7799_v37 = vld [vmem:[%s15508_s4 + $0x500] sm:$0xff] }
 0x411   :  { %11030 = vmatpush3.msra.mxu1 %v12591_v0  ;;  %10486 = vmatmul.mubr.f32.gmra.mxu0 %v10443_v30  ;;  %v13758_v28 = vpop.f32.mrf.mxu0  ;;  %v4147_v30 = vld [vmem:[#allocation2 + $0x400] sm:$0xff] }
 0x412   :  { %10543 = vmatprep.subr.mxu0 %v7810_v42  ;;  %10973 = vmatmul.mubr.f32.gmra.mxu1 %v3911_v47  ;;  %15515 = vst [vmem:[#allocation9_spill] sm:$0xff] %v13758_v28  ;;  %v10528_v23 = vpop.f32.mrf.mxu1  ;;  %v4150_v47 = vld [vmem:[#allocation2 + $0x418] sm:$0xff] }
 0x413   :  { %11031 = vmatprep.subr.mxu1 %v12598_v2  ;;  %10544 = vmatpush3.msra.mxu0 %v7810_v42  ;;  %v7830_v42 = vld [vmem:[%s15508_s4 + $0x5f8] sm:$0xff] }
 0x414   :  { %11032 = vmatpush3.msra.mxu1 %v12598_v2  ;;  %10545 = vmatprep.subr.mxu0 %v7809_v52 }
 0x415   :  { %11033 = vmatprep.subr.mxu1 %v12605_v4  ;;  %10488 = vmatprep.mubr.f32.mxu0 %v2550_v59  ;;  %v7829_v59 = vld [vmem:[%s15508_s4 + $0x5f0] sm:$0xff] }
 0x416   :  { %10546 = vmatpush3.msra.mxu0 %v7809_v52  ;;  %11034 = vmatpush3.msra.mxu1 %v12605_v4 }
 0x417   :  { %10489 = vmatmul.mubr.f32.gmra.mxu0 %v10446_v24  ;;  %10547 = vmatprep.subr.mxu0 %v7808_v31  ;;  %v4149_v24 = vld [vmem:[#allocation2 + $0x410] sm:$0xff] }
 0x418   :  { %11035 = vmatprep.subr.mxu1 %v12612_v6  ;;  %10548 = vmatpush3.msra.mxu0 %v7808_v31 }
 0x419   :  { %11036 = vmatpush3.msra.mxu1 %v12612_v6  ;;  %10549 = vmatprep.subr.mxu0 %v7807_v54 }
 0x41a   :  { %11037 = vmatprep.subr.mxu1 %v12620_v8  ;;  %10550 = vmatpush3.msra.mxu0 %v7807_v54 }
 0x41b   :  { %11038 = vmatpush3.msra.mxu1 %v12620_v8  ;;  %10551 = vmatprep.subr.mxu0 %v7806_v57 }
 0x41c   :  { %11039 = vmatprep.subr.mxu1 %v12628_v10  ;;  %10552 = vmatpush3.msra.mxu0 %v7806_v57  ;;  %v4151_v57 = vld [vmem:[#allocation2 + $0x420] sm:$0xff] }
 0x41d   :  { %11040 = vmatpush3.msra.mxu1 %v12628_v10  ;;  %10553 = vmatprep.subr.mxu0 %v7805_v7 }
 0x41e   :  { %11041 = vmatprep.subr.mxu1 %v12636_v12  ;;  %10554 = vmatpush3.msra.mxu0 %v7805_v7  ;;  %v4152_v7 = vld [vmem:[#allocation2 + $0x428] sm:$0xff] }
 0x41f   :  { %11042 = vmatpush3.msra.mxu1 %v12636_v12  ;;  %10555 = vmatprep.subr.mxu0 %v7804_v45 }
 0x420   :  { %11043 = vmatprep.subr.mxu1 %v12644_v14  ;;  %10556 = vmatpush3.msra.mxu0 %v7804_v45 }
 0x421   :  { %11044 = vmatpush3.msra.mxu1 %v12644_v14  ;;  %10557 = vmatprep.subr.mxu0 %v7803_v19 }
 0x422   :  { %11045 = vmatprep.subr.mxu1 %v12652_v16  ;;  %10558 = vmatpush3.msra.mxu0 %v7803_v19 }
 0x423   :  { %11046 = vmatpush3.msra.mxu1 %v12652_v16  ;;  %10559 = vmatprep.subr.mxu0 %v7802_v21 }
 0x424   :  { %11047 = vmatprep.subr.mxu1 %v12658_v17  ;;  %10560 = vmatpush3.msra.mxu0 %v7802_v21  ;;  %v7827_v21 = vld [vmem:[%s15508_s4 + $0x5e0] sm:$0xff] }
 0x425   :  { %11048 = vmatpush3.msra.mxu1 %v12658_v17  ;;  %10561 = vmatprep.subr.mxu0 %v7801_v25  ;;  %v10129_v34 = vpop.f32.mrf.mxu0 }
 0x426   :  { %11049 = vmatprep.subr.mxu1 %v12664_v18  ;;  %10562 = vmatpush3.msra.mxu0 %v7801_v25  ;;  %v13767_v26 = vadd.f32 %v10129_v34, %v13667_v9  ;;  %v2773_v9 = vpop.f32.mrf.mxu1 }
 0x427   :  { %11050 = vmatpush3.msra.mxu1 %v12664_v18  ;;  %11051 = vmatprep.mubr.f32.mxu1 %v4147_v30  ;;  %v13773_v41 = vpop.f32.mrf.mxu0  ;;  %v7826_v30 = vld [vmem:[%s15508_s4 + $0x5d8] sm:$0xff] }
 0x428   :  { %10563 = vmatprep.subr.mxu0 %v7800_v32  ;;  %11052 = vmatmul.mubr.f32.vlgmr.msra.gmra.mxu1 %v4148_v55  ;;  %v10531_v54 = vpop.f32.mrf.mxu1 }
 0x429   :  { %11107 = vmatprep.subr.mxu1 %v12559_v53  ;;  %10564 = vmatpush3.msra.mxu0 %v7800_v32  ;;  %v4154_v32 = vld [vmem:[#allocation2 + $0x438] sm:$0xff] }
 0x42a   :  { %11108 = vmatpush3.msra.mxu1 %v12559_v53  ;;  %10565 = vmatprep.subr.mxu0 %v7799_v37  ;;  %v2783_v19 = vpop.f32.mrf.mxu1 }
 0x42b   :  { %11109 = vmatprep.subr.mxu1 %v12563_v56  ;;  %10566 = vmatpush3.msra.mxu0 %v7799_v37  ;;  %v10132_v44 = vpop.f32.mrf.mxu0 }
 0x42c   :  { %10567 = vmatprep.mubr.f32.mxu0 %v2763_v27  ;;  %11054 = vmatprep.mubr.f32.mxu1 %v4149_v24  ;;  %v13782_v52 = vadd.f32 %v10132_v44, %v13682_v1  ;;  %v7828_v1 = vld [vmem:[%s15508_s4 + $0x5e8] sm:$0xff]  ;;  %v4153_v27 = vld [vmem:[#allocation2 + $0x430] sm:$0xff]  ;;  %v7823_v24 = vld [vmem:[%s15508_s4 + $0x5c0] sm:$0xff] }
 0x42d   :  { %11110 = vmatpush3.msra.mxu1 %v12563_v56  ;;  %10568 = vmatmul.mubr.f32.vlgmr.msra.gmra.mxu0 %v10525_v43  ;;  %v13788_v31 = vpop.f32.mrf.mxu0  ;;  %v7819_v44 = vld [vmem:[%s15508_s4 + $0x5a0] sm:$0xff] }
 0x42e   :  { %10623 = vmatprep.subr.mxu0 %v7830_v42  ;;  %11055 = vmatmul.mubr.f32.gmra.mxu1 %v4150_v47  ;;  %v7820_v47 = vld [vmem:[%s15508_s4 + $0x5a8] sm:$0xff] }
 0x42f   :  { %11111 = vmatprep.subr.mxu1 %v12570_v58  ;;  %10624 = vmatpush3.msra.mxu0 %v7830_v42  ;;  %v7821_v42 = vld [vmem:[%s15508_s4 + $0x5b0] sm:$0xff] }
 0x430   :  { %11112 = vmatpush3.msra.mxu1 %v12570_v58  ;;  %10625 = vmatprep.subr.mxu0 %v7829_v59 }
 0x431   :  { %11113 = vmatprep.subr.mxu1 %v12577_v60  ;;  %10570 = vmatprep.mubr.f32.mxu0 %v2773_v9  ;;  %v10135_v45 = vpop.f32.mrf.mxu0  ;;  %v7822_v9 = vld [vmem:[%s15508_s4 + $0x5b8] sm:$0xff] }
 0x432   :  { %10626 = vmatpush3.msra.mxu0 %v7829_v59  ;;  %11057 = vmatprep.mubr.f32.mxu1 %v4151_v57  ;;  %v13797_v43 = vadd.f32 %v10135_v45, %v13697_v35  ;;  %v10534_v35 = vpop.f32.mrf.mxu1  ;;  %v7817_v57 = vld [vmem:[%s15508_s4 + $0x590] sm:$0xff]  ;;  %v4390_v45 = vld [vmem:[#allocation2 + $0x440] sm:$0xff] }
 0x433   :  { %11114 = vmatpush3.msra.mxu1 %v12577_v60  ;;  %10571 = vmatmul.mubr.f32.gmra.mxu0 %v10528_v23  ;;  %v13803_v25 = vpop.f32.mrf.mxu0  ;;  %v7825_v23 = vld [vmem:[%s15508_s4 + $0x5d0] sm:$0xff] }
 0x434   :  { %10627 = vmatprep.subr.mxu0 %v7828_v1  ;;  %11058 = vmatmul.mubr.f32.gmra.mxu1 %v4152_v7  ;;  %v2793_v37 = vpop.f32.mrf.mxu1 }
 0x435   :  { %11115 = vmatprep.subr.mxu1 %v12584_v62  ;;  %10628 = vmatpush3.msra.mxu0 %v7828_v1 }
 0x436   :  { %11116 = vmatpush3.msra.mxu1 %v12584_v62  ;;  %10629 = vmatprep.subr.mxu0 %v7827_v21  ;;  %v10613_v59 = vpop.f32.mrf.mxu1 }
 0x437   :  { %11117 = vmatprep.subr.mxu1 %v12591_v0  ;;  %10573 = vmatprep.mubr.f32.mxu0 %v2783_v19  ;;  %v10138_v55 = vpop.f32.mrf.mxu0  ;;  %v7816_v19 = vld [vmem:[%s15508_s4 + $0x588] sm:$0xff] }
 0x438   :  { %10630 = vmatpush3.msra.mxu0 %v7827_v21  ;;  %11060 = vmatprep.mubr.f32.mxu1 %v4153_v27  ;;  %v13812_v34 = vadd.f32 %v10138_v55, %v13712_v49  ;;  %v7824_v49 = vld [vmem:[%s15508_s4 + $0x5c8] sm:$0xff]  ;;  %v3006_v1 = vpop.f32.mrf.mxu1 }
 0x439   :  { %11118 = vmatpush3.msra.mxu1 %v12591_v0  ;;  %10574 = vmatmul.mubr.f32.gmra.mxu0 %v10531_v54  ;;  %v7818_v54 = vld [vmem:[%s15508_s4 + $0x598] sm:$0xff]  ;;  %v13858_v7 = vpop.f32.mrf.mxu0  ;;  %v4391_v21 = vld [vmem:[#allocation2 + $0x448] sm:$0xff] }
 0x43a   :  { %10631 = vmatprep.subr.mxu0 %v7826_v30  ;;  %11061 = vmatmul.mubr.f32.gmra.mxu1 %v4154_v32  ;;  %15516 = vst [vmem:[#allocation10_spill] sm:$0xff] %v13858_v7  ;;  %v7815_v32 = vld [vmem:[%s15508_s4 + $0x580] sm:$0xff] }
 0x43b   :  { %11119 = vmatprep.subr.mxu1 %v12598_v2  ;;  %10632 = vmatpush3.msra.mxu0 %v7826_v30 }
 0x43c   :  { %11120 = vmatpush3.msra.mxu1 %v12598_v2  ;;  %10633 = vmatprep.subr.mxu0 %v7825_v23 }
 0x43d   :  { %11121 = vmatprep.subr.mxu1 %v12605_v4  ;;  %10576 = vmatprep.mubr.f32.mxu0 %v2793_v37  ;;  %v7846_v37 = vld [vmem:[%s15508_s4 + $0x678] sm:$0xff] }
 0x43e   :  { %10634 = vmatpush3.msra.mxu0 %v7825_v23  ;;  %11122 = vmatpush3.msra.mxu1 %v12605_v4  ;;  %v4392_v23 = vld [vmem:[#allocation2 + $0x450] sm:$0xff] }
 0x43f   :  { %10577 = vmatmul.mubr.f32.gmra.mxu0 %v10534_v35  ;;  %10635 = vmatprep.subr.mxu0 %v7824_v49  ;;  %v10616_v35 = vpop.f32.mrf.mxu1 }
 0x440   :  { %11123 = vmatprep.subr.mxu1 %v12612_v6  ;;  %10636 = vmatpush3.msra.mxu0 %v7824_v49  ;;  %v4393_v49 = vld [vmem:[#allocation2 + $0x458] sm:$0xff] }
 0x441   :  { %11124 = vmatpush3.msra.mxu1 %v12612_v6  ;;  %10637 = vmatprep.subr.mxu0 %v7823_v24 }
 0x442   :  { %11125 = vmatprep.subr.mxu1 %v12620_v8  ;;  %10638 = vmatpush3.msra.mxu0 %v7823_v24 }
 0x443   :  { %11126 = vmatpush3.msra.mxu1 %v12620_v8  ;;  %10639 = vmatprep.subr.mxu0 %v7822_v9 }
 0x444   :  { %11127 = vmatprep.subr.mxu1 %v12628_v10  ;;  %10640 = vmatpush3.msra.mxu0 %v7822_v9 }
 0x445   :  { %11128 = vmatpush3.msra.mxu1 %v12628_v10  ;;  %10641 = vmatprep.subr.mxu0 %v7821_v42 }
 0x446   :  { %11129 = vmatprep.subr.mxu1 %v12636_v12  ;;  %10642 = vmatpush3.msra.mxu0 %v7821_v42  ;;  %v7845_v42 = vld [vmem:[%s15508_s4 + $0x670] sm:$0xff] }
 0x447   :  { %11130 = vmatpush3.msra.mxu1 %v12636_v12  ;;  %10643 = vmatprep.subr.mxu0 %v7820_v47 }
 0x448   :  { %11131 = vmatprep.subr.mxu1 %v12644_v14  ;;  %10644 = vmatpush3.msra.mxu0 %v7820_v47 }
 0x449   :  { %11132 = vmatpush3.msra.mxu1 %v12644_v14  ;;  %10645 = vmatprep.subr.mxu0 %v7819_v44 }
 0x44a   :  { %11133 = vmatprep.subr.mxu1 %v12652_v16  ;;  %10646 = vmatpush3.msra.mxu0 %v7819_v44 }
 0x44b   :  { %11134 = vmatpush3.msra.mxu1 %v12652_v16  ;;  %10647 = vmatprep.subr.mxu0 %v7818_v54 }
 0x44c   :  { %11135 = vmatprep.subr.mxu1 %v12658_v17  ;;  %10648 = vmatpush3.msra.mxu0 %v7818_v54  ;;  %v4394_v54 = vld [vmem:[#allocation2 + $0x460] sm:$0xff] }
 0x44d   :  { %11136 = vmatpush3.msra.mxu1 %v12658_v17  ;;  %10649 = vmatprep.subr.mxu0 %v7817_v57  ;;  %v10217_v27 = vpop.f32.mrf.mxu0 }
 0x44e   :  { %11137 = vmatprep.subr.mxu1 %v12664_v18  ;;  %10650 = vmatpush3.msra.mxu0 %v7817_v57  ;;  %v13867_v30 = vadd.f32 %v10217_v27, %v13767_v26  ;;  %v3016_v26 = vpop.f32.mrf.mxu1  ;;  %v4396_v27 = vld [vmem:[#allocation2 + $0x470] sm:$0xff] }
 0x44f   :  { %11138 = vmatpush3.msra.mxu1 %v12664_v18  ;;  %11139 = vmatprep.mubr.f32.mxu1 %v4390_v45  ;;  %v13873_v55 = vpop.f32.mrf.mxu0 }
 0x450   :  { %10651 = vmatprep.subr.mxu0 %v7816_v19  ;;  %11140 = vmatmul.mubr.f32.vlgmr.msra.gmra.mxu1 %v4391_v21  ;;  %v10619_v44 = vpop.f32.mrf.mxu1 }
 0x451   :  { %11195 = vmatprep.subr.mxu1 %v12559_v53  ;;  %10652 = vmatpush3.msra.mxu0 %v7816_v19  ;;  %v7843_v19 = vld [vmem:[%s15508_s4 + $0x660] sm:$0xff] }
 0x452   :  { %11196 = vmatpush3.msra.mxu1 %v12559_v53  ;;  %10653 = vmatprep.subr.mxu0 %v7815_v32 }
 0x453   :  { %11197 = vmatprep.subr.mxu1 %v12563_v56  ;;  %10654 = vmatpush3.msra.mxu0 %v7815_v32  ;;  %v10220_v24 = vpop.f32.mrf.mxu0  ;;  %v4397_v32 = vld [vmem:[#allocation2 + $0x478] sm:$0xff] }
 0x454   :  { %10655 = vmatprep.mubr.f32.mxu0 %v3006_v1  ;;  %11142 = vmatprep.mubr.f32.mxu1 %v4392_v23  ;;  %v13882_v9 = vadd.f32 %v10220_v24, %v13782_v52  ;;  %v7844_v52 = vld [vmem:[%s15508_s4 + $0x668] sm:$0xff]  ;;  %v3026_v1 = vpop.f32.mrf.mxu1  ;;  %v7839_v24 = vld [vmem:[%s15508_s4 + $0x640] sm:$0xff] }
 0x455   :  { %11198 = vmatpush3.msra.mxu1 %v12563_v56  ;;  %10656 = vmatmul.mubr.f32.vlgmr.msra.gmra.mxu0 %v10613_v59  ;;  %v13888_v47 = vpop.f32.mrf.mxu0  ;;  %v4395_v59 = vld [vmem:[#allocation2 + $0x468] sm:$0xff] }
 0x456   :  { %10711 = vmatprep.subr.mxu0 %v7846_v37  ;;  %11143 = vmatmul.mubr.f32.gmra.mxu1 %v4393_v49 }
 0x457   :  { %11199 = vmatprep.subr.mxu1 %v12570_v58  ;;  %10712 = vmatpush3.msra.mxu0 %v7846_v37  ;;  %v7841_v37 = vld [vmem:[%s15508_s4 + $0x650] sm:$0xff] }
 0x458   :  { %11200 = vmatpush3.msra.mxu1 %v12570_v58  ;;  %10713 = vmatprep.subr.mxu0 %v7845_v42 }
 0x459   :  { %11201 = vmatprep.subr.mxu1 %v12577_v60  ;;  %10658 = vmatprep.mubr.f32.mxu0 %v3016_v26  ;;  %v10223_v57 = vpop.f32.mrf.mxu0 }
 0x45a   :  { %10714 = vmatpush3.msra.mxu0 %v7845_v42  ;;  %11145 = vmatprep.mubr.f32.mxu1 %v4394_v54  ;;  %v13897_v45 = vadd.f32 %v10223_v57, %v13797_v43  ;;  %v10622_v43 = vpop.f32.mrf.mxu1  ;;  %v7838_v42 = vld [vmem:[%s15508_s4 + $0x638] sm:$0xff]  ;;  %v7836_v54 = vld [vmem:[%s15508_s4 + $0x628] sm:$0xff] }
 0x45b   :  { %11202 = vmatpush3.msra.mxu1 %v12577_v60  ;;  %10659 = vmatmul.mubr.f32.gmra.mxu0 %v10616_v35  ;;  %v13903_v21 = vpop.f32.mrf.mxu0  ;;  %v7842_v35 = vld [vmem:[%s15508_s4 + $0x658] sm:$0xff] }
 0x45c   :  { %10715 = vmatprep.subr.mxu0 %v7844_v52  ;;  %11146 = vmatmul.mubr.f32.gmra.mxu1 %v4395_v59  ;;  %v3036_v49 = vpop.f32.mrf.mxu1  ;;  %v7834_v57 = vld [vmem:[%s15508_s4 + $0x618] sm:$0xff] }
 0x45d   :  { %11203 = vmatprep.subr.mxu1 %v12584_v62  ;;  %10716 = vmatpush3.msra.mxu0 %v7844_v52  ;;  %v7835_v52 = vld [vmem:[%s15508_s4 + $0x620] sm:$0xff] }
 0x45e   :  { %11204 = vmatpush3.msra.mxu1 %v12584_v62  ;;  %10717 = vmatprep.subr.mxu0 %v7843_v19  ;;  %v10701_v59 = vpop.f32.mrf.mxu1 }
 0x45f   :  { %11205 = vmatprep.subr.mxu1 %v12591_v0  ;;  %10661 = vmatprep.mubr.f32.mxu0 %v3026_v1  ;;  %v10226_v23 = vpop.f32.mrf.mxu0  ;;  %v7833_v1 = vld [vmem:[%s15508_s4 + $0x610] sm:$0xff] }
 0x460   :  { %10718 = vmatpush3.msra.mxu0 %v7843_v19  ;;  %11148 = vmatprep.mubr.f32.mxu1 %v4396_v27  ;;  %v13912_v26 = vadd.f32 %v10226_v23, %v13812_v34  ;;  %v7840_v34 = vld [vmem:[%s15508_s4 + $0x648] sm:$0xff]  ;;  %v3249_v19 = vpop.f32.mrf.mxu1 }
 0x461   :  { %11206 = vmatpush3.msra.mxu1 %v12591_v0  ;;  %10662 = vmatmul.mubr.f32.gmra.mxu0 %v10619_v44  ;;  %v7837_v44 = vld [vmem:[%s15508_s4 + $0x630] sm:$0xff]  ;;  %v13958_v27 = vpop.f32.mrf.mxu0 }
 0x462   :  { %10719 = vmatprep.subr.mxu0 %v7842_v35  ;;  %11149 = vmatmul.mubr.f32.gmra.mxu1 %v4397_v32  ;;  %15517 = vst [vmem:[#allocation11_spill] sm:$0xff] %v13958_v27  ;;  %v4634_v32 = vld [vmem:[#allocation2 + $0x488] sm:$0xff] }
 0x463   :  { %11207 = vmatprep.subr.mxu1 %v12598_v2  ;;  %10720 = vmatpush3.msra.mxu0 %v7842_v35  ;;  %v7832_v35 = vld [vmem:[%s15508_s4 + $0x608] sm:$0xff] }
 0x464   :  { %11208 = vmatpush3.msra.mxu1 %v12598_v2  ;;  %10721 = vmatprep.subr.mxu0 %v7841_v37 }
 0x465   :  { %11209 = vmatprep.subr.mxu1 %v12605_v4  ;;  %10664 = vmatprep.mubr.f32.mxu0 %v3036_v49 }
 0x466   :  { %10722 = vmatpush3.msra.mxu0 %v7841_v37  ;;  %11210 = vmatpush3.msra.mxu1 %v12605_v4  ;;  %v10704_v37 = vpop.f32.mrf.mxu1 }
 0x467   :  { %10665 = vmatmul.mubr.f32.gmra.mxu0 %v10622_v43  ;;  %10723 = vmatprep.subr.mxu0 %v7840_v34  ;;  %v4633_v43 = vld [vmem:[#allocation2 + $0x480] sm:$0xff] }
 0x468   :  { %11211 = vmatprep.subr.mxu1 %v12612_v6  ;;  %10724 = vmatpush3.msra.mxu0 %v7840_v34  ;;  %v7831_v34 = vld [vmem:[%s15508_s4 + $0x600] sm:$0xff] }
 0x469   :  { %11212 = vmatpush3.msra.mxu1 %v12612_v6  ;;  %10725 = vmatprep.subr.mxu0 %v7839_v24 }
 0x46a   :  { %11213 = vmatprep.subr.mxu1 %v12620_v8  ;;  %10726 = vmatpush3.msra.mxu0 %v7839_v24 }
 0x46b   :  { %11214 = vmatpush3.msra.mxu1 %v12620_v8  ;;  %10727 = vmatprep.subr.mxu0 %v7838_v42 }
 0x46c   :  { %11215 = vmatprep.subr.mxu1 %v12628_v10  ;;  %10728 = vmatpush3.msra.mxu0 %v7838_v42  ;;  %v4635_v42 = vld [vmem:[#allocation2 + $0x490] sm:$0xff] }
 0x46d   :  { %11216 = vmatpush3.msra.mxu1 %v12628_v10  ;;  %10729 = vmatprep.subr.mxu0 %v7837_v44 }
 0x46e   :  { %11217 = vmatprep.subr.mxu1 %v12636_v12  ;;  %10730 = vmatpush3.msra.mxu0 %v7837_v44  ;;  %v7862_v44 = vld [vmem:[%s15508_s4 + $0x6f8] sm:$0xff] }
 0x46f   :  { %11218 = vmatpush3.msra.mxu1 %v12636_v12  ;;  %10731 = vmatprep.subr.mxu0 %v7836_v54 }
 0x470   :  { %11219 = vmatprep.subr.mxu1 %v12644_v14  ;;  %10732 = vmatpush3.msra.mxu0 %v7836_v54  ;;  %v4636_v54 = vld [vmem:[#allocation2 + $0x498] sm:$0xff] }
 0x471   :  { %11220 = vmatpush3.msra.mxu1 %v12644_v14  ;;  %10733 = vmatprep.subr.mxu0 %v7835_v52 }
 0x472   :  { %11221 = vmatprep.subr.mxu1 %v12652_v16  ;;  %10734 = vmatpush3.msra.mxu0 %v7835_v52 }
 0x473   :  { %11222 = vmatpush3.msra.mxu1 %v12652_v16  ;;  %10735 = vmatprep.subr.mxu0 %v7834_v57 }
 0x474   :  { %11223 = vmatprep.subr.mxu1 %v12658_v17  ;;  %10736 = vmatpush3.msra.mxu0 %v7834_v57 }
 0x475   :  { %11224 = vmatpush3.msra.mxu1 %v12658_v17  ;;  %10737 = vmatprep.subr.mxu0 %v7833_v1  ;;  %v10305_v23 = vpop.f32.mrf.mxu0 }
 0x476   :  { %11225 = vmatprep.subr.mxu1 %v12664_v18  ;;  %10738 = vmatpush3.msra.mxu0 %v7833_v1  ;;  %v13967_v49 = vadd.f32 %v10305_v23, %v13867_v30  ;;  %v3259_v30 = vpop.f32.mrf.mxu1  ;;  %v7861_v1 = vld [vmem:[%s15508_s4 + $0x6f0] sm:$0xff] }
 0x477   :  { %11226 = vmatpush3.msra.mxu1 %v12664_v18  ;;  %11227 = vmatprep.mubr.f32.mxu1 %v4633_v43  ;;  %v13973_v24 = vpop.f32.mrf.mxu0 }
 0x478   :  { %10739 = vmatprep.subr.mxu0 %v7832_v35  ;;  %11228 = vmatmul.mubr.f32.vlgmr.msra.gmra.mxu1 %v4634_v32 }
 0x479   :  { %11283 = vmatprep.subr.mxu1 %v12559_v53  ;;  %10740 = vmatpush3.msra.mxu0 %v7832_v35  ;;  %v10707_v35 = vpop.f32.mrf.mxu1 }
 0x47a   :  { %11284 = vmatpush3.msra.mxu1 %v12559_v53  ;;  %10741 = vmatprep.subr.mxu0 %v7831_v34 }
 0x47b   :  { %11285 = vmatprep.subr.mxu1 %v12563_v56  ;;  %10742 = vmatpush3.msra.mxu0 %v7831_v34  ;;  %v10308_v52 = vpop.f32.mrf.mxu0  ;;  %v3269_v23 = vpop.f32.mrf.mxu1 }
 0x47c   :  { %10743 = vmatprep.mubr.f32.mxu0 %v3249_v19  ;;  %11230 = vmatprep.mubr.f32.mxu1 %v4635_v42  ;;  %v13982_v57 = vadd.f32 %v10308_v52, %v13882_v9  ;;  %v4637_v19 = vld [vmem:[#allocation2 + $0x4a0] sm:$0xff]  ;;  %v7860_v9 = vld [vmem:[%s15508_s4 + $0x6e8] sm:$0xff] }
 0x47d   :  { %11286 = vmatpush3.msra.mxu1 %v12563_v56  ;;  %10744 = vmatmul.mubr.f32.vlgmr.msra.gmra.mxu0 %v10701_v59  ;;  %v13988_v43 = vpop.f32.mrf.mxu0  ;;  %v4638_v59 = vld [vmem:[#allocation2 + $0x4a8] sm:$0xff]  ;;  %v7859_v42 = vld [vmem:[%s15508_s4 + $0x6e0] sm:$0xff] }
 0x47e   :  { %10799 = vmatprep.subr.mxu0 %v7862_v44  ;;  %11231 = vmatmul.mubr.f32.gmra.mxu1 %v4636_v54  ;;  %v4640_v54 = vld [vmem:[#allocation2 + $0x4b8] sm:$0xff] }
 0x47f   :  { %11287 = vmatprep.subr.mxu1 %v12570_v58  ;;  %10800 = vmatpush3.msra.mxu0 %v7862_v44  ;;  %v4639_v44 = vld [vmem:[#allocation2 + $0x4b0] sm:$0xff] }
 0x480   :  { %11288 = vmatpush3.msra.mxu1 %v12570_v58  ;;  %10801 = vmatprep.subr.mxu0 %v7861_v1 }
 0x481   :  { %11289 = vmatprep.subr.mxu1 %v12577_v60  ;;  %10746 = vmatprep.mubr.f32.mxu0 %v3259_v30  ;;  %v10311_v32 = vpop.f32.mrf.mxu0 }
 0x482   :  { %10802 = vmatpush3.msra.mxu0 %v7861_v1  ;;  %11233 = vmatprep.mubr.f32.mxu1 %v4637_v19  ;;  %v13997_v34 = vadd.f32 %v10311_v32, %v13897_v45  ;;  %v10710_v45 = vpop.f32.mrf.mxu1  ;;  %v7857_v19 = vld [vmem:[%s15508_s4 + $0x6d0] sm:$0xff] }
 0x483   :  { %11290 = vmatpush3.msra.mxu1 %v12577_v60  ;;  %10747 = vmatmul.mubr.f32.gmra.mxu0 %v10704_v37  ;;  %v14003_v30 = vpop.f32.mrf.mxu0  ;;  %v7858_v37 = vld [vmem:[%s15508_s4 + $0x6d8] sm:$0xff]  ;;  %v7853_v32 = vld [vmem:[%s15508_s4 + $0x6b0] sm:$0xff] }
 0x484   :  { %15518 = vst [vmem:[#allocation12_spill] sm:$0xff] %v14003_v30  ;;  %10803 = vmatprep.subr.mxu0 %v7860_v9  ;;  %11234 = vmatmul.mubr.f32.gmra.mxu1 %v4638_v59  ;;  %v7854_v59 = vld [vmem:[%s15508_s4 + $0x6b8] sm:$0xff]  ;;  %v5364_v30 = vld [vmem:[#allocation2 + $0x550] sm:$0xff] }
 0x485   :  { %11291 = vmatprep.subr.mxu1 %v12584_v62  ;;  %10804 = vmatpush3.msra.mxu0 %v7860_v9  ;;  %v3279_v9 = vpop.f32.mrf.mxu1 }
 0x486   :  { %11292 = vmatpush3.msra.mxu1 %v12584_v62  ;;  %10805 = vmatprep.subr.mxu0 %v7859_v42 }
 0x487   :  { %11293 = vmatprep.subr.mxu1 %v12591_v0  ;;  %10749 = vmatprep.mubr.f32.mxu0 %v3269_v23  ;;  %v10314_v52 = vpop.f32.mrf.mxu0  ;;  %v7852_v23 = vld [vmem:[%s15508_s4 + $0x6a8] sm:$0xff] }
 0x488   :  { %10806 = vmatpush3.msra.mxu0 %v7859_v42  ;;  %11236 = vmatprep.mubr.f32.mxu1 %v4639_v44  ;;  %v14012_v1 = vadd.f32 %v10314_v52, %v13912_v26  ;;  %v7856_v26 = vld [vmem:[%s15508_s4 + $0x6c8] sm:$0xff]  ;;  %v7851_v42 = vld [vmem:[%s15508_s4 + $0x6a0] sm:$0xff]  ;;  %v10789_v44 = vpop.f32.mrf.mxu1 }
 0x489   :  { %11294 = vmatpush3.msra.mxu1 %v12591_v0  ;;  %10750 = vmatmul.mubr.f32.gmra.mxu0 %v10707_v35  ;;  %v7855_v35 = vld [vmem:[%s15508_s4 + $0x6c0] sm:$0xff]  ;;  %v14058_v52 = vpop.f32.mrf.mxu0 }
 0x48a   :  { %10807 = vmatprep.subr.mxu0 %v7858_v37  ;;  %11237 = vmatmul.mubr.f32.gmra.mxu1 %v4640_v54  ;;  %v3492_v54 = vpop.f32.mrf.mxu1  ;;  %15519 = vst [vmem:[#allocation13_spill] sm:$0xff] %v14058_v52 }
 0x48b   :  { %11295 = vmatprep.subr.mxu1 %v12598_v2  ;;  %10808 = vmatpush3.msra.mxu0 %v7858_v37  ;;  %v7849_v37 = vld [vmem:[%s15508_s4 + $0x690] sm:$0xff] }
 0x48c   :  { %11296 = vmatpush3.msra.mxu1 %v12598_v2  ;;  %10809 = vmatprep.subr.mxu0 %v7857_v19 }
 0x48d   :  { %11297 = vmatprep.subr.mxu1 %v12605_v4  ;;  %10752 = vmatprep.mubr.f32.mxu0 %v3279_v9  ;;  %v7848_v9 = vld [vmem:[%s15508_s4 + $0x688] sm:$0xff] }
 0x48e   :  { %10810 = vmatpush3.msra.mxu0 %v7857_v19  ;;  %11298 = vmatpush3.msra.mxu1 %v12605_v4  ;;  %v4876_v19 = vld [vmem:[#allocation2 + $0x4c0] sm:$0xff] }
 0x48f   :  { %10753 = vmatmul.mubr.f32.gmra.mxu0 %v10710_v45  ;;  %10811 = vmatprep.subr.mxu0 %v7856_v26  ;;  %v7850_v45 = vld [vmem:[%s15508_s4 + $0x698] sm:$0xff] }
 0x490   :  { %11299 = vmatprep.subr.mxu1 %v12612_v6  ;;  %10812 = vmatpush3.msra.mxu0 %v7856_v26  ;;  %v4877_v26 = vld [vmem:[#allocation2 + $0x4c8] sm:$0xff] }
 0x491   :  { %11300 = vmatpush3.msra.mxu1 %v12612_v6  ;;  %10813 = vmatprep.subr.mxu0 %v7855_v35 }
 0x492   :  { %11301 = vmatprep.subr.mxu1 %v12620_v8  ;;  %10814 = vmatpush3.msra.mxu0 %v7855_v35 }
 0x493   :  { %11302 = vmatpush3.msra.mxu1 %v12620_v8  ;;  %10815 = vmatprep.subr.mxu0 %v7854_v59 }
 0x494   :  { %11303 = vmatprep.subr.mxu1 %v12628_v10  ;;  %10816 = vmatpush3.msra.mxu0 %v7854_v59  ;;  %v10792_v59 = vpop.f32.mrf.mxu1 }
 0x495   :  { %11304 = vmatpush3.msra.mxu1 %v12628_v10  ;;  %10817 = vmatprep.subr.mxu0 %v7853_v32 }
 0x496   :  { %11305 = vmatprep.subr.mxu1 %v12636_v12  ;;  %10818 = vmatpush3.msra.mxu0 %v7853_v32 }
 0x497   :  { %11306 = vmatpush3.msra.mxu1 %v12636_v12  ;;  %10819 = vmatprep.subr.mxu0 %v7852_v23 }
 0x498   :  { %11307 = vmatprep.subr.mxu1 %v12644_v14  ;;  %10820 = vmatpush3.msra.mxu0 %v7852_v23  ;;  %v7847_v23 = vld [vmem:[%s15508_s4 + $0x680] sm:$0xff] }
 0x499   :  { %11308 = vmatpush3.msra.mxu1 %v12644_v14  ;;  %10821 = vmatprep.subr.mxu0 %v7851_v42 }
 0x49a   :  { %11309 = vmatprep.subr.mxu1 %v12652_v16  ;;  %10822 = vmatpush3.msra.mxu0 %v7851_v42 }
 0x49b   :  { %11310 = vmatpush3.msra.mxu1 %v12652_v16  ;;  %10823 = vmatprep.subr.mxu0 %v7850_v45 }
 0x49c   :  { %11311 = vmatprep.subr.mxu1 %v12658_v17  ;;  %10824 = vmatpush3.msra.mxu0 %v7850_v45  ;;  %v4878_v45 = vld [vmem:[#allocation2 + $0x4d0] sm:$0xff] }
 0x49d   :  { %11312 = vmatpush3.msra.mxu1 %v12658_v17  ;;  %10825 = vmatprep.subr.mxu0 %v7849_v37  ;;  %v10393_v35 = vpop.f32.mrf.mxu0 }
 0x49e   :  { %11313 = vmatprep.subr.mxu1 %v12664_v18  ;;  %10826 = vmatpush3.msra.mxu0 %v7849_v37  ;;  %v14067_v32 = vadd.f32 %v10393_v35, %v13967_v49  ;;  %v3502_v49 = vpop.f32.mrf.mxu1  ;;  %v7878_v37 = vld [vmem:[%s15508_s4 + $0x778] sm:$0xff] }
 0x49f   :  { %11314 = vmatpush3.msra.mxu1 %v12664_v18  ;;  %11315 = vmatprep.mubr.f32.mxu1 %v4876_v19  ;;  %v14073_v42 = vpop.f32.mrf.mxu0  ;;  %v4879_v19 = vld [vmem:[#allocation2 + $0x4d8] sm:$0xff] }
 0x4a0   :  { %10827 = vmatprep.subr.mxu0 %v7848_v9  ;;  %11316 = vmatmul.mubr.f32.vlgmr.msra.gmra.mxu1 %v4877_v26 }
 0x4a1   :  { %11371 = vmatprep.subr.mxu1 %v12559_v53  ;;  %10828 = vmatpush3.msra.mxu0 %v7848_v9  ;;  %v7877_v9 = vld [vmem:[%s15508_s4 + $0x770] sm:$0xff] }
 0x4a2   :  { %11372 = vmatpush3.msra.mxu1 %v12559_v53  ;;  %10829 = vmatprep.subr.mxu0 %v7847_v23 }
 0x4a3   :  { %11373 = vmatprep.subr.mxu1 %v12563_v56  ;;  %10830 = vmatpush3.msra.mxu0 %v7847_v23  ;;  %v10396_v35 = vpop.f32.mrf.mxu0  ;;  %v10795_v23 = vpop.f32.mrf.mxu1 }
 0x4a4   :  { %10831 = vmatprep.mubr.f32.mxu0 %v3492_v54  ;;  %11318 = vmatprep.mubr.f32.mxu1 %v4878_v45  ;;  %v14082_v26 = vadd.f32 %v10396_v35, %v13982_v57  ;;  %v4880_v54 = vld [vmem:[#allocation2 + $0x4e0] sm:$0xff]  ;;  %v7876_v57 = vld [vmem:[%s15508_s4 + $0x768] sm:$0xff] }
 0x4a5   :  { %11374 = vmatpush3.msra.mxu1 %v12563_v56  ;;  %10832 = vmatmul.mubr.f32.vlgmr.msra.gmra.mxu0 %v10789_v44  ;;  %v14088_v52 = vpop.f32.mrf.mxu0  ;;  %v4881_v44 = vld [vmem:[#allocation2 + $0x4e8] sm:$0xff] }
 0x4a6   :  { %10887 = vmatprep.subr.mxu0 %v7878_v37  ;;  %11319 = vmatmul.mubr.f32.gmra.mxu1 %v4879_v19  ;;  %v3512_v19 = vpop.f32.mrf.mxu1 }
 0x4a7   :  { %11375 = vmatprep.subr.mxu1 %v12570_v58  ;;  %10888 = vmatpush3.msra.mxu0 %v7878_v37  ;;  %v7875_v37 = vld [vmem:[%s15508_s4 + $0x760] sm:$0xff] }
 0x4a8   :  { %11376 = vmatpush3.msra.mxu1 %v12570_v58  ;;  %10889 = vmatprep.subr.mxu0 %v7877_v9 }
 0x4a9   :  { %11377 = vmatprep.subr.mxu1 %v12577_v60  ;;  %10834 = vmatprep.mubr.f32.mxu0 %v3502_v49  ;;  %v10399_v45 = vpop.f32.mrf.mxu0 }
 0x4aa   :  { %10890 = vmatpush3.msra.mxu0 %v7877_v9  ;;  %11321 = vmatprep.mubr.f32.mxu1 %v4880_v54  ;;  %v14097_v35 = vadd.f32 %v10399_v45, %v13997_v34  ;;  %v4882_v9 = vld [vmem:[#allocation2 + $0x4f0] sm:$0xff]  ;;  %v10798_v34 = vpop.f32.mrf.mxu1  ;;  %v4883_v54 = vld [vmem:[#allocation2 + $0x4f8] sm:$0xff] }
 0x4ab   :  { %11378 = vmatpush3.msra.mxu1 %v12577_v60  ;;  %10835 = vmatmul.mubr.f32.gmra.mxu0 %v10792_v59  ;;  %v14103_v49 = vpop.f32.mrf.mxu0  ;;  %v7874_v59 = vld [vmem:[%s15508_s4 + $0x758] sm:$0xff] }
 0x4ac   :  { %15520 = vst [vmem:[#allocation14_spill] sm:$0xff] %v14103_v49  ;;  %10891 = vmatprep.subr.mxu0 %v7876_v57  ;;  %11322 = vmatmul.mubr.f32.gmra.mxu1 %v4881_v44  ;;  %v5121_v49 = vld [vmem:[#allocation2 + $0x510] sm:$0xff] }
 0x4ad   :  { %11379 = vmatprep.subr.mxu1 %v12584_v62  ;;  %10892 = vmatpush3.msra.mxu0 %v7876_v57  ;;  %v7873_v57 = vld [vmem:[%s15508_s4 + $0x750] sm:$0xff] }
 0x4ae   :  { %11380 = vmatpush3.msra.mxu1 %v12584_v62  ;;  %10893 = vmatprep.subr.mxu0 %v7875_v37 }
 0x4af   :  { %11381 = vmatprep.subr.mxu1 %v12591_v0  ;;  %10837 = vmatprep.mubr.f32.mxu0 %v3512_v19  ;;  %v10402_v45 = vpop.f32.mrf.mxu0  ;;  %v3522_v19 = vpop.f32.mrf.mxu1 }
 0x4b0   :  { %10894 = vmatpush3.msra.mxu0 %v7875_v37  ;;  %11324 = vmatprep.mubr.f32.mxu1 %v4882_v9  ;;  %v14112_v44 = vadd.f32 %v10402_v45, %v14012_v1  ;;  %v7872_v1 = vld [vmem:[%s15508_s4 + $0x748] sm:$0xff]  ;;  %v7870_v37 = vld [vmem:[%s15508_s4 + $0x738] sm:$0xff]  ;;  %v7869_v9 = vld [vmem:[%s15508_s4 + $0x730] sm:$0xff] }
 0x4b1   :  { %11382 = vmatpush3.msra.mxu1 %v12591_v0  ;;  %10838 = vmatmul.mubr.f32.gmra.mxu0 %v10795_v23  ;;  %v7871_v23 = vld [vmem:[%s15508_s4 + $0x740] sm:$0xff]  ;;  %v7866_v45 = vld [vmem:[%s15508_s4 + $0x718] sm:$0xff] }
 0x4b2   :  { %10895 = vmatprep.subr.mxu0 %v7874_v59  ;;  %11325 = vmatmul.mubr.f32.gmra.mxu1 %v4883_v54  ;;  %v10877_v54 = vpop.f32.mrf.mxu1 }
 0x4b3   :  { %11383 = vmatprep.subr.mxu1 %v12598_v2  ;;  %10896 = vmatpush3.msra.mxu0 %v7874_v59  ;;  %v7867_v59 = vld [vmem:[%s15508_s4 + $0x720] sm:$0xff] }
 0x4b4   :  { %11384 = vmatpush3.msra.mxu1 %v12598_v2  ;;  %10897 = vmatprep.subr.mxu0 %v7873_v57 }
 0x4b5   :  { %11385 = vmatprep.subr.mxu1 %v12605_v4  ;;  %10840 = vmatprep.mubr.f32.mxu0 %v3522_v19  ;;  %v3735_v19 = vpop.f32.mrf.mxu1 }
 0x4b6   :  { %10898 = vmatpush3.msra.mxu0 %v7873_v57  ;;  %11386 = vmatpush3.msra.mxu1 %v12605_v4  ;;  %v7865_v57 = vld [vmem:[%s15508_s4 + $0x710] sm:$0xff] }
 0x4b7   :  { %10841 = vmatmul.mubr.f32.gmra.mxu0 %v10798_v34  ;;  %10899 = vmatprep.subr.mxu0 %v7872_v1  ;;  %v7868_v34 = vld [vmem:[%s15508_s4 + $0x728] sm:$0xff] }
 0x4b8   :  { %11387 = vmatprep.subr.mxu1 %v12612_v6  ;;  %10900 = vmatpush3.msra.mxu0 %v7872_v1  ;;  %v14158_v1 = vpop.f32.mrf.mxu0 }
 0x4b9   :  { %11388 = vmatpush3.msra.mxu1 %v12612_v6  ;;  %10901 = vmatprep.subr.mxu0 %v7871_v23  ;;  %15521 = vst [vmem:[#allocation15_spill] sm:$0xff] %v14158_v1 }
 0x4ba   :  { %11389 = vmatprep.subr.mxu1 %v12620_v8  ;;  %10902 = vmatpush3.msra.mxu0 %v7871_v23  ;;  %v5119_v23 = vld [vmem:[#allocation2 + $0x500] sm:$0xff] }
 0x4bb   :  { %11390 = vmatpush3.msra.mxu1 %v12620_v8  ;;  %10903 = vmatprep.subr.mxu0 %v7870_v37 }
 0x4bc   :  { %11391 = vmatprep.subr.mxu1 %v12628_v10  ;;  %10904 = vmatpush3.msra.mxu0 %v7870_v37  ;;  %v7864_v37 = vld [vmem:[%s15508_s4 + $0x708] sm:$0xff] }
 0x4bd   :  { %11392 = vmatpush3.msra.mxu1 %v12628_v10  ;;  %10905 = vmatprep.subr.mxu0 %v7869_v9 }
 0x4be   :  { %11393 = vmatprep.subr.mxu1 %v12636_v12  ;;  %10906 = vmatpush3.msra.mxu0 %v7869_v9  ;;  %v5120_v9 = vld [vmem:[#allocation2 + $0x508] sm:$0xff] }
 0x4bf   :  { %11394 = vmatpush3.msra.mxu1 %v12636_v12  ;;  %10907 = vmatprep.subr.mxu0 %v7868_v34 }
 0x4c0   :  { %11395 = vmatprep.subr.mxu1 %v12644_v14  ;;  %10908 = vmatpush3.msra.mxu0 %v7868_v34 }
 0x4c1   :  { %11396 = vmatpush3.msra.mxu1 %v12644_v14  ;;  %10909 = vmatprep.subr.mxu0 %v7867_v59 }
 0x4c2   :  { %11397 = vmatprep.subr.mxu1 %v12652_v16  ;;  %10910 = vmatpush3.msra.mxu0 %v7867_v59  ;;  %v10880_v59 = vpop.f32.mrf.mxu1 }
 0x4c3   :  { %11398 = vmatpush3.msra.mxu1 %v12652_v16  ;;  %10911 = vmatprep.subr.mxu0 %v7866_v45 }
 0x4c4   :  { %11399 = vmatprep.subr.mxu1 %v12658_v17  ;;  %10912 = vmatpush3.msra.mxu0 %v7866_v45  ;;  %v7863_v45 = vld [vmem:[%s15508_s4 + $0x700] sm:$0xff] }
 0x4c5   :  { %11400 = vmatpush3.msra.mxu1 %v12658_v17  ;;  %10913 = vmatprep.subr.mxu0 %v7865_v57  ;;  %v10481_v34 = vpop.f32.mrf.mxu0 }
 0x4c6   :  { %11401 = vmatprep.subr.mxu1 %v12664_v18  ;;  %10914 = vmatpush3.msra.mxu0 %v7865_v57  ;;  %v14167_v27 = vadd.f32 %v10481_v34, %v14067_v32  ;;  %v3745_v32 = vpop.f32.mrf.mxu1  ;;  %v7894_v57 = vld [vmem:[%s15508_s4 + $0x7f8] sm:$0xff] }
 0x4c7   :  { %11402 = vmatpush3.msra.mxu1 %v12664_v18  ;;  %11403 = vmatprep.mubr.f32.mxu1 %v5119_v23  ;;  %v14173_v1 = vpop.f32.mrf.mxu0  ;;  %v5122_v23 = vld [vmem:[#allocation2 + $0x518] sm:$0xff] }
 0x4c8   :  { %10915 = vmatprep.subr.mxu0 %v7864_v37  ;;  %11404 = vmatmul.mubr.f32.vlgmr.msra.gmra.mxu1 %v5120_v9 }
 0x4c9   :  { %11459 = vmatprep.subr.mxu1 %v12559_v53  ;;  %10916 = vmatpush3.msra.mxu0 %v7864_v37  ;;  %v7893_v37 = vld [vmem:[%s15508_s4 + $0x7f0] sm:$0xff] }
 0x4ca   :  { %11460 = vmatpush3.msra.mxu1 %v12559_v53  ;;  %10917 = vmatprep.subr.mxu0 %v7863_v45 }
 0x4cb   :  { %11461 = vmatprep.subr.mxu1 %v12563_v56  ;;  %10918 = vmatpush3.msra.mxu0 %v7863_v45  ;;  %v10484_v34 = vpop.f32.mrf.mxu0  ;;  %v10883_v45 = vpop.f32.mrf.mxu1 }
 0x4cc   :  { %10919 = vmatprep.mubr.f32.mxu0 %v3735_v19  ;;  %11406 = vmatprep.mubr.f32.mxu1 %v5121_v49  ;;  %v14182_v9 = vadd.f32 %v10484_v34, %v14082_v26  ;;  %v5123_v19 = vld [vmem:[#allocation2 + $0x520] sm:$0xff]  ;;  %v7892_v26 = vld [vmem:[%s15508_s4 + $0x7e8] sm:$0xff] }
 0x4cd   :  { %11462 = vmatpush3.msra.mxu1 %v12563_v56  ;;  %10920 = vmatmul.mubr.f32.vlgmr.msra.gmra.mxu0 %v10877_v54  ;;  %v14188_v7 = vpop.f32.mrf.mxu0  ;;  %v5124_v49 = vld [vmem:[#allocation2 + $0x528] sm:$0xff] }
 0x4ce   :  { %15522 = vst [vmem:[#allocation16_spill] sm:$0xff] %v14188_v7  ;;  %10975 = vmatprep.subr.mxu0 %v7894_v57  ;;  %11407 = vmatmul.mubr.f32.gmra.mxu1 %v5122_v23  ;;  %v3755_v23 = vpop.f32.mrf.mxu1 }
 0x4cf   :  { %11463 = vmatprep.subr.mxu1 %v12570_v58  ;;  %10976 = vmatpush3.msra.mxu0 %v7894_v57  ;;  %v7891_v57 = vld [vmem:[%s15508_s4 + $0x7e0] sm:$0xff] }
 0x4d0   :  { %11464 = vmatpush3.msra.mxu1 %v12570_v58  ;;  %10977 = vmatprep.subr.mxu0 %v7893_v37 }
 0x4d1   :  { %11465 = vmatprep.subr.mxu1 %v12577_v60  ;;  %10922 = vmatprep.mubr.f32.mxu0 %v3745_v32  ;;  %v10487_v54 = vpop.f32.mrf.mxu0 }
 0x4d2   :  { %10978 = vmatpush3.msra.mxu0 %v7893_v37  ;;  %11409 = vmatprep.mubr.f32.mxu1 %v5123_v19  ;;  %v14197_v34 = vadd.f32 %v10487_v54, %v14097_v35  ;;  %v5125_v37 = vld [vmem:[#allocation2 + $0x530] sm:$0xff]  ;;  %v10886_v35 = vpop.f32.mrf.mxu1  ;;  %v5126_v19 = vld [vmem:[#allocation2 + $0x538] sm:$0xff] }
 0x4d3   :  { %11466 = vmatpush3.msra.mxu1 %v12577_v60  ;;  %10923 = vmatmul.mubr.f32.gmra.mxu0 %v10880_v59  ;;  %v14203_v32 = vpop.f32.mrf.mxu0  ;;  %v7890_v59 = vld [vmem:[%s15508_s4 + $0x7d8] sm:$0xff] }
 0x4d4   :  { %15523 = vst [vmem:[#allocation17_spill] sm:$0xff] %v14203_v32  ;;  %10979 = vmatprep.subr.mxu0 %v7892_v26  ;;  %11410 = vmatmul.mubr.f32.gmra.mxu1 %v5124_v49 }
 0x4d5   :  { %11467 = vmatprep.subr.mxu1 %v12584_v62  ;;  %10980 = vmatpush3.msra.mxu0 %v7892_v26  ;;  %v7889_v26 = vld [vmem:[%s15508_s4 + $0x7d0] sm:$0xff] }
 0x4d6   :  { %11468 = vmatpush3.msra.mxu1 %v12584_v62  ;;  %10981 = vmatprep.subr.mxu0 %v7891_v57 }
 0x4d7   :  { %11469 = vmatprep.subr.mxu1 %v12591_v0  ;;  %10925 = vmatprep.mubr.f32.mxu0 %v3755_v23  ;;  %v10490_v54 = vpop.f32.mrf.mxu0  ;;  %v3765_v23 = vpop.f32.mrf.mxu1 }
 0x4d8   :  { %10982 = vmatpush3.msra.mxu0 %v7891_v57  ;;  %11412 = vmatprep.mubr.f32.mxu1 %v5125_v37  ;;  %v14212_v49 = vadd.f32 %v10490_v54, %v14112_v44  ;;  %v7888_v44 = vld [vmem:[%s15508_s4 + $0x7c8] sm:$0xff]  ;;  %v7886_v57 = vld [vmem:[%s15508_s4 + $0x7b8] sm:$0xff]  ;;  %v7885_v37 = vld [vmem:[%s15508_s4 + $0x7b0] sm:$0xff] }
 0x4d9   :  { %11470 = vmatpush3.msra.mxu1 %v12591_v0  ;;  %10926 = vmatmul.mubr.f32.gmra.mxu0 %v10883_v45  ;;  %v7887_v45 = vld [vmem:[%s15508_s4 + $0x7c0] sm:$0xff]  ;;  %v7882_v54 = vld [vmem:[%s15508_s4 + $0x798] sm:$0xff] }
 0x4da   :  { %10983 = vmatprep.subr.mxu0 %v7890_v59  ;;  %11413 = vmatmul.mubr.f32.gmra.mxu1 %v5126_v19  ;;  %v10965_v19 = vpop.f32.mrf.mxu1 }
 0x4db   :  { %11471 = vmatprep.subr.mxu1 %v12598_v2  ;;  %10984 = vmatpush3.msra.mxu0 %v7890_v59  ;;  %v7883_v59 = vld [vmem:[%s15508_s4 + $0x7a0] sm:$0xff] }
 0x4dc   :  { %11472 = vmatpush3.msra.mxu1 %v12598_v2  ;;  %10985 = vmatprep.subr.mxu0 %v7889_v26 }
 0x4dd   :  { %11473 = vmatprep.subr.mxu1 %v12605_v4  ;;  %10928 = vmatprep.mubr.f32.mxu0 %v3765_v23  ;;  %v3978_v23 = vpop.f32.mrf.mxu1 }
 0x4de   :  { %10986 = vmatpush3.msra.mxu0 %v7889_v26  ;;  %11474 = vmatpush3.msra.mxu1 %v12605_v4  ;;  %v7881_v26 = vld [vmem:[%s15508_s4 + $0x790] sm:$0xff] }
 0x4df   :  { %10929 = vmatmul.mubr.f32.gmra.mxu0 %v10886_v35  ;;  %10987 = vmatprep.subr.mxu0 %v7888_v44  ;;  %v7884_v35 = vld [vmem:[%s15508_s4 + $0x7a8] sm:$0xff] }
 0x4e0   :  { %11475 = vmatprep.subr.mxu1 %v12612_v6  ;;  %10988 = vmatpush3.msra.mxu0 %v7888_v44  ;;  %v14258_v44 = vpop.f32.mrf.mxu0 }
 0x4e1   :  { %11476 = vmatpush3.msra.mxu1 %v12612_v6  ;;  %10989 = vmatprep.subr.mxu0 %v7887_v45  ;;  %15524 = vst [vmem:[#allocation18_spill] sm:$0xff] %v14258_v44 }
 0x4e2   :  { %11477 = vmatprep.subr.mxu1 %v12620_v8  ;;  %10990 = vmatpush3.msra.mxu0 %v7887_v45  ;;  %v5362_v45 = vld [vmem:[#allocation2 + $0x540] sm:$0xff] }
 0x4e3   :  { %11478 = vmatpush3.msra.mxu1 %v12620_v8  ;;  %10991 = vmatprep.subr.mxu0 %v7886_v57 }
 0x4e4   :  { %11479 = vmatprep.subr.mxu1 %v12628_v10  ;;  %10992 = vmatpush3.msra.mxu0 %v7886_v57  ;;  %v7880_v57 = vld [vmem:[%s15508_s4 + $0x788] sm:$0xff] }
 0x4e5   :  { %11480 = vmatpush3.msra.mxu1 %v12628_v10  ;;  %10993 = vmatprep.subr.mxu0 %v7885_v37 }
 0x4e6   :  { %11481 = vmatprep.subr.mxu1 %v12636_v12  ;;  %10994 = vmatpush3.msra.mxu0 %v7885_v37  ;;  %v5363_v37 = vld [vmem:[#allocation2 + $0x548] sm:$0xff] }
 0x4e7   :  { %11482 = vmatpush3.msra.mxu1 %v12636_v12  ;;  %10995 = vmatprep.subr.mxu0 %v7884_v35 }
 0x4e8   :  { %11483 = vmatprep.subr.mxu1 %v12644_v14  ;;  %10996 = vmatpush3.msra.mxu0 %v7884_v35 }
 0x4e9   :  { %11484 = vmatpush3.msra.mxu1 %v12644_v14  ;;  %10997 = vmatprep.subr.mxu0 %v7883_v59 }
 0x4ea   :  { %11485 = vmatprep.subr.mxu1 %v12652_v16  ;;  %10998 = vmatpush3.msra.mxu0 %v7883_v59  ;;  %v10968_v59 = vpop.f32.mrf.mxu1 }
 0x4eb   :  { %11486 = vmatpush3.msra.mxu1 %v12652_v16  ;;  %10999 = vmatprep.subr.mxu0 %v7882_v54 }
 0x4ec   :  { %11487 = vmatprep.subr.mxu1 %v12658_v17  ;;  %11000 = vmatpush3.msra.mxu0 %v7882_v54  ;;  %v7879_v54 = vld [vmem:[%s15508_s4 + $0x780] sm:$0xff] }
 0x4ed   :  { %11488 = vmatpush3.msra.mxu1 %v12658_v17  ;;  %11001 = vmatprep.subr.mxu0 %v7881_v26  ;;  %v10569_v35 = vpop.f32.mrf.mxu0 }
 0x4ee   :  { %11489 = vmatprep.subr.mxu1 %v12664_v18  ;;  %11002 = vmatpush3.msra.mxu0 %v7881_v26  ;;  %v14267_v32 = vadd.f32 %v10569_v35, %v14167_v27  ;;  %v3988_v27 = vpop.f32.mrf.mxu1  ;;  %v7910_v26 = vld [vmem:[%s15508_s4 + $0x878] sm:$0xff] }
 0x4ef   :  { %11490 = vmatpush3.msra.mxu1 %v12664_v18  ;;  %11491 = vmatprep.mubr.f32.mxu1 %v5362_v45  ;;  %v14273_v44 = vpop.f32.mrf.mxu0  ;;  %v5365_v45 = vld [vmem:[#allocation2 + $0x558] sm:$0xff] }
 0x4f0   :  { %11003 = vmatprep.subr.mxu0 %v7880_v57  ;;  %11492 = vmatmul.mubr.f32.vlgmr.msra.gmra.mxu1 %v5363_v37 }
 0x4f1   :  { %11547 = vmatprep.subr.mxu1 %v12559_v53  ;;  %11004 = vmatpush3.msra.mxu0 %v7880_v57  ;;  %v7909_v57 = vld [vmem:[%s15508_s4 + $0x870] sm:$0xff] }
 0x4f2   :  { %11548 = vmatpush3.msra.mxu1 %v12559_v53  ;;  %11005 = vmatprep.subr.mxu0 %v7879_v54 }
 0x4f3   :  { %11549 = vmatprep.subr.mxu1 %v12563_v56  ;;  %11006 = vmatpush3.msra.mxu0 %v7879_v54  ;;  %v10572_v35 = vpop.f32.mrf.mxu0  ;;  %v10971_v54 = vpop.f32.mrf.mxu1 }
 0x4f4   :  { %11007 = vmatprep.mubr.f32.mxu0 %v3978_v23  ;;  %11494 = vmatprep.mubr.f32.mxu1 %v5364_v30  ;;  %v14282_v37 = vadd.f32 %v10572_v35, %v14182_v9  ;;  %v5366_v23 = vld [vmem:[#allocation2 + $0x560] sm:$0xff]  ;;  %v7908_v30 = vld [vmem:[%s15508_s4 + $0x868] sm:$0xff] }
 0x4f5   :  { %11550 = vmatpush3.msra.mxu1 %v12563_v56  ;;  %11008 = vmatmul.mubr.f32.vlgmr.msra.gmra.mxu0 %v10965_v19  ;;  %v14288_v28 = vpop.f32.mrf.mxu0  ;;  %v5367_v9 = vld [vmem:[#allocation2 + $0x568] sm:$0xff] }
 0x4f6   :  { %15525 = vst [vmem:[#allocation19_spill] sm:$0xff] %v14288_v28  ;;  %11063 = vmatprep.subr.mxu0 %v7910_v26  ;;  %11495 = vmatmul.mubr.f32.gmra.mxu1 %v5365_v45  ;;  %v3998_v45 = vpop.f32.mrf.mxu1  ;;  %v5607_v28 = vld [vmem:[#allocation2 + $0x590] sm:$0xff] }
 0x4f7   :  { %11551 = vmatprep.subr.mxu1 %v12570_v58  ;;  %11064 = vmatpush3.msra.mxu0 %v7910_v26  ;;  %v7907_v26 = vld [vmem:[%s15508_s4 + $0x860] sm:$0xff] }
 0x4f8   :  { %11552 = vmatpush3.msra.mxu1 %v12570_v58  ;;  %11065 = vmatprep.subr.mxu0 %v7909_v57 }
 0x4f9   :  { %11553 = vmatprep.subr.mxu1 %v12577_v60  ;;  %11010 = vmatprep.mubr.f32.mxu0 %v3988_v27  ;;  %v10575_v19 = vpop.f32.mrf.mxu0 }
 0x4fa   :  { %11066 = vmatpush3.msra.mxu0 %v7909_v57  ;;  %11497 = vmatprep.mubr.f32.mxu1 %v5366_v23  ;;  %v14297_v35 = vadd.f32 %v10575_v19, %v14197_v34  ;;  %v5368_v57 = vld [vmem:[#allocation2 + $0x570] sm:$0xff]  ;;  %v10974_v34 = vpop.f32.mrf.mxu1  ;;  %v5369_v23 = vld [vmem:[#allocation2 + $0x578] sm:$0xff] }
 0x4fb   :  { %11554 = vmatpush3.msra.mxu1 %v12577_v60  ;;  %11011 = vmatmul.mubr.f32.gmra.mxu0 %v10968_v59  ;;  %v14303_v27 = vpop.f32.mrf.mxu0  ;;  %v7906_v59 = vld [vmem:[%s15508_s4 + $0x858] sm:$0xff] }
 0x4fc   :  { %15526 = vst [vmem:[#allocation20_spill] sm:$0xff] %v14303_v27  ;;  %11067 = vmatprep.subr.mxu0 %v7908_v30  ;;  %11498 = vmatmul.mubr.f32.gmra.mxu1 %v5367_v9 }
 0x4fd   :  { %11555 = vmatprep.subr.mxu1 %v12584_v62  ;;  %11068 = vmatpush3.msra.mxu0 %v7908_v30  ;;  %v7905_v30 = vld [vmem:[%s15508_s4 + $0x850] sm:$0xff] }
 0x4fe   :  { %11556 = vmatpush3.msra.mxu1 %v12584_v62  ;;  %11069 = vmatprep.subr.mxu0 %v7907_v26 }
 0x4ff   :  { %11557 = vmatprep.subr.mxu1 %v12591_v0  ;;  %11013 = vmatprep.mubr.f32.mxu0 %v3998_v45  ;;  %v10578_v19 = vpop.f32.mrf.mxu0  ;;  %v4008_v45 = vpop.f32.mrf.mxu1 }
 0x500   :  { %11070 = vmatpush3.msra.mxu0 %v7907_v26  ;;  %11500 = vmatprep.mubr.f32.mxu1 %v5368_v57  ;;  %v14312_v9 = vadd.f32 %v10578_v19, %v14212_v49  ;;  %v7904_v49 = vld [vmem:[%s15508_s4 + $0x848] sm:$0xff]  ;;  %v7902_v26 = vld [vmem:[%s15508_s4 + $0x838] sm:$0xff]  ;;  %v7901_v57 = vld [vmem:[%s15508_s4 + $0x830] sm:$0xff] }
 0x501   :  { %11558 = vmatpush3.msra.mxu1 %v12591_v0  ;;  %11014 = vmatmul.mubr.f32.gmra.mxu0 %v10971_v54  ;;  %v7903_v54 = vld [vmem:[%s15508_s4 + $0x840] sm:$0xff]  ;;  %v7898_v19 = vld [vmem:[%s15508_s4 + $0x818] sm:$0xff] }
 0x502   :  { %11071 = vmatprep.subr.mxu0 %v7906_v59  ;;  %11501 = vmatmul.mubr.f32.gmra.mxu1 %v5369_v23  ;;  %v11053_v23 = vpop.f32.mrf.mxu1 }
 0x503   :  { %11559 = vmatprep.subr.mxu1 %v12598_v2  ;;  %11072 = vmatpush3.msra.mxu0 %v7906_v59  ;;  %v7899_v59 = vld [vmem:[%s15508_s4 + $0x820] sm:$0xff] }
 0x504   :  { %11560 = vmatpush3.msra.mxu1 %v12598_v2  ;;  %11073 = vmatprep.subr.mxu0 %v7905_v30 }
 0x505   :  { %11561 = vmatprep.subr.mxu1 %v12605_v4  ;;  %11016 = vmatprep.mubr.f32.mxu0 %v4008_v45  ;;  %v4221_v45 = vpop.f32.mrf.mxu1 }
 0x506   :  { %11074 = vmatpush3.msra.mxu0 %v7905_v30  ;;  %11562 = vmatpush3.msra.mxu1 %v12605_v4  ;;  %v7897_v30 = vld [vmem:[%s15508_s4 + $0x810] sm:$0xff] }
 0x507   :  { %11017 = vmatmul.mubr.f32.gmra.mxu0 %v10974_v34  ;;  %11075 = vmatprep.subr.mxu0 %v7904_v49  ;;  %v7900_v34 = vld [vmem:[%s15508_s4 + $0x828] sm:$0xff] }
 0x508   :  { %11563 = vmatprep.subr.mxu1 %v12612_v6  ;;  %11076 = vmatpush3.msra.mxu0 %v7904_v49  ;;  %v14358_v49 = vpop.f32.mrf.mxu0 }
 0x509   :  { %11564 = vmatpush3.msra.mxu1 %v12612_v6  ;;  %11077 = vmatprep.subr.mxu0 %v7903_v54  ;;  %15527 = vst [vmem:[#allocation21_spill] sm:$0xff] %v14358_v49 }
 0x50a   :  { %11565 = vmatprep.subr.mxu1 %v12620_v8  ;;  %11078 = vmatpush3.msra.mxu0 %v7903_v54  ;;  %v5605_v54 = vld [vmem:[#allocation2 + $0x580] sm:$0xff] }
 0x50b   :  { %11566 = vmatpush3.msra.mxu1 %v12620_v8  ;;  %11079 = vmatprep.subr.mxu0 %v7902_v26 }
 0x50c   :  { %11567 = vmatprep.subr.mxu1 %v12628_v10  ;;  %11080 = vmatpush3.msra.mxu0 %v7902_v26  ;;  %v7896_v26 = vld [vmem:[%s15508_s4 + $0x808] sm:$0xff] }
 0x50d   :  { %11568 = vmatpush3.msra.mxu1 %v12628_v10  ;;  %11081 = vmatprep.subr.mxu0 %v7901_v57 }
 0x50e   :  { %11569 = vmatprep.subr.mxu1 %v12636_v12  ;;  %11082 = vmatpush3.msra.mxu0 %v7901_v57  ;;  %v5606_v57 = vld [vmem:[#allocation2 + $0x588] sm:$0xff] }
 0x50f   :  { %11570 = vmatpush3.msra.mxu1 %v12636_v12  ;;  %11083 = vmatprep.subr.mxu0 %v7900_v34 }
 0x510   :  { %11571 = vmatprep.subr.mxu1 %v12644_v14  ;;  %11084 = vmatpush3.msra.mxu0 %v7900_v34 }
 0x511   :  { %11572 = vmatpush3.msra.mxu1 %v12644_v14  ;;  %11085 = vmatprep.subr.mxu0 %v7899_v59 }
 0x512   :  { %11573 = vmatprep.subr.mxu1 %v12652_v16  ;;  %11086 = vmatpush3.msra.mxu0 %v7899_v59  ;;  %v11056_v59 = vpop.f32.mrf.mxu1 }
 0x513   :  { %11574 = vmatpush3.msra.mxu1 %v12652_v16  ;;  %11087 = vmatprep.subr.mxu0 %v7898_v19 }
 0x514   :  { %11575 = vmatprep.subr.mxu1 %v12658_v17  ;;  %11088 = vmatpush3.msra.mxu0 %v7898_v19  ;;  %v7895_v19 = vld [vmem:[%s15508_s4 + $0x800] sm:$0xff] }
 0x515   :  { %11576 = vmatpush3.msra.mxu1 %v12658_v17  ;;  %11089 = vmatprep.subr.mxu0 %v7897_v30  ;;  %v10657_v34 = vpop.f32.mrf.mxu0 }
 0x516   :  { %11577 = vmatprep.subr.mxu1 %v12664_v18  ;;  %11090 = vmatpush3.msra.mxu0 %v7897_v30  ;;  %v14367_v27 = vadd.f32 %v10657_v34, %v14267_v32  ;;  %v4231_v32 = vpop.f32.mrf.mxu1  ;;  %v7926_v30 = vld [vmem:[%s15508_s4 + $0x8f8] sm:$0xff] }
 0x517   :  { %11578 = vmatpush3.msra.mxu1 %v12664_v18  ;;  %11579 = vmatprep.mubr.f32.mxu1 %v5605_v54  ;;  %v14373_v49 = vpop.f32.mrf.mxu0  ;;  %v5608_v54 = vld [vmem:[#allocation2 + $0x598] sm:$0xff] }
 0x518   :  { %11091 = vmatprep.subr.mxu0 %v7896_v26  ;;  %11580 = vmatmul.mubr.f32.vlgmr.msra.gmra.mxu1 %v5606_v57 }
 0x519   :  { %11635 = vmatprep.subr.mxu1 %v12559_v53  ;;  %11092 = vmatpush3.msra.mxu0 %v7896_v26  ;;  %v7925_v26 = vld [vmem:[%s15508_s4 + $0x8f0] sm:$0xff] }
 0x51a   :  { %11636 = vmatpush3.msra.mxu1 %v12559_v53  ;;  %11093 = vmatprep.subr.mxu0 %v7895_v19 }
 0x51b   :  { %11637 = vmatprep.subr.mxu1 %v12563_v56  ;;  %11094 = vmatpush3.msra.mxu0 %v7895_v19  ;;  %v10660_v34 = vpop.f32.mrf.mxu0  ;;  %v11059_v19 = vpop.f32.mrf.mxu1 }
 0x51c   :  { %11095 = vmatprep.mubr.f32.mxu0 %v4221_v45  ;;  %11582 = vmatprep.mubr.f32.mxu1 %v5607_v28  ;;  %v14382_v57 = vadd.f32 %v10660_v34, %v14282_v37  ;;  %v5609_v45 = vld [vmem:[#allocation2 + $0x5a0] sm:$0xff]  ;;  %v7924_v28 = vld [vmem:[%s15508_s4 + $0x8e8] sm:$0xff] }
 0x51d   :  { %11638 = vmatpush3.msra.mxu1 %v12563_v56  ;;  %11096 = vmatmul.mubr.f32.vlgmr.msra.gmra.mxu0 %v11053_v23  ;;  %v14388_v7 = vpop.f32.mrf.mxu0  ;;  %v5610_v37 = vld [vmem:[#allocation2 + $0x5a8] sm:$0xff] }
 0x51e   :  { %15528 = vst [vmem:[#allocation22_spill] sm:$0xff] %v14388_v7  ;;  %11151 = vmatprep.subr.mxu0 %v7926_v30  ;;  %11583 = vmatmul.mubr.f32.gmra.mxu1 %v5608_v54  ;;  %v4241_v54 = vpop.f32.mrf.mxu1  ;;  %v5850_v7 = vld [vmem:[#allocation2 + $0x5d0] sm:$0xff] }
 0x51f   :  { %11639 = vmatprep.subr.mxu1 %v12570_v58  ;;  %11152 = vmatpush3.msra.mxu0 %v7926_v30  ;;  %v7923_v30 = vld [vmem:[%s15508_s4 + $0x8e0] sm:$0xff] }
 0x520   :  { %11640 = vmatpush3.msra.mxu1 %v12570_v58  ;;  %11153 = vmatprep.subr.mxu0 %v7925_v26 }
 0x521   :  { %11641 = vmatprep.subr.mxu1 %v12577_v60  ;;  %11098 = vmatprep.mubr.f32.mxu0 %v4231_v32  ;;  %v10663_v23 = vpop.f32.mrf.mxu0 }
 0x522   :  { %11154 = vmatpush3.msra.mxu0 %v7925_v26  ;;  %11585 = vmatprep.mubr.f32.mxu1 %v5609_v45  ;;  %v14397_v34 = vadd.f32 %v10663_v23, %v14297_v35  ;;  %v5611_v26 = vld [vmem:[#allocation2 + $0x5b0] sm:$0xff]  ;;  %v11062_v35 = vpop.f32.mrf.mxu1  ;;  %v5612_v45 = vld [vmem:[#allocation2 + $0x5b8] sm:$0xff] }
 0x523   :  { %11642 = vmatpush3.msra.mxu1 %v12577_v60  ;;  %11099 = vmatmul.mubr.f32.gmra.mxu0 %v11056_v59  ;;  %v14403_v32 = vpop.f32.mrf.mxu0  ;;  %v7922_v59 = vld [vmem:[%s15508_s4 + $0x8d8] sm:$0xff] }
 0x524   :  { %15529 = vst [vmem:[#allocation23_spill] sm:$0xff] %v14403_v32  ;;  %11155 = vmatprep.subr.mxu0 %v7924_v28  ;;  %11586 = vmatmul.mubr.f32.gmra.mxu1 %v5610_v37 }
 0x525   :  { %11643 = vmatprep.subr.mxu1 %v12584_v62  ;;  %11156 = vmatpush3.msra.mxu0 %v7924_v28  ;;  %v7921_v28 = vld [vmem:[%s15508_s4 + $0x8d0] sm:$0xff] }
 0x526   :  { %11644 = vmatpush3.msra.mxu1 %v12584_v62  ;;  %11157 = vmatprep.subr.mxu0 %v7923_v30 }
 0x527   :  { %11645 = vmatprep.subr.mxu1 %v12591_v0  ;;  %11101 = vmatprep.mubr.f32.mxu0 %v4241_v54  ;;  %v10666_v23 = vpop.f32.mrf.mxu0  ;;  %v4251_v54 = vpop.f32.mrf.mxu1 }
 0x528   :  { %11158 = vmatpush3.msra.mxu0 %v7923_v30  ;;  %11588 = vmatprep.mubr.f32.mxu1 %v5611_v26  ;;  %v14412_v37 = vadd.f32 %v10666_v23, %v14312_v9  ;;  %v7920_v9 = vld [vmem:[%s15508_s4 + $0x8c8] sm:$0xff]  ;;  %v7918_v30 = vld [vmem:[%s15508_s4 + $0x8b8] sm:$0xff]  ;;  %v7917_v26 = vld [vmem:[%s15508_s4 + $0x8b0] sm:$0xff] }
 0x529   :  { %11646 = vmatpush3.msra.mxu1 %v12591_v0  ;;  %11102 = vmatmul.mubr.f32.gmra.mxu0 %v11059_v19  ;;  %v7919_v19 = vld [vmem:[%s15508_s4 + $0x8c0] sm:$0xff]  ;;  %v7914_v23 = vld [vmem:[%s15508_s4 + $0x898] sm:$0xff] }
 0x52a   :  { %11159 = vmatprep.subr.mxu0 %v7922_v59  ;;  %11589 = vmatmul.mubr.f32.gmra.mxu1 %v5612_v45  ;;  %v11141_v45 = vpop.f32.mrf.mxu1 }
 0x52b   :  { %11647 = vmatprep.subr.mxu1 %v12598_v2  ;;  %11160 = vmatpush3.msra.mxu0 %v7922_v59  ;;  %v7915_v59 = vld [vmem:[%s15508_s4 + $0x8a0] sm:$0xff] }
 0x52c   :  { %11648 = vmatpush3.msra.mxu1 %v12598_v2  ;;  %11161 = vmatprep.subr.mxu0 %v7921_v28 }
 0x52d   :  { %11649 = vmatprep.subr.mxu1 %v12605_v4  ;;  %11104 = vmatprep.mubr.f32.mxu0 %v4251_v54  ;;  %v4464_v54 = vpop.f32.mrf.mxu1 }
 0x52e   :  { %11162 = vmatpush3.msra.mxu0 %v7921_v28  ;;  %11650 = vmatpush3.msra.mxu1 %v12605_v4  ;;  %v7913_v28 = vld [vmem:[%s15508_s4 + $0x890] sm:$0xff] }
 0x52f   :  { %11105 = vmatmul.mubr.f32.gmra.mxu0 %v11062_v35  ;;  %11163 = vmatprep.subr.mxu0 %v7920_v9  ;;  %v7916_v35 = vld [vmem:[%s15508_s4 + $0x8a8] sm:$0xff] }
 0x530   :  { %11651 = vmatprep.subr.mxu1 %v12612_v6  ;;  %11164 = vmatpush3.msra.mxu0 %v7920_v9  ;;  %v14458_v9 = vpop.f32.mrf.mxu0 }
 0x531   :  { %11652 = vmatpush3.msra.mxu1 %v12612_v6  ;;  %11165 = vmatprep.subr.mxu0 %v7919_v19  ;;  %15530 = vst [vmem:[#allocation24_spill] sm:$0xff] %v14458_v9 }
 0x532   :  { %11653 = vmatprep.subr.mxu1 %v12620_v8  ;;  %11166 = vmatpush3.msra.mxu0 %v7919_v19  ;;  %v5848_v19 = vld [vmem:[#allocation2 + $0x5c0] sm:$0xff] }
 0x533   :  { %11654 = vmatpush3.msra.mxu1 %v12620_v8  ;;  %11167 = vmatprep.subr.mxu0 %v7918_v30 }
 0x534   :  { %11655 = vmatprep.subr.mxu1 %v12628_v10  ;;  %11168 = vmatpush3.msra.mxu0 %v7918_v30  ;;  %v7912_v30 = vld [vmem:[%s15508_s4 + $0x888] sm:$0xff] }
 0x535   :  { %11656 = vmatpush3.msra.mxu1 %v12628_v10  ;;  %11169 = vmatprep.subr.mxu0 %v7917_v26 }
 0x536   :  { %11657 = vmatprep.subr.mxu1 %v12636_v12  ;;  %11170 = vmatpush3.msra.mxu0 %v7917_v26  ;;  %v5849_v26 = vld [vmem:[#allocation2 + $0x5c8] sm:$0xff] }
 0x537   :  { %11658 = vmatpush3.msra.mxu1 %v12636_v12  ;;  %11171 = vmatprep.subr.mxu0 %v7916_v35 }
 0x538   :  { %11659 = vmatprep.subr.mxu1 %v12644_v14  ;;  %11172 = vmatpush3.msra.mxu0 %v7916_v35 }
 0x539   :  { %11660 = vmatpush3.msra.mxu1 %v12644_v14  ;;  %11173 = vmatprep.subr.mxu0 %v7915_v59 }
 0x53a   :  { %11661 = vmatprep.subr.mxu1 %v12652_v16  ;;  %11174 = vmatpush3.msra.mxu0 %v7915_v59  ;;  %v11144_v59 = vpop.f32.mrf.mxu1 }
 0x53b   :  { %11662 = vmatpush3.msra.mxu1 %v12652_v16  ;;  %11175 = vmatprep.subr.mxu0 %v7914_v23 }
 0x53c   :  { %11663 = vmatprep.subr.mxu1 %v12658_v17  ;;  %11176 = vmatpush3.msra.mxu0 %v7914_v23  ;;  %v7911_v23 = vld [vmem:[%s15508_s4 + $0x880] sm:$0xff] }
 0x53d   :  { %11664 = vmatpush3.msra.mxu1 %v12658_v17  ;;  %11177 = vmatprep.subr.mxu0 %v7913_v28  ;;  %v10745_v35 = vpop.f32.mrf.mxu0 }
 0x53e   :  { %11665 = vmatprep.subr.mxu1 %v12664_v18  ;;  %11178 = vmatpush3.msra.mxu0 %v7913_v28  ;;  %v14467_v32 = vadd.f32 %v10745_v35, %v14367_v27  ;;  %v4474_v27 = vpop.f32.mrf.mxu1  ;;  %v7942_v28 = vld [vmem:[%s15508_s4 + $0x978] sm:$0xff] }
 0x53f   :  { %11666 = vmatpush3.msra.mxu1 %v12664_v18  ;;  %11667 = vmatprep.mubr.f32.mxu1 %v5848_v19  ;;  %v14473_v9 = vpop.f32.mrf.mxu0  ;;  %v5851_v19 = vld [vmem:[#allocation2 + $0x5d8] sm:$0xff] }
 0x540   :  { %15531 = vst [vmem:[#allocation25_spill] sm:$0xff] %v14473_v9  ;;  %11179 = vmatprep.subr.mxu0 %v7912_v30  ;;  %11668 = vmatmul.mubr.f32.vlgmr.msra.gmra.mxu1 %v5849_v26 }
 0x541   :  { %11723 = vmatprep.subr.mxu1 %v12559_v53  ;;  %11180 = vmatpush3.msra.mxu0 %v7912_v30  ;;  %v7941_v30 = vld [vmem:[%s15508_s4 + $0x970] sm:$0xff] }
 0x542   :  { %11724 = vmatpush3.msra.mxu1 %v12559_v53  ;;  %11181 = vmatprep.subr.mxu0 %v7911_v23 }
 0x543   :  { %11725 = vmatprep.subr.mxu1 %v12563_v56  ;;  %11182 = vmatpush3.msra.mxu0 %v7911_v23  ;;  %v10748_v35 = vpop.f32.mrf.mxu0  ;;  %v11147_v23 = vpop.f32.mrf.mxu1 }
 0x544   :  { %11183 = vmatprep.mubr.f32.mxu0 %v4464_v54  ;;  %11670 = vmatprep.mubr.f32.mxu1 %v5850_v7  ;;  %v14482_v26 = vadd.f32 %v10748_v35, %v14382_v57  ;;  %v5852_v54 = vld [vmem:[#allocation2 + $0x5e0] sm:$0xff]  ;;  %v7940_v7 = vld [vmem:[%s15508_s4 + $0x968] sm:$0xff] }
 0x545   :  { %11726 = vmatpush3.msra.mxu1 %v12563_v56  ;;  %11184 = vmatmul.mubr.f32.vlgmr.msra.gmra.mxu0 %v11141_v45  ;;  %v14488_v9 = vpop.f32.mrf.mxu0  ;;  %v5853_v57 = vld [vmem:[#allocation2 + $0x5e8] sm:$0xff] }
 0x546   :  { %15532 = vst [vmem:[#allocation26_spill] sm:$0xff] %v14488_v9  ;;  %11239 = vmatprep.subr.mxu0 %v7942_v28  ;;  %11671 = vmatmul.mubr.f32.gmra.mxu1 %v5851_v19  ;;  %v4484_v19 = vpop.f32.mrf.mxu1  ;;  %v6093_v9 = vld [vmem:[#allocation2 + $0x610] sm:$0xff] }
 0x547   :  { %11727 = vmatprep.subr.mxu1 %v12570_v58  ;;  %11240 = vmatpush3.msra.mxu0 %v7942_v28  ;;  %v7939_v28 = vld [vmem:[%s15508_s4 + $0x960] sm:$0xff] }
 0x548   :  { %11728 = vmatpush3.msra.mxu1 %v12570_v58  ;;  %11241 = vmatprep.subr.mxu0 %v7941_v30 }
 0x549   :  { %11729 = vmatprep.subr.mxu1 %v12577_v60  ;;  %11186 = vmatprep.mubr.f32.mxu0 %v4474_v27  ;;  %v10751_v45 = vpop.f32.mrf.mxu0 }
 0x54a   :  { %11242 = vmatpush3.msra.mxu0 %v7941_v30  ;;  %11673 = vmatprep.mubr.f32.mxu1 %v5852_v54  ;;  %v14497_v35 = vadd.f32 %v10751_v45, %v14397_v34  ;;  %v5854_v30 = vld [vmem:[#allocation2 + $0x5f0] sm:$0xff]  ;;  %v11150_v34 = vpop.f32.mrf.mxu1  ;;  %v5855_v54 = vld [vmem:[#allocation2 + $0x5f8] sm:$0xff] }
 0x54b   :  { %11730 = vmatpush3.msra.mxu1 %v12577_v60  ;;  %11187 = vmatmul.mubr.f32.gmra.mxu0 %v11144_v59  ;;  %v14503_v27 = vpop.f32.mrf.mxu0  ;;  %v7938_v59 = vld [vmem:[%s15508_s4 + $0x958] sm:$0xff] }
 0x54c   :  { %15533 = vst [vmem:[#allocation27_spill] sm:$0xff] %v14503_v27  ;;  %11243 = vmatprep.subr.mxu0 %v7940_v7  ;;  %11674 = vmatmul.mubr.f32.gmra.mxu1 %v5853_v57 }
 0x54d   :  { %11731 = vmatprep.subr.mxu1 %v12584_v62  ;;  %11244 = vmatpush3.msra.mxu0 %v7940_v7  ;;  %v7937_v7 = vld [vmem:[%s15508_s4 + $0x950] sm:$0xff] }
 0x54e   :  { %11732 = vmatpush3.msra.mxu1 %v12584_v62  ;;  %11245 = vmatprep.subr.mxu0 %v7939_v28 }
 0x54f   :  { %11733 = vmatprep.subr.mxu1 %v12591_v0  ;;  %11189 = vmatprep.mubr.f32.mxu0 %v4484_v19  ;;  %v10754_v45 = vpop.f32.mrf.mxu0  ;;  %v4494_v19 = vpop.f32.mrf.mxu1 }
 0x550   :  { %11246 = vmatpush3.msra.mxu0 %v7939_v28  ;;  %11676 = vmatprep.mubr.f32.mxu1 %v5854_v30  ;;  %v14512_v57 = vadd.f32 %v10754_v45, %v14412_v37  ;;  %v7936_v37 = vld [vmem:[%s15508_s4 + $0x948] sm:$0xff]  ;;  %v7934_v28 = vld [vmem:[%s15508_s4 + $0x938] sm:$0xff]  ;;  %v7933_v30 = vld [vmem:[%s15508_s4 + $0x930] sm:$0xff] }
 0x551   :  { %11734 = vmatpush3.msra.mxu1 %v12591_v0  ;;  %11190 = vmatmul.mubr.f32.gmra.mxu0 %v11147_v23  ;;  %v7935_v23 = vld [vmem:[%s15508_s4 + $0x940] sm:$0xff]  ;;  %v7930_v45 = vld [vmem:[%s15508_s4 + $0x918] sm:$0xff] }
 0x552   :  { %11247 = vmatprep.subr.mxu0 %v7938_v59  ;;  %11677 = vmatmul.mubr.f32.gmra.mxu1 %v5855_v54  ;;  %v11229_v54 = vpop.f32.mrf.mxu1 }
 0x553   :  { %11735 = vmatprep.subr.mxu1 %v12598_v2  ;;  %11248 = vmatpush3.msra.mxu0 %v7938_v59  ;;  %v7931_v59 = vld [vmem:[%s15508_s4 + $0x920] sm:$0xff] }
 0x554   :  { %11736 = vmatpush3.msra.mxu1 %v12598_v2  ;;  %11249 = vmatprep.subr.mxu0 %v7937_v7 }
 0x555   :  { %11737 = vmatprep.subr.mxu1 %v12605_v4  ;;  %11192 = vmatprep.mubr.f32.mxu0 %v4494_v19  ;;  %v4707_v19 = vpop.f32.mrf.mxu1 }
 0x556   :  { %11250 = vmatpush3.msra.mxu0 %v7937_v7  ;;  %11738 = vmatpush3.msra.mxu1 %v12605_v4  ;;  %v7929_v7 = vld [vmem:[%s15508_s4 + $0x910] sm:$0xff] }
 0x557   :  { %11193 = vmatmul.mubr.f32.gmra.mxu0 %v11150_v34  ;;  %11251 = vmatprep.subr.mxu0 %v7936_v37  ;;  %v7932_v34 = vld [vmem:[%s15508_s4 + $0x928] sm:$0xff] }
 0x558   :  { %11739 = vmatprep.subr.mxu1 %v12612_v6  ;;  %11252 = vmatpush3.msra.mxu0 %v7936_v37  ;;  %v14558_v37 = vpop.f32.mrf.mxu0 }
 0x559   :  { %11740 = vmatpush3.msra.mxu1 %v12612_v6  ;;  %11253 = vmatprep.subr.mxu0 %v7935_v23  ;;  %15534 = vst [vmem:[#allocation28_spill] sm:$0xff] %v14558_v37 }
 0x55a   :  { %11741 = vmatprep.subr.mxu1 %v12620_v8  ;;  %11254 = vmatpush3.msra.mxu0 %v7935_v23  ;;  %v6091_v23 = vld [vmem:[#allocation2 + $0x600] sm:$0xff] }
 0x55b   :  { %11742 = vmatpush3.msra.mxu1 %v12620_v8  ;;  %11255 = vmatprep.subr.mxu0 %v7934_v28 }
 0x55c   :  { %11743 = vmatprep.subr.mxu1 %v12628_v10  ;;  %11256 = vmatpush3.msra.mxu0 %v7934_v28  ;;  %v7928_v28 = vld [vmem:[%s15508_s4 + $0x908] sm:$0xff] }
 0x55d   :  { %11744 = vmatpush3.msra.mxu1 %v12628_v10  ;;  %11257 = vmatprep.subr.mxu0 %v7933_v30 }
 0x55e   :  { %11745 = vmatprep.subr.mxu1 %v12636_v12  ;;  %11258 = vmatpush3.msra.mxu0 %v7933_v30  ;;  %v6092_v30 = vld [vmem:[#allocation2 + $0x608] sm:$0xff] }
 0x55f   :  { %11746 = vmatpush3.msra.mxu1 %v12636_v12  ;;  %11259 = vmatprep.subr.mxu0 %v7932_v34 }
 0x560   :  { %11747 = vmatprep.subr.mxu1 %v12644_v14  ;;  %11260 = vmatpush3.msra.mxu0 %v7932_v34 }
 0x561   :  { %11748 = vmatpush3.msra.mxu1 %v12644_v14  ;;  %11261 = vmatprep.subr.mxu0 %v7931_v59 }
 0x562   :  { %11749 = vmatprep.subr.mxu1 %v12652_v16  ;;  %11262 = vmatpush3.msra.mxu0 %v7931_v59  ;;  %v11232_v59 = vpop.f32.mrf.mxu1 }
 0x563   :  { %11750 = vmatpush3.msra.mxu1 %v12652_v16  ;;  %11263 = vmatprep.subr.mxu0 %v7930_v45 }
 0x564   :  { %11751 = vmatprep.subr.mxu1 %v12658_v17  ;;  %11264 = vmatpush3.msra.mxu0 %v7930_v45  ;;  %v7927_v45 = vld [vmem:[%s15508_s4 + $0x900] sm:$0xff] }
 0x565   :  { %11752 = vmatpush3.msra.mxu1 %v12658_v17  ;;  %11265 = vmatprep.subr.mxu0 %v7929_v7  ;;  %v10833_v34 = vpop.f32.mrf.mxu0 }
 0x566   :  { %11753 = vmatprep.subr.mxu1 %v12664_v18  ;;  %11266 = vmatpush3.msra.mxu0 %v7929_v7  ;;  %v14567_v27 = vadd.f32 %v10833_v34, %v14467_v32  ;;  %v4717_v32 = vpop.f32.mrf.mxu1  ;;  %v7958_v7 = vld [vmem:[%s15508_s4 + $0x9f8] sm:$0xff] }
 0x567   :  { %11754 = vmatpush3.msra.mxu1 %v12664_v18  ;;  %11755 = vmatprep.mubr.f32.mxu1 %v6091_v23  ;;  %v14573_v37 = vpop.f32.mrf.mxu0  ;;  %v6094_v23 = vld [vmem:[#allocation2 + $0x618] sm:$0xff] }
 0x568   :  { %15535 = vst [vmem:[#allocation29_spill] sm:$0xff] %v14573_v37  ;;  %11267 = vmatprep.subr.mxu0 %v7928_v28  ;;  %11756 = vmatmul.mubr.f32.vlgmr.msra.gmra.mxu1 %v6092_v30 }
 0x569   :  { %11811 = vmatprep.subr.mxu1 %v12559_v53  ;;  %11268 = vmatpush3.msra.mxu0 %v7928_v28  ;;  %v7957_v28 = vld [vmem:[%s15508_s4 + $0x9f0] sm:$0xff] }
 0x56a   :  { %11812 = vmatpush3.msra.mxu1 %v12559_v53  ;;  %11269 = vmatprep.subr.mxu0 %v7927_v45 }
 0x56b   :  { %11813 = vmatprep.subr.mxu1 %v12563_v56  ;;  %11270 = vmatpush3.msra.mxu0 %v7927_v45  ;;  %v10836_v34 = vpop.f32.mrf.mxu0  ;;  %v11235_v45 = vpop.f32.mrf.mxu1 }
 0x56c   :  { %11271 = vmatprep.mubr.f32.mxu0 %v4707_v19  ;;  %11758 = vmatprep.mubr.f32.mxu1 %v6093_v9  ;;  %v14582_v30 = vadd.f32 %v10836_v34, %v14482_v26  ;;  %v6095_v19 = vld [vmem:[#allocation2 + $0x620] sm:$0xff]  ;;  %v7956_v9 = vld [vmem:[%s15508_s4 + $0x9e8] sm:$0xff] }
 0x56d   :  { %11814 = vmatpush3.msra.mxu1 %v12563_v56  ;;  %11272 = vmatmul.mubr.f32.vlgmr.msra.gmra.mxu0 %v11229_v54  ;;  %v14588_v37 = vpop.f32.mrf.mxu0  ;;  %v6096_v26 = vld [vmem:[#allocation2 + $0x628] sm:$0xff] }
 0x56e   :  { %15536 = vst [vmem:[#allocation30_spill] sm:$0xff] %v14588_v37  ;;  %11327 = vmatprep.subr.mxu0 %v7958_v7  ;;  %11759 = vmatmul.mubr.f32.gmra.mxu1 %v6094_v23  ;;  %v4727_v23 = vpop.f32.mrf.mxu1  ;;  %v6336_v37 = vld [vmem:[#allocation2 + $0x650] sm:$0xff] }
 0x56f   :  { %11815 = vmatprep.subr.mxu1 %v12570_v58  ;;  %11328 = vmatpush3.msra.mxu0 %v7958_v7  ;;  %v7955_v7 = vld [vmem:[%s15508_s4 + $0x9e0] sm:$0xff] }
 0x570   :  { %11816 = vmatpush3.msra.mxu1 %v12570_v58  ;;  %11329 = vmatprep.subr.mxu0 %v7957_v28 }
 0x571   :  { %11817 = vmatprep.subr.mxu1 %v12577_v60  ;;  %11274 = vmatprep.mubr.f32.mxu0 %v4717_v32  ;;  %v10839_v54 = vpop.f32.mrf.mxu0 }
 0x572   :  { %11330 = vmatpush3.msra.mxu0 %v7957_v28  ;;  %11761 = vmatprep.mubr.f32.mxu1 %v6095_v19  ;;  %v14597_v34 = vadd.f32 %v10839_v54, %v14497_v35  ;;  %v6097_v28 = vld [vmem:[#allocation2 + $0x630] sm:$0xff]  ;;  %v11238_v35 = vpop.f32.mrf.mxu1  ;;  %v6098_v19 = vld [vmem:[#allocation2 + $0x638] sm:$0xff] }
 0x573   :  { %11818 = vmatpush3.msra.mxu1 %v12577_v60  ;;  %11275 = vmatmul.mubr.f32.gmra.mxu0 %v11232_v59  ;;  %v14603_v32 = vpop.f32.mrf.mxu0  ;;  %v7954_v59 = vld [vmem:[%s15508_s4 + $0x9d8] sm:$0xff] }
 0x574   :  { %15537 = vst [vmem:[#allocation31_spill] sm:$0xff] %v14603_v32  ;;  %11331 = vmatprep.subr.mxu0 %v7956_v9  ;;  %11762 = vmatmul.mubr.f32.gmra.mxu1 %v6096_v26 }
 0x575   :  { %11819 = vmatprep.subr.mxu1 %v12584_v62  ;;  %11332 = vmatpush3.msra.mxu0 %v7956_v9  ;;  %v7953_v9 = vld [vmem:[%s15508_s4 + $0x9d0] sm:$0xff] }
 0x576   :  { %11820 = vmatpush3.msra.mxu1 %v12584_v62  ;;  %11333 = vmatprep.subr.mxu0 %v7955_v7 }
 0x577   :  { %11821 = vmatprep.subr.mxu1 %v12591_v0  ;;  %11277 = vmatprep.mubr.f32.mxu0 %v4727_v23  ;;  %v10842_v54 = vpop.f32.mrf.mxu0  ;;  %v4737_v23 = vpop.f32.mrf.mxu1 }
 0x578   :  { %11334 = vmatpush3.msra.mxu0 %v7955_v7  ;;  %11764 = vmatprep.mubr.f32.mxu1 %v6097_v28  ;;  %v14612_v26 = vadd.f32 %v10842_v54, %v14512_v57  ;;  %v7952_v57 = vld [vmem:[%s15508_s4 + $0x9c8] sm:$0xff]  ;;  %v7950_v7 = vld [vmem:[%s15508_s4 + $0x9b8] sm:$0xff]  ;;  %v7949_v28 = vld [vmem:[%s15508_s4 + $0x9b0] sm:$0xff] }
 0x579   :  { %11822 = vmatpush3.msra.mxu1 %v12591_v0  ;;  %11278 = vmatmul.mubr.f32.gmra.mxu0 %v11235_v45  ;;  %v7951_v45 = vld [vmem:[%s15508_s4 + $0x9c0] sm:$0xff]  ;;  %v7946_v54 = vld [vmem:[%s15508_s4 + $0x998] sm:$0xff] }
 0x57a   :  { %11335 = vmatprep.subr.mxu0 %v7954_v59  ;;  %11765 = vmatmul.mubr.f32.gmra.mxu1 %v6098_v19  ;;  %v11317_v19 = vpop.f32.mrf.mxu1 }
 0x57b   :  { %11823 = vmatprep.subr.mxu1 %v12598_v2  ;;  %11336 = vmatpush3.msra.mxu0 %v7954_v59  ;;  %v7947_v59 = vld [vmem:[%s15508_s4 + $0x9a0] sm:$0xff] }
 0x57c   :  { %11824 = vmatpush3.msra.mxu1 %v12598_v2  ;;  %11337 = vmatprep.subr.mxu0 %v7953_v9 }
 0x57d   :  { %11825 = vmatprep.subr.mxu1 %v12605_v4  ;;  %11280 = vmatprep.mubr.f32.mxu0 %v4737_v23  ;;  %v4950_v23 = vpop.f32.mrf.mxu1 }
 0x57e   :  { %11338 = vmatpush3.msra.mxu0 %v7953_v9  ;;  %11826 = vmatpush3.msra.mxu1 %v12605_v4  ;;  %v7945_v9 = vld [vmem:[%s15508_s4 + $0x990] sm:$0xff] }
 0x57f   :  { %11281 = vmatmul.mubr.f32.gmra.mxu0 %v11238_v35  ;;  %11339 = vmatprep.subr.mxu0 %v7952_v57  ;;  %v7948_v35 = vld [vmem:[%s15508_s4 + $0x9a8] sm:$0xff] }
 0x580   :  { %11827 = vmatprep.subr.mxu1 %v12612_v6  ;;  %11340 = vmatpush3.msra.mxu0 %v7952_v57  ;;  %v14658_v57 = vpop.f32.mrf.mxu0 }
 0x581   :  { %11828 = vmatpush3.msra.mxu1 %v12612_v6  ;;  %11341 = vmatprep.subr.mxu0 %v7951_v45  ;;  %15538 = vst [vmem:[#allocation32_spill] sm:$0xff] %v14658_v57 }
 0x582   :  { %11829 = vmatprep.subr.mxu1 %v12620_v8  ;;  %11342 = vmatpush3.msra.mxu0 %v7951_v45  ;;  %v6334_v45 = vld [vmem:[#allocation2 + $0x640] sm:$0xff] }
 0x583   :  { %11830 = vmatpush3.msra.mxu1 %v12620_v8  ;;  %11343 = vmatprep.subr.mxu0 %v7950_v7 }
 0x584   :  { %11831 = vmatprep.subr.mxu1 %v12628_v10  ;;  %11344 = vmatpush3.msra.mxu0 %v7950_v7  ;;  %v7944_v7 = vld [vmem:[%s15508_s4 + $0x988] sm:$0xff] }
 0x585   :  { %11832 = vmatpush3.msra.mxu1 %v12628_v10  ;;  %11345 = vmatprep.subr.mxu0 %v7949_v28 }
 0x586   :  { %11833 = vmatprep.subr.mxu1 %v12636_v12  ;;  %11346 = vmatpush3.msra.mxu0 %v7949_v28  ;;  %v6335_v28 = vld [vmem:[#allocation2 + $0x648] sm:$0xff] }
 0x587   :  { %11834 = vmatpush3.msra.mxu1 %v12636_v12  ;;  %11347 = vmatprep.subr.mxu0 %v7948_v35 }
 0x588   :  { %11835 = vmatprep.subr.mxu1 %v12644_v14  ;;  %11348 = vmatpush3.msra.mxu0 %v7948_v35 }
 0x589   :  { %11836 = vmatpush3.msra.mxu1 %v12644_v14  ;;  %11349 = vmatprep.subr.mxu0 %v7947_v59 }
 0x58a   :  { %11837 = vmatprep.subr.mxu1 %v12652_v16  ;;  %11350 = vmatpush3.msra.mxu0 %v7947_v59  ;;  %v11320_v59 = vpop.f32.mrf.mxu1 }
 0x58b   :  { %11838 = vmatpush3.msra.mxu1 %v12652_v16  ;;  %11351 = vmatprep.subr.mxu0 %v7946_v54 }
 0x58c   :  { %11839 = vmatprep.subr.mxu1 %v12658_v17  ;;  %11352 = vmatpush3.msra.mxu0 %v7946_v54  ;;  %v7943_v54 = vld [vmem:[%s15508_s4 + $0x980] sm:$0xff] }
 0x58d   :  { %11840 = vmatpush3.msra.mxu1 %v12658_v17  ;;  %11353 = vmatprep.subr.mxu0 %v7945_v9  ;;  %v10921_v35 = vpop.f32.mrf.mxu0 }
 0x58e   :  { %11841 = vmatprep.subr.mxu1 %v12664_v18  ;;  %11354 = vmatpush3.msra.mxu0 %v7945_v9  ;;  %v14667_v32 = vadd.f32 %v10921_v35, %v14567_v27  ;;  %v4960_v27 = vpop.f32.mrf.mxu1  ;;  %v7974_v9 = vld [vmem:[%s15508_s4 + $0xa78] sm:$0xff] }
 0x58f   :  { %11842 = vmatpush3.msra.mxu1 %v12664_v18  ;;  %11843 = vmatprep.mubr.f32.mxu1 %v6334_v45  ;;  %v14673_v57 = vpop.f32.mrf.mxu0  ;;  %v6337_v45 = vld [vmem:[#allocation2 + $0x658] sm:$0xff] }
 0x590   :  { %11355 = vmatprep.subr.mxu0 %v7944_v7  ;;  %11844 = vmatmul.mubr.f32.vlgmr.msra.gmra.mxu1 %v6335_v28 }
 0x591   :  { %11899 = vmatprep.subr.mxu1 %v12559_v53  ;;  %11356 = vmatpush3.msra.mxu0 %v7944_v7 }
 0x592   :  { %11900 = vmatpush3.msra.mxu1 %v12559_v53  ;;  %11357 = vmatprep.subr.mxu0 %v7943_v54  ;;  %v7973_v53 = vld [vmem:[%s15508_s4 + $0xa70] sm:$0xff] }
 0x593   :  { %11901 = vmatprep.subr.mxu1 %v12563_v56  ;;  %11358 = vmatpush3.msra.mxu0 %v7943_v54  ;;  %v10924_v35 = vpop.f32.mrf.mxu0  ;;  %v11323_v54 = vpop.f32.mrf.mxu1 }
 0x594   :  { %11359 = vmatprep.mubr.f32.mxu0 %v4950_v23  ;;  %11846 = vmatprep.mubr.f32.mxu1 %v6336_v37  ;;  %v14682_v28 = vadd.f32 %v10924_v35, %v14582_v30  ;;  %v6338_v23 = vld [vmem:[#allocation2 + $0x660] sm:$0xff]  ;;  %v6339_v37 = vld [vmem:[#allocation2 + $0x668] sm:$0xff]  ;;  %v6340_v35 = vld [vmem:[#allocation2 + $0x670] sm:$0xff] }
 0x595   :  { %11902 = vmatpush3.msra.mxu1 %v12563_v56  ;;  %11360 = vmatmul.mubr.f32.vlgmr.msra.gmra.mxu0 %v11317_v19  ;;  %v14688_v7 = vpop.f32.mrf.mxu0  ;;  %v7972_v56 = vld [vmem:[%s15508_s4 + $0xa68] sm:$0xff]  ;;  %v4970_v19 = vpop.f32.mrf.mxu1 }
 0x596   :  { %11415 = vmatprep.subr.mxu0 %v7974_v9  ;;  %11847 = vmatmul.mubr.f32.gmra.mxu1 %v6337_v45 }
 0x597   :  { %11903 = vmatprep.subr.mxu1 %v12570_v58  ;;  %11416 = vmatpush3.msra.mxu0 %v7974_v9  ;;  %v707_v9 = vadd.f32 %v13021_v50, %v13024_v51  ;;  %v6341_v50 = vld [vmem:[#allocation2 + $0x678] sm:$0xff] }
 0x598   :  { %11904 = vmatpush3.msra.mxu1 %v12570_v58  ;;  %11417 = vmatprep.subr.mxu0 %v7973_v53  ;;  %v7971_v58 = vld [vmem:[%s15508_s4 + $0xa60] sm:$0xff] }
 0x599   :  { %11905 = vmatprep.subr.mxu1 %v12577_v60  ;;  %11362 = vmatprep.mubr.f32.mxu0 %v4960_v27  ;;  %v10927_v30 = vpop.f32.mrf.mxu0 }
 0x59a   :  { %11418 = vmatpush3.msra.mxu0 %v7973_v53  ;;  %11849 = vmatprep.mubr.f32.mxu1 %v6338_v23  ;;  %v14697_v45 = vadd.f32 %v10927_v30, %v14597_v34  ;;  %v980_v34 = vadd.f32 %v13473_v40, %v707_v9  ;;  %v717_v40 = vadd.f32 %v13032_v61, %v13035_v63  ;;  %v15541_v9 = vld [vmem:[#allocation9_spill] sm:$0xff] }
 0x59b   :  { %11906 = vmatpush3.msra.mxu1 %v12577_v60  ;;  %11363 = vmatmul.mubr.f32.gmra.mxu0 %v11320_v59  ;;  %v14703_v27 = vpop.f32.mrf.mxu0  ;;  %v11326_v60 = vpop.f32.mrf.mxu1  ;;  %v7970_v59 = vld [vmem:[%s15508_s4 + $0xa58] sm:$0xff]  ;;  %v737_v30 = vadd.f32 %v13458_v33, %v13066_v22 }
 0x59c   :  { %11419 = vmatprep.subr.mxu0 %v7972_v56  ;;  %11850 = vmatmul.mubr.f32.gmra.mxu1 %v6339_v37  ;;  %v1223_v53 = vadd.f32 %v13573_v46, %v980_v34  ;;  %v15542_v34 = vld [vmem:[#allocation12_spill] sm:$0xff] }
 0x59d   :  { %11907 = vmatprep.subr.mxu1 %v12584_v62  ;;  %11420 = vmatpush3.msra.mxu0 %v7972_v56  ;;  %v4980_v46 = vpop.f32.mrf.mxu1 }
 0x59e   :  { %11908 = vmatpush3.msra.mxu1 %v12584_v62  ;;  %11421 = vmatprep.subr.mxu0 %v7971_v58  ;;  %v7969_v62 = vld [vmem:[%s15508_s4 + $0xa50] sm:$0xff]  ;;  %v1466_v56 = vadd.f32 %v13673_v15, %v1223_v53 }
 0x59f   :  { %11909 = vmatprep.subr.mxu1 %v12591_v0  ;;  %11365 = vmatprep.mubr.f32.mxu0 %v4970_v19  ;;  %v10930_v51 = vpop.f32.mrf.mxu0  ;;  %v14732_v61 = vpop.f32.mrf.mxu1  ;;  %v986_v19 = vadd.f32 %v13558_v36, %v737_v30  ;;  %v15553_v30 = vld [vmem:[#allocation30_spill] sm:$0xff] }
 0x5a0   :  { %11422 = vmatpush3.msra.mxu0 %v7971_v58  ;;  %11852 = vmatprep.mubr.f32.mxu1 %v6340_v35  ;;  %v14716_v23 = vadd.f32 %v10930_v51, %v14612_v26  ;;  %v982_v26 = vadd.f32 %v13488_v48, %v717_v40  ;;  %v727_v48 = vadd.f32 %v13042_v11, %v13045_v13  ;;  %v7961_v58 = vld [vmem:[%s15508_s4 + $0xa10] sm:$0xff]  ;;  %v6577_v51 = vld [vmem:[#allocation2 + $0x680] sm:$0xff] }
 0x5a1   :  { %11910 = vmatpush3.msra.mxu1 %v12591_v0  ;;  %11366 = vmatmul.mubr.f32.gmra.mxu0 %v11323_v54  ;;  %v1709_v0 = vadd.f32 %v13773_v41, %v1466_v56  ;;  %v7968_v54 = vld [vmem:[%s15508_s4 + $0xa48] sm:$0xff]  ;;  %v1229_v36 = vadd.f32 %v13658_v39, %v986_v19  ;;  %v7989_v19 = vld [vmem:[%s15508_s4 + $0xaf0] sm:$0xff] }
 0x5a2   :  { %11423 = vmatprep.subr.mxu0 %v7970_v59  ;;  %11853 = vmatmul.mubr.f32.gmra.mxu1 %v6341_v50  ;;  %v1225_v63 = vadd.f32 %v13588_v3, %v982_v26  ;;  %v14749_v3 = vpop.f32.mrf.mxu1  ;;  %v15546_v56 = vld [vmem:[#allocation14_spill] sm:$0xff] }
 0x5a3   :  { %11911 = vmatprep.subr.mxu1 %v12598_v2  ;;  %11424 = vmatpush3.msra.mxu0 %v7970_v59  ;;  %v1952_v15 = vadd.f32 %v13873_v55, %v1709_v0  ;;  %v984_v55 = vadd.f32 %v13503_v5, %v727_v48  ;;  %v1472_v35 = vadd.f32 %v15541_v9, %v1229_v36  ;;  %v15544_v59 = vld [vmem:[#allocation29_spill] sm:$0xff]  ;;  %v6578_v26 = vld [vmem:[#allocation2 + $0x688] sm:$0xff]  ;;  %v15548_v48 = vld [vmem:[#allocation11_spill] sm:$0xff] }
 0x5a4   :  { %11912 = vmatpush3.msra.mxu1 %v12598_v2  ;;  %11425 = vmatprep.subr.mxu0 %v7969_v62  ;;  %v7967_v2 = vld [vmem:[%s15508_s4 + $0xa40] sm:$0xff]  ;;  %v1468_v41 = vadd.f32 %v13688_v29, %v1225_v63  ;;  %v7965_v29 = vld [vmem:[%s15508_s4 + $0xa30] sm:$0xff] }
 0x5a5   :  { %11913 = vmatprep.subr.mxu1 %v12605_v4  ;;  %11368 = vmatprep.mubr.f32.mxu0 %v4980_v46  ;;  %v2195_v37 = vadd.f32 %v13973_v24, %v1952_v15  ;;  %v1227_v24 = vadd.f32 %v13603_v20, %v984_v55  ;;  %v15549_v55 = vld [vmem:[#allocation17_spill] sm:$0xff] }
 0x5a6   :  { %11426 = vmatpush3.msra.mxu0 %v7969_v62  ;;  %11914 = vmatpush3.msra.mxu1 %v12605_v4  ;;  %v7966_v4 = vld [vmem:[%s15508_s4 + $0xa38] sm:$0xff]  ;;  %v1711_v11 = vadd.f32 %v13788_v31, %v1468_v41  ;;  %v7964_v31 = vld [vmem:[%s15508_s4 + $0xa28] sm:$0xff] }
 0x5a7   :  { %11369 = vmatmul.mubr.f32.gmra.mxu0 %v11326_v60  ;;  %11427 = vmatprep.subr.mxu0 %v7968_v54  ;;  %v2438_v13 = vadd.f32 %v14073_v42, %v2195_v37  ;;  %v14767_v42 = vpop.f32.mrf.mxu1  ;;  %v1470_v20 = vadd.f32 %v13703_v38, %v1227_v24  ;;  %v7962_v38 = vld [vmem:[%s15508_s4 + $0xa18] sm:$0xff]  ;;  %v15545_v62 = vld [vmem:[#allocation10_spill] sm:$0xff]  ;;  %v6579_v37 = vld [vmem:[#allocation2 + $0x690] sm:$0xff] }
 0x5a8   :  { %11915 = vmatprep.subr.mxu1 %v12612_v6  ;;  %11428 = vmatpush3.msra.mxu0 %v7968_v54  ;;  %v1954_v5 = vadd.f32 %v13888_v47, %v1711_v11  ;;  %v1715_v40 = vadd.f32 %v15545_v62, %v1472_v35  ;;  %v15547_v54 = vld [vmem:[#allocation22_spill] sm:$0xff]  ;;  %v15551_v24 = vld [vmem:[#allocation13_spill] sm:$0xff] }
 0x5a9   :  { %11916 = vmatpush3.msra.mxu1 %v12612_v6  ;;  %11429 = vmatprep.subr.mxu0 %v7967_v2  ;;  %v2681_v6 = vadd.f32 %v14173_v1, %v2438_v13  ;;  %v7963_v1 = vld [vmem:[%s15508_s4 + $0xa20] sm:$0xff]  ;;  %v1713_v22 = vadd.f32 %v13803_v25, %v1470_v20  ;;  %v15550_v13 = vld [vmem:[#allocation26_spill] sm:$0xff] }
 0x5aa   :  { %11917 = vmatprep.subr.mxu1 %v12620_v8  ;;  %11430 = vmatpush3.msra.mxu0 %v7967_v2  ;;  %v1958_v41 = vadd.f32 %v15548_v48, %v1715_v40  ;;  %v15558_v35 = vld [vmem:[#allocation21_spill] sm:$0xff]  ;;  %v6584_v40 = vld [vmem:[#allocation2 + $0x6b8] sm:$0xff] }
 0x5ab   :  { %11918 = vmatpush3.msra.mxu1 %v12620_v8  ;;  %11431 = vmatprep.subr.mxu0 %v7966_v4  ;;  %v2197_v8 = vadd.f32 %v13988_v43, %v1954_v5  ;;  %v2924_v47 = vadd.f32 %v14273_v44, %v2681_v6  ;;  %v14788_v43 = vpop.f32.mrf.mxu1  ;;  %v1956_v25 = vadd.f32 %v13903_v21, %v1713_v22  ;;  %v15540_v44 = vld [vmem:[#allocation25_spill] sm:$0xff]  ;;  %v15543_v21 = vld [vmem:[#allocation19_spill] sm:$0xff]  ;;  %v15552_v6 = vld [vmem:[#allocation20_spill] sm:$0xff] }
 0x5ac   :  { %11919 = vmatprep.subr.mxu1 %v12628_v10  ;;  %11432 = vmatpush3.msra.mxu0 %v7966_v4  ;;  %v2201_v5 = vadd.f32 %v15551_v24, %v1958_v41  ;;  %v7983_v41 = vld [vmem:[%s15508_s4 + $0xac0] sm:$0xff]  ;;  %v7978_v24 = vld [vmem:[%s15508_s4 + $0xa98] sm:$0xff] }
 0x5ad   :  { %11920 = vmatpush3.msra.mxu1 %v12628_v10  ;;  %11433 = vmatprep.subr.mxu0 %v7965_v29  ;;  %v2440_v10 = vadd.f32 %v14088_v52, %v2197_v8  ;;  %v3167_v33 = vadd.f32 %v14373_v49, %v2924_v47  ;;  %v2199_v39 = vadd.f32 %v15542_v34, %v1956_v25  ;;  %v14807_v53 = vpop.f32.mrf.mxu1  ;;  %v6580_v8 = vld [vmem:[#allocation2 + $0x698] sm:$0xff]  ;;  %v15554_v47 = vld [vmem:[#allocation15_spill] sm:$0xff] }
 0x5ae   :  { %11921 = vmatprep.subr.mxu1 %v12636_v12  ;;  %11434 = vmatpush3.msra.mxu0 %v7965_v29 }
 0x5af   :  { %11922 = vmatpush3.msra.mxu1 %v12636_v12  ;;  %11435 = vmatprep.subr.mxu0 %v7964_v31  ;;  %v15539_v12 = vld [vmem:[#allocation16_spill] sm:$0xff]  ;;  %v3410_v49 = vadd.f32 %v15540_v44, %v3167_v33  ;;  %v2442_v46 = vadd.f32 %v15546_v56, %v2199_v39  ;;  %v6581_v33 = vld [vmem:[#allocation2 + $0x6a0] sm:$0xff]  ;;  %v15556_v44 = vld [vmem:[#allocation18_spill] sm:$0xff] }
 0x5b0   :  { %11923 = vmatprep.subr.mxu1 %v12644_v14  ;;  %11436 = vmatpush3.msra.mxu0 %v7964_v31  ;;  %v2683_v52 = vadd.f32 %v15539_v12, %v2440_v10  ;;  %v7988_v12 = vld [vmem:[%s15508_s4 + $0xae8] sm:$0xff]  ;;  %v15559_v39 = vld [vmem:[#allocation31_spill] sm:$0xff] }
 0x5b1   :  { %11924 = vmatpush3.msra.mxu1 %v12644_v14  ;;  %11437 = vmatprep.subr.mxu0 %v7963_v1  ;;  %v14802_v14 = vpop.f32.mrf.mxu0  ;;  %v3653_v50 = vadd.f32 %v15544_v59, %v3410_v49  ;;  %v2685_v11 = vadd.f32 %v15549_v55, %v2442_v46 }
 0x5b2   :  { %11925 = vmatprep.subr.mxu1 %v12652_v16  ;;  %11438 = vmatpush3.msra.mxu0 %v7963_v1  ;;  %v2926_v60 = vadd.f32 %v15543_v21, %v2683_v52  ;;  %v2444_v1 = vadd.f32 %v15554_v47, %v2201_v5  ;;  %v7977_v5 = vld [vmem:[%s15508_s4 + $0xa90] sm:$0xff] }
 0x5b3   :  { %11926 = vmatpush3.msra.mxu1 %v12652_v16  ;;  %11439 = vmatprep.subr.mxu0 %v7962_v38  ;;  %v7960_v16 = vld [vmem:[%s15508_s4 + $0xa08] sm:$0xff]  ;;  %v3896_v15 = vadd.f32 %v14673_v57, %v3653_v50  ;;  %v5213_v57 = vpop.f32.mrf.mxu1  ;;  %v2928_v31 = vadd.f32 %v15552_v6, %v2685_v11 }
 0x5b4   :  { %11927 = vmatprep.subr.mxu1 %v12658_v17  ;;  %11440 = vmatpush3.msra.mxu0 %v7962_v38  ;;  %v3169_v63 = vadd.f32 %v15547_v54, %v2926_v60  ;;  %v2687_v49 = vadd.f32 %v15556_v44, %v2444_v1  ;;  %v6583_v60 = vld [vmem:[#allocation2 + $0x6b0] sm:$0xff]  ;;  %v7976_v6 = vld [vmem:[%s15508_s4 + $0xa88] sm:$0xff] }
 0x5b5   :  { %11928 = vmatpush3.msra.mxu1 %v12658_v17  ;;  %11441 = vmatprep.subr.mxu0 %v7961_v58  ;;  %v11009_v0 = vpop.f32.mrf.mxu0  ;;  %v7959_v17 = vld [vmem:[%s15508_s4 + $0xa00] sm:$0xff]  ;;  %v11414_v36 = vpop.f32.mrf.mxu1  ;;  %v8004_v1 = vld [vmem:[%s15508_s4 + $0xb68] sm:$0xff] }
 0x5b6   :  { %11929 = vmatprep.subr.mxu1 %v12664_v18  ;;  %11442 = vmatpush3.msra.mxu0 %v7961_v58  ;;  %v14819_v2 = vadd.f32 %v11009_v0, %v14667_v32  ;;  %v3412_v29 = vadd.f32 %v15550_v13, %v3169_v63  ;;  %v15557_v58 = vld [vmem:[#allocation27_spill] sm:$0xff]  ;;  %v2930_v34 = vadd.f32 %v15558_v35, %v2687_v49  ;;  %v15561_v0 = vld [vmem:[#allocation28_spill] sm:$0xff] }
 0x5b7   :  { %11930 = vmatpush3.msra.mxu1 %v12664_v18  ;;  %11931 = vmatprep.mubr.f32.mxu1 %v6577_v51  ;;  %v4100_v4 = vpop.f32.mrf.mxu0  ;;  %v7990_v18 = vld [vmem:[%s15508_s4 + $0xaf8] sm:$0xff]  ;;  %v5223_v59 = vpop.f32.mrf.mxu1  ;;  %v7981_v13 = vld [vmem:[%s15508_s4 + $0xab0] sm:$0xff] }
 0x5b8   :  { %11443 = vmatprep.subr.mxu0 %v7960_v16  ;;  %11932 = vmatmul.mubr.f32.vlgmr.msra.gmra.mxu1 %v6578_v26  ;;  %v14828_v32 = vadd.f32 %v4100_v4, %v3896_v15  ;;  %v3655_v20 = vadd.f32 %v15553_v30, %v3412_v29  ;;  %v15560_v51 = vld [vmem:[#allocation24_spill] sm:$0xff]  ;;  %v7979_v29 = vld [vmem:[%s15508_s4 + $0xaa0] sm:$0xff] }
 0x5b9   :  { %11444 = vmatpush3.msra.mxu0 %v7960_v16  ;;  %11447 = vmatprep.mubr.f32.mxu0 %v14749_v3  ;;  %v15555_v3 = vld [vmem:[#allocation23_spill] sm:$0xff]  ;;  %v3173_v62 = vadd.f32 %v15560_v51, %v2930_v34  ;;  %v11493_v46 = vpop.f32.mrf.mxu1  ;;  %v7982_v4 = vld [vmem:[%s15508_s4 + $0xab8] sm:$0xff] }
 0x5ba   :  { %11445 = vmatprep.subr.mxu0 %v7959_v17  ;;  %11934 = vmatprep.mubr.f32.mxu1 %v6579_v37  ;;  %v3171_v10 = vadd.f32 %v15555_v3, %v2928_v31  ;;  %v3898_v38 = vadd.f32 %v14688_v7, %v3655_v20  ;;  %v7985_v16 = vld [vmem:[%s15508_s4 + $0xad0] sm:$0xff]  ;;  %v7975_v31 = vld [vmem:[%s15508_s4 + $0xa80] sm:$0xff]  ;;  %v8006_v20 = vld [vmem:[%s15508_s4 + $0xb78] sm:$0xff] }
 0x5bb   :  { %11446 = vmatpush3.msra.mxu0 %v7959_v17  ;;  %v11012_v22 = vpop.f32.mrf.mxu0  ;;  %v3416_v54 = vadd.f32 %v15561_v0, %v3173_v62  ;;  %v5436_v48 = vpop.f32.mrf.mxu1  ;;  %v8003_v3 = vld [vmem:[%s15508_s4 + $0xb60] sm:$0xff]  ;;  %v7994_v62 = vld [vmem:[%s15508_s4 + $0xb18] sm:$0xff] }
 0x5bc   :  { %11448 = vmatmul.mubr.f32.vlgmr.msra.gmra.mxu0 %v14732_v61  ;;  %11503 = vmatprep.subr.mxu0 %v7990_v18  ;;  %v14845_v25 = vadd.f32 %v11012_v22, %v14682_v28  ;;  %v3414_v9 = vadd.f32 %v15557_v58, %v3171_v10  ;;  %v6582_v61 = vld [vmem:[#allocation2 + $0x6a8] sm:$0xff]  ;;  %v7987_v28 = vld [vmem:[%s15508_s4 + $0xae0] sm:$0xff] }
 0x5bd   :  { %11935 = vmatmul.mubr.f32.gmra.mxu1 %v6580_v8  ;;  %11504 = vmatpush3.msra.mxu0 %v7990_v18  ;;  %v4110_v52 = vpop.f32.mrf.mxu0  ;;  %v8005_v8 = vld [vmem:[%s15508_s4 + $0xb70] sm:$0xff] }
 0x5be   :  { %11505 = vmatprep.subr.mxu0 %v7989_v19  ;;  %11450 = vmatprep.mubr.f32.mxu0 %v14788_v43  ;;  %v14853_v7 = vadd.f32 %v4110_v52, %v3898_v38  ;;  %v3657_v21 = vadd.f32 %v15559_v39, %v3414_v9  ;;  %v7986_v43 = vld [vmem:[%s15508_s4 + $0xad8] sm:$0xff] }
 0x5bf   :  { %11506 = vmatpush3.msra.mxu0 %v7989_v19  ;;  %11937 = vmatprep.mubr.f32.mxu1 %v6581_v33 }
 0x5c0   :  { %11451 = vmatmul.mubr.f32.gmra.mxu0 %v14767_v42  ;;  %11507 = vmatprep.subr.mxu0 %v7988_v12  ;;  %v3900_v56 = vadd.f32 %v14703_v27, %v3657_v21  ;;  %v15562_v27 = vld [vmem:[#allocation32_spill] sm:$0xff] }
 0x5c1   :  { %11938 = vmatmul.mubr.f32.gmra.mxu1 %v6582_v61  ;;  %11508 = vmatpush3.msra.mxu0 %v7988_v12  ;;  %v11015_v50 = vpop.f32.mrf.mxu0  ;;  %v3659_v15 = vadd.f32 %v15562_v27, %v3416_v54  ;;  %v8001_v12 = vld [vmem:[%s15508_s4 + $0xb50] sm:$0xff]  ;;  %v7999_v61 = vld [vmem:[%s15508_s4 + $0xb40] sm:$0xff]  ;;  %v8022_v54 = vld [vmem:[%s15508_s4 + $0xbf8] sm:$0xff] }
 0x5c2   :  { %11509 = vmatprep.subr.mxu0 %v7987_v28  ;;  %11453 = vmatprep.mubr.f32.mxu0 %v5213_v57  ;;  %v14867_v42 = vadd.f32 %v11015_v50, %v14697_v45  ;;  %v7984_v45 = vld [vmem:[%s15508_s4 + $0xac8] sm:$0xff] }
 0x5c3   :  { %11510 = vmatpush3.msra.mxu0 %v7987_v28  ;;  %11940 = vmatprep.mubr.f32.mxu1 %v6583_v60  ;;  %v4120_v26 = vpop.f32.mrf.mxu0  ;;  %v3902_v17 = vadd.f32 %v14802_v14, %v3659_v15  ;;  %v11496_v14 = vpop.f32.mrf.mxu1  ;;  %v7996_v60 = vld [vmem:[%s15508_s4 + $0xb28] sm:$0xff]  ;;  %v8019_v15 = vld [vmem:[%s15508_s4 + $0xbe0] sm:$0xff] }
 0x5c4   :  { %11454 = vmatmul.mubr.f32.gmra.mxu0 %v14807_v53  ;;  %11511 = vmatprep.subr.mxu0 %v7986_v43  ;;  %v14874_v63 = vadd.f32 %v4120_v26, %v3900_v56  ;;  %v7991_v26 = vld [vmem:[%s15508_s4 + $0xb00] sm:$0xff]  ;;  %v8020_v27 = vld [vmem:[%s15508_s4 + $0xbe8] sm:$0xff] }
 0x5c5   :  { %11941 = vmatmul.mubr.f32.gmra.mxu1 %v6584_v40  ;;  %11512 = vmatpush3.msra.mxu0 %v7986_v43  ;;  %v5446_v57 = vpop.f32.mrf.mxu1 }
 0x5c6   :  { %11513 = vmatprep.subr.mxu0 %v7985_v16  ;;  %11456 = vmatprep.mubr.f32.mxu0 %v5223_v59  ;;  %v7995_v59 = vld [vmem:[%s15508_s4 + $0xb20] sm:$0xff] }
 0x5c7   :  { %11514 = vmatpush3.msra.mxu0 %v7985_v16  ;;  %v11018_v53 = vpop.f32.mrf.mxu0  ;;  %v11499_v18 = vpop.f32.mrf.mxu1  ;;  %v7992_v16 = vld [vmem:[%s15508_s4 + $0xb08] sm:$0xff] }
 0x5c8   :  { %11457 = vmatmul.mubr.f32.gmra.mxu0 %v11414_v36  ;;  %11515 = vmatprep.subr.mxu0 %v7984_v45  ;;  %v14885_v37 = vadd.f32 %v11018_v53, %v14716_v23  ;;  %v7980_v23 = vld [vmem:[%s15508_s4 + $0xaa8] sm:$0xff]  ;;  %v8002_v36 = vld [vmem:[%s15508_s4 + $0xb58] sm:$0xff] }
 0x5c9   :  { %11516 = vmatpush3.msra.mxu0 %v7984_v45  ;;  %11535 = vmatprep.mubr.f32.mxu0 %v5436_v48  ;;  %v4130_v55 = vpop.f32.mrf.mxu0  ;;  %v5456_v30 = vpop.f32.mrf.mxu1 }
 0x5ca   :  { %11517 = vmatprep.subr.mxu0 %v7983_v41  ;;  %v14890_v11 = vadd.f32 %v4130_v55, %v3902_v17  ;;  %v8017_v17 = vld [vmem:[%s15508_s4 + $0xbd0] sm:$0xff] }
 0x5cb   :  { %11518 = vmatpush3.msra.mxu0 %v7983_v41  ;;  %v11502_v47 = vpop.f32.mrf.mxu1  ;;  %v8018_v41 = vld [vmem:[%s15508_s4 + $0xbd8] sm:$0xff] }
 0x5cc   :  { %11519 = vmatprep.subr.mxu0 %v7982_v4 }
 0x5cd   :  { %11520 = vmatpush3.msra.mxu0 %v7982_v4  ;;  %v5466_v33 = vpop.f32.mrf.mxu1 }
 0x5ce   :  { %11521 = vmatprep.subr.mxu0 %v7981_v13 }
 0x5cf   :  { %11522 = vmatpush3.msra.mxu0 %v7981_v13  ;;  %v8015_v13 = vld [vmem:[%s15508_s4 + $0xbc0] sm:$0xff] }
 0x5d0   :  { %11523 = vmatprep.subr.mxu0 %v7980_v23 }
 0x5d1   :  { %11524 = vmatpush3.msra.mxu0 %v7980_v23 }
 0x5d2   :  { %11525 = vmatprep.subr.mxu0 %v7979_v29 }
 0x5d3   :  { %11526 = vmatpush3.msra.mxu0 %v7979_v29  ;;  %v8014_v29 = vld [vmem:[%s15508_s4 + $0xbb8] sm:$0xff] }
 0x5d4   :  { %11527 = vmatprep.subr.mxu0 %v7978_v24 }
 0x5d5   :  { %11528 = vmatpush3.msra.mxu0 %v7978_v24 }
 0x5d6   :  { %11529 = vmatprep.subr.mxu0 %v7977_v5 }
 0x5d7   :  { %11530 = vmatpush3.msra.mxu0 %v7977_v5 }
 0x5d8   :  { %11531 = vmatprep.subr.mxu0 %v7976_v6 }
 0x5d9   :  { %11532 = vmatpush3.msra.mxu0 %v7976_v6 }
 0x5da   :  { %11533 = vmatprep.subr.mxu0 %v7975_v31 }
 0x5db   :  { %11534 = vmatpush3.msra.mxu0 %v7975_v31 }
 0x5dc   :  { %11536 = vmatmul.mubr.f32.vlgmr.msra.gmra.mxu0 %v11493_v46  ;;  %11591 = vmatprep.subr.mxu0 %v8006_v20  ;;  %v7993_v46 = vld [vmem:[%s15508_s4 + $0xb10] sm:$0xff] }
 0x5dd   :  { %11592 = vmatpush3.msra.mxu0 %v8006_v20  ;;  %11538 = vmatprep.mubr.f32.mxu0 %v5446_v57  ;;  %v11097_v19 = vpop.f32.mrf.mxu0  ;;  %v8013_v57 = vld [vmem:[%s15508_s4 + $0xbb0] sm:$0xff]  ;;  %v8011_v20 = vld [vmem:[%s15508_s4 + $0xba0] sm:$0xff] }
 0x5de   :  { %11593 = vmatprep.subr.mxu0 %v8005_v8  ;;  %v14923_v22 = vadd.f32 %v11097_v19, %v14819_v2  ;;  %v11581_v2 = vpop.f32.mrf.mxu1 }
 0x5df   :  { %11594 = vmatpush3.msra.mxu0 %v8005_v8  ;;  %v4343_v10 = vpop.f32.mrf.mxu0  ;;  %v8010_v8 = vld [vmem:[%s15508_s4 + $0xb98] sm:$0xff] }
 0x5e0   :  { %11539 = vmatmul.mubr.f32.gmra.mxu0 %v11496_v14  ;;  %11595 = vmatprep.subr.mxu0 %v8004_v1  ;;  %v14929_v38 = vadd.f32 %v4343_v10, %v14828_v32  ;;  %v8000_v32 = vld [vmem:[%s15508_s4 + $0xb48] sm:$0xff]  ;;  %v5679_v58 = vpop.f32.mrf.mxu1 }
 0x5e1   :  { %11596 = vmatpush3.msra.mxu0 %v8004_v1  ;;  %11541 = vmatprep.mubr.f32.mxu0 %v5456_v30 }
 0x5e2   :  { %11597 = vmatprep.subr.mxu0 %v8003_v3  ;;  %v11584_v39 = vpop.f32.mrf.mxu1 }
 0x5e3   :  { %11598 = vmatpush3.msra.mxu0 %v8003_v3  ;;  %v11100_v52 = vpop.f32.mrf.mxu0 }
 0x5e4   :  { %11542 = vmatmul.mubr.f32.gmra.mxu0 %v11499_v18  ;;  %11599 = vmatprep.subr.mxu0 %v8002_v36  ;;  %v14938_v44 = vadd.f32 %v11100_v52, %v14845_v25  ;;  %v7998_v25 = vld [vmem:[%s15508_s4 + $0xb38] sm:$0xff]  ;;  %v5689_v50 = vpop.f32.mrf.mxu1  ;;  %v8012_v18 = vld [vmem:[%s15508_s4 + $0xba8] sm:$0xff] }
 0x5e5   :  { %11600 = vmatpush3.msra.mxu0 %v8002_v36  ;;  %11544 = vmatprep.mubr.f32.mxu0 %v5466_v33  ;;  %v4353_v49 = vpop.f32.mrf.mxu0  ;;  %v8008_v33 = vld [vmem:[%s15508_s4 + $0xb88] sm:$0xff]  ;;  %v8007_v36 = vld [vmem:[%s15508_s4 + $0xb80] sm:$0xff]  ;;  %v8038_v52 = vld [vmem:[%s15508_s4 + $0xc78] sm:$0xff] }
 0x5e6   :  { %11601 = vmatprep.subr.mxu0 %v8001_v12  ;;  %v14944_v9 = vadd.f32 %v4353_v49, %v14853_v7  ;;  %v7997_v7 = vld [vmem:[%s15508_s4 + $0xb30] sm:$0xff] }
 0x5e7   :  { %11602 = vmatpush3.msra.mxu0 %v8001_v12 }
 0x5e8   :  { %11545 = vmatmul.mubr.f32.gmra.mxu0 %v11502_v47  ;;  %11603 = vmatprep.subr.mxu0 %v8000_v32 }
 0x5e9   :  { %11604 = vmatpush3.msra.mxu0 %v8000_v32  ;;  %11623 = vmatprep.mubr.f32.mxu0 %v5679_v58  ;;  %v11103_v28 = vpop.f32.mrf.mxu0  ;;  %v8037_v58 = vld [vmem:[%s15508_s4 + $0xc70] sm:$0xff] }
 0x5ea   :  { %11605 = vmatprep.subr.mxu0 %v7999_v61  ;;  %v14953_v35 = vadd.f32 %v11103_v28, %v14867_v42  ;;  %v11587_v42 = vpop.f32.mrf.mxu1  ;;  %v8034_v28 = vld [vmem:[%s15508_s4 + $0xc58] sm:$0xff] }
 0x5eb   :  { %11606 = vmatpush3.msra.mxu0 %v7999_v61  ;;  %v4363_v34 = vpop.f32.mrf.mxu0 }
 0x5ec   :  { %11607 = vmatprep.subr.mxu0 %v7998_v25  ;;  %v14959_v21 = vadd.f32 %v4363_v34, %v14874_v63  ;;  %v5699_v0 = vpop.f32.mrf.mxu1  ;;  %v8021_v63 = vld [vmem:[%s15508_s4 + $0xbf0] sm:$0xff]  ;;  %v8032_v34 = vld [vmem:[%s15508_s4 + $0xc48] sm:$0xff] }
 0x5ed   :  { %11608 = vmatpush3.msra.mxu0 %v7998_v25  ;;  %v8035_v25 = vld [vmem:[%s15508_s4 + $0xc60] sm:$0xff] }
 0x5ee   :  { %11609 = vmatprep.subr.mxu0 %v7997_v7  ;;  %v11590_v45 = vpop.f32.mrf.mxu1 }
 0x5ef   :  { %11610 = vmatpush3.msra.mxu0 %v7997_v7  ;;  %v11106_v43 = vpop.f32.mrf.mxu0  ;;  %v8033_v7 = vld [vmem:[%s15508_s4 + $0xc50] sm:$0xff] }
 0x5f0   :  { %11611 = vmatprep.subr.mxu0 %v7996_v60  ;;  %v14968_v51 = vadd.f32 %v11106_v43, %v14885_v37  ;;  %v5709_v48 = vpop.f32.mrf.mxu1  ;;  %v8016_v37 = vld [vmem:[%s15508_s4 + $0xbc8] sm:$0xff]  ;;  %v8029_v43 = vld [vmem:[%s15508_s4 + $0xc30] sm:$0xff] }
 0x5f1   :  { %11612 = vmatpush3.msra.mxu0 %v7996_v60  ;;  %v4373_v40 = vpop.f32.mrf.mxu0  ;;  %v8030_v60 = vld [vmem:[%s15508_s4 + $0xc38] sm:$0xff] }
 0x5f2   :  { %11613 = vmatprep.subr.mxu0 %v7995_v59  ;;  %v14974_v56 = vadd.f32 %v4373_v40, %v14890_v11 }
 0x5f3   :  { %11614 = vmatpush3.msra.mxu0 %v7995_v59 }
 0x5f4   :  { %11615 = vmatprep.subr.mxu0 %v7994_v62 }
 0x5f5   :  { %11616 = vmatpush3.msra.mxu0 %v7994_v62 }
 0x5f6   :  { %11617 = vmatprep.subr.mxu0 %v7993_v46 }
 0x5f7   :  { %11618 = vmatpush3.msra.mxu0 %v7993_v46 }
 0x5f8   :  { %11619 = vmatprep.subr.mxu0 %v7992_v16 }
 0x5f9   :  { %11620 = vmatpush3.msra.mxu0 %v7992_v16  ;;  %v8026_v16 = vld [vmem:[%s15508_s4 + $0xc18] sm:$0xff] }
 0x5fa   :  { %11621 = vmatprep.subr.mxu0 %v7991_v26 }
 0x5fb   :  { %11622 = vmatpush3.msra.mxu0 %v7991_v26 }
 0x5fc   :  { %11624 = vmatmul.mubr.f32.vlgmr.msra.gmra.mxu0 %v11581_v2  ;;  %11679 = vmatprep.subr.mxu0 %v8022_v54 }
 0x5fd   :  { %11680 = vmatpush3.msra.mxu0 %v8022_v54  ;;  %11626 = vmatprep.mubr.f32.mxu0 %v5689_v50  ;;  %v8028_v50 = vld [vmem:[%s15508_s4 + $0xc28] sm:$0xff] }
 0x5fe   :  { %11681 = vmatprep.subr.mxu0 %v8021_v63 }
 0x5ff   :  { %11682 = vmatpush3.msra.mxu0 %v8021_v63 }
 0x600   :  { %11627 = vmatmul.mubr.f32.gmra.mxu0 %v11584_v39  ;;  %11683 = vmatprep.subr.mxu0 %v8020_v27  ;;  %v15000_v53 = vpop.f32.mrf.mxu1  ;;  %v8031_v39 = vld [vmem:[%s15508_s4 + $0xc40] sm:$0xff] }
 0x601   :  { %11684 = vmatpush3.msra.mxu0 %v8020_v27  ;;  %11629 = vmatprep.mubr.f32.mxu0 %v5699_v0  ;;  %v8025_v0 = vld [vmem:[%s15508_s4 + $0xc10] sm:$0xff] }
 0x602   :  { %11685 = vmatprep.subr.mxu0 %v8019_v15  ;;  %v5922_v55 = vpop.f32.mrf.mxu1 }
 0x603   :  { %11686 = vmatpush3.msra.mxu0 %v8019_v15 }
 0x604   :  { %11630 = vmatmul.mubr.f32.gmra.mxu0 %v11587_v42  ;;  %11687 = vmatprep.subr.mxu0 %v8018_v41 }
 0x605   :  { %11688 = vmatpush3.msra.mxu0 %v8018_v41  ;;  %11632 = vmatprep.mubr.f32.mxu0 %v5709_v48  ;;  %v11185_v4 = vpop.f32.mrf.mxu0  ;;  %v8023_v41 = vld [vmem:[%s15508_s4 + $0xc00] sm:$0xff] }
 0x606   :  { %11689 = vmatprep.subr.mxu0 %v8017_v17  ;;  %v15009_v11 = vadd.f32 %v11185_v4, %v14923_v22  ;;  %v11672_v31 = vpop.f32.mrf.mxu1  ;;  %v8009_v22 = vld [vmem:[%s15508_s4 + $0xb90] sm:$0xff] }
 0x607   :  { %11690 = vmatpush3.msra.mxu0 %v8017_v17  ;;  %v4586_v14 = vpop.f32.mrf.mxu0 }
 0x608   :  { %11633 = vmatmul.mubr.f32.gmra.mxu0 %v11590_v45  ;;  %11691 = vmatprep.subr.mxu0 %v8016_v37  ;;  %v15015_v23 = vadd.f32 %v4586_v14, %v14929_v38  ;;  %v5932_v1 = vpop.f32.mrf.mxu1  ;;  %v8024_v45 = vld [vmem:[%s15508_s4 + $0xc08] sm:$0xff] }
 0x609   :  { %11692 = vmatpush3.msra.mxu0 %v8016_v37  ;;  %11711 = vmatprep.mubr.f32.mxu0 %v5922_v55  ;;  %v8053_v55 = vld [vmem:[%s15508_s4 + $0xcf0] sm:$0xff]  ;;  %v8052_v14 = vld [vmem:[%s15508_s4 + $0xce8] sm:$0xff] }
 0x60a   :  { %11693 = vmatprep.subr.mxu0 %v8015_v13 }
 0x60b   :  { %11694 = vmatpush3.msra.mxu0 %v8015_v13  ;;  %v11188_v24 = vpop.f32.mrf.mxu0 }
 0x60c   :  { %11695 = vmatprep.subr.mxu0 %v8014_v29  ;;  %v15024_v5 = vadd.f32 %v11188_v24, %v14938_v44  ;;  %v11675_v38 = vpop.f32.mrf.mxu1 }
 0x60d   :  { %11696 = vmatpush3.msra.mxu0 %v8014_v29  ;;  %v4596_v6 = vpop.f32.mrf.mxu0  ;;  %v8051_v29 = vld [vmem:[%s15508_s4 + $0xce0] sm:$0xff] }
 0x60e   :  { %11697 = vmatprep.subr.mxu0 %v8013_v57  ;;  %v15030_v30 = vadd.f32 %v4596_v6, %v14944_v9  ;;  %v5942_v32 = vpop.f32.mrf.mxu1  ;;  %v8036_v9 = vld [vmem:[%s15508_s4 + $0xc68] sm:$0xff] }
 0x60f   :  { %11698 = vmatpush3.msra.mxu0 %v8013_v57 }
 0x610   :  { %11699 = vmatprep.subr.mxu0 %v8012_v18 }
 0x611   :  { %11700 = vmatpush3.msra.mxu0 %v8012_v18  ;;  %v11191_v47 = vpop.f32.mrf.mxu0 }
 0x612   :  { %11701 = vmatprep.subr.mxu0 %v8011_v20  ;;  %v15039_v19 = vadd.f32 %v11191_v47, %v14953_v35  ;;  %v11678_v61 = vpop.f32.mrf.mxu1  ;;  %v8046_v47 = vld [vmem:[%s15508_s4 + $0xcb8] sm:$0xff] }
 0x613   :  { %11702 = vmatpush3.msra.mxu0 %v8011_v20  ;;  %v4606_v3 = vpop.f32.mrf.mxu0  ;;  %v8048_v20 = vld [vmem:[%s15508_s4 + $0xcc8] sm:$0xff] }
 0x614   :  { %11703 = vmatprep.subr.mxu0 %v8010_v8  ;;  %v15045_v10 = vadd.f32 %v4606_v3, %v14959_v21  ;;  %v5952_v35 = vpop.f32.mrf.mxu1 }
 0x615   :  { %11704 = vmatpush3.msra.mxu0 %v8010_v8  ;;  %v8047_v8 = vld [vmem:[%s15508_s4 + $0xcc0] sm:$0xff] }
 0x616   :  { %11705 = vmatprep.subr.mxu0 %v8009_v22 }
 0x617   :  { %11706 = vmatpush3.msra.mxu0 %v8009_v22  ;;  %v11194_v2 = vpop.f32.mrf.mxu0  ;;  %v8043_v22 = vld [vmem:[%s15508_s4 + $0xca0] sm:$0xff] }
 0x618   :  { %11707 = vmatprep.subr.mxu0 %v8008_v33  ;;  %v15054_v12 = vadd.f32 %v11194_v2, %v14968_v51 }
 0x619   :  { %11708 = vmatpush3.msra.mxu0 %v8008_v33  ;;  %v4616_v44 = vpop.f32.mrf.mxu0 }
 0x61a   :  { %11709 = vmatprep.subr.mxu0 %v8007_v36  ;;  %v15060_v49 = vadd.f32 %v4616_v44, %v14974_v56  ;;  %v8027_v56 = vld [vmem:[%s15508_s4 + $0xc20] sm:$0xff] }
 0x61b   :  { %11710 = vmatpush3.msra.mxu0 %v8007_v36  ;;  %v8040_v36 = vld [vmem:[%s15508_s4 + $0xc88] sm:$0xff]  ;;  %v8039_v44 = vld [vmem:[%s15508_s4 + $0xc80] sm:$0xff] }
 0x61c   :  { %11712 = vmatmul.mubr.f32.vlgmr.msra.gmra.mxu0 %v15000_v53  ;;  %11767 = vmatprep.subr.mxu0 %v8038_v52  ;;  %v8054_v53 = vld [vmem:[%s15508_s4 + $0xcf8] sm:$0xff] }
 0x61d   :  { %11768 = vmatpush3.msra.mxu0 %v8038_v52  ;;  %11714 = vmatprep.mubr.f32.mxu0 %v5932_v1  ;;  %v8045_v1 = vld [vmem:[%s15508_s4 + $0xcb0] sm:$0xff] }
 0x61e   :  { %11769 = vmatprep.subr.mxu0 %v8037_v58 }
 0x61f   :  { %11770 = vmatpush3.msra.mxu0 %v8037_v58 }
 0x620   :  { %11715 = vmatmul.mubr.f32.gmra.mxu0 %v11672_v31  ;;  %11771 = vmatprep.subr.mxu0 %v8036_v9 }
 0x621   :  { %11772 = vmatpush3.msra.mxu0 %v8036_v9  ;;  %11717 = vmatprep.mubr.f32.mxu0 %v5942_v32  ;;  %v8070_v9 = vld [vmem:[%s15508_s4 + $0xd78] sm:$0xff] }
 0x622   :  { %11773 = vmatprep.subr.mxu0 %v8035_v25 }
 0x623   :  { %11774 = vmatpush3.msra.mxu0 %v8035_v25 }
 0x624   :  { %11718 = vmatmul.mubr.f32.gmra.mxu0 %v11675_v38  ;;  %11775 = vmatprep.subr.mxu0 %v8034_v28  ;;  %v8041_v38 = vld [vmem:[%s15508_s4 + $0xc90] sm:$0xff] }
 0x625   :  { %11776 = vmatpush3.msra.mxu0 %v8034_v28  ;;  %11720 = vmatprep.mubr.f32.mxu0 %v5952_v35 }
 0x626   :  { %11777 = vmatprep.subr.mxu0 %v8033_v7 }
 0x627   :  { %11778 = vmatpush3.msra.mxu0 %v8033_v7  ;;  %v8068_v7 = vld [vmem:[%s15508_s4 + $0xd68] sm:$0xff] }
 0x628   :  { %11721 = vmatmul.mubr.f32.gmra.mxu0 %v11678_v61  ;;  %11779 = vmatprep.subr.mxu0 %v8032_v34  ;;  %v11757_v21 = vpop.f32.mrf.mxu1  ;;  %v8069_v61 = vld [vmem:[%s15508_s4 + $0xd70] sm:$0xff] }
 0x629   :  { %11780 = vmatpush3.msra.mxu0 %v8032_v34 }
 0x62a   :  { %11781 = vmatprep.subr.mxu0 %v8031_v39  ;;  %v6165_v59 = vpop.f32.mrf.mxu1 }
 0x62b   :  { %11782 = vmatpush3.msra.mxu0 %v8031_v39  ;;  %11799 = vmatprep.mubr.f32.mxu0 %v6165_v59 }
 0x62c   :  { %11783 = vmatprep.subr.mxu0 %v8030_v60 }
 0x62d   :  { %11784 = vmatpush3.msra.mxu0 %v8030_v60  ;;  %v11273_v51 = vpop.f32.mrf.mxu0  ;;  %v8067_v60 = vld [vmem:[%s15508_s4 + $0xd60] sm:$0xff] }
 0x62e   :  { %11785 = vmatprep.subr.mxu0 %v8029_v43  ;;  %v15094_v62 = vadd.f32 %v11273_v51, %v15009_v11  ;;  %v11760_v40 = vpop.f32.mrf.mxu1 }
 0x62f   :  { %11786 = vmatpush3.msra.mxu0 %v8029_v43  ;;  %v4829_v46 = vpop.f32.mrf.mxu0  ;;  %v8066_v43 = vld [vmem:[%s15508_s4 + $0xd58] sm:$0xff] }
 0x630   :  { %11787 = vmatprep.subr.mxu0 %v8028_v50  ;;  %v15100_v42 = vadd.f32 %v4829_v46, %v15015_v23  ;;  %v6175_v26 = vpop.f32.mrf.mxu1 }
 0x631   :  { %11788 = vmatpush3.msra.mxu0 %v8028_v50 }
 0x632   :  { %11789 = vmatprep.subr.mxu0 %v8027_v56 }
 0x633   :  { %11790 = vmatpush3.msra.mxu0 %v8027_v56  ;;  %v11276_v54 = vpop.f32.mrf.mxu0 }
 0x634   :  { %11791 = vmatprep.subr.mxu0 %v8026_v16  ;;  %v15109_v63 = vadd.f32 %v11276_v54, %v15024_v5  ;;  %v11763_v15 = vpop.f32.mrf.mxu1  ;;  %v8050_v5 = vld [vmem:[%s15508_s4 + $0xcd8] sm:$0xff] }
 0x635   :  { %11792 = vmatpush3.msra.mxu0 %v8026_v16  ;;  %v4839_v27 = vpop.f32.mrf.mxu0 }
 0x636   :  { %11793 = vmatprep.subr.mxu0 %v8025_v0  ;;  %v15115_v48 = vadd.f32 %v4839_v27, %v15030_v30  ;;  %v6185_v37 = vpop.f32.mrf.mxu1  ;;  %v8049_v30 = vld [vmem:[%s15508_s4 + $0xcd0] sm:$0xff] }
 0x637   :  { %11794 = vmatpush3.msra.mxu0 %v8025_v0  ;;  %v8061_v27 = vld [vmem:[%s15508_s4 + $0xd30] sm:$0xff] }
 0x638   :  { %11795 = vmatprep.subr.mxu0 %v8024_v45 }
 0x639   :  { %11796 = vmatpush3.msra.mxu0 %v8024_v45  ;;  %v11279_v17 = vpop.f32.mrf.mxu0 }
 0x63a   :  { %11797 = vmatprep.subr.mxu0 %v8023_v41  ;;  %v15124_v4 = vadd.f32 %v11279_v17, %v15039_v19  ;;  %v11766_v23 = vpop.f32.mrf.mxu1  ;;  %v8044_v19 = vld [vmem:[%s15508_s4 + $0xca8] sm:$0xff] }
 0x63b   :  { %11798 = vmatpush3.msra.mxu0 %v8023_v41  ;;  %v4849_v11 = vpop.f32.mrf.mxu0  ;;  %v8058_v41 = vld [vmem:[%s15508_s4 + $0xd18] sm:$0xff]  ;;  %v8056_v17 = vld [vmem:[%s15508_s4 + $0xd08] sm:$0xff] }
 0x63c   :  { %11800 = vmatmul.mubr.f32.vlgmr.msra.gmra.mxu0 %v11757_v21  ;;  %11855 = vmatprep.subr.mxu0 %v8054_v53  ;;  %v15130_v13 = vadd.f32 %v4849_v11, %v15045_v10  ;;  %v6195_v6 = vpop.f32.mrf.mxu1  ;;  %v8042_v10 = vld [vmem:[%s15508_s4 + $0xc98] sm:$0xff] }
 0x63d   :  { %11856 = vmatpush3.msra.mxu0 %v8054_v53  ;;  %11802 = vmatprep.mubr.f32.mxu0 %v6175_v26  ;;  %v8063_v26 = vld [vmem:[%s15508_s4 + $0xd40] sm:$0xff]  ;;  %v8057_v53 = vld [vmem:[%s15508_s4 + $0xd10] sm:$0xff] }
 0x63e   :  { %11857 = vmatprep.subr.mxu0 %v8053_v55 }
 0x63f   :  { %11858 = vmatpush3.msra.mxu0 %v8053_v55  ;;  %v11282_v57 = vpop.f32.mrf.mxu0 }
 0x640   :  { %11803 = vmatmul.mubr.f32.gmra.mxu0 %v11760_v40  ;;  %11859 = vmatprep.subr.mxu0 %v8052_v14  ;;  %v15139_v24 = vadd.f32 %v11282_v57, %v15054_v12  ;;  %v8065_v40 = vld [vmem:[%s15508_s4 + $0xd50] sm:$0xff] }
 0x641   :  { %11860 = vmatpush3.msra.mxu0 %v8052_v14  ;;  %11805 = vmatprep.mubr.f32.mxu0 %v6185_v37  ;;  %v4859_v18 = vpop.f32.mrf.mxu0  ;;  %v8055_v37 = vld [vmem:[%s15508_s4 + $0xd00] sm:$0xff] }
 0x642   :  { %11861 = vmatprep.subr.mxu0 %v8051_v29  ;;  %v15145_v31 = vadd.f32 %v4859_v18, %v15060_v49 }
 0x643   :  { %11862 = vmatpush3.msra.mxu0 %v8051_v29 }
 0x644   :  { %11806 = vmatmul.mubr.f32.gmra.mxu0 %v11763_v15  ;;  %11863 = vmatprep.subr.mxu0 %v8050_v5  ;;  %v8060_v15 = vld [vmem:[%s15508_s4 + $0xd28] sm:$0xff] }
 0x645   :  { %11864 = vmatpush3.msra.mxu0 %v8050_v5  ;;  %11808 = vmatprep.mubr.f32.mxu0 %v6195_v6 }
 0x646   :  { %11865 = vmatprep.subr.mxu0 %v8049_v30 }
 0x647   :  { %11866 = vmatpush3.msra.mxu0 %v8049_v30 }
 0x648   :  { %11809 = vmatmul.mubr.f32.gmra.mxu0 %v11766_v23  ;;  %11867 = vmatprep.subr.mxu0 %v8048_v20 }
 0x649   :  { %11868 = vmatpush3.msra.mxu0 %v8048_v20 }
 0x64a   :  { %11869 = vmatprep.subr.mxu0 %v8047_v8 }
 0x64b   :  { %11870 = vmatpush3.msra.mxu0 %v8047_v8 }
 0x64c   :  { %11871 = vmatprep.subr.mxu0 %v8046_v47 }
 0x64d   :  { %11872 = vmatpush3.msra.mxu0 %v8046_v47 }
 0x64e   :  { %11873 = vmatprep.subr.mxu0 %v8045_v1 }
 0x64f   :  { %11874 = vmatpush3.msra.mxu0 %v8045_v1 }
 0x650   :  { %11875 = vmatprep.subr.mxu0 %v8044_v19  ;;  %v11845_v3 = vpop.f32.mrf.mxu1 }
 0x651   :  { %11876 = vmatpush3.msra.mxu0 %v8044_v19 }
 0x652   :  { %11877 = vmatprep.subr.mxu0 %v8043_v22  ;;  %v6408_v33 = vpop.f32.mrf.mxu1 }
 0x653   :  { %11878 = vmatpush3.msra.mxu0 %v8043_v22  ;;  %11887 = vmatprep.mubr.f32.mxu0 %v6408_v33 }
 0x654   :  { %11879 = vmatprep.subr.mxu0 %v8042_v10 }
 0x655   :  { %11880 = vmatpush3.msra.mxu0 %v8042_v10  ;;  %v11361_v2 = vpop.f32.mrf.mxu0 }
 0x656   :  { %11881 = vmatprep.subr.mxu0 %v8041_v38  ;;  %v15178_v12 = vadd.f32 %v11361_v2, %v15094_v62  ;;  %v11848_v52 = vpop.f32.mrf.mxu1 }
 0x657   :  { %11882 = vmatpush3.msra.mxu0 %v8041_v38  ;;  %v5072_v32 = vpop.f32.mrf.mxu0 }
 0x658   :  { %11883 = vmatprep.subr.mxu0 %v8040_v36  ;;  %v15184_v49 = vadd.f32 %v5072_v32, %v15100_v42  ;;  %v6418_v58 = vpop.f32.mrf.mxu1  ;;  %v8064_v42 = vld [vmem:[%s15508_s4 + $0xd48] sm:$0xff] }
 0x659   :  { %11884 = vmatpush3.msra.mxu0 %v8040_v36 }
 0x65a   :  { %11885 = vmatprep.subr.mxu0 %v8039_v44 }
 0x65b   :  { %11886 = vmatpush3.msra.mxu0 %v8039_v44  ;;  %v11364_v25 = vpop.f32.mrf.mxu0 }
 0x65c   :  { %11888 = vmatmul.mubr.f32.vlgmr.msra.gmra.mxu0 %v11845_v3  ;;  %11943 = vmatprep.subr.mxu0 %v8070_v9  ;;  %v15193_v28 = vadd.f32 %v11364_v25, %v15109_v63  ;;  %v11851_v35 = vpop.f32.mrf.mxu1  ;;  %v8062_v63 = vld [vmem:[%s15508_s4 + $0xd38] sm:$0xff] }
 0x65d   :  { %11944 = vmatpush3.msra.mxu0 %v8070_v9  ;;  %11890 = vmatprep.mubr.f32.mxu0 %v6418_v58  ;;  %v5082_v34 = vpop.f32.mrf.mxu0  ;;  %v12380_v9 = vmov 0.0  }
 0x65e   :  { %11945 = vmatprep.subr.mxu0 %v8069_v61  ;;  %v15199_v39 = vadd.f32 %v5082_v34, %v15115_v48  ;;  %v6428_v21 = vpop.f32.mrf.mxu1  ;;  %v8059_v48 = vld [vmem:[%s15508_s4 + $0xd20] sm:$0xff]  ;;  %11987 = vmatprep.subr.mxu1 %v12380_v9 }
 0x65f   :  { %11946 = vmatpush3.msra.mxu0 %v8069_v61  ;;  %v6875_v61 = vld [vmem:[#allocation4 + $0xf8] sm:$0xff]  ;;  %12019 = vmatprep.mubr.msk.f32.mxu1 %vm12381_vm0, %v12380_v9 }
 0x660   :  { %11891 = vmatmul.mubr.f32.gmra.mxu0 %v11848_v52  ;;  %11947 = vmatprep.subr.mxu0 %v8068_v7 }
 0x661   :  { %11948 = vmatpush3.msra.mxu0 %v8068_v7  ;;  %11893 = vmatprep.mubr.f32.mxu0 %v6428_v21  ;;  %v11367_v59 = vpop.f32.mrf.mxu0  ;;  %v6858_v7 = vld [vmem:[#allocation4 + $0x78] sm:$0xff]  ;;  %v6873_v21 = vld [vmem:[#allocation4 + $0xe8] sm:$0xff] }
 0x662   :  { %11949 = vmatprep.subr.mxu0 %v8067_v60  ;;  %v15208_v50 = vadd.f32 %v11367_v59, %v15124_v4  ;;  %v11854_v51 = vpop.f32.mrf.mxu1  ;;  %11988 = vmatpush3.msra.mxu1 %v6875_v61 }
 0x663   :  { %11950 = vmatpush3.msra.mxu0 %v8067_v60  ;;  %v5092_v62 = vpop.f32.mrf.mxu0  ;;  %11989 = vmatprep.subr.mxu1 %v12380_v9  ;;  %v6857_v60 = vld [vmem:[#allocation4 + $0x70] sm:$0xff] }
 0x664   :  { %11894 = vmatmul.mubr.f32.gmra.mxu0 %v11851_v35  ;;  %11951 = vmatprep.subr.mxu0 %v8066_v43  ;;  %v15214_v56 = vadd.f32 %v5092_v62, %v15130_v13  ;;  %v6438_v46 = vpop.f32.mrf.mxu1  ;;  %v6874_v35 = vld [vmem:[#allocation4 + $0xf0] sm:$0xff] }
 0x665   :  { %11952 = vmatpush3.msra.mxu0 %v8066_v43  ;;  %11896 = vmatprep.mubr.f32.mxu0 %v6438_v46  ;;  %v6855_v46 = vld [vmem:[#allocation4 + $0x60] sm:$0xff] }
 0x666   :  { %11953 = vmatprep.subr.mxu0 %v8065_v40  ;;  %11990 = vmatpush3.msra.mxu1 %v6874_v35 }
 0x667   :  { %11954 = vmatpush3.msra.mxu0 %v8065_v40  ;;  %v11370_v16 = vpop.f32.mrf.mxu0  ;;  %11991 = vmatprep.subr.mxu1 %v12380_v9 }
 0x668   :  { %v5118_v0 = vadd.f32 %v11370_v16, %v15139_v24  ;;  %11897 = vmatmul.mubr.f32.gmra.mxu0 %v11854_v51  ;;  %11955 = vmatprep.subr.mxu0 %v8064_v42  ;;  %v6856_v51 = vld [vmem:[#allocation4 + $0x68] sm:$0xff]  ;;  %v6854_v16 = vld [vmem:[#allocation4 + $0x58] sm:$0xff] }
 0x669   :  { %11956 = vmatpush3.msra.mxu0 %v8064_v42  ;;  %v5102_v54 = vpop.f32.mrf.mxu0  ;;  %11992 = vmatpush3.msra.mxu1 %v6873_v21  ;;  %v6870_v42 = vld [vmem:[#allocation4 + $0xd0] sm:$0xff] }
 0x66a   :  { %v5117_v45 = vadd.f32 %v5102_v54, %v15145_v31  ;;  %11957 = vmatprep.subr.mxu0 %v8063_v26  ;;  %11993 = vmatprep.subr.mxu1 %v12380_v9  ;;  %v6868_v54 = vld [vmem:[#allocation4 + $0xc0] sm:$0xff] }
 0x66b   :  { %11958 = vmatpush3.msra.mxu0 %v8063_v26  ;;  %v6869_v26 = vld [vmem:[#allocation4 + $0xc8] sm:$0xff] }
 0x66c   :  { %11959 = vmatprep.subr.mxu0 %v8062_v63 }
 0x66d   :  { %11960 = vmatpush3.msra.mxu0 %v8062_v63  ;;  %v6852_v63 = vld [vmem:[#allocation4 + $0x48] sm:$0xff] }
 0x66e   :  { %11961 = vmatprep.subr.mxu0 %v8061_v27 }
 0x66f   :  { %11962 = vmatpush3.msra.mxu0 %v8061_v27  ;;  %v6851_v27 = vld [vmem:[#allocation4 + $0x40] sm:$0xff] }
 0x670   :  { %11963 = vmatprep.subr.mxu0 %v8060_v15 }
 0x671   :  { %11964 = vmatpush3.msra.mxu0 %v8060_v15  ;;  %v6866_v15 = vld [vmem:[#allocation4 + $0xb0] sm:$0xff] }
 0x672   :  { %11965 = vmatprep.subr.mxu0 %v8059_v48 }
 0x673   :  { %11966 = vmatpush3.msra.mxu0 %v8059_v48  ;;  %v6850_v48 = vld [vmem:[#allocation4 + $0x38] sm:$0xff] }
 0x674   :  { %11967 = vmatprep.subr.mxu0 %v8058_v41 }
 0x675   :  { %11968 = vmatpush3.msra.mxu0 %v8058_v41  ;;  %v6865_v41 = vld [vmem:[#allocation4 + $0xa8] sm:$0xff] }
 0x676   :  { %11969 = vmatprep.subr.mxu0 %v8057_v53 }
 0x677   :  { %11970 = vmatpush3.msra.mxu0 %v8057_v53  ;;  %v6849_v53 = vld [vmem:[#allocation4 + $0x30] sm:$0xff] }
 0x678   :  { %v11933_v4 = vpop.f32.mrf.mxu1  ;;  %11971 = vmatprep.subr.mxu0 %v8056_v17 }
 0x679   :  { %11972 = vmatpush3.msra.mxu0 %v8056_v17  ;;  %v6864_v17 = vld [vmem:[#allocation4 + $0xa0] sm:$0xff] }
 0x67a   :  { %v6651_v55 = vpop.f32.mrf.mxu1  ;;  %11973 = vmatprep.subr.mxu0 %v8055_v37 }
 0x67b   :  { %11974 = vmatpush3.msra.mxu0 %v8055_v37  ;;  %11975 = vmatprep.mubr.f32.mxu0 %v6651_v55  ;;  %v6848_v37 = vld [vmem:[#allocation4 + $0x28] sm:$0xff]  ;;  %v6847_v55 = vld [vmem:[#allocation4 + $0x20] sm:$0xff] }
 0x67c   :  { %v11449_v11 = vpop.f32.mrf.mxu0  ;;  %11976 = vmatmul.mubr.f32.vlgmr.msra.gmra.mxu0 %v11933_v4  ;;  %12022 = vmatprep.subr.mxu0 %v12380_v9  ;;  %v6863_v4 = vld [vmem:[#allocation4 + $0x98] sm:$0xff] }
 0x67d   :  { %v5355_v13 = vadd.f32 %v11449_v11, %v15178_v12  ;;  %v11936_v14 = vpop.f32.mrf.mxu1  ;;  %12023 = vmatpush3.msra.mxu0 %v6858_v7 }
 0x67e   :  { %v5315_v23 = vpop.f32.mrf.mxu0  ;;  %12024 = vmatprep.subr.mxu0 %v12380_v9 }
 0x67f   :  { %v5354_v29 = vadd.f32 %v5315_v23, %v15184_v49  ;;  %v6661_v57 = vpop.f32.mrf.mxu1  ;;  %12025 = vmatpush3.msra.mxu0 %v6857_v60 }
 0x680   :  { %11978 = vmatprep.mubr.f32.mxu0 %v6661_v57  ;;  %v11452_v24 = vpop.f32.mrf.mxu0  ;;  %12026 = vmatprep.subr.mxu0 %v12380_v9  ;;  %v6845_v57 = vld [vmem:[#allocation4 + $0x10] sm:$0xff] }
 0x681   :  { %v5357_v5 = vadd.f32 %v11452_v24, %v15193_v28  ;;  %v11939_v18 = vpop.f32.mrf.mxu1  ;;  %11979 = vmatmul.mubr.f32.gmra.mxu0 %v11936_v14  ;;  %v6846_v14 = vld [vmem:[#allocation4 + $0x18] sm:$0xff] }
 0x682   :  { %v5325_v6 = vpop.f32.mrf.mxu0  ;;  %12027 = vmatpush3.msra.mxu0 %v6856_v51 }
 0x683   :  { %v5356_v31 = vadd.f32 %v5325_v6, %v15199_v39  ;;  %v6671_v30 = vpop.f32.mrf.mxu1  ;;  %12028 = vmatprep.subr.mxu0 %v12380_v9  ;;  %v6844_v6 = vld [vmem:[#allocation4 + $0x8] sm:$0xff] }
 0x684   :  { %11981 = vmatprep.mubr.f32.mxu0 %v6671_v30  ;;  %v11455_v20 = vpop.f32.mrf.mxu0  ;;  %12029 = vmatpush3.msra.mxu0 %v6855_v46 }
 0x685   :  { %v5359_v8 = vadd.f32 %v11455_v20, %v15208_v50  ;;  %v11942_v47 = vpop.f32.mrf.mxu1  ;;  %11982 = vmatmul.mubr.f32.gmra.mxu0 %v11939_v18  ;;  %v6872_v50 = vld [vmem:[#allocation4 + $0xe0] sm:$0xff]  ;;  %12030 = vmatprep.subr.mxu0 %v12380_v9 }
 0x686   :  { %v5335_v1 = vpop.f32.mrf.mxu0  ;;  %11994 = vmatpush3.msra.mxu1 %v6872_v50  ;;  %12031 = vmatpush3.msra.mxu0 %v6854_v16  ;;  %v6860_v18 = vld [vmem:[#allocation4 + $0x80] sm:$0xff] }
 0x687   :  { %v5358_v19 = vadd.f32 %v5335_v1, %v15214_v56  ;;  %v6681_v22 = vpop.f32.mrf.mxu1  ;;  %11995 = vmatprep.subr.mxu1 %v12380_v9  ;;  %v6871_v56 = vld [vmem:[#allocation4 + $0xd8] sm:$0xff]  ;;  %12032 = vmatprep.subr.mxu0 %v12380_v9  ;;  %v6843_v20 = vld [vmem:[#allocation4] sm:$0xff] }
 0x688   :  { %11984 = vmatprep.mubr.f32.mxu0 %v6681_v22  ;;  %v11458_v3 = vpop.f32.mrf.mxu0  ;;  %11996 = vmatpush3.msra.mxu1 %v6871_v56 }
 0x689   :  { %v5361_v10 = vadd.f32 %v11458_v3, %v5118_v0  ;;  %11985 = vmatmul.mubr.f32.gmra.mxu0 %v11942_v47  ;;  %11997 = vmatprep.subr.mxu1 %v12380_v9  ;;  %v6853_v0 = vld [vmem:[#allocation4 + $0x50] sm:$0xff] }
 0x68a   :  { %v5345_v33 = vpop.f32.mrf.mxu0  ;;  %11998 = vmatpush3.msra.mxu1 %v6870_v42  ;;  %12033 = vmatpush3.msra.mxu0 %v6853_v0 }
 0x68b   :  { %v5360_v38 = vadd.f32 %v5345_v33, %v5117_v45  ;;  %11999 = vmatprep.subr.mxu1 %v12380_v9  ;;  %12034 = vmatprep.subr.mxu0 %v12380_v9  ;;  %v6867_v45 = vld [vmem:[#allocation4 + $0xb8] sm:$0xff] }
 0x68c   :  { %12000 = vmatpush3.msra.mxu1 %v6869_v26  ;;  %12035 = vmatpush3.msra.mxu0 %v6852_v63 }
 0x68d   :  { %12001 = vmatprep.subr.mxu1 %v12380_v9  ;;  %12036 = vmatprep.subr.mxu0 %v12380_v9 }
 0x68e   :  { %12002 = vmatpush3.msra.mxu1 %v6868_v54  ;;  %12037 = vmatpush3.msra.mxu0 %v6851_v27 }
 0x68f   :  { %12003 = vmatprep.subr.mxu1 %v12380_v9  ;;  %12038 = vmatprep.subr.mxu0 %v12380_v9 }
 0x690   :  { %12004 = vmatpush3.msra.mxu1 %v6867_v45  ;;  %12039 = vmatpush3.msra.mxu0 %v6850_v48 }
 0x691   :  { %12005 = vmatprep.subr.mxu1 %v12380_v9  ;;  %12040 = vmatprep.subr.mxu0 %v12380_v9 }
 0x692   :  { %12006 = vmatpush3.msra.mxu1 %v6866_v15  ;;  %12041 = vmatpush3.msra.mxu0 %v6849_v53 }
 0x693   :  { %12007 = vmatprep.subr.mxu1 %v12380_v9  ;;  %12042 = vmatprep.subr.mxu0 %v12380_v9 }
 0x694   :  { %12008 = vmatpush3.msra.mxu1 %v6865_v41  ;;  %12043 = vmatpush3.msra.mxu0 %v6848_v37 }
 0x695   :  { %12009 = vmatprep.subr.mxu1 %v12380_v9  ;;  %12044 = vmatprep.subr.mxu0 %v12380_v9 }
 0x696   :  { %12010 = vmatpush3.msra.mxu1 %v6864_v17  ;;  %12045 = vmatpush3.msra.mxu0 %v6847_v55 }
 0x697   :  { %12011 = vmatprep.subr.mxu1 %v12380_v9  ;;  %12046 = vmatprep.subr.mxu0 %v12380_v9 }
 0x698   :  { %12012 = vmatpush3.msra.mxu1 %v6863_v4  ;;  %12047 = vmatpush3.msra.mxu0 %v6846_v14 }
 0x699   :  { %12013 = vmatprep.subr.mxu1 %v12380_v9  ;;  %12048 = vmatprep.subr.mxu0 %v12380_v9 }
 0x69a   :  { %12049 = vmatpush3.msra.mxu0 %v6845_v57  ;;  %12054 = vmatprep.mubr.msk.f32.mxu0 %vm12381_vm0, %v12380_v9 }
 0x69b   :  { %12050 = vmatprep.subr.mxu0 %v12380_v9 }
 0x69c   :  { %v11537_v36 = vpop.f32.mrf.mxu0  ;;  %12051 = vmatpush3.msra.mxu0 %v6844_v6 }
 0x69d   :  { %v15254_v2 = vadd.f32 %v11537_v36, %v5355_v13  ;;  %v6862_v13 = vld [vmem:[#allocation4 + $0x90] sm:$0xff]  ;;  %12052 = vmatprep.subr.mxu0 %v12380_v9 }
 0x69e   :  { %v5558_v12 = vpop.f32.mrf.mxu0  ;;  %12014 = vmatpush3.msra.mxu1 %v6862_v13  ;;  %12053 = vmatpush3.msra.mxu0 %v6843_v20 }
 0x69f   :  { %v15256_v52 = vadd.f32 %v5558_v12, %v5354_v29  ;;  %12015 = vmatprep.subr.mxu1 %v12380_v9  ;;  %v6861_v29 = vld [vmem:[#allocation4 + $0x88] sm:$0xff]  ;;  %12092 = vmatprep.subr.mxu0 %v12380_v9 }
 0x6a0   :  { %v11540_v44 = vpop.f32.mrf.mxu0  ;;  %12016 = vmatpush3.msra.mxu1 %v6861_v29 }
 0x6a1   :  { %v15258_v32 = vadd.f32 %v11540_v44, %v5357_v5  ;;  %12017 = vmatprep.subr.mxu1 %v12380_v9 }
 0x6a2   :  { %v5568_v49 = vpop.f32.mrf.mxu0  ;;  %12018 = vmatpush3.msra.mxu1 %v6860_v18  ;;  %v15337_v18 = vld [vmem:[%s15509_s5] ss:$0 sm:$0xff] }
 0x6a3   :  { %v15260_v58 = vadd.f32 %v5568_v49, %v5356_v31  ;;  %12057 = vmatprep.subr.mxu1 %v12380_v9 }
 0x6a4   :  { %v11543_v25 = vpop.f32.mrf.mxu0 }
 0x6a5   :  { %v15264_v28 = vadd.f32 %v11543_v25, %v5359_v8 }
 0x6a6   :  { %v5578_v34 = vpop.f32.mrf.mxu0 }
 0x6a7   :  { %v15267_v39 = vadd.f32 %v5578_v34, %v5358_v19 }
 0x6a8   :  { %v11546_v59 = vpop.f32.mrf.mxu0 }
 0x6a9   :  { %v15271_v43 = vadd.f32 %v11546_v59, %v5361_v10 }
 0x6aa   :  { %v5588_v62 = vpop.f32.mrf.mxu0 }
 0x6ab   :  { %v15275_v40 = vadd.f32 %v5588_v62, %v5360_v38 }
 0x6bc   :  { %v15295_v11 = vpop.f32.mrf.mxu0 }
 0x6bd   :  { %v5841_v4 = vadd.f32 %v15295_v11, %v15254_v2 }
 0x6be   :  { %v15299_v23 = vpop.f32.mrf.mxu0 }
 0x6bf   :  { %v5840_v55 = vadd.f32 %v15299_v23, %v15256_v52 }
 0x6c0   :  { %v11628_v24 = vpop.f32.mrf.mxu0 }
 0x6c1   :  { %v5843_v5 = vadd.f32 %v11628_v24, %v15258_v32 }
 0x6c2   :  { %v5811_v31 = vpop.f32.mrf.mxu0 }
 0x6c3   :  { %v5842_v30 = vadd.f32 %v5811_v31, %v15260_v58 }
 0x6c4   :  { %v11631_v8 = vpop.f32.mrf.mxu0 }
 0x6c5   :  { %v5845_v47 = vadd.f32 %v11631_v8, %v15264_v28  ;;  %v7032_v8 = vld [vmem:[#allocation4 + $0x178] sm:$0xff] }
 0x6c6   :  { %v5821_v1 = vpop.f32.mrf.mxu0 }
 0x6c7   :  { %v5844_v19 = vadd.f32 %v5821_v1, %v15267_v39 }
 0x6c8   :  { %v11634_v22 = vpop.f32.mrf.mxu0 }
 0x6c9   :  { %v5847_v3 = vadd.f32 %v11634_v22, %v15271_v43  ;;  %v7120_v22 = vld [vmem:[#allocation4 + $0x1f8] sm:$0xff] }
 0x6ca   :  { %v5831_v10 = vpop.f32.mrf.mxu0 }
 0x6cb   :  { %v5846_v33 = vadd.f32 %v5831_v10, %v15275_v40  ;;  %v7030_v10 = vld [vmem:[#allocation4 + $0x168] sm:$0xff] }
 0x6dc   :  { %v11713_v38 = vpop.f32.mrf.mxu0 }
 0x6dd   :  { %v6084_v13 = vadd.f32 %v11713_v38, %v5841_v4  ;;  %v7109_v4 = vld [vmem:[#allocation4 + $0x1a0] sm:$0xff] }
 0x6de   :  { %v6044_v36 = vpop.f32.mrf.mxu0 }
 0x6df   :  { %v6083_v14 = vadd.f32 %v6044_v36, %v5840_v55  ;;  %v7019_v55 = vld [vmem:[#allocation4 + $0x110] sm:$0xff] }
 0x6e0   :  { %v11716_v12 = vpop.f32.mrf.mxu0 }
 0x6e1   :  { %v15318_v44 = vadd.f32 %v11716_v12, %v5843_v5  ;;  %v7029_v12 = vld [vmem:[#allocation4 + $0x160] sm:$0xff] }
 0x6e2   :  { %v6054_v32 = vpop.f32.mrf.mxu0 }
 0x6e3   :  { %v15320_v49 = vadd.f32 %v6054_v32, %v5842_v30  ;;  %v7118_v32 = vld [vmem:[#allocation4 + $0x1e8] sm:$0xff] }
 0x6e4   :  { %v11719_v58 = vpop.f32.mrf.mxu0 }
 0x6e5   :  { %v6088_v61 = vadd.f32 %v11719_v58, %v5845_v47 }
 0x6e6   :  { %v6064_v25 = vpop.f32.mrf.mxu0 }
 0x6e7   :  { %v6087_v28 = vadd.f32 %v6064_v25, %v5844_v19  ;;  %v7031_v19 = vld [vmem:[#allocation4 + $0x170] sm:$0xff] }
 0x6e8   :  { %v11722_v35 = vpop.f32.mrf.mxu0 }
 0x6e9   :  { %v6090_v7 = vadd.f32 %v11722_v35, %v5847_v3  ;;  %v7117_v35 = vld [vmem:[#allocation4 + $0x1e0] sm:$0xff] }
 0x6ea   :  { %v6074_v34 = vpop.f32.mrf.mxu0 }
 0x6eb   :  { %v6089_v39 = vadd.f32 %v6074_v34, %v5846_v33  ;;  %v7119_v33 = vld [vmem:[#allocation4 + $0x1f0] sm:$0xff] }
 0x6fc   :  { %v11801_v21 = vpop.f32.mrf.mxu0 }
 0x6fd   :  { %v6327_v29 = vadd.f32 %v11801_v21, %v6084_v13  ;;  %v7027_v21 = vld [vmem:[#allocation4 + $0x150] sm:$0xff] }
 0x6fe   :  { %v6287_v60 = vpop.f32.mrf.mxu0 }
 0x6ff   :  { %v6326_v57 = vadd.f32 %v6287_v60, %v6083_v14  ;;  %v7116_v60 = vld [vmem:[#allocation4 + $0x1d8] sm:$0xff]  ;;  %v7018_v14 = vld [vmem:[#allocation4 + $0x108] sm:$0xff] }
 0x700   :  { %v15322_v59 = vpop.f32.mrf.mxu0 }
 0x702   :  { %v15324_v43 = vpop.f32.mrf.mxu0 }
 0x704   :  { %v11807_v50 = vpop.f32.mrf.mxu0 }
 0x705   :  { %v6331_v51 = vadd.f32 %v11807_v50, %v6088_v61 }
 0x706   :  { %v6307_v62 = vpop.f32.mrf.mxu0 }
 0x707   :  { %v6330_v40 = vadd.f32 %v6307_v62, %v6087_v28  ;;  %v7028_v28 = vld [vmem:[#allocation4 + $0x158] sm:$0xff]  ;;  %v7026_v62 = vld [vmem:[#allocation4 + $0x148] sm:$0xff] }
 0x708   :  { %v11810_v56 = vpop.f32.mrf.mxu0 }
 0x709   :  { %v6333_v46 = vadd.f32 %v11810_v56, %v6090_v7 }
 0x70a   :  { %v6317_v42 = vpop.f32.mrf.mxu0 }
 0x70b   :  { %v6332_v16 = vadd.f32 %v6317_v42, %v6089_v39  ;;  %v7114_v42 = vld [vmem:[#allocation4 + $0x1c8] sm:$0xff] }
 0x71c   :  { %v11889_v26 = vpop.f32.mrf.mxu0 }
 0x71d   :  { %v6570_v24 = vadd.f32 %v11889_v26, %v6327_v29  ;;  %v7113_v26 = vld [vmem:[#allocation4 + $0x1c0] sm:$0xff] }
 0x71e   :  { %v6530_v0 = vpop.f32.mrf.mxu0  ;;  %v7017_v29 = vld [vmem:[#allocation4 + $0x100] sm:$0xff] }
 0x71f   :  { %v6569_v6 = vadd.f32 %v6530_v0, %v6326_v57  ;;  %v7023_v0 = vld [vmem:[#allocation4 + $0x130] sm:$0xff]  ;;  %v7106_v57 = vld [vmem:[#allocation4 + $0x188] sm:$0xff] }
 0x720   :  { %v15326_v54 = vpop.f32.mrf.mxu0 }
 0x722   :  { %v15328_v63 = vpop.f32.mrf.mxu0 }
 0x724   :  { %v11895_v45 = vpop.f32.mrf.mxu0 }
 0x725   :  { %v6574_v27 = vadd.f32 %v11895_v45, %v6331_v51  ;;  %v7112_v45 = vld [vmem:[#allocation4 + $0x1b8] sm:$0xff] }
 0x726   :  { %v6550_v15 = vpop.f32.mrf.mxu0 }
 0x727   :  { %v6573_v48 = vadd.f32 %v6550_v15, %v6330_v40  ;;  %v7115_v40 = vld [vmem:[#allocation4 + $0x1d0] sm:$0xff]  ;;  %v7022_v15 = vld [vmem:[#allocation4 + $0x128] sm:$0xff] }
 0x728   :  { %v11898_v41 = vpop.f32.mrf.mxu0 }
 0x729   :  { %v6576_v53 = vadd.f32 %v11898_v41, %v6333_v46  ;;  %v7025_v46 = vld [vmem:[#allocation4 + $0x140] sm:$0xff] }
 0x72a   :  { %v6560_v17 = vpop.f32.mrf.mxu0 }
 0x72b   :  { %v6575_v37 = vadd.f32 %v6560_v17, %v6332_v16  ;;  %v7024_v16 = vld [vmem:[#allocation4 + $0x138] sm:$0xff]  ;;  %v7110_v17 = vld [vmem:[#allocation4 + $0x1a8] sm:$0xff] }
 0x73c   :  { %v11977_v5 = vpop.f32.mrf.mxu0 }
 0x73d   :  { %v6813_v31 = vadd.f32 %v11977_v5, %v6570_v24 }
 0x73e   :  { %v6773_v30 = vpop.f32.mrf.mxu0 }
 0x73f   :  { %v6828_v20 = vadd.f32 %v15337_v18, %v6813_v31  ;;  %v6812_v2 = vadd.f32 %v6773_v30, %v6569_v6  ;;  %v7105_v6 = vld [vmem:[#allocation4 + $0x180] sm:$0xff]  ;;  %v7208_v31 = vld [vmem:[#allocation4 + $0x278] sm:$0xff] }
 0x741   :  { %v6836_v11 = vmax.f32 %v6828_v20, 0.0  ;;  %v6827_v52 = vadd.f32 %v15337_v18, %v6812_v2  ;;  %v15341_v23 = vpop.f32.mrf.mxu0  ;;  %v7207_v20 = vld [vmem:[#allocation4 + $0x270] sm:$0xff]  ;;  %v7206_v2 = vld [vmem:[#allocation4 + $0x268] sm:$0xff] }
 0x743   :  { %v6835_v47 = vmax.f32 %v6827_v52, 0.0  ;;  %v15343_v1 = vpop.f32.mrf.mxu0  ;;  %12020 = vmatmul.mubr.f32.vlgmr.msra.gmra.mxu1 %v6836_v11  ;;  %v7295_v11 = vld [vmem:[#allocation4 + $0x2f0] sm:$0xff]  ;;  %v7205_v52 = vld [vmem:[#allocation4 + $0x260] sm:$0xff] }
 0x744   :  { %12058 = vmatpush3.msra.mxu1 %v7032_v8  ;;  %12089 = vmatprep.mubr.msk.f32.mxu1 %vm12381_vm0, %v12380_v9  ;;  %v7204_v8 = vld [vmem:[#allocation4 + $0x258] sm:$0xff] }
 0x745   :  { %v11983_v3 = vpop.f32.mrf.mxu0  ;;  %12059 = vmatprep.subr.mxu1 %v12380_v9  ;;  %12055 = vmatmul.mubr.f32.vlgmr.msra.gmra.mxu0 %v6835_v47  ;;  %v7293_v47 = vld [vmem:[#allocation4 + $0x2e0] sm:$0xff] }
 0x746   :  { %v6817_v38 = vadd.f32 %v11983_v3, %v6574_v27  ;;  %12060 = vmatpush3.msra.mxu1 %v7031_v19  ;;  %12093 = vmatpush3.msra.mxu0 %v7120_v22  ;;  %v6328_v27 = vadd.f32 %v15324_v43, %v15320_v49  ;;  %v7020_v43 = vld [vmem:[#allocation4 + $0x118] sm:$0xff]  ;;  %v7202_v22 = vld [vmem:[#allocation4 + $0x248] sm:$0xff]  ;;  %v7291_v3 = vld [vmem:[#allocation4 + $0x2d0] sm:$0xff] }
 0x747   :  { %v6793_v36 = vpop.f32.mrf.mxu0  ;;  %12061 = vmatprep.subr.mxu1 %v12380_v9  ;;  %12094 = vmatprep.subr.mxu0 %v12380_v9  ;;  %v7292_v19 = vld [vmem:[#allocation4 + $0x2d8] sm:$0xff] }
 0x748   :  { %v15351_v58 = vadd.f32 %v15337_v18, %v6817_v38  ;;  %v6816_v61 = vadd.f32 %v6793_v36, %v6573_v48  ;;  %12062 = vmatpush3.msra.mxu1 %v7030_v10  ;;  %12095 = vmatpush3.msra.mxu0 %v7119_v33  ;;  %v7111_v48 = vld [vmem:[#allocation4 + $0x1b0] sm:$0xff]  ;;  %v6571_v41 = vadd.f32 %v15328_v63, %v6328_v27  ;;  %v7201_v10 = vld [vmem:[#allocation4 + $0x240] sm:$0xff]  ;;  %v7290_v33 = vld [vmem:[#allocation4 + $0x2c8] sm:$0xff] }
 0x749   :  { %v11986_v25 = vpop.f32.mrf.mxu0  ;;  %12063 = vmatprep.subr.mxu1 %v12380_v9  ;;  %12096 = vmatprep.subr.mxu0 %v12380_v9  ;;  %v7200_v38 = vld [vmem:[#allocation4 + $0x238] sm:$0xff]  ;;  %v7289_v36 = vld [vmem:[#allocation4 + $0x2c0] sm:$0xff]  ;;  %v7382_v27 = vld [vmem:[#allocation4 + $0x368] sm:$0xff] }
 0x74a   :  { %v15356_v7 = vadd.f32 %v15337_v18, %v6816_v61  ;;  %v6819_v34 = vadd.f32 %v11986_v25, %v6576_v53  ;;  %12064 = vmatpush3.msra.mxu1 %v7029_v12  ;;  %12097 = vmatpush3.msra.mxu0 %v7118_v32  ;;  %v7021_v53 = vld [vmem:[#allocation4 + $0x120] sm:$0xff]  ;;  %v6814_v49 = vadd.f32 %v15343_v1, %v6571_v41  ;;  %v7203_v1 = vld [vmem:[#allocation4 + $0x250] sm:$0xff]  ;;  %v7288_v32 = vld [vmem:[#allocation4 + $0x2b8] sm:$0xff] }
 0x74b   :  { %v6803_v39 = vpop.f32.mrf.mxu0  ;;  %12065 = vmatprep.subr.mxu1 %v12380_v9  ;;  %12098 = vmatprep.subr.mxu0 %v12380_v9  ;;  %v7199_v12 = vld [vmem:[#allocation4 + $0x230] sm:$0xff]  ;;  %v7198_v61 = vld [vmem:[#allocation4 + $0x228] sm:$0xff]  ;;  %v7380_v41 = vld [vmem:[#allocation4 + $0x358] sm:$0xff] }
 0x74c   :  { %v15361_v50 = vadd.f32 %v15337_v18, %v6819_v34  ;;  %v6818_v51 = vadd.f32 %v6803_v39, %v6575_v37  ;;  %12066 = vmatpush3.msra.mxu1 %v7028_v28  ;;  %12099 = vmatpush3.msra.mxu0 %v7117_v35  ;;  %v6329_v37 = vadd.f32 %v15322_v59, %v15318_v44  ;;  %v7108_v44 = vld [vmem:[#allocation4 + $0x198] sm:$0xff]  ;;  %v7287_v25 = vld [vmem:[#allocation4 + $0x2b0] sm:$0xff]  ;;  %v7197_v28 = vld [vmem:[#allocation4 + $0x220] sm:$0xff] }
 0x74d   :  { %12067 = vmatprep.subr.mxu1 %v12380_v9  ;;  %12100 = vmatprep.subr.mxu0 %v12380_v9  ;;  %v6829_v13 = vadd.f32 %v15337_v18, %v6814_v49  ;;  %v7286_v35 = vld [vmem:[#allocation4 + $0x2a8] sm:$0xff]  ;;  %v7196_v34 = vld [vmem:[#allocation4 + $0x218] sm:$0xff]  ;;  %v7285_v39 = vld [vmem:[#allocation4 + $0x2a0] sm:$0xff] }
 0x74e   :  { %v15366_v56 = vadd.f32 %v15337_v18, %v6818_v51  ;;  %12068 = vmatpush3.msra.mxu1 %v7027_v21  ;;  %12101 = vmatpush3.msra.mxu0 %v7116_v60  ;;  %v6572_v63 = vadd.f32 %v15326_v54, %v6329_v37  ;;  %v7107_v54 = vld [vmem:[#allocation4 + $0x190] sm:$0xff]  ;;  %v7284_v60 = vld [vmem:[#allocation4 + $0x298] sm:$0xff]  ;;  %v7194_v51 = vld [vmem:[#allocation4 + $0x208] sm:$0xff] }
 0x74f   :  { %12069 = vmatprep.subr.mxu1 %v12380_v9  ;;  %12102 = vmatprep.subr.mxu0 %v12380_v9  ;;  %v6837_v5 = vmax.f32 %v6829_v13, 0.0  ;;  %v7195_v21 = vld [vmem:[#allocation4 + $0x210] sm:$0xff]  ;;  %v7468_v37 = vld [vmem:[#allocation4 + $0x3d8] sm:$0xff]  ;;  %v7378_v49 = vld [vmem:[#allocation4 + $0x348] sm:$0xff] }
 0x750   :  { %12070 = vmatpush3.msra.mxu1 %v7026_v62  ;;  %12103 = vmatpush3.msra.mxu0 %v7115_v40  ;;  %v6815_v59 = vadd.f32 %v15341_v23, %v6572_v63  ;;  %v7294_v23 = vld [vmem:[#allocation4 + $0x2e8] sm:$0xff]  ;;  %v7283_v62 = vld [vmem:[#allocation4 + $0x290] sm:$0xff]  ;;  %v7193_v40 = vld [vmem:[#allocation4 + $0x200] sm:$0xff] }
 0x751   :  { %12071 = vmatprep.subr.mxu1 %v12380_v9  ;;  %12104 = vmatprep.subr.mxu0 %v12380_v9  ;;  %v7466_v63 = vld [vmem:[#allocation4 + $0x3c8] sm:$0xff]  ;;  %v7464_v13 = vld [vmem:[#allocation4 + $0x3b8] sm:$0xff] }
 0x752   :  { %12072 = vmatpush3.msra.mxu1 %v7025_v46  ;;  %12105 = vmatpush3.msra.mxu0 %v7114_v42  ;;  %v6830_v24 = vadd.f32 %v15337_v18, %v6815_v59  ;;  %v7296_v18 = vld [vmem:[#allocation4 + $0x2f8] sm:$0xff]  ;;  %v7282_v46 = vld [vmem:[#allocation4 + $0x288] sm:$0xff]  ;;  %v6839_v42 = vmax.f32 %v15356_v7, 0.0  ;;  %v7375_v59 = vld [vmem:[#allocation4 + $0x330] sm:$0xff] }
 0x753   :  { %12073 = vmatprep.subr.mxu1 %v12380_v9  ;;  %12106 = vmatprep.subr.mxu0 %v12380_v9  ;;  %v7472_v7 = vld [vmem:[#allocation4 + $0x3f8] sm:$0xff] }
 0x754   :  { %12074 = vmatpush3.msra.mxu1 %v7024_v16  ;;  %12107 = vmatpush3.msra.mxu0 %v7113_v26  ;;  %v6838_v30 = vmax.f32 %v6830_v24, 0.0  ;;  %v7281_v16 = vld [vmem:[#allocation4 + $0x280] sm:$0xff]  ;;  %v7384_v26 = vld [vmem:[#allocation4 + $0x378] sm:$0xff] }
 0x755   :  { %12075 = vmatprep.subr.mxu1 %v12380_v9  ;;  %12108 = vmatprep.subr.mxu0 %v12380_v9  ;;  %v7372_v24 = vld [vmem:[#allocation4 + $0x318] sm:$0xff] }
 0x756   :  { %12076 = vmatpush3.msra.mxu1 %v7023_v0  ;;  %12109 = vmatpush3.msra.mxu0 %v7112_v45  ;;  %v6840_v0 = vmax.f32 %v15351_v58, 0.0  ;;  %v7383_v45 = vld [vmem:[#allocation4 + $0x370] sm:$0xff]  ;;  %v7381_v58 = vld [vmem:[#allocation4 + $0x360] sm:$0xff] }
 0x757   :  { %12077 = vmatprep.subr.mxu1 %v12380_v9  ;;  %12110 = vmatprep.subr.mxu0 %v12380_v9 }
 0x758   :  { %12078 = vmatpush3.msra.mxu1 %v7022_v15  ;;  %12111 = vmatpush3.msra.mxu0 %v7111_v48  ;;  %v7471_v15 = vld [vmem:[#allocation4 + $0x3f0] sm:$0xff]  ;;  %v7470_v48 = vld [vmem:[#allocation4 + $0x3e8] sm:$0xff] }
 0x759   :  { %12079 = vmatprep.subr.mxu1 %v12380_v9  ;;  %12112 = vmatprep.subr.mxu0 %v12380_v9 }
 0x75a   :  { %12080 = vmatpush3.msra.mxu1 %v7021_v53  ;;  %12113 = vmatpush3.msra.mxu0 %v7110_v17  ;;  %v7469_v53 = vld [vmem:[#allocation4 + $0x3e0] sm:$0xff]  ;;  %v7379_v17 = vld [vmem:[#allocation4 + $0x350] sm:$0xff] }
 0x75b   :  { %12081 = vmatprep.subr.mxu1 %v12380_v9  ;;  %12114 = vmatprep.subr.mxu0 %v12380_v9 }
 0x75c   :  { %12082 = vmatpush3.msra.mxu1 %v7020_v43  ;;  %12115 = vmatpush3.msra.mxu0 %v7109_v4  ;;  %v7467_v43 = vld [vmem:[#allocation4 + $0x3d0] sm:$0xff]  ;;  %v7377_v4 = vld [vmem:[#allocation4 + $0x340] sm:$0xff] }
 0x75d   :  { %12083 = vmatprep.subr.mxu1 %v12380_v9  ;;  %12116 = vmatprep.subr.mxu0 %v12380_v9 }
 0x75e   :  { %12084 = vmatpush3.msra.mxu1 %v7019_v55  ;;  %12117 = vmatpush3.msra.mxu0 %v7108_v44  ;;  %v7376_v55 = vld [vmem:[#allocation4 + $0x338] sm:$0xff]  ;;  %v7465_v44 = vld [vmem:[#allocation4 + $0x3c0] sm:$0xff] }
 0x75f   :  { %12085 = vmatprep.subr.mxu1 %v12380_v9  ;;  %12118 = vmatprep.subr.mxu0 %v12380_v9 }
 0x760   :  { %12086 = vmatpush3.msra.mxu1 %v7018_v14  ;;  %12119 = vmatpush3.msra.mxu0 %v7107_v54  ;;  %v7374_v14 = vld [vmem:[#allocation4 + $0x328] sm:$0xff]  ;;  %v7463_v54 = vld [vmem:[#allocation4 + $0x3b0] sm:$0xff] }
 0x761   :  { %12087 = vmatprep.subr.mxu1 %v12380_v9  ;;  %12120 = vmatprep.subr.mxu0 %v12380_v9 }
 0x762   :  { %12088 = vmatpush3.msra.mxu1 %v7017_v29  ;;  %12121 = vmatpush3.msra.mxu0 %v7106_v57  ;;  %v7373_v29 = vld [vmem:[#allocation4 + $0x320] sm:$0xff]  ;;  %v7462_v57 = vld [vmem:[#allocation4 + $0x3a8] sm:$0xff] }
 0x763   :  { %12090 = vmatmul.mubr.f32.vlgmr.msra.gmra.mxu1 %v6837_v5  ;;  %12122 = vmatprep.subr.mxu0 %v12380_v9  ;;  %v7461_v5 = vld [vmem:[#allocation4 + $0x3a0] sm:$0xff] }
 0x764   :  { %12127 = vmatprep.subr.mxu1 %v12380_v9  ;;  %12123 = vmatpush3.msra.mxu0 %v7105_v6  ;;  %v7371_v6 = vld [vmem:[#allocation4 + $0x310] sm:$0xff] }
 0x765   :  { %12124 = vmatprep.mubr.msk.f32.mxu0 %vm12381_vm0, %v12380_v9  ;;  %12128 = vmatpush3.msra.mxu1 %v7208_v31  ;;  %v7460_v31 = vld [vmem:[#allocation4 + $0x398] sm:$0xff] }
 0x766   :  { %12125 = vmatmul.mubr.f32.vlgmr.msra.gmra.mxu0 %v6838_v30  ;;  %12129 = vmatprep.subr.mxu1 %v12380_v9  ;;  %v7370_v30 = vld [vmem:[#allocation4 + $0x308] sm:$0xff] }
 0x767   :  { %12162 = vmatprep.subr.mxu0 %v12380_v9  ;;  %12130 = vmatpush3.msra.mxu1 %v7207_v20  ;;  %v7459_v20 = vld [vmem:[#allocation4 + $0x390] sm:$0xff] }
 0x768   :  { %12163 = vmatpush3.msra.mxu0 %v7296_v18  ;;  %12131 = vmatprep.subr.mxu1 %v12380_v9  ;;  %v7369_v18 = vld [vmem:[#allocation4 + $0x300] sm:$0xff] }
 0x769   :  { %12164 = vmatprep.subr.mxu0 %v12380_v9  ;;  %12132 = vmatpush3.msra.mxu1 %v7206_v2  ;;  %v7458_v2 = vld [vmem:[#allocation4 + $0x388] sm:$0xff] }
 0x76a   :  { %12165 = vmatpush3.msra.mxu0 %v7295_v11  ;;  %12133 = vmatprep.subr.mxu1 %v12380_v9  ;;  %v6841_v11 = vmax.f32 %v15366_v56, 0.0  ;;  %v7568_v56 = vld [vmem:[#allocation6 + $0x78] sm:$0xff] }
 0x76b   :  { %12166 = vmatprep.subr.mxu0 %v12380_v9  ;;  %12134 = vmatpush3.msra.mxu1 %v7205_v52  ;;  %v7457_v52 = vld [vmem:[#allocation4 + $0x380] sm:$0xff] }
 0x76c   :  { %12167 = vmatpush3.msra.mxu0 %v7294_v23  ;;  %12135 = vmatprep.subr.mxu1 %v12380_v9  ;;  %v6842_v23 = vmax.f32 %v15361_v50, 0.0  ;;  %v7565_v50 = vld [vmem:[#allocation6 + $0x60] sm:$0xff] }
 0x76d   :  { %12168 = vmatprep.subr.mxu0 %v12380_v9  ;;  %12136 = vmatpush3.msra.mxu1 %v7204_v8  ;;  %v7567_v8 = vld [vmem:[#allocation6 + $0x70] sm:$0xff] }
 0x76e   :  { %12169 = vmatpush3.msra.mxu0 %v7293_v47  ;;  %12137 = vmatprep.subr.mxu1 %v12380_v9  ;;  %v7566_v47 = vld [vmem:[#allocation6 + $0x68] sm:$0xff] }
 0x76f   :  { %12170 = vmatprep.subr.mxu0 %v12380_v9  ;;  %12138 = vmatpush3.msra.mxu1 %v7203_v1  ;;  %v7564_v1 = vld [vmem:[#allocation6 + $0x58] sm:$0xff] }
 0x770   :  { %12171 = vmatpush3.msra.mxu0 %v7292_v19  ;;  %12139 = vmatprep.subr.mxu1 %v12380_v9  ;;  %v7563_v19 = vld [vmem:[#allocation6 + $0x50] sm:$0xff] }
 0x771   :  { %12172 = vmatprep.subr.mxu0 %v12380_v9  ;;  %12140 = vmatpush3.msra.mxu1 %v7202_v22  ;;  %v7562_v22 = vld [vmem:[#allocation6 + $0x48] sm:$0xff] }
 0x772   :  { %12173 = vmatpush3.msra.mxu0 %v7291_v3  ;;  %12141 = vmatprep.subr.mxu1 %v12380_v9  ;;  %v7561_v3 = vld [vmem:[#allocation6 + $0x40] sm:$0xff] }
 0x773   :  { %12174 = vmatprep.subr.mxu0 %v12380_v9  ;;  %12142 = vmatpush3.msra.mxu1 %v7201_v10  ;;  %v7560_v10 = vld [vmem:[#allocation6 + $0x38] sm:$0xff] }
 0x774   :  { %12175 = vmatpush3.msra.mxu0 %v7290_v33  ;;  %12143 = vmatprep.subr.mxu1 %v12380_v9  ;;  %v7559_v33 = vld [vmem:[#allocation6 + $0x30] sm:$0xff] }
 0x775   :  { %12176 = vmatprep.subr.mxu0 %v12380_v9  ;;  %12144 = vmatpush3.msra.mxu1 %v7200_v38  ;;  %v7558_v38 = vld [vmem:[#allocation6 + $0x28] sm:$0xff] }
 0x776   :  { %12177 = vmatpush3.msra.mxu0 %v7289_v36  ;;  %12145 = vmatprep.subr.mxu1 %v12380_v9  ;;  %v7557_v36 = vld [vmem:[#allocation6 + $0x20] sm:$0xff] }
 0x777   :  { %12178 = vmatprep.subr.mxu0 %v12380_v9  ;;  %12146 = vmatpush3.msra.mxu1 %v7199_v12  ;;  %v7556_v12 = vld [vmem:[#allocation6 + $0x18] sm:$0xff] }
 0x778   :  { %12179 = vmatpush3.msra.mxu0 %v7288_v32  ;;  %12147 = vmatprep.subr.mxu1 %v12380_v9  ;;  %v7555_v32 = vld [vmem:[#allocation6 + $0x10] sm:$0xff] }
 0x779   :  { %12180 = vmatprep.subr.mxu0 %v12380_v9  ;;  %12148 = vmatpush3.msra.mxu1 %v7198_v61  ;;  %v7554_v61 = vld [vmem:[#allocation6 + $0x8] sm:$0xff] }
 0x77a   :  { %12181 = vmatpush3.msra.mxu0 %v7287_v25  ;;  %12149 = vmatprep.subr.mxu1 %v12380_v9  ;;  %v7553_v25 = vld [vmem:[#allocation6] sm:$0xff] }
 0x77b   :  { %12182 = vmatprep.subr.mxu0 %v12380_v9  ;;  %12150 = vmatpush3.msra.mxu1 %v7197_v28 }
 0x77c   :  { %12183 = vmatpush3.msra.mxu0 %v7286_v35  ;;  %12151 = vmatprep.subr.mxu1 %v12380_v9 }
 0x77d   :  { %12184 = vmatprep.subr.mxu0 %v12380_v9  ;;  %12152 = vmatpush3.msra.mxu1 %v7196_v34 }
 0x77e   :  { %12185 = vmatpush3.msra.mxu0 %v7285_v39  ;;  %12153 = vmatprep.subr.mxu1 %v12380_v9 }
 0x77f   :  { %12186 = vmatprep.subr.mxu0 %v12380_v9  ;;  %12154 = vmatpush3.msra.mxu1 %v7195_v21 }
 0x780   :  { %12187 = vmatpush3.msra.mxu0 %v7284_v60  ;;  %12155 = vmatprep.subr.mxu1 %v12380_v9 }
 0x781   :  { %12188 = vmatprep.subr.mxu0 %v12380_v9  ;;  %12156 = vmatpush3.msra.mxu1 %v7194_v51 }
 0x782   :  { %12189 = vmatpush3.msra.mxu0 %v7283_v62  ;;  %12157 = vmatprep.subr.mxu1 %v12380_v9 }
 0x783   :  { %12190 = vmatprep.subr.mxu0 %v12380_v9  ;;  %12158 = vmatpush3.msra.mxu1 %v7193_v40 }
 0x784   :  { %12159 = vmatprep.mubr.msk.f32.mxu1 %vm12381_vm0, %v12380_v9  ;;  %12191 = vmatpush3.msra.mxu0 %v7282_v46 }
 0x785   :  { %12160 = vmatmul.mubr.f32.vlgmr.msra.gmra.mxu1 %v6839_v42  ;;  %12192 = vmatprep.subr.mxu0 %v12380_v9 }
 0x786   :  { %12197 = vmatprep.subr.mxu1 %v12380_v9  ;;  %12193 = vmatpush3.msra.mxu0 %v7281_v16 }
 0x787   :  { %12194 = vmatprep.mubr.msk.f32.mxu0 %vm12381_vm0, %v12380_v9  ;;  %12198 = vmatpush3.msra.mxu1 %v7384_v26 }
 0x788   :  { %12195 = vmatmul.mubr.f32.vlgmr.msra.gmra.mxu0 %v6840_v0  ;;  %12199 = vmatprep.subr.mxu1 %v12380_v9 }
 0x789   :  { %12232 = vmatprep.subr.mxu0 %v12380_v9  ;;  %12200 = vmatpush3.msra.mxu1 %v7383_v45 }
 0x78a   :  { %12233 = vmatpush3.msra.mxu0 %v7472_v7  ;;  %12201 = vmatprep.subr.mxu1 %v12380_v9 }
 0x78b   :  { %12234 = vmatprep.subr.mxu0 %v12380_v9  ;;  %12202 = vmatpush3.msra.mxu1 %v7382_v27 }
 0x78c   :  { %12235 = vmatpush3.msra.mxu0 %v7471_v15  ;;  %12203 = vmatprep.subr.mxu1 %v12380_v9 }
 0x78d   :  { %12236 = vmatprep.subr.mxu0 %v12380_v9  ;;  %12204 = vmatpush3.msra.mxu1 %v7381_v58 }
 0x78e   :  { %12237 = vmatpush3.msra.mxu0 %v7470_v48  ;;  %12205 = vmatprep.subr.mxu1 %v12380_v9 }
 0x78f   :  { %12238 = vmatprep.subr.mxu0 %v12380_v9  ;;  %12206 = vmatpush3.msra.mxu1 %v7380_v41  ;;  %v8072_v41 = vld [vmem:[%s15511_s7] ss:$0 sm:$0xff] }
 0x790   :  { %12239 = vmatpush3.msra.mxu0 %v7469_v53  ;;  %12207 = vmatprep.subr.mxu1 %v12380_v9 }
 0x791   :  { %12240 = vmatprep.subr.mxu0 %v12380_v9  ;;  %12208 = vmatpush3.msra.mxu1 %v7379_v17 }
 0x792   :  { %12241 = vmatpush3.msra.mxu0 %v7468_v37  ;;  %12209 = vmatprep.subr.mxu1 %v12380_v9 }
 0x793   :  { %12242 = vmatprep.subr.mxu0 %v12380_v9  ;;  %12210 = vmatpush3.msra.mxu1 %v7378_v49 }
 0x794   :  { %12243 = vmatpush3.msra.mxu0 %v7467_v43  ;;  %12211 = vmatprep.subr.mxu1 %v12380_v9  ;;  %v8073_v43 = vld [vmem:[%s15513_s9] ss:$0 sm:$0xff] }
 0x795   :  { %12244 = vmatprep.subr.mxu0 %v12380_v9  ;;  %12212 = vmatpush3.msra.mxu1 %v7377_v4 }
 0x796   :  { %12245 = vmatpush3.msra.mxu0 %v7466_v63  ;;  %12213 = vmatprep.subr.mxu1 %v12380_v9 }
 0x797   :  { %12246 = vmatprep.subr.mxu0 %v12380_v9  ;;  %12214 = vmatpush3.msra.mxu1 %v7376_v55 }
 0x798   :  { %12247 = vmatpush3.msra.mxu0 %v7465_v44  ;;  %12215 = vmatprep.subr.mxu1 %v12380_v9 }
 0x799   :  { %12248 = vmatprep.subr.mxu0 %v12380_v9  ;;  %12216 = vmatpush3.msra.mxu1 %v7375_v59 }
 0x79a   :  { %12249 = vmatpush3.msra.mxu0 %v7464_v13  ;;  %12217 = vmatprep.subr.mxu1 %v12380_v9 }
 0x79b   :  { %12250 = vmatprep.subr.mxu0 %v12380_v9  ;;  %12218 = vmatpush3.msra.mxu1 %v7374_v14 }
 0x79c   :  { %12251 = vmatpush3.msra.mxu0 %v7463_v54  ;;  %12219 = vmatprep.subr.mxu1 %v12380_v9 }
 0x79d   :  { %12252 = vmatprep.subr.mxu0 %v12380_v9  ;;  %12220 = vmatpush3.msra.mxu1 %v7373_v29 }
 0x79e   :  { %12253 = vmatpush3.msra.mxu0 %v7462_v57  ;;  %12221 = vmatprep.subr.mxu1 %v12380_v9 }
 0x79f   :  { %12254 = vmatprep.subr.mxu0 %v12380_v9  ;;  %12222 = vmatpush3.msra.mxu1 %v7372_v24 }
 0x7a0   :  { %12255 = vmatpush3.msra.mxu0 %v7461_v5  ;;  %12223 = vmatprep.subr.mxu1 %v12380_v9 }
 0x7a1   :  { %12256 = vmatprep.subr.mxu0 %v12380_v9  ;;  %12224 = vmatpush3.msra.mxu1 %v7371_v6 }
 0x7a2   :  { %12257 = vmatpush3.msra.mxu0 %v7460_v31  ;;  %12225 = vmatprep.subr.mxu1 %v12380_v9 }
 0x7a3   :  { %12258 = vmatprep.subr.mxu0 %v12380_v9  ;;  %12226 = vmatpush3.msra.mxu1 %v7370_v30 }
 0x7a4   :  { %12259 = vmatpush3.msra.mxu0 %v7459_v20  ;;  %12227 = vmatprep.subr.mxu1 %v12380_v9 }
 0x7a5   :  { %12260 = vmatprep.subr.mxu0 %v12380_v9  ;;  %12228 = vmatpush3.msra.mxu1 %v7369_v18 }
 0x7a6   :  { %12229 = vmatprep.mubr.msk.f32.mxu1 %vm12381_vm0, %v12380_v9  ;;  %12261 = vmatpush3.msra.mxu0 %v7458_v2 }
 0x7a7   :  { %12230 = vmatmul.mubr.f32.vlgmr.msra.gmra.mxu1 %v6841_v11  ;;  %12262 = vmatprep.subr.mxu0 %v12380_v9 }
 0x7a8   :  { %12263 = vmatpush3.msra.mxu0 %v7457_v52  ;;  %12264 = vmatprep.mubr.msk.f32.mxu0 %vm12381_vm0, %v12380_v9 }
 0x7a9   :  { %12265 = vmatmul.mubr.f32.vlgmr.msra.gmra.mxu0 %v6842_v23  ;;  %12267 = vmatprep.subr.mxu1 %v12380_v9 }
 0x7aa   :  { %12299 = vmatprep.mubr.msk.f32.mxu1 %vm12381_vm0, %v12380_v9  ;;  %12268 = vmatpush3.msra.mxu1 %v7568_v56 }
 0x7ab   :  { %12269 = vmatprep.subr.mxu1 %v12380_v9 }
 0x7ac   :  { %12270 = vmatpush3.msra.mxu1 %v7567_v8 }
 0x7ad   :  { %12271 = vmatprep.subr.mxu1 %v12380_v9 }
 0x7ae   :  { %12272 = vmatpush3.msra.mxu1 %v7566_v47 }
 0x7af   :  { %12273 = vmatprep.subr.mxu1 %v12380_v9 }
 0x7b0   :  { %12274 = vmatpush3.msra.mxu1 %v7565_v50 }
 0x7b1   :  { %12275 = vmatprep.subr.mxu1 %v12380_v9 }
 0x7b2   :  { %12276 = vmatpush3.msra.mxu1 %v7564_v1 }
 0x7b3   :  { %12277 = vmatprep.subr.mxu1 %v12380_v9 }
 0x7b4   :  { %12278 = vmatpush3.msra.mxu1 %v7563_v19 }
 0x7b5   :  { %12279 = vmatprep.subr.mxu1 %v12380_v9 }
 0x7b6   :  { %12280 = vmatpush3.msra.mxu1 %v7562_v22 }
 0x7b7   :  { %12281 = vmatprep.subr.mxu1 %v12380_v9 }
 0x7b8   :  { %12282 = vmatpush3.msra.mxu1 %v7561_v3 }
 0x7b9   :  { %12283 = vmatprep.subr.mxu1 %v12380_v9 }
 0x7ba   :  { %12284 = vmatpush3.msra.mxu1 %v7560_v10 }
 0x7bb   :  { %12285 = vmatprep.subr.mxu1 %v12380_v9 }
 0x7bc   :  { %12286 = vmatpush3.msra.mxu1 %v7559_v33 }
 0x7bd   :  { %12287 = vmatprep.subr.mxu1 %v12380_v9 }
 0x7be   :  { %12288 = vmatpush3.msra.mxu1 %v7558_v38 }
 0x7bf   :  { %12289 = vmatprep.subr.mxu1 %v12380_v9 }
 0x7c0   :  { %12290 = vmatpush3.msra.mxu1 %v7557_v36 }
 0x7c1   :  { %12291 = vmatprep.subr.mxu1 %v12380_v9 }
 0x7c2   :  { %12292 = vmatpush3.msra.mxu1 %v7556_v12 }
 0x7c3   :  { %12293 = vmatprep.subr.mxu1 %v12380_v9 }
 0x7c4   :  { %12294 = vmatpush3.msra.mxu1 %v7555_v32 }
 0x7c5   :  { %12295 = vmatprep.subr.mxu1 %v12380_v9 }
 0x7c6   :  { %12296 = vmatpush3.msra.mxu1 %v7554_v61 }
 0x7c7   :  { %12297 = vmatprep.subr.mxu1 %v12380_v9 }
 0x7c8   :  { %12298 = vmatpush3.msra.mxu1 %v7553_v25 }
 0x803   :  { %v6942_v28 = vpop.f32.mrf.mxu1 }
 0x805   :  { %v12021_v35 = vpop.f32.mrf.mxu1  ;;  %v7012_v34 = vpop.f32.mrf.mxu0 }
 0x806   :  { %v7013_v39 = vadd.f32 %v7012_v34, %v6942_v28 }
 0x807   :  { %v12056_v21 = vpop.f32.mrf.mxu0 }
 0x823   :  { %v7099_v60 = vpop.f32.mrf.mxu1 }
 0x824   :  { %v7103_v0 = vadd.f32 %v7099_v60, %v7013_v39 }
 0x825   :  { %v12091_v51 = vpop.f32.mrf.mxu1 }
 0x826   :  { %v7187_v62 = vpop.f32.mrf.mxu0 }
 0x827   :  { %v7191_v45 = vadd.f32 %v7187_v62, %v7103_v0 }
 0x828   :  { %v12126_v40 = vpop.f32.mrf.mxu0 }
 0x845   :  { %v7275_v46 = vpop.f32.mrf.mxu1 }
 0x846   :  { %v7279_v7 = vadd.f32 %v7275_v46, %v7191_v45 }
 0x847   :  { %v12161_v42 = vpop.f32.mrf.mxu1 }
 0x848   :  { %v7363_v16 = vpop.f32.mrf.mxu0 }
 0x849   :  { %v7367_v27 = vadd.f32 %v7363_v16, %v7279_v7 }
 0x84a   :  { %v12196_v26 = vpop.f32.mrf.mxu0 }
 0x867   :  { %v7451_v9 = vpop.f32.mrf.mxu1 }
 0x868   :  { %v7455_v15 = vadd.f32 %v7451_v9, %v7367_v27 }
 0x869   :  { %v12231_v58 = vpop.f32.mrf.mxu1  ;;  %v7539_v48 = vpop.f32.mrf.mxu0 }
 0x86a   :  { %v7543_v53 = vadd.f32 %v7539_v48, %v7455_v15 }
 0x86b   :  { %v12266_v17 = vpop.f32.mrf.mxu0 }
 0x86c   :  { %v7551_v37 = vadd.f32 %v8072_v41, %v7543_v53 }
 0x86e   :  { %v7552_v49 = vmax.f32 %v7551_v37, 0.0 }
 0x870   :  { %12300 = vmatmul.mubr.f32.vlgmr.msra.gmra.mxu1 %v7552_v49 }
 0x930   :  { %v7642_v4 = vpop.f32.mrf.mxu1 }
 0x931   :  { %v7643_v63 = vadd.f32 %v8073_v43, %v7642_v4 }
 0x932   :  { %v12301_v55 = vpop.f32.mrf.mxu1 }
 0x933   :  { %12309 = vtanh.f32 %v7643_v63 }
 0x940   :  { %v12310_v44 = vpop.eup %12309 }
 0x941   :  { %7647 = vst [vmem:[%s15514_s10] sm:$0xff] %v12310_v44 }
 0x942   :  { %7652 = vsyncpa [#allocation3], 1 }
 0x943   :  { %7653 = vsyncpa [#allocation5], 1 }

</bundles_post_ra>
